<compile_context>
chip_gen: v6e
topology: v6e:2x2x1
jax: 0.10.0
libtpu: 0.0.40
codegen_flags: <defaults>
</compile_context>

<pallas_src>
import functools

import jax
import jax.numpy as jnp
from jax.experimental import pallas as pl
from jax.experimental.pallas import tpu as pltpu


def _round_up(x, m):
    return (x + m - 1) // m * m


def _fused_hand_subnet_kernel(x_ref, wl_ref, sl_ref, wh_ref, sh_ref, mask_ref,
                              o_ref, buf_a, buf_b, col_ref,
                              *, H, W, C_pad, L):
    """Fused [SepConv -> BN -> Swish] x L -> SepConv head for one batch element.

    Layouts (channels on the 128-lane axis, flattened padded spatial on sublanes):
      x_ref   : (ROWS, C_pad)        zero-padded input, ROWS = (H+2)*(W+2)+tail
      wl_ref  : (L, 9*C_pad, C_pad)  folded per-layer weights, bf16
                w[l, tap*C_pad + c, o] = wdw[dy,dx,c] * (wpw[c,o] * bn_scale[o])
      sl_ref  : (L, 1, C_pad)        folded shift = b_pw*scale + bn_shift (f32)
      wh_ref  : (9*C_pad, Cout_pad)  folded head weights, bf16 (no BN)
      sh_ref  : (1, Cout_pad)        head bias (f32, zero-padded)
      mask_ref: (H*(W+2), 1)         1.0 for rows that are real output pixels
      o_ref   : (H*(W+2), Cout_pad)  head output (halo rows sliced off by wrapper)
      buf_a/b : (ROWS, C_pad) f32    ping-pong activation scratch
      col_ref : (H*(W+2), 9*C_pad)   bf16 im2col scratch
    """
    WP = W + 2
    HWP = H * WP
    ROWS = buf_a.shape[0]
    TAIL0 = (H + 1) * WP + 1          # first row past the layer write-back window

    # Zero only the border strips the layer write-back never touches (the
    # interior and the remaining halo rows are always overwritten — with masked
    # zeros for the halo — before being read).  No full-buffer zeroing.
    for buf in (buf_a, buf_b):
        buf[0:WP + 1, :] = jnp.zeros((WP + 1, C_pad), jnp.float32)
        buf[TAIL0:, :] = jnp.zeros((ROWS - TAIL0, C_pad), jnp.float32)

    bufs = (buf_a, buf_b)

    def build_im2col(src_ref):
        # Tap (dy, dx) of the 3x3 window == contiguous row window starting at
        # dy*WP + dx of the flattened padded activation -> just 9 row-window
        # copies, no per-tap (H, W, C) reshape/relayout.
        for tap in range(9):
            off = (tap // 3) * WP + (tap % 3)
            col_ref[:, tap * C_pad:(tap + 1) * C_pad] = (
                src_ref[off:off + HWP, :].astype(jnp.bfloat16))

    valid = mask_ref[...] > 0.5       # rows whose in-row index is < W

    # TODO(synk): for large num_layers / 631-channel production size, stream the
    # per-layer weights via an extra "arbitrary" grid axis instead of holding
    # all L layers resident in VMEM.
    for layer in range(L):
        build_im2col(x_ref if layer == 0 else bufs[(layer - 1) % 2])
        # Single long-K MXU matmul: (HWP, 9*C_pad) @ (9*C_pad, C_pad), f32 acc.
        y = jnp.dot(col_ref[...], wl_ref[layer],
                    preferred_element_type=jnp.float32)
        y = y + sl_ref[layer]          # folded pointwise bias + eval-mode BN affine
        y = y * jax.nn.sigmoid(y)      # Swish (f32)
        # Zero halo rows so the block write re-creates the zero-padding border
        # of the destination buffer.
        y = jnp.where(valid, y, 0.0)
        bufs[layer % 2][WP + 1:WP + 1 + HWP, :] = y

    # Head: SeparableConv, no norm / no activation. Output channels are padded
    # to a full 128-lane width -> unmasked stores.
    build_im2col(x_ref if L == 0 else bufs[(L - 1) % 2])
    yh = jnp.dot(col_ref[...], wh_ref[...], preferred_element_type=jnp.float32)
    o_ref[...] = (yh + sh_ref[...]).astype(o_ref.dtype)


class _KeyGen:
    def __init__(self, key):
        self._key = key

    def __call__(self):
        self._key, sub = jax.random.split(self._key)
        return sub


def init_params(key, in_channels, num_anchors, num_hand_parameters,
                num_layers, num_iteration_steps):
    """Deterministic synthetic parameter init (shapes per module __init__)."""
    kg = _KeyGen(key)
    eps = 0.001
    f32 = jnp.float32

    def nrm(shape, scale=0.1):
        return scale * jax.random.normal(kg(), shape, f32)

    params = {"conv": [], "bn": [], "head": None}

    # conv_list: SeparableConvBlock(in, in_channels, norm=False, activation=False)
    for _ in range(num_layers):
        w_dw = nrm((3, 3, in_channels))
        w_pw = nrm((in_channels, in_channels))
        b_pw = nrm((1, in_channels))
        params["conv"].append((w_dw, w_pw, b_pw))

    # norm_layer: [num_iteration_steps][num_layers] BatchNorm2d(in_channels, eps=1e-3)
    # TODO(synk): training-mode BatchNorm (batch statistics / momentum update) not
    # implemented; eval-mode running-stat normalization is folded into scale/shift.
    for _ in range(num_iteration_steps):
        step_bns = []
        for _ in range(num_layers):
            gamma = 1.0 + nrm((1, in_channels))
            beta = nrm((1, in_channels))
            running_mean = nrm((1, in_channels))
            running_var = 1.0 + 0.1 * jax.random.uniform(kg(), (1, in_channels), f32)
            scale = gamma / jnp.sqrt(running_var + eps)
            shift = beta - running_mean * scale
            step_bns.append((scale, shift))
        params["bn"].append(step_bns)

    # head: SeparableConvBlock(in_channels, num_anchors*num_hand_parameters)
    c_out = num_anchors * num_hand_parameters
    w_dw = nrm((3, 3, in_channels))
    w_pw = nrm((in_channels, c_out))
    b_pw = nrm((1, c_out))
    params["head"] = (w_dw, w_pw, b_pw)
    return params


def _fold_sepconv(w_dw, w_pw_eff, c_pad, cout_pad):
    """Fold depthwise taps into one (9*C_pad, Cout_pad) matmul weight."""
    c_in, c_out = w_pw_eff.shape
    w9 = w_dw.reshape(9, c_in)[:, :, None] * w_pw_eff[None, :, :]   # (9, Cin, Cout)
    w9 = jnp.pad(w9, ((0, 0), (0, c_pad - c_in), (0, cout_pad - c_out)))
    return w9.reshape(9 * c_pad, cout_pad)


@functools.partial(jax.jit, static_argnums=(2,))
def iterative_hand_subnet_forward(params, feat_nchw, iter_step_py):
    """Forward pass. feat_nchw: (N, C, H, W) float32; returns (N, A*P, H, W)."""
    N, C, H, W = feat_nchw.shape
    L = len(params["conv"])
    HP, WP = H + 2, W + 2
    HWP = H * WP
    C_pad = _round_up(C, 128)
    rows = _round_up(HP * WP + 2, 8)   # +2: im2col over-read tail for halo rows

    # NCHW -> flattened, zero-padded (spatial halo + channel pad) channel-last slab.
    x = jnp.transpose(feat_nchw, (0, 2, 3, 1))                       # (N,H,W,C)
    x = jnp.pad(x, ((0, 0), (1, 1), (1, 1), (0, C_pad - C)))         # (N,HP,WP,Cp)
    x = x.reshape(N, HP * WP, C_pad)
    x = jnp.pad(x, ((0, 0), (0, rows - HP * WP), (0, 0)))            # (N,rows,Cp)

    # Fold depthwise taps + pointwise bias + eval-mode BN into one matmul weight
    # and an additive shift per layer (tiny XLA ops, fused under jit).
    w_blocks, s_blocks = [], []
    for i in range(L):
        w_dw, w_pw, b_pw = params["conv"][i]
        scale, shift = params["bn"][iter_step_py][i]
        w_blocks.append(_fold_sepconv(w_dw, w_pw * scale, C_pad, C_pad))
        s_blocks.append(jnp.pad(b_pw * scale + shift, ((0, 0), (0, C_pad - C))))
    w_layers = jnp.stack(w_blocks, 0).astype(jnp.bfloat16)   # (L, 9*Cp, Cp)
    s_layers = jnp.stack(s_blocks, 0)                        # (L, 1, Cp)  f32

    w_dw_h, w_pw_h, b_pw_h = params["head"]
    Cout = w_pw_h.shape[1]
    Cout_pad = _round_up(Cout, 128)
    w_head = _fold_sepconv(w_dw_h, w_pw_h, C_pad, Cout_pad).astype(jnp.bfloat16)
    s_head = jnp.pad(b_pw_h, ((0, 0), (0, Cout_pad - Cout)))         # (1, Cout_pad)

    # 1.0 for im2col rows that correspond to real output pixels (col index < W).
    mask = (jnp.arange(HWP, dtype=jnp.int32) % WP < W).astype(jnp.float32)[:, None]

    kernel = functools.partial(_fused_hand_subnet_kernel,
                               H=H, W=W, C_pad=C_pad, L=L)

    flops = 2 * N * HWP * 9 * C_pad * (L * C_pad + Cout_pad)
    bytes_accessed = int(x.size * 4 + w_layers.size * 2 + w_head.size * 2
                         + s_layers.size * 4 + s_head.size * 4 + mask.size * 4
                         + N * HWP * Cout_pad * 4)

    out = pl.pallas_call(
        kernel,
        out_shape=jax.ShapeDtypeStruct((N, HWP, Cout_pad), jnp.float32),
        grid_spec=pltpu.PrefetchScalarGridSpec(
            num_scalar_prefetch=0,
            grid=(N,),
            in_specs=[
                pl.BlockSpec((None, rows, C_pad), lambda n: (n, 0, 0)),
                pl.BlockSpec((L, 9 * C_pad, C_pad), lambda n: (0, 0, 0)),
                pl.BlockSpec((L, 1, C_pad), lambda n: (0, 0, 0)),
                pl.BlockSpec((9 * C_pad, Cout_pad), lambda n: (0, 0)),
                pl.BlockSpec((1, Cout_pad), lambda n: (0, 0)),
                pl.BlockSpec((HWP, 1), lambda n: (0, 0)),
            ],
            out_specs=pl.BlockSpec((None, HWP, Cout_pad), lambda n: (n, 0, 0)),
            scratch_shapes=[
                pltpu.VMEM((rows, C_pad), jnp.float32),        # ping
                pltpu.VMEM((rows, C_pad), jnp.float32),        # pong
                pltpu.VMEM((HWP, 9 * C_pad), jnp.bfloat16),    # im2col
            ],
        ),
        compiler_params=pltpu.CompilerParams(
            dimension_semantics=("parallel",),
            vmem_limit_bytes=32 * 1024 * 1024),
        cost_estimate=pl.CostEstimate(
            flops=int(flops),
            transcendentals=int(N * L * HWP * C_pad),
            bytes_accessed=bytes_accessed),
    )(x, w_layers, s_layers, w_head, s_head, mask)

    # Drop halo rows and padded channels; the remaining transpose is a tiny
    # XLA op (kernel-side stores were full-lane-width / unmasked).
    out = out.reshape(N, H, WP, Cout_pad)[:, :, :W, :Cout]
    # torch.cat([feat], dim=1) of a single element is the identity.
    return jnp.transpose(out, (0, 3, 1, 2))                  # NHWC -> NCHW


if __name__ == "__main__":
    # Small shapes consistent with the module's forward.
    N, C, H, W = 2, 16, 16, 16
    num_anchors = 3
    num_classes = 2          # unused in forward, kept for signature parity
    num_layers = 2
    num_hand_parameters = 4
    num_iteration_steps = 2
    iter_step_py = 1

    key = jax.random.PRNGKey(0)
    k_feat, k_params = jax.random.split(key)

    feat = jax.random.normal(k_feat, (N, C, H, W), jnp.float32)  # NCHW input
    params = init_params(k_params, C, num_anchors, num_hand_parameters,
                         num_layers, num_iteration_steps)

    out = iterative_hand_subnet_forward(params, feat, iter_step_py)
    out = jax.block_until_ready(out)

    expected = (N, num_anchors * num_hand_parameters, H, W)
    assert out.shape == expected, (out.shape, expected)
    assert out.dtype == jnp.float32
    assert bool(jnp.all(jnp.isfinite(out)))
    print("KERNEL_OK")
</pallas_src>

<mosaic_0001>
module attributes {stable_mosaic.version = 11 : i64} {
  func.func @_fused_hand_subnet_kernel(%arg0: i32, %arg1: memref<1x328x128xf32, #tpu.memory_space<vmem>>, %arg2: memref<2x1152x128xbf16, #tpu.memory_space<vmem>>, %arg3: memref<2x1x128xf32, #tpu.memory_space<vmem>>, %arg4: memref<1152x128xbf16, #tpu.memory_space<vmem>>, %arg5: memref<1x128xf32, #tpu.memory_space<vmem>>, %arg6: memref<288x1xf32, #tpu.memory_space<vmem>>, %arg7: memref<1x288x128xf32, #tpu.memory_space<vmem>>, %arg8: memref<328x128xf32, #tpu.memory_space<vmem>>, %arg9: memref<328x128xf32, #tpu.memory_space<vmem>>, %arg10: memref<288x1152xbf16, #tpu.memory_space<vmem>>) attributes {dimension_semantics = [#tpu.dimension_semantics<parallel>], iteration_bounds = array<i64: 2>, scalar_prefetch = 0 : i64, scratch_operands = 3 : i64, tpu.core_type = #tpu.core_type<tc>, window_params = [{transform_indices = @transform_0, window_bounds = array<i64: 1, 328, 128>}, {pipeline_mode = #tpu.pipeline_mode<synchronous>, transform_indices = @transform_1, window_bounds = array<i64: 2, 1152, 128>}, {pipeline_mode = #tpu.pipeline_mode<synchronous>, transform_indices = @transform_2, window_bounds = array<i64: 2, 1, 128>}, {pipeline_mode = #tpu.pipeline_mode<synchronous>, transform_indices = @transform_3, window_bounds = array<i64: 1152, 128>}, {pipeline_mode = #tpu.pipeline_mode<synchronous>, transform_indices = @transform_4, window_bounds = array<i64: 1, 128>}, {pipeline_mode = #tpu.pipeline_mode<synchronous>, transform_indices = @transform_5, window_bounds = array<i64: 288, 1>}, {transform_indices = @transform_6, window_bounds = array<i64: 1, 288, 128>}]} {
    %cst = arith.constant 0.000000e+00 : f32
    %0 = vector.broadcast %cst : f32 to vector<19x128xf32>
    %c0 = arith.constant 0 : index
    %c0_0 = arith.constant 0 : index
    %1 = vector.load %arg8[%c0, %c0_0] : memref<328x128xf32, #tpu.memory_space<vmem>>, vector<19x128xf32>
    tpu.vector_store %arg8[%c0, %c0_0], %0 {strides = array<i32>} : memref<328x128xf32, #tpu.memory_space<vmem>>, vector<19x128xf32>,
    %cst_1 = arith.constant 0.000000e+00 : f32
    %2 = vector.broadcast %cst_1 : f32 to vector<21x128xf32>
    %c307 = arith.constant 307 : index
    %c0_2 = arith.constant 0 : index
    %3 = vector.load %arg8[%c307, %c0_2] : memref<328x128xf32, #tpu.memory_space<vmem>>, vector<21x128xf32>
    tpu.vector_store %arg8[%c307, %c0_2], %2 {strides = array<i32>} : memref<328x128xf32, #tpu.memory_space<vmem>>, vector<21x128xf32>,
    %cst_3 = arith.constant 0.000000e+00 : f32
    %4 = vector.broadcast %cst_3 : f32 to vector<19x128xf32>
    %c0_4 = arith.constant 0 : index
    %c0_5 = arith.constant 0 : index
    %5 = vector.load %arg9[%c0_4, %c0_5] : memref<328x128xf32, #tpu.memory_space<vmem>>, vector<19x128xf32>
    tpu.vector_store %arg9[%c0_4, %c0_5], %4 {strides = array<i32>} : memref<328x128xf32, #tpu.memory_space<vmem>>, vector<19x128xf32>,
    %cst_6 = arith.constant 0.000000e+00 : f32
    %6 = vector.broadcast %cst_6 : f32 to vector<21x128xf32>
    %c307_7 = arith.constant 307 : index
    %c0_8 = arith.constant 0 : index
    %7 = vector.load %arg9[%c307_7, %c0_8] : memref<328x128xf32, #tpu.memory_space<vmem>>, vector<21x128xf32>
    tpu.vector_store %arg9[%c307_7, %c0_8], %6 {strides = array<i32>} : memref<328x128xf32, #tpu.memory_space<vmem>>, vector<21x128xf32>,
    %c0_9 = arith.constant 0 : index
    %c0_10 = arith.constant 0 : index
    %8 = vector.load %arg6[%c0_9, %c0_10] : memref<288x1xf32, #tpu.memory_space<vmem>>, vector<288x1xf32>
    %cst_11 = arith.constant 5.000000e-01 : f32
    %9 = vector.broadcast %cst_11 : f32 to vector<288x1xf32>
    %10 = arith.cmpf ogt, %8, %9 : vector<288x1xf32>
    %c0_12 = arith.constant 0 : index
    %c0_13 = arith.constant 0 : index
    %c0_14 = arith.constant 0 : index
    %11 = vector.load %arg1[%c0_12, %c0_13, %c0_14] : memref<1x328x128xf32, #tpu.memory_space<vmem>>, vector<1x288x128xf32>
    %12 = vector.shape_cast %11 : vector<1x288x128xf32> to vector<288x128xf32>
    %13 = arith.truncf %12 : vector<288x128xf32> to vector<288x128xbf16>
    %c0_15 = arith.constant 0 : index
    %c0_16 = arith.constant 0 : index
    %14 = vector.load %arg10[%c0_15, %c0_16] : memref<288x1152xbf16, #tpu.memory_space<vmem>>, vector<288x128xbf16>
    tpu.vector_store %arg10[%c0_15, %c0_16], %13 {strides = array<i32>} : memref<288x1152xbf16, #tpu.memory_space<vmem>>, vector<288x128xbf16>,
    %c0_17 = arith.constant 0 : index
    %c1 = arith.constant 1 : index
    %c0_18 = arith.constant 0 : index
    %15 = vector.load %arg1[%c0_17, %c1, %c0_18] : memref<1x328x128xf32, #tpu.memory_space<vmem>>, vector<1x288x128xf32>
    %16 = vector.shape_cast %15 : vector<1x288x128xf32> to vector<288x128xf32>
    %17 = arith.truncf %16 : vector<288x128xf32> to vector<288x128xbf16>
    %c0_19 = arith.constant 0 : index
    %c128 = arith.constant 128 : index
    %18 = vector.load %arg10[%c0_19, %c128] : memref<288x1152xbf16, #tpu.memory_space<vmem>>, vector<288x128xbf16>
    tpu.vector_store %arg10[%c0_19, %c128], %17 {strides = array<i32>} : memref<288x1152xbf16, #tpu.memory_space<vmem>>, vector<288x128xbf16>,
    %c0_20 = arith.constant 0 : index
    %c2 = arith.constant 2 : index
    %c0_21 = arith.constant 0 : index
    %19 = vector.load %arg1[%c0_20, %c2, %c0_21] : memref<1x328x128xf32, #tpu.memory_space<vmem>>, vector<1x288x128xf32>
    %20 = vector.shape_cast %19 : vector<1x288x128xf32> to vector<288x128xf32>
    %21 = arith.truncf %20 : vector<288x128xf32> to vector<288x128xbf16>
    %c0_22 = arith.constant 0 : index
    %c256 = arith.constant 256 : index
    %22 = vector.load %arg10[%c0_22, %c256] : memref<288x1152xbf16, #tpu.memory_space<vmem>>, vector<288x128xbf16>
    tpu.vector_store %arg10[%c0_22, %c256], %21 {strides = array<i32>} : memref<288x1152xbf16, #tpu.memory_space<vmem>>, vector<288x128xbf16>,
    %c0_23 = arith.constant 0 : index
    %c18 = arith.constant 18 : index
    %c0_24 = arith.constant 0 : index
    %23 = vector.load %arg1[%c0_23, %c18, %c0_24] : memref<1x328x128xf32, #tpu.memory_space<vmem>>, vector<1x288x128xf32>
    %24 = vector.shape_cast %23 : vector<1x288x128xf32> to vector<288x128xf32>
    %25 = arith.truncf %24 : vector<288x128xf32> to vector<288x128xbf16>
    %c0_25 = arith.constant 0 : index
    %c384 = arith.constant 384 : index
    %26 = vector.load %arg10[%c0_25, %c384] : memref<288x1152xbf16, #tpu.memory_space<vmem>>, vector<288x128xbf16>
    tpu.vector_store %arg10[%c0_25, %c384], %25 {strides = array<i32>} : memref<288x1152xbf16, #tpu.memory_space<vmem>>, vector<288x128xbf16>,
    %c0_26 = arith.constant 0 : index
    %c19 = arith.constant 19 : index
    %c0_27 = arith.constant 0 : index
    %27 = vector.load %arg1[%c0_26, %c19, %c0_27] : memref<1x328x128xf32, #tpu.memory_space<vmem>>, vector<1x288x128xf32>
    %28 = vector.shape_cast %27 : vector<1x288x128xf32> to vector<288x128xf32>
    %29 = arith.truncf %28 : vector<288x128xf32> to vector<288x128xbf16>
    %c0_28 = arith.constant 0 : index
    %c512 = arith.constant 512 : index
    %30 = vector.load %arg10[%c0_28, %c512] : memref<288x1152xbf16, #tpu.memory_space<vmem>>, vector<288x128xbf16>
    tpu.vector_store %arg10[%c0_28, %c512], %29 {strides = array<i32>} : memref<288x1152xbf16, #tpu.memory_space<vmem>>, vector<288x128xbf16>,
    %c0_29 = arith.constant 0 : index
    %c20 = arith.constant 20 : index
    %c0_30 = arith.constant 0 : index
    %31 = vector.load %arg1[%c0_29, %c20, %c0_30] : memref<1x328x128xf32, #tpu.memory_space<vmem>>, vector<1x288x128xf32>
    %32 = vector.shape_cast %31 : vector<1x288x128xf32> to vector<288x128xf32>
    %33 = arith.truncf %32 : vector<288x128xf32> to vector<288x128xbf16>
    %c0_31 = arith.constant 0 : index
    %c640 = arith.constant 640 : index
    %34 = vector.load %arg10[%c0_31, %c640] : memref<288x1152xbf16, #tpu.memory_space<vmem>>, vector<288x128xbf16>
    tpu.vector_store %arg10[%c0_31, %c640], %33 {strides = array<i32>} : memref<288x1152xbf16, #tpu.memory_space<vmem>>, vector<288x128xbf16>,
    %c0_32 = arith.constant 0 : index
    %c36 = arith.constant 36 : index
    %c0_33 = arith.constant 0 : index
    %35 = vector.load %arg1[%c0_32, %c36, %c0_33] : memref<1x328x128xf32, #tpu.memory_space<vmem>>, vector<1x288x128xf32>
    %36 = vector.shape_cast %35 : vector<1x288x128xf32> to vector<288x128xf32>
    %37 = arith.truncf %36 : vector<288x128xf32> to vector<288x128xbf16>
    %c0_34 = arith.constant 0 : index
    %c768 = arith.constant 768 : index
    %38 = vector.load %arg10[%c0_34, %c768] : memref<288x1152xbf16, #tpu.memory_space<vmem>>, vector<288x128xbf16>
    tpu.vector_store %arg10[%c0_34, %c768], %37 {strides = array<i32>} : memref<288x1152xbf16, #tpu.memory_space<vmem>>, vector<288x128xbf16>,
    %c0_35 = arith.constant 0 : index
    %c37 = arith.constant 37 : index
    %c0_36 = arith.constant 0 : index
    %39 = vector.load %arg1[%c0_35, %c37, %c0_36] : memref<1x328x128xf32, #tpu.memory_space<vmem>>, vector<1x288x128xf32>
    %40 = vector.shape_cast %39 : vector<1x288x128xf32> to vector<288x128xf32>
    %41 = arith.truncf %40 : vector<288x128xf32> to vector<288x128xbf16>
    %c0_37 = arith.constant 0 : index
    %c896 = arith.constant 896 : index
    %42 = vector.load %arg10[%c0_37, %c896] : memref<288x1152xbf16, #tpu.memory_space<vmem>>, vector<288x128xbf16>
    tpu.vector_store %arg10[%c0_37, %c896], %41 {strides = array<i32>} : memref<288x1152xbf16, #tpu.memory_space<vmem>>, vector<288x128xbf16>,
    %c0_38 = arith.constant 0 : index
    %c38 = arith.constant 38 : index
    %c0_39 = arith.constant 0 : index
    %43 = vector.load %arg1[%c0_38, %c38, %c0_39] : memref<1x328x128xf32, #tpu.memory_space<vmem>>, vector<1x288x128xf32>
    %44 = vector.shape_cast %43 : vector<1x288x128xf32> to vector<288x128xf32>
    %45 = arith.truncf %44 : vector<288x128xf32> to vector<288x128xbf16>
    %c0_40 = arith.constant 0 : index
    %c1024 = arith.constant 1024 : index
    %46 = vector.load %arg10[%c0_40, %c1024] : memref<288x1152xbf16, #tpu.memory_space<vmem>>, vector<288x128xbf16>
    tpu.vector_store %arg10[%c0_40, %c1024], %45 {strides = array<i32>} : memref<288x1152xbf16, #tpu.memory_space<vmem>>, vector<288x128xbf16>,
    %c0_41 = arith.constant 0 : index
    %c0_42 = arith.constant 0 : index
    %47 = vector.load %arg10[%c0_41, %c0_42] : memref<288x1152xbf16, #tpu.memory_space<vmem>>, vector<288x1152xbf16>
    %c0_43 = arith.constant 0 : index
    %c0_44 = arith.constant 0 : index
    %c0_45 = arith.constant 0 : index
    %48 = vector.load %arg2[%c0_43, %c0_44, %c0_45] : memref<2x1152x128xbf16, #tpu.memory_space<vmem>>, vector<1x1152x128xbf16>
    %49 = vector.shape_cast %48 : vector<1x1152x128xbf16> to vector<1152x128xbf16>
    %cst_46 = arith.constant dense<0.000000e+00> : vector<288x128xf32>
    %50 = tpu.matmul %47, %49, %cst_46 {dimension_numbers = #tpu.dot_dimension_numbers<[1], [0], [0], [1], [0, 0, 1, 1], [], []>} : vector<288x1152xbf16>, vector<1152x128xbf16>, vector<288x128xf32> -> vector<288x128xf32>
    %c0_47 = arith.constant 0 : index
    %c0_48 = arith.constant 0 : index
    %c0_49 = arith.constant 0 : index
    %51 = vector.load %arg3[%c0_47, %c0_48, %c0_49] : memref<2x1x128xf32, #tpu.memory_space<vmem>>, vector<1x1x128xf32>
    %52 = vector.shape_cast %51 : vector<1x1x128xf32> to vector<1x128xf32>
    %53 = vector.broadcast %52 : vector<1x128xf32> to vector<288x128xf32>
    %54 = arith.addf %50, %53 : vector<288x128xf32>
    %55 = arith.negf %54 : vector<288x128xf32>
    %56 = math.exp %55 : vector<288x128xf32>
    %cst_50 = arith.constant 1.000000e+00 : f32
    %57 = vector.broadcast %cst_50 : f32 to vector<288x128xf32>
    %58 = arith.addf %57, %56 : vector<288x128xf32>
    %59 = arith.divf %57, %58 : vector<288x128xf32>
    %60 = arith.mulf %54, %59 : vector<288x128xf32>
    %cst_51 = arith.constant 0.000000e+00 : f32
    %61 = vector.shape_cast %10 : vector<288x1xi1> to vector<288x1xi1>
    %62 = vector.broadcast %61 : vector<288x1xi1> to vector<288x128xi1>
    %63 = vector.broadcast %cst_51 : f32 to vector<288x128xf32>
    %64 = arith.select %62, %60, %63 : vector<288x128xi1>, vector<288x128xf32>
    %c19_52 = arith.constant 19 : index
    %c0_53 = arith.constant 0 : index
    %65 = vector.load %arg8[%c19_52, %c0_53] : memref<328x128xf32, #tpu.memory_space<vmem>>, vector<288x128xf32>
    tpu.vector_store %arg8[%c19_52, %c0_53], %64 {strides = array<i32>} : memref<328x128xf32, #tpu.memory_space<vmem>>, vector<288x128xf32>,
    %c0_54 = arith.constant 0 : index
    %c0_55 = arith.constant 0 : index
    %66 = vector.load %arg8[%c0_54, %c0_55] : memref<328x128xf32, #tpu.memory_space<vmem>>, vector<288x128xf32>
    %67 = arith.truncf %66 : vector<288x128xf32> to vector<288x128xbf16>
    %c0_56 = arith.constant 0 : index
    %c0_57 = arith.constant 0 : index
    %68 = vector.load %arg10[%c0_56, %c0_57] : memref<288x1152xbf16, #tpu.memory_space<vmem>>, vector<288x128xbf16>
    tpu.vector_store %arg10[%c0_56, %c0_57], %67 {strides = array<i32>} : memref<288x1152xbf16, #tpu.memory_space<vmem>>, vector<288x128xbf16>,
    %c1_58 = arith.constant 1 : index
    %c0_59 = arith.constant 0 : index
    %69 = vector.load %arg8[%c1_58, %c0_59] : memref<328x128xf32, #tpu.memory_space<vmem>>, vector<288x128xf32>
    %70 = arith.truncf %69 : vector<288x128xf32> to vector<288x128xbf16>
    %c0_60 = arith.constant 0 : index
    %c128_61 = arith.constant 128 : index
    %71 = vector.load %arg10[%c0_60, %c128_61] : memref<288x1152xbf16, #tpu.memory_space<vmem>>, vector<288x128xbf16>
    tpu.vector_store %arg10[%c0_60, %c128_61], %70 {strides = array<i32>} : memref<288x1152xbf16, #tpu.memory_space<vmem>>, vector<288x128xbf16>,
    %c2_62 = arith.constant 2 : index
    %c0_63 = arith.constant 0 : index
    %72 = vector.load %arg8[%c2_62, %c0_63] : memref<328x128xf32, #tpu.memory_space<vmem>>, vector<288x128xf32>
    %73 = arith.truncf %72 : vector<288x128xf32> to vector<288x128xbf16>
    %c0_64 = arith.constant 0 : index
    %c256_65 = arith.constant 256 : index
    %74 = vector.load %arg10[%c0_64, %c256_65] : memref<288x1152xbf16, #tpu.memory_space<vmem>>, vector<288x128xbf16>
    tpu.vector_store %arg10[%c0_64, %c256_65], %73 {strides = array<i32>} : memref<288x1152xbf16, #tpu.memory_space<vmem>>, vector<288x128xbf16>,
    %c18_66 = arith.constant 18 : index
    %c0_67 = arith.constant 0 : index
    %75 = vector.load %arg8[%c18_66, %c0_67] : memref<328x128xf32, #tpu.memory_space<vmem>>, vector<288x128xf32>
    %76 = arith.truncf %75 : vector<288x128xf32> to vector<288x128xbf16>
    %c0_68 = arith.constant 0 : index
    %c384_69 = arith.constant 384 : index
    %77 = vector.load %arg10[%c0_68, %c384_69] : memref<288x1152xbf16, #tpu.memory_space<vmem>>, vector<288x128xbf16>
    tpu.vector_store %arg10[%c0_68, %c384_69], %76 {strides = array<i32>} : memref<288x1152xbf16, #tpu.memory_space<vmem>>, vector<288x128xbf16>,
    %c19_70 = arith.constant 19 : index
    %c0_71 = arith.constant 0 : index
    %78 = vector.load %arg8[%c19_70, %c0_71] : memref<328x128xf32, #tpu.memory_space<vmem>>, vector<288x128xf32>
    %79 = arith.truncf %78 : vector<288x128xf32> to vector<288x128xbf16>
    %c0_72 = arith.constant 0 : index
    %c512_73 = arith.constant 512 : index
    %80 = vector.load %arg10[%c0_72, %c512_73] : memref<288x1152xbf16, #tpu.memory_space<vmem>>, vector<288x128xbf16>
    tpu.vector_store %arg10[%c0_72, %c512_73], %79 {strides = array<i32>} : memref<288x1152xbf16, #tpu.memory_space<vmem>>, vector<288x128xbf16>,
    %c20_74 = arith.constant 20 : index
    %c0_75 = arith.constant 0 : index
    %81 = vector.load %arg8[%c20_74, %c0_75] : memref<328x128xf32, #tpu.memory_space<vmem>>, vector<288x128xf32>
    %82 = arith.truncf %81 : vector<288x128xf32> to vector<288x128xbf16>
    %c0_76 = arith.constant 0 : index
    %c640_77 = arith.constant 640 : index
    %83 = vector.load %arg10[%c0_76, %c640_77] : memref<288x1152xbf16, #tpu.memory_space<vmem>>, vector<288x128xbf16>
    tpu.vector_store %arg10[%c0_76, %c640_77], %82 {strides = array<i32>} : memref<288x1152xbf16, #tpu.memory_space<vmem>>, vector<288x128xbf16>,
    %c36_78 = arith.constant 36 : index
    %c0_79 = arith.constant 0 : index
    %84 = vector.load %arg8[%c36_78, %c0_79] : memref<328x128xf32, #tpu.memory_space<vmem>>, vector<288x128xf32>
    %85 = arith.truncf %84 : vector<288x128xf32> to vector<288x128xbf16>
    %c0_80 = arith.constant 0 : index
    %c768_81 = arith.constant 768 : index
    %86 = vector.load %arg10[%c0_80, %c768_81] : memref<288x1152xbf16, #tpu.memory_space<vmem>>, vector<288x128xbf16>
    tpu.vector_store %arg10[%c0_80, %c768_81], %85 {strides = array<i32>} : memref<288x1152xbf16, #tpu.memory_space<vmem>>, vector<288x128xbf16>,
    %c37_82 = arith.constant 37 : index
    %c0_83 = arith.constant 0 : index
    %87 = vector.load %arg8[%c37_82, %c0_83] : memref<328x128xf32, #tpu.memory_space<vmem>>, vector<288x128xf32>
    %88 = arith.truncf %87 : vector<288x128xf32> to vector<288x128xbf16>
    %c0_84 = arith.constant 0 : index
    %c896_85 = arith.constant 896 : index
    %89 = vector.load %arg10[%c0_84, %c896_85] : memref<288x1152xbf16, #tpu.memory_space<vmem>>, vector<288x128xbf16>
    tpu.vector_store %arg10[%c0_84, %c896_85], %88 {strides = array<i32>} : memref<288x1152xbf16, #tpu.memory_space<vmem>>, vector<288x128xbf16>,
    %c38_86 = arith.constant 38 : index
    %c0_87 = arith.constant 0 : index
    %90 = vector.load %arg8[%c38_86, %c0_87] : memref<328x128xf32, #tpu.memory_space<vmem>>, vector<288x128xf32>
    %91 = arith.truncf %90 : vector<288x128xf32> to vector<288x128xbf16>
    %c0_88 = arith.constant 0 : index
    %c1024_89 = arith.constant 1024 : index
    %92 = vector.load %arg10[%c0_88, %c1024_89] : memref<288x1152xbf16, #tpu.memory_space<vmem>>, vector<288x128xbf16>
    tpu.vector_store %arg10[%c0_88, %c1024_89], %91 {strides = array<i32>} : memref<288x1152xbf16, #tpu.memory_space<vmem>>, vector<288x128xbf16>,
    %c0_90 = arith.constant 0 : index
    %c0_91 = arith.constant 0 : index
    %93 = vector.load %arg10[%c0_90, %c0_91] : memref<288x1152xbf16, #tpu.memory_space<vmem>>, vector<288x1152xbf16>
    %c1_92 = arith.constant 1 : index
    %c0_93 = arith.constant 0 : index
    %c0_94 = arith.constant 0 : index
    %94 = vector.load %arg2[%c1_92, %c0_93, %c0_94] : memref<2x1152x128xbf16, #tpu.memory_space<vmem>>, vector<1x1152x128xbf16>
    %95 = vector.shape_cast %94 : vector<1x1152x128xbf16> to vector<1152x128xbf16>
    %cst_95 = arith.constant dense<0.000000e+00> : vector<288x128xf32>
    %96 = tpu.matmul %93, %95, %cst_95 {dimension_numbers = #tpu.dot_dimension_numbers<[1], [0], [0], [1], [0, 0, 1, 1], [], []>} : vector<288x1152xbf16>, vector<1152x128xbf16>, vector<288x128xf32> -> vector<288x128xf32>
    %c1_96 = arith.constant 1 : index
    %c0_97 = arith.constant 0 : index
    %c0_98 = arith.constant 0 : index
    %97 = vector.load %arg3[%c1_96, %c0_97, %c0_98] : memref<2x1x128xf32, #tpu.memory_space<vmem>>, vector<1x1x128xf32>
    %98 = vector.shape_cast %97 : vector<1x1x128xf32> to vector<1x128xf32>
    %99 = vector.broadcast %98 : vector<1x128xf32> to vector<288x128xf32>
    %100 = arith.addf %96, %99 : vector<288x128xf32>
    %101 = arith.negf %100 : vector<288x128xf32>
    %102 = math.exp %101 : vector<288x128xf32>
    %cst_99 = arith.constant 1.000000e+00 : f32
    %103 = vector.broadcast %cst_99 : f32 to vector<288x128xf32>
    %104 = arith.addf %103, %102 : vector<288x128xf32>
    %105 = arith.divf %103, %104 : vector<288x128xf32>
    %106 = arith.mulf %100, %105 : vector<288x128xf32>
    %cst_100 = arith.constant 0.000000e+00 : f32
    %107 = vector.shape_cast %10 : vector<288x1xi1> to vector<288x1xi1>
    %108 = vector.broadcast %107 : vector<288x1xi1> to vector<288x128xi1>
    %109 = vector.broadcast %cst_100 : f32 to vector<288x128xf32>
    %110 = arith.select %108, %106, %109 : vector<288x128xi1>, vector<288x128xf32>
    %c19_101 = arith.constant 19 : index
    %c0_102 = arith.constant 0 : index
    %111 = vector.load %arg9[%c19_101, %c0_102] : memref<328x128xf32, #tpu.memory_space<vmem>>, vector<288x128xf32>
    tpu.vector_store %arg9[%c19_101, %c0_102], %110 {strides = array<i32>} : memref<328x128xf32, #tpu.memory_space<vmem>>, vector<288x128xf32>,
    %c0_103 = arith.constant 0 : index
    %c0_104 = arith.constant 0 : index
    %112 = vector.load %arg9[%c0_103, %c0_104] : memref<328x128xf32, #tpu.memory_space<vmem>>, vector<288x128xf32>
    %113 = arith.truncf %112 : vector<288x128xf32> to vector<288x128xbf16>
    %c0_105 = arith.constant 0 : index
    %c0_106 = arith.constant 0 : index
    %114 = vector.load %arg10[%c0_105, %c0_106] : memref<288x1152xbf16, #tpu.memory_space<vmem>>, vector<288x128xbf16>
    tpu.vector_store %arg10[%c0_105, %c0_106], %113 {strides = array<i32>} : memref<288x1152xbf16, #tpu.memory_space<vmem>>, vector<288x128xbf16>,
    %c1_107 = arith.constant 1 : index
    %c0_108 = arith.constant 0 : index
    %115 = vector.load %arg9[%c1_107, %c0_108] : memref<328x128xf32, #tpu.memory_space<vmem>>, vector<288x128xf32>
    %116 = arith.truncf %115 : vector<288x128xf32> to vector<288x128xbf16>
    %c0_109 = arith.constant 0 : index
    %c128_110 = arith.constant 128 : index
    %117 = vector.load %arg10[%c0_109, %c128_110] : memref<288x1152xbf16, #tpu.memory_space<vmem>>, vector<288x128xbf16>
    tpu.vector_store %arg10[%c0_109, %c128_110], %116 {strides = array<i32>} : memref<288x1152xbf16, #tpu.memory_space<vmem>>, vector<288x128xbf16>,
    %c2_111 = arith.constant 2 : index
    %c0_112 = arith.constant 0 : index
    %118 = vector.load %arg9[%c2_111, %c0_112] : memref<328x128xf32, #tpu.memory_space<vmem>>, vector<288x128xf32>
    %119 = arith.truncf %118 : vector<288x128xf32> to vector<288x128xbf16>
    %c0_113 = arith.constant 0 : index
    %c256_114 = arith.constant 256 : index
    %120 = vector.load %arg10[%c0_113, %c256_114] : memref<288x1152xbf16, #tpu.memory_space<vmem>>, vector<288x128xbf16>
    tpu.vector_store %arg10[%c0_113, %c256_114], %119 {strides = array<i32>} : memref<288x1152xbf16, #tpu.memory_space<vmem>>, vector<288x128xbf16>,
    %c18_115 = arith.constant 18 : index
    %c0_116 = arith.constant 0 : index
    %121 = vector.load %arg9[%c18_115, %c0_116] : memref<328x128xf32, #tpu.memory_space<vmem>>, vector<288x128xf32>
    %122 = arith.truncf %121 : vector<288x128xf32> to vector<288x128xbf16>
    %c0_117 = arith.constant 0 : index
    %c384_118 = arith.constant 384 : index
    %123 = vector.load %arg10[%c0_117, %c384_118] : memref<288x1152xbf16, #tpu.memory_space<vmem>>, vector<288x128xbf16>
    tpu.vector_store %arg10[%c0_117, %c384_118], %122 {strides = array<i32>} : memref<288x1152xbf16, #tpu.memory_space<vmem>>, vector<288x128xbf16>,
    %c19_119 = arith.constant 19 : index
    %c0_120 = arith.constant 0 : index
    %124 = vector.load %arg9[%c19_119, %c0_120] : memref<328x128xf32, #tpu.memory_space<vmem>>, vector<288x128xf32>
    %125 = arith.truncf %124 : vector<288x128xf32> to vector<288x128xbf16>
    %c0_121 = arith.constant 0 : index
    %c512_122 = arith.constant 512 : index
    %126 = vector.load %arg10[%c0_121, %c512_122] : memref<288x1152xbf16, #tpu.memory_space<vmem>>, vector<288x128xbf16>
    tpu.vector_store %arg10[%c0_121, %c512_122], %125 {strides = array<i32>} : memref<288x1152xbf16, #tpu.memory_space<vmem>>, vector<288x128xbf16>,
    %c20_123 = arith.constant 20 : index
    %c0_124 = arith.constant 0 : index
    %127 = vector.load %arg9[%c20_123, %c0_124] : memref<328x128xf32, #tpu.memory_space<vmem>>, vector<288x128xf32>
    %128 = arith.truncf %127 : vector<288x128xf32> to vector<288x128xbf16>
    %c0_125 = arith.constant 0 : index
    %c640_126 = arith.constant 640 : index
    %129 = vector.load %arg10[%c0_125, %c640_126] : memref<288x1152xbf16, #tpu.memory_space<vmem>>, vector<288x128xbf16>
    tpu.vector_store %arg10[%c0_125, %c640_126], %128 {strides = array<i32>} : memref<288x1152xbf16, #tpu.memory_space<vmem>>, vector<288x128xbf16>,
    %c36_127 = arith.constant 36 : index
    %c0_128 = arith.constant 0 : index
    %130 = vector.load %arg9[%c36_127, %c0_128] : memref<328x128xf32, #tpu.memory_space<vmem>>, vector<288x128xf32>
    %131 = arith.truncf %130 : vector<288x128xf32> to vector<288x128xbf16>
    %c0_129 = arith.constant 0 : index
    %c768_130 = arith.constant 768 : index
    %132 = vector.load %arg10[%c0_129, %c768_130] : memref<288x1152xbf16, #tpu.memory_space<vmem>>, vector<288x128xbf16>
    tpu.vector_store %arg10[%c0_129, %c768_130], %131 {strides = array<i32>} : memref<288x1152xbf16, #tpu.memory_space<vmem>>, vector<288x128xbf16>,
    %c37_131 = arith.constant 37 : index
    %c0_132 = arith.constant 0 : index
    %133 = vector.load %arg9[%c37_131, %c0_132] : memref<328x128xf32, #tpu.memory_space<vmem>>, vector<288x128xf32>
    %134 = arith.truncf %133 : vector<288x128xf32> to vector<288x128xbf16>
    %c0_133 = arith.constant 0 : index
    %c896_134 = arith.constant 896 : index
    %135 = vector.load %arg10[%c0_133, %c896_134] : memref<288x1152xbf16, #tpu.memory_space<vmem>>, vector<288x128xbf16>
    tpu.vector_store %arg10[%c0_133, %c896_134], %134 {strides = array<i32>} : memref<288x1152xbf16, #tpu.memory_space<vmem>>, vector<288x128xbf16>,
    %c38_135 = arith.constant 38 : index
    %c0_136 = arith.constant 0 : index
    %136 = vector.load %arg9[%c38_135, %c0_136] : memref<328x128xf32, #tpu.memory_space<vmem>>, vector<288x128xf32>
    %137 = arith.truncf %136 : vector<288x128xf32> to vector<288x128xbf16>
    %c0_137 = arith.constant 0 : index
    %c1024_138 = arith.constant 1024 : index
    %138 = vector.load %arg10[%c0_137, %c1024_138] : memref<288x1152xbf16, #tpu.memory_space<vmem>>, vector<288x128xbf16>
    tpu.vector_store %arg10[%c0_137, %c1024_138], %137 {strides = array<i32>} : memref<288x1152xbf16, #tpu.memory_space<vmem>>, vector<288x128xbf16>,
    %c0_139 = arith.constant 0 : index
    %c0_140 = arith.constant 0 : index
    %139 = vector.load %arg10[%c0_139, %c0_140] : memref<288x1152xbf16, #tpu.memory_space<vmem>>, vector<288x1152xbf16>
    %c0_141 = arith.constant 0 : index
    %c0_142 = arith.constant 0 : index
    %140 = vector.load %arg4[%c0_141, %c0_142] : memref<1152x128xbf16, #tpu.memory_space<vmem>>, vector<1152x128xbf16>
    %cst_143 = arith.constant dense<0.000000e+00> : vector<288x128xf32>
    %141 = tpu.matmul %139, %140, %cst_143 {dimension_numbers = #tpu.dot_dimension_numbers<[1], [0], [0], [1], [0, 0, 1, 1], [], []>} : vector<288x1152xbf16>, vector<1152x128xbf16>, vector<288x128xf32> -> vector<288x128xf32>
    %c0_144 = arith.constant 0 : index
    %c0_145 = arith.constant 0 : index
    %142 = vector.load %arg5[%c0_144, %c0_145] : memref<1x128xf32, #tpu.memory_space<vmem>>, vector<1x128xf32>
    %143 = vector.broadcast %142 : vector<1x128xf32> to vector<288x128xf32>
    %144 = arith.addf %141, %143 : vector<288x128xf32>
    %c0_146 = arith.constant 0 : index
    %c0_147 = arith.constant 0 : index
    %c0_148 = arith.constant 0 : index
    %145 = vector.load %arg7[%c0_146, %c0_147, %c0_148] : memref<1x288x128xf32, #tpu.memory_space<vmem>>, vector<1x288x128xf32>
    %146 = vector.shape_cast %145 : vector<1x288x128xf32> to vector<288x128xf32>
    %147 = vector.shape_cast %144 : vector<288x128xf32> to vector<1x288x128xf32>
    tpu.vector_store %arg7[%c0_146, %c0_147, %c0_148], %147 {strides = array<i32>} : memref<1x288x128xf32, #tpu.memory_space<vmem>>, vector<1x288x128xf32>,
    return
  }
  func.func @transform_0(%arg0: i32) -> (i32, i32, i32) {
    %c0_i32 = arith.constant 0 : i32
    %c0_i32_0 = arith.constant 0 : i32
    %c0_i32_1 = arith.constant 0 : i32
    return %arg0, %c0_i32, %c0_i32_0 : i32, i32, i32
  }
  func.func @transform_1(%arg0: i32) -> (i32, i32, i32) {
    %c0_i32 = arith.constant 0 : i32
    %c0_i32_0 = arith.constant 0 : i32
    %c0_i32_1 = arith.constant 0 : i32
    %c0_i32_2 = arith.constant 0 : i32
    return %c0_i32, %c0_i32_0, %c0_i32_1 : i32, i32, i32
  }
  func.func @transform_2(%arg0: i32) -> (i32, i32, i32) {
    %c0_i32 = arith.constant 0 : i32
    %c0_i32_0 = arith.constant 0 : i32
    %c0_i32_1 = arith.constant 0 : i32
    %c0_i32_2 = arith.constant 0 : i32
    return %c0_i32, %c0_i32_0, %c0_i32_1 : i32, i32, i32
  }
  func.func @transform_3(%arg0: i32) -> (i32, i32) {
    %c0_i32 = arith.constant 0 : i32
    %c0_i32_0 = arith.constant 0 : i32
    %c0_i32_1 = arith.constant 0 : i32
    return %c0_i32, %c0_i32_0 : i32, i32
  }
  func.func @transform_4(%arg0: i32) -> (i32, i32) {
    %c0_i32 = arith.constant 0 : i32
    %c0_i32_0 = arith.constant 0 : i32
    %c0_i32_1 = arith.constant 0 : i32
    return %c0_i32, %c0_i32_0 : i32, i32
  }
  func.func @transform_5(%arg0: i32) -> (i32, i32) {
    %c0_i32 = arith.constant 0 : i32
    %c0_i32_0 = arith.constant 0 : i32
    %c0_i32_1 = arith.constant 0 : i32
    return %c0_i32, %c0_i32_0 : i32, i32
  }
  func.func @transform_6(%arg0: i32) -> (i32, i32, i32) {
    %c0_i32 = arith.constant 0 : i32
    %c0_i32_0 = arith.constant 0 : i32
    %c0_i32_1 = arith.constant 0 : i32
    return %arg0, %c0_i32, %c0_i32_0 : i32, i32, i32
  }
}

</mosaic_0001>

<bundles_post_ra>
// kernel: mul.36
= control target key start
LH: loop header
LB: loop body
LE: loop exit
PB: predicated region body
PF: predicated region fallthrough
CT: control target
= control target key end

     0   :  { %vm17_vm0 = vcmask 130048   ;;  %s62_s0 = inlined_call_operand.vmem [shape: f32[3,3,16], index: 0, kind: input, shape index: {}]   ;;  %s63_s1 = inlined_call_operand.vmem [shape: f32[9,16], index: 1, kind: output, shape index: {}]  }
   0x1   :  { %v30_v0 = vld [vmem:[%s62_s0 + $0x8] sm:$0xf]  ;;  %v31_v1 = vld [vmem:[%s62_s0 + $0x4] sm:$0xf]  ;;  %v14_v2 = vld [vmem:[%s62_s0] sm:$0xf] }
   0x2   :  { %9 = vst [vmem:[#allocation0] sm:$0xf] %v30_v0  ;;  %13 = vst [vmem:[#allocation0 + $0x10] sm:$0xf] %v31_v1 }
   0x3   :  { %15 = vst [vmem:[#allocation0 + $0x8] sm:$0xf] %v14_v2 }
   0x9   :  { %v20_v4 = vld [vmem:[#allocation0 + $0x10] sm:$0x7]   ;;  %v25_v5 = vld [vmem:[#allocation0] sm:$0x7]  }
   0xa   :  { %v16_v3 = vld [vmem:[#allocation0 + $0x8] sm:$0x7]   ;;  %32 = vst.msk [vmem:[%s63_s1 + $0x3] sm:$0x7] %vm17_vm0, %v20_v4   ;;  %33 = vst.msk [vmem:[%s63_s1 + $0x6] sm:$0x7] %vm17_vm0, %v25_v5  }
   0xb   :  { %18 = vst.msk [vmem:[%s63_s1] sm:$0x7] %vm17_vm0, %v16_v3  }

// kernel: iterative_hand_subnet_forward.1
= control target key start
LH: loop header
LB: loop body
LE: loop exit
PB: predicated region body
PF: predicated region fallthrough
CT: control target
= control target key end

     0   :  { %s18935_s21 = smov 0   ;;  %s21945_s0 = inlined_call_operand.vmem [shape: f32[2,328,128], index: 0, kind: input, shape index: {}]   ;;  %s21946_s1 = inlined_call_operand.vmem [shape: bf16[2,1152,128], index: 1, kind: input, shape index: {}]   ;;  %s21947_s2 = inlined_call_operand.vmem [shape: f32[2,1,128], index: 2, kind: input, shape index: {}]   ;;  %s21948_s3 = inlined_call_operand.vmem [shape: bf16[1152,128], index: 3, kind: input, shape index: {}]   ;;  %s21949_s4 = inlined_call_operand.vmem [shape: f32[1,128], index: 4, kind: input, shape index: {}]   ;;  %s21950_s5 = inlined_call_operand.vmem [shape: f32[288,1], index: 5, kind: input, shape index: {}]   ;;  %s21951_s6 = inlined_call_operand.vmem [shape: f32[2,288,128], index: 6, kind: output, shape index: {}]  }
   0x1 LB: > { %s14518_s22 = sadd.s32 4294967295, %s18896_s21   ;;  %p14522_p0 = scmp.ge.s32.totalorder %s18896_s21, 1  ;;  %s18896_s21 = sphi %s18935_s21, %s16_s21  }
   0x2   : > { %p212_p1 = scmp.lt.s32.totalorder %s18896_s21, 3 }
   0x4   : > { %p213_p2 = pnand %p14522_p0, %p212_p1 }
   0x6   : > { %216 = sbr.rel (%p213_p2) target bundleno = 1878 (0x756), region = 44 }
   0xb   : > { %v17673_v0 = vld [vmem:[%s21946_s1 + $0x38] sm:$0xff]   ;;  %v21952_v1 = vmov 0   ;;  %v17675_v3 = vld [vmem:[%s21946_s1 + $0x30] sm:$0xff]   ;;  %v17677_v5 = vld [vmem:[%s21946_s1 + $0x28] sm:$0xff]   ;;  %p242_p3 = scmp.lt.s32.totalorder %s14518_s22, 1 }
   0xc   : > { %3872 = vmatprep.subr.bf16.mxu0 %v21952_v1  ;;  %4049 = vmatprep.subr.bf16.mxu1 %v21952_v1  ;;  %v17674_v2 = vld [vmem:[%s21946_s1 + $0xb8] sm:$0xff]   ;;  %v17676_v4 = vld [vmem:[%s21946_s1 + $0xb0] sm:$0xff]   ;;  %v17678_v6 = vld [vmem:[%s21946_s1 + $0xa8] sm:$0xff]  }
   0xd   : > { %3873 = vmatpush1.bf16.msra.mxu0 %v17673_v0  ;;  %17671 = vset.pattern.permute.xlu0 %v21952_v1  ;;  %v17679_v7 = vld [vmem:[%s21946_s1 + $0x20] sm:$0xff]   ;;  %v17681_v9 = vld [vmem:[%s21946_s1 + $0x18] sm:$0xff]   ;;  %v17683_v11 = vld [vmem:[%s21946_s1 + $0x10] sm:$0xff]   ;;  %s22102_s22 = smov (!%p242_p3, %s14518_s22), 1 }
   0xe   : > { %4050 = vmatpush1.bf16.msra.mxu1 %v17674_v2  ;;  %3874 = vmatprep.subr.bf16.mxu0 %v21952_v1  ;;  %v17680_v8 = vld [vmem:[%s21946_s1 + $0xa0] sm:$0xff]   ;;  %v17682_v10 = vld [vmem:[%s21946_s1 + $0x98] sm:$0xff]   ;;  %v17684_v12 = vld [vmem:[%s21946_s1 + $0x90] sm:$0xff]   ;;  %s17659_s29 = smul.u32 328, %s22102_s22 }
   0xf   : > { %4051 = vmatprep.subr.bf16.mxu1 %v21952_v1  ;;  %17672 = vset.pattern.permute.xlu1 %v21952_v1  ;;  %v17685_v13 = vld [vmem:[%s21946_s1 + $0x8] sm:$0xff]   ;;  %v17687_v15 = vld [vmem:[%s21946_s1] sm:$0xff]   ;;  %v17689_v17 = vld [vmem:[%s21946_s1 + $0x78] sm:$0xff]   ;;  %s17660_s13 = smul.u32 288, %s22102_s22 }
  0x10   : > { %v17686_v14 = vld [vmem:[%s21946_s1 + $0x88] sm:$0xff]   ;;  %v17688_v16 = vld [vmem:[%s21946_s1 + $0x80] sm:$0xff]   ;;  %s19019_s12 = scalar_lea.vmem %s21945_s0, %s17659_s29  ;;  %v17690_v18 = vld [vmem:[%s21946_s1 + $0xf8] sm:$0xff]  }
  0x11   : > { %3875 = vmatpush1.bf16.msra.mxu0 %v17675_v3  ;;  %v337_v19 = vld [vmem:[%s19019_s12] sm:$0xff]  ;;  %v338_v20 = vld [vmem:[%s19019_s12 + $0x8] sm:$0xff]  ;;  %v17691_v26 = vld [vmem:[%s21946_s1 + $0x70] sm:$0xff]   ;;  %s21862_s16 = scalar_lea.vmem %s21951_s6, %s17660_s13 }
  0x12   : > { %4052 = vmatpush1.bf16.msra.mxu1 %v17676_v4  ;;  %3876 = vmatprep.subr.bf16.mxu0 %v21952_v1  ;;  %v553_v21 = vld [vmem:[%s19019_s12 + $0x1] sm:$0xff]  ;;  %v16421_v22 = vpack.c.bf16 %v337_v19, %v337_v19  ;;  %v16422_v23 = vpack.c.bf16 %v338_v20, %v338_v20  ;;  %v554_v24 = vld [vmem:[%s19019_s12 + $0x9] sm:$0xff]  ;;  %v985_v32 = vld [vmem:[%s19019_s12 + $0x12] sm:$0xff] }
  0x13   : > { %4053 = vmatprep.subr.bf16.mxu1 %v21952_v1  ;;  %v16457_v25 = vpack.c.bf16 %v553_v21, %v553_v21  ;;  %v16458_v27 = vpack.c.bf16 %v554_v24, %v554_v24  ;;  %v769_v28 = vld [vmem:[%s19019_s12 + $0x2] sm:$0xff]  ;;  %v770_v29 = vld [vmem:[%s19019_s12 + $0xa] sm:$0xff]  ;;  %v986_v33 = vld [vmem:[%s19019_s12 + $0x1a] sm:$0xff]  ;;  %v16529_v35 = vpack.c.bf16 %v985_v32, %v985_v32 }
  0x14   : > { %517 = vst [vmem:[#allocation4] sm:$0xf] %v16421_v22  ;;  %518 = vst [vmem:[#allocation4 + $0x24] sm:$0xf] %v16422_v23  ;;  %v16493_v30 = vpack.c.bf16 %v769_v28, %v769_v28  ;;  %v16494_v31 = vpack.c.bf16 %v770_v29, %v770_v29  ;;  %v17692_v34 = vld [vmem:[%s21946_s1 + $0xf0] sm:$0xff]   ;;  %v16530_v36 = vpack.c.bf16 %v986_v33, %v986_v33  ;;  %v17693_v38 = vld [vmem:[%s21946_s1 + $0x68] sm:$0xff]  }
  0x15   : > { %3877 = vmatpush1.bf16.msra.mxu0 %v17677_v5  ;;  %733 = vst [vmem:[#allocation4 + $0x4] sm:$0xf] %v16457_v25  ;;  %734 = vst [vmem:[#allocation4 + $0x28] sm:$0xf] %v16458_v27  ;;  %v339_v37 = vld [vmem:[%s19019_s12 + $0x10] sm:$0xff]  ;;  %v340_v39 = vld [vmem:[%s19019_s12 + $0x18] sm:$0xff] }
  0x16   : > { %4054 = vmatpush1.bf16.msra.mxu1 %v17678_v6  ;;  %3878 = vmatprep.subr.bf16.mxu0 %v21952_v1  ;;  %949 = vst [vmem:[#allocation4 + $0x8] sm:$0xf] %v16493_v30  ;;  %950 = vst [vmem:[#allocation4 + $0x2c] sm:$0xf] %v16494_v31  ;;  %v16423_v40 = vpack.c.bf16 %v339_v37, %v339_v37  ;;  %v555_v41 = vld [vmem:[%s19019_s12 + $0x11] sm:$0xff]  ;;  %v556_v42 = vld [vmem:[%s19019_s12 + $0x19] sm:$0xff]  ;;  %v16424_v43 = vpack.c.bf16 %v340_v39, %v340_v39 }
  0x17   : > { %4055 = vmatprep.subr.bf16.mxu1 %v21952_v1  ;;  %1165 = vst [vmem:[#allocation4 + $0xc] sm:$0xf] %v16529_v35  ;;  %1166 = vst [vmem:[#allocation4 + $0x30] sm:$0xf] %v16530_v36  ;;  %v16459_v44 = vpack.c.bf16 %v555_v41, %v555_v41  ;;  %v16460_v45 = vpack.c.bf16 %v556_v42, %v556_v42  ;;  %v987_v46 = vld [vmem:[%s19019_s12 + $0x22] sm:$0xff]  ;;  %v988_v47 = vld [vmem:[%s19019_s12 + $0x2a] sm:$0xff] }
  0x18   : > { %951 = vst [vmem:[#allocation4 + $0x50] sm:$0xf] %v16529_v35  ;;  %952 = vst [vmem:[#allocation4 + $0x74] sm:$0xf] %v16530_v36  ;;  %v17694_v48 = vld [vmem:[%s21946_s1 + $0xe8] sm:$0xff]   ;;  %v16531_v49 = vpack.c.bf16 %v987_v46, %v987_v46  ;;  %v16532_v50 = vpack.c.bf16 %v988_v47, %v988_v47  ;;  %v341_v51 = vld [vmem:[%s19019_s12 + $0x20] sm:$0xff] }
  0x19   : > { %3879 = vmatpush1.bf16.msra.mxu0 %v17679_v7  ;;  %519 = vst [vmem:[#allocation4 + $0x48] sm:$0xf] %v16423_v40  ;;  %520 = vst [vmem:[#allocation4 + $0x6c] sm:$0xf] %v16424_v43  ;;  %v342_v52 = vld [vmem:[%s19019_s12 + $0x28] sm:$0xff]  ;;  %v16425_v53 = vpack.c.bf16 %v341_v51, %v341_v51  ;;  %v989_v59 = vld [vmem:[%s19019_s12 + $0x32] sm:$0xff] }
  0x1a   : > { %4056 = vmatpush1.bf16.msra.mxu1 %v17680_v8  ;;  %3880 = vmatprep.subr.bf16.mxu0 %v21952_v1  ;;  %735 = vst [vmem:[#allocation4 + $0x4c] sm:$0xf] %v16459_v44  ;;  %736 = vst [vmem:[#allocation4 + $0x70] sm:$0xf] %v16460_v45  ;;  %v557_v54 = vld [vmem:[%s19019_s12 + $0x21] sm:$0xff]  ;;  %v558_v55 = vld [vmem:[%s19019_s12 + $0x29] sm:$0xff]  ;;  %v16426_v56 = vpack.c.bf16 %v342_v52, %v342_v52  ;;  %v16533_v62 = vpack.c.bf16 %v989_v59, %v989_v59 }
  0x1b   : > { %4057 = vmatprep.subr.bf16.mxu1 %v21952_v1  ;;  %1167 = vst [vmem:[#allocation4 + $0x54] sm:$0xf] %v16531_v49  ;;  %1168 = vst [vmem:[#allocation4 + $0x78] sm:$0xf] %v16532_v50  ;;  %v16461_v57 = vpack.c.bf16 %v557_v54, %v557_v54  ;;  %v16462_v58 = vpack.c.bf16 %v558_v55, %v558_v55  ;;  %v990_v60 = vld [vmem:[%s19019_s12 + $0x3a] sm:$0xff]  ;;  %v343_v3 = vld [vmem:[%s19019_s12 + $0x30] sm:$0xff] }
  0x1c   : > { %953 = vst [vmem:[#allocation4 + $0x98] sm:$0xf] %v16531_v49  ;;  %954 = vst [vmem:[#allocation4 + $0xbc] sm:$0xf] %v16532_v50  ;;  %v17695_v61 = vld [vmem:[%s21946_s1 + $0x60] sm:$0xff]   ;;  %v16534_v63 = vpack.c.bf16 %v990_v60, %v990_v60  ;;  %v344_v4 = vld [vmem:[%s19019_s12 + $0x38] sm:$0xff]  ;;  %v16427_v7 = vpack.c.bf16 %v343_v3, %v343_v3 }
  0x1d   : > { %3881 = vmatpush1.bf16.msra.mxu0 %v17681_v9  ;;  %521 = vst [vmem:[#allocation4 + $0x90] sm:$0xf] %v16425_v53  ;;  %v17696_v0 = vld [vmem:[%s21946_s1 + $0xe0] sm:$0xff]   ;;  %v17704_v2 = vld [vmem:[#allocation4 + $0x4] ss:$36 sps:$4 sm:$0xff]   ;;  %v16428_v8 = vpack.c.bf16 %v344_v4, %v344_v4  ;;  %v17701_v20 = vld [vmem:[%s21946_s1 + $0x48] sm:$0xff]  }
  0x1e   : > { %4058 = vmatpush1.bf16.msra.mxu1 %v17682_v10  ;;  %3882 = vmatprep.subr.bf16.mxu0 %v21952_v1  ;;  %522 = vst [vmem:[#allocation4 + $0xb4] sm:$0xf] %v16426_v56  ;;  %737 = vst [vmem:[#allocation4 + $0x94] sm:$0xf] %v16461_v57  ;;  %v559_v5 = vld [vmem:[%s19019_s12 + $0x31] sm:$0xff]  ;;  %v560_v10 = vld [vmem:[%s19019_s12 + $0x39] sm:$0xff] }
  0x1f   : > { %4059 = vmatprep.subr.bf16.mxu1 %v21952_v1  ;;  %738 = vst [vmem:[#allocation4 + $0xb8] sm:$0xf] %v16462_v58  ;;  %1169 = vst [vmem:[#allocation4 + $0x9c] sm:$0xf] %v16533_v62  ;;  %3904 = vmatprep.mubr.bf16.mxu0 %v17704_v2  ;;  %v17708_v6 = vld [vmem:[#allocation4 + $0xc] ss:$36 sps:$4 sm:$0xff]   ;;  %v16463_v9 = vpack.c.bf16 %v559_v5, %v559_v5 }
  0x20   : > { %1170 = vst [vmem:[#allocation4 + $0xc0] sm:$0xf] %v16534_v63  ;;  %955 = vst [vmem:[#allocation4 + $0xe0] sm:$0xf] %v16533_v62  ;;  %4081 = vmatprep.mubr.bf16.mxu1 %v17708_v6  ;;  %v17700_v19 = vld [vmem:[%s21946_s1 + $0xd0] sm:$0xff]   ;;  %v345_v21 = vld [vmem:[%s19019_s12 + $0x40] sm:$0xff] }
  0x21   : > { %3883 = vmatpush1.bf16.msra.mxu0 %v17683_v11  ;;  %956 = vst [vmem:[#allocation4 + $0x104] sm:$0xf] %v16534_v63  ;;  %v991_v11 = vld [vmem:[%s19019_s12 + $0x42] sm:$0xff]  ;;  %523 = vst [vmem:[#allocation4 + $0xd8] sm:$0xf] %v16427_v7  ;;  %v16429_v23 = vpack.c.bf16 %v345_v21, %v345_v21  ;;  %v993_v28 = vld [vmem:[%s19019_s12 + $0x52] sm:$0xff] }
  0x22   : > { %4060 = vmatpush1.bf16.msra.mxu1 %v17684_v12  ;;  %3884 = vmatprep.subr.bf16.mxu0 %v21952_v1  ;;  %v17697_v12 = vld [vmem:[%s21946_s1 + $0x58] sm:$0xff]   ;;  %524 = vst [vmem:[#allocation4 + $0xfc] sm:$0xf] %v16428_v8  ;;  %739 = vst [vmem:[#allocation4 + $0xdc] sm:$0xf] %v16463_v9  ;;  %v346_v22 = vld [vmem:[%s19019_s12 + $0x48] sm:$0xff]  ;;  %v16537_v32 = vpack.c.bf16 %v993_v28, %v993_v28 }
  0x23   : > { %4061 = vmatprep.subr.bf16.mxu1 %v21952_v1  ;;  %v561_v24 = vld [vmem:[%s19019_s12 + $0x41] sm:$0xff]  ;;  %v16430_v25 = vpack.c.bf16 %v346_v22, %v346_v22  ;;  %525 = vst [vmem:[#allocation4 + $0x120] sm:$0xf] %v16429_v23  ;;  %v348_v35 = vld [vmem:[%s19019_s12 + $0x58] sm:$0xff]  ;;  %v17707_v40 = vld [vmem:[#allocation4] ss:$36 sps:$4 sm:$0xff]  }
  0x24   : > { %v16465_v27 = vpack.c.bf16 %v561_v24, %v561_v24  ;;  %v994_v29 = vld [vmem:[%s19019_s12 + $0x5a] sm:$0xff]  ;;  %v17702_v30 = vld [vmem:[%s21946_s1 + $0xc8] sm:$0xff]   ;;  %1173 = vst [vmem:[#allocation4 + $0x12c] sm:$0xf] %v16537_v32  ;;  %959 = vst [vmem:[#allocation4 + $0x170] sm:$0xf] %v16537_v32  ;;  %v16432_v39 = vpack.c.bf16 %v348_v35, %v348_v35 }
  0x25   : > { %3885 = vmatpush1.bf16.msra.mxu0 %v17685_v13  ;;  %v16464_v13 = vpack.c.bf16 %v560_v10, %v560_v10  ;;  %v16538_v33 = vpack.c.bf16 %v994_v29, %v994_v29  ;;  %526 = vst [vmem:[#allocation4 + $0x144] sm:$0xf] %v16430_v25  ;;  %v17703_v36 = vld [vmem:[%s21946_s1 + $0x40] sm:$0xff]   ;;  %v563_v41 = vld [vmem:[%s19019_s12 + $0x51] sm:$0xff]  ;;  %v350_v54 = vld [vmem:[%s19019_s12 + $0x68] sm:$0xff] }
  0x26   : > { %4062 = vmatpush1.bf16.msra.mxu1 %v17686_v14  ;;  %3886 = vmatprep.subr.bf16.mxu0 %v21952_v1  ;;  %v16535_v14 = vpack.c.bf16 %v991_v11, %v991_v11  ;;  %741 = vst [vmem:[#allocation4 + $0x124] sm:$0xf] %v16465_v27  ;;  %v17706_v37 = vld [vmem:[%s21946_s1 + $0xc0] sm:$0xff]   ;;  %v17710_v44 = vld [vmem:[%s21946_s1 + $0x138] sm:$0xff]   ;;  %528 = vst [vmem:[#allocation4 + $0x18c] sm:$0xf] %v16432_v39  ;;  %v16467_v46 = vpack.c.bf16 %v563_v41, %v563_v41 }
  0x27   : > { %4063 = vmatprep.subr.bf16.mxu1 %v21952_v1  ;;  %740 = vst [vmem:[#allocation4 + $0x100] sm:$0xf] %v16464_v13  ;;  %1174 = vst [vmem:[#allocation4 + $0x150] sm:$0xf] %v16538_v33  ;;  %v564_v42 = vld [vmem:[%s19019_s12 + $0x59] sm:$0xff]  ;;  %v995_v43 = vld [vmem:[%s19019_s12 + $0x62] sm:$0xff]  ;;  %v16434_v56 = vpack.c.bf16 %v350_v54, %v350_v54 }
  0x28   : > { %1171 = vst [vmem:[#allocation4 + $0xe4] sm:$0xf] %v16535_v14  ;;  %957 = vst [vmem:[#allocation4 + $0x128] sm:$0xf] %v16535_v14  ;;  %v17711_v45 = vld [vmem:[#allocation4 + $0x8] ss:$36 sps:$4 sm:$0xff]   ;;  %v16468_v47 = vpack.c.bf16 %v564_v42, %v564_v42  ;;  %v16539_v49 = vpack.c.bf16 %v995_v43, %v995_v43 }
  0x29   : > { %3887 = vmatpush1.bf16.msra.mxu0 %v17687_v15  ;;  %v17698_v15 = vld [vmem:[%s21946_s1 + $0xd8] sm:$0xff]   ;;  %960 = vst [vmem:[#allocation4 + $0x194] sm:$0xf] %v16538_v33  ;;  %v17715_v51 = vld [vmem:[#allocation4 + $0x54] ss:$36 sps:$4 sm:$0xff]   ;;  %v17718_v4 = vld [vmem:[%s21946_s1 + $0x130] sm:$0xff]  }
  0x2a   : > { %4064 = vmatpush1.bf16.msra.mxu1 %v17688_v16  ;;  %3888 = vmatprep.subr.bf16.mxu0 %v21952_v1  ;;  %v992_v16 = vld [vmem:[%s19019_s12 + $0x4a] sm:$0xff]  ;;  %v17712_v50 = vld [vmem:[#allocation4 + $0x4c] ss:$36 sps:$4 sm:$0xff]   ;;  %743 = vst [vmem:[#allocation4 + $0x16c] sm:$0xf] %v16467_v46  ;;  %v997_v59 = vld [vmem:[%s19019_s12 + $0x72] sm:$0xff] }
  0x2b   : > { %4065 = vmatprep.subr.bf16.mxu1 %v21952_v1  ;;  %v349_v53 = vld [vmem:[%s19019_s12 + $0x60] sm:$0xff]  ;;  %744 = vst [vmem:[#allocation4 + $0x190] sm:$0xf] %v16468_v47  ;;  %1175 = vst [vmem:[#allocation4 + $0x174] sm:$0xf] %v16539_v49  ;;  %v566_v58 = vld [vmem:[%s19019_s12 + $0x69] sm:$0xff]  ;;  %v16541_v63 = vpack.c.bf16 %v997_v59, %v997_v59 }
  0x2c   : > { %v16433_v55 = vpack.c.bf16 %v349_v53, %v349_v53  ;;  %v565_v57 = vld [vmem:[%s19019_s12 + $0x61] sm:$0xff]  ;;  %961 = vst [vmem:[#allocation4 + $0x1b8] sm:$0xf] %v16539_v49  ;;  %530 = vst [vmem:[#allocation4 + $0x1d4] sm:$0xf] %v16434_v56  ;;  %v352_v5 = vld [vmem:[%s19019_s12 + $0x78] sm:$0xff] }
  0x2d   : > { %3889 = vmatpush2.bf16.msra.mxu0 %v17689_v17  ;;  %v16536_v17 = vpack.c.bf16 %v992_v16, %v992_v16  ;;  %v16469_v60 = vpack.c.bf16 %v565_v57, %v565_v57  ;;  %v998_v62 = vld [vmem:[%s19019_s12 + $0x7a] sm:$0xff]  ;;  %1177 = vst [vmem:[#allocation4 + $0x1bc] sm:$0xf] %v16541_v63  ;;  %963 = vst [vmem:[#allocation4 + $0x200] sm:$0xf] %v16541_v63  ;;  %v567_v6 = vld [vmem:[%s19019_s12 + $0x71] sm:$0xff]  ;;  %v16436_v7 = vpack.c.bf16 %v352_v5, %v352_v5 }
  0x2e   : > { %4066 = vmatpush2.bf16.msra.mxu1 %v17690_v18  ;;  %3890 = vmatprep.subr.bf16.mxu0 %v21952_v1  ;;  %v17699_v18 = vld [vmem:[%s21946_s1 + $0x50] sm:$0xff]   ;;  %529 = vst [vmem:[#allocation4 + $0x1b0] sm:$0xf] %v16433_v55  ;;  %v16542_v2 = vpack.c.bf16 %v998_v62, %v998_v62  ;;  %v568_v8 = vld [vmem:[%s19019_s12 + $0x79] sm:$0xff]  ;;  %v16471_v9 = vpack.c.bf16 %v567_v6, %v567_v6  ;;  %v354_v23 = vld [vmem:[%s19019_s12 + $0x88] sm:$0xff] }
  0x2f   : > { %4067 = vmatprep.subr.bf16.mxu1 %v21952_v1  ;;  %1172 = vst [vmem:[#allocation4 + $0x108] sm:$0xf] %v16536_v17  ;;  %958 = vst [vmem:[#allocation4 + $0x14c] sm:$0xf] %v16536_v17  ;;  %v17714_v10 = vld [vmem:[#allocation4 + $0x48] ss:$36 sps:$4 sm:$0xff]   ;;  %v16472_v11 = vpack.c.bf16 %v568_v8, %v568_v8  ;;  %v16438_v24 = vpack.c.bf16 %v354_v23, %v354_v23 }
  0x30   : > { %745 = vst [vmem:[#allocation4 + $0x1b4] sm:$0xf] %v16469_v60  ;;  %1178 = vst [vmem:[#allocation4 + $0x1e0] sm:$0xf] %v16542_v2  ;;  %v1000_v13 = vld [vmem:[%s19019_s12 + $0x8a] sm:$0xff]  ;;  %v17732_v22 = vld [vmem:[%s21946_s1 + $0x120] sm:$0xff]  }
  0x31   : > { %3891 = vmatpush2.bf16.msra.mxu0 %v17691_v26  ;;  %v562_v26 = vld [vmem:[%s19019_s12 + $0x49] sm:$0xff]  ;;  %964 = vst [vmem:[#allocation4 + $0x224] sm:$0xf] %v16542_v2  ;;  %v17717_v14 = vld [vmem:[#allocation4 + $0x50] ss:$36 sps:$4 sm:$0xff]   ;;  %v16544_v16 = vpack.c.bf16 %v1000_v13, %v1000_v13  ;;  %v17739_v32 = vld [vmem:[%s21946_s1 + $0x118] sm:$0xff]  }
  0x32   : > { %4068 = vmatpush2.bf16.msra.mxu1 %v17692_v34  ;;  %3892 = vmatprep.subr.bf16.mxu0 %v21952_v1  ;;  %v16466_v31 = vpack.c.bf16 %v562_v26, %v562_v26  ;;  %v347_v34 = vld [vmem:[%s19019_s12 + $0x50] sm:$0xff]  ;;  %532 = vst [vmem:[#allocation4 + $0x21c] sm:$0xf] %v16436_v7  ;;  %747 = vst [vmem:[#allocation4 + $0x1fc] sm:$0xf] %v16471_v9  ;;  %v569_v25 = vld [vmem:[%s19019_s12 + $0x81] sm:$0xff] }
  0x33   : > { %4069 = vmatprep.subr.bf16.mxu1 %v21952_v1  ;;  %v17719_v17 = vld [vmem:[#allocation4 + $0x94] ss:$36 sps:$4 sm:$0xff]   ;;  %748 = vst [vmem:[#allocation4 + $0x220] sm:$0xf] %v16472_v11  ;;  %1180 = vst [vmem:[#allocation4 + $0x228] sm:$0xf] %v16544_v16  ;;  %v16473_v28 = vpack.c.bf16 %v569_v25, %v569_v25 }
  0x34   : > { %742 = vst [vmem:[#allocation4 + $0x148] sm:$0xf] %v16466_v31  ;;  %966 = vst [vmem:[#allocation4 + $0x26c] sm:$0xf] %v16544_v16  ;;  %v570_v26 = vld [vmem:[%s19019_s12 + $0x89] sm:$0xff]  ;;  %v1002_v35 = vld [vmem:[%s19019_s12 + $0x9a] sm:$0xff] }
  0x35   : > { %3893 = vmatpush2.bf16.msra.mxu0 %v17693_v38  ;;  %v16431_v38 = vpack.c.bf16 %v347_v34, %v347_v34  ;;  %v17721_v27 = vld [vmem:[#allocation4 + $0x90] ss:$36 sps:$4 sm:$0xff]   ;;  %v16474_v29 = vpack.c.bf16 %v570_v26, %v570_v26  ;;  %v17726_v31 = vld [vmem:[#allocation4 + $0xdc] ss:$36 sps:$4 sm:$0xff]   ;;  %534 = vst [vmem:[#allocation4 + $0x264] sm:$0xf] %v16438_v24 }
  0x36   : > { %4070 = vmatpush2.bf16.msra.mxu1 %v17694_v48  ;;  %3894 = vmatprep.subr.bf16.mxu0 %v21952_v1  ;;  %v996_v48 = vld [vmem:[%s19019_s12 + $0x6a] sm:$0xff]  ;;  %749 = vst [vmem:[#allocation4 + $0x244] sm:$0xf] %v16473_v28  ;;  %v17729_v33 = vld [vmem:[#allocation4 + $0xe4] ss:$36 sps:$4 sm:$0xff]   ;;  %v573_v54 = vld [vmem:[%s19019_s12 + $0xa1] sm:$0xff] }
  0x37   : > { %4071 = vmatprep.subr.bf16.mxu1 %v21952_v1  ;;  %527 = vst [vmem:[#allocation4 + $0x168] sm:$0xf] %v16431_v38  ;;  %v16540_v52 = vpack.c.bf16 %v996_v48, %v996_v48  ;;  %750 = vst [vmem:[#allocation4 + $0x268] sm:$0xf] %v16474_v29  ;;  %v1001_v34 = vld [vmem:[%s19019_s12 + $0x92] sm:$0xff]  ;;  %v1004_v46 = vld [vmem:[%s19019_s12 + $0xaa] sm:$0xff]  ;;  %v16477_v59 = vpack.c.bf16 %v573_v54, %v573_v54 }
  0x38   : > { %v355_v38 = vld [vmem:[%s19019_s12 + $0x90] sm:$0xff]  ;;  %v356_v39 = vld [vmem:[%s19019_s12 + $0x98] sm:$0xff]  ;;  %v358_v53 = vld [vmem:[%s19019_s12 + $0xa8] sm:$0xff] }
  0x39   : > { %3895 = vmatpush2.bf16.msra.mxu0 %v17695_v61  ;;  %1176 = vst [vmem:[#allocation4 + $0x198] sm:$0xf] %v16540_v52  ;;  %v16470_v61 = vpack.c.bf16 %v566_v58, %v566_v58  ;;  %962 = vst [vmem:[#allocation4 + $0x1dc] sm:$0xf] %v16540_v52  ;;  %v16439_v41 = vpack.c.bf16 %v355_v38, %v355_v38  ;;  %v16440_v42 = vpack.c.bf16 %v356_v39, %v356_v39  ;;  %v572_v43 = vld [vmem:[%s19019_s12 + $0x99] sm:$0xff]  ;;  %v17746_v47 = vld [vmem:[%s21946_s1 + $0x110] sm:$0xff]  }
  0x3a   : > { %4072 = vmatpush2.bf16.msra.mxu1 %v17696_v0  ;;  %3896 = vmatprep.subr.bf16.mxu0 %v21952_v1  ;;  %v351_v0 = vld [vmem:[%s19019_s12 + $0x70] sm:$0xff]  ;;  %v16476_v48 = vpack.c.bf16 %v572_v43, %v572_v43  ;;  %v357_v52 = vld [vmem:[%s19019_s12 + $0xa0] sm:$0xff]  ;;  %v16442_v57 = vpack.c.bf16 %v358_v53, %v358_v53  ;;  %753 = vst [vmem:[#allocation4 + $0x2d4] sm:$0xf] %v16477_v59  ;;  %v17781_v5 = vld [vmem:[%s21946_s1 + $0x1b8] sm:$0xff]  }
  0x3b   : > { %4073 = vmatprep.subr.bf16.mxu1 %v21952_v1  ;;  %v16435_v3 = vpack.c.bf16 %v351_v0, %v351_v0  ;;  %746 = vst [vmem:[#allocation4 + $0x1d8] sm:$0xf] %v16470_v61  ;;  %535 = vst [vmem:[#allocation4 + $0x288] sm:$0xf] %v16439_v41  ;;  %v17731_v55 = vld [vmem:[#allocation4 + $0xe0] ss:$36 sps:$4 sm:$0xff]   ;;  %v16441_v56 = vpack.c.bf16 %v357_v52, %v357_v52 }
  0x3c   : > { %536 = vst [vmem:[#allocation4 + $0x2ac] sm:$0xf] %v16440_v42  ;;  %752 = vst [vmem:[#allocation4 + $0x2b0] sm:$0xf] %v16476_v48  ;;  %v574_v58 = vld [vmem:[%s19019_s12 + $0xa9] sm:$0xff]  ;;  %v1005_v60 = vld [vmem:[%s19019_s12 + $0xb2] sm:$0xff] }
  0x3d   : > { %3897 = vmatpush2.bf16.msra.mxu0 %v17697_v12  ;;  %531 = vst [vmem:[#allocation4 + $0x1f8] sm:$0xf] %v16435_v3  ;;  %v999_v12 = vld [vmem:[%s19019_s12 + $0x82] sm:$0xff]  ;;  %v1006_v61 = vld [vmem:[%s19019_s12 + $0xba] sm:$0xff]  ;;  %v16478_v63 = vpack.c.bf16 %v574_v58, %v574_v58  ;;  %v16549_v0 = vpack.c.bf16 %v1005_v60, %v1005_v60  ;;  %537 = vst [vmem:[#allocation4 + $0x2d0] sm:$0xf] %v16441_v56 }
  0x3e   : > { %4074 = vmatpush2.bf16.msra.mxu1 %v17698_v15  ;;  %3898 = vmatprep.subr.bf16.mxu0 %v21952_v1  ;;  %v16543_v15 = vpack.c.bf16 %v999_v12, %v999_v12  ;;  %v17733_v62 = vld [vmem:[#allocation4 + $0x124] ss:$36 sps:$4 sm:$0xff]   ;;  %v16550_v2 = vpack.c.bf16 %v1006_v61, %v1006_v61  ;;  %v17736_v3 = vld [vmem:[#allocation4 + $0x12c] ss:$36 sps:$4 sm:$0xff]   ;;  %538 = vst [vmem:[#allocation4 + $0x2f4] sm:$0xf] %v16442_v57 }
  0x3f   : > { %4075 = vmatprep.subr.bf16.mxu1 %v21952_v1  ;;  %754 = vst [vmem:[#allocation4 + $0x2f8] sm:$0xf] %v16478_v63  ;;  %1185 = vst [vmem:[#allocation4 + $0x2dc] sm:$0xf] %v16549_v0  ;;  %v359_v6 = vld [vmem:[%s19019_s12 + $0xb0] sm:$0xff]  ;;  %v360_v7 = vld [vmem:[%s19019_s12 + $0xb8] sm:$0xff] }
  0x40   : > { %1179 = vst [vmem:[#allocation4 + $0x204] sm:$0xf] %v16543_v15  ;;  %965 = vst [vmem:[#allocation4 + $0x248] sm:$0xf] %v16543_v15  ;;  %v16443_v8 = vpack.c.bf16 %v359_v6, %v359_v6  ;;  %v16444_v9 = vpack.c.bf16 %v360_v7, %v360_v7  ;;  %v17763_v11 = vld [vmem:[%s21946_s1 + $0x100] sm:$0xff]   ;;  %v17780_v23 = vld [vmem:[%s21946_s1 + $0x170] sm:$0xff]  }
  0x41   : > { %3899 = vmatpush2.bf16.msra.mxu0 %v17699_v18  ;;  %v17722_v18 = vld [vmem:[#allocation4 + $0x9c] ss:$36 sps:$4 sm:$0xff]   ;;  %1186 = vst [vmem:[#allocation4 + $0x300] sm:$0xf] %v16550_v2  ;;  %971 = vst [vmem:[#allocation4 + $0x320] sm:$0xf] %v16549_v0 }
  0x42   : > { %4076 = vmatpush2.bf16.msra.mxu1 %v17700_v19  ;;  %3900 = vmatprep.subr.bf16.mxu0 %v21952_v1  ;;  %v17725_v19 = vld [vmem:[%s21946_s1 + $0x128] sm:$0xff]   ;;  %972 = vst [vmem:[#allocation4 + $0x344] sm:$0xf] %v16550_v2  ;;  %539 = vst [vmem:[#allocation4 + $0x318] sm:$0xf] %v16443_v8  ;;  %v576_v15 = vld [vmem:[%s19019_s12 + $0xb9] sm:$0xff] }
  0x43   : > { %4077 = vmatprep.subr.bf16.mxu1 %v21952_v1  ;;  %540 = vst [vmem:[#allocation4 + $0x33c] sm:$0xf] %v16444_v9  ;;  %v17735_v13 = vld [vmem:[#allocation4 + $0x120] ss:$36 sps:$4 sm:$0xff]   ;;  %v17740_v16 = vld [vmem:[#allocation4 + $0x16c] ss:$36 sps:$4 sm:$0xff]  }
  0x44   : > { %v17742_v26 = vld [vmem:[#allocation4 + $0x168] ss:$36 sps:$4 sm:$0xff]   ;;  %v17745_v28 = vld [vmem:[#allocation4 + $0x170] ss:$36 sps:$4 sm:$0xff]   ;;  %v1012_v59 = vld [vmem:[%s19019_s12 + $0xea] sm:$0xff] }
  0x45   : > { %3901 = vmatpush2.bf16.msra.mxu0 %v17701_v20  ;;  %v353_v20 = vld [vmem:[%s19019_s12 + $0x80] sm:$0xff]  ;;  %v1009_v39 = vld [vmem:[%s19019_s12 + $0xd2] sm:$0xff]  ;;  %v17807_v0 = vld [vmem:[%s21946_s1 + $0x188] sm:$0xff]  }
  0x46   : > { %4078 = vmatpush2.bf16.msra.mxu1 %v17702_v30  ;;  %3902 = vmatprep.subr.bf16.mxu0 %v21952_v1  ;;  %v16437_v21 = vpack.c.bf16 %v353_v20, %v353_v20  ;;  %v17724_v30 = vld [vmem:[#allocation4 + $0x98] ss:$36 sps:$4 sm:$0xff]   ;;  %v17784_v20 = vld [vmem:[%s21946_s1 + $0x1b0] sm:$0xff]   ;;  %v17793_v41 = vld [vmem:[%s21946_s1 + $0x1a0] sm:$0xff]   ;;  %v16553_v42 = vpack.c.bf16 %v1009_v39, %v1009_v39 }
  0x47   : > { %4079 = vmatprep.subr.bf16.mxu1 %v21952_v1  ;;  %v17747_v29 = vld [vmem:[#allocation4 + $0x1b4] ss:$36 sps:$4 sm:$0xff]   ;;  %v1010_v43 = vld [vmem:[%s19019_s12 + $0xda] sm:$0xff]  ;;  %v579_v53 = vld [vmem:[%s19019_s12 + $0xd1] sm:$0xff] }
  0x48   : > { %533 = vst [vmem:[#allocation4 + $0x240] sm:$0xf] %v16437_v21  ;;  %v1007_v21 = vld [vmem:[%s19019_s12 + $0xc2] sm:$0xff]  ;;  %1189 = vst [vmem:[#allocation4 + $0x36c] sm:$0xf] %v16553_v42  ;;  %v17798_v52 = vld [vmem:[%s21946_s1 + $0x198] sm:$0xff]   ;;  %v16483_v56 = vpack.c.bf16 %v579_v53, %v579_v53 }
  0x49   : > { %3903 = vmatpush2.bf16.msra.mxu0 %v17703_v36  ;;  %v16545_v36 = vpack.c.bf16 %v1001_v34, %v1001_v34  ;;  %v16551_v24 = vpack.c.bf16 %v1007_v21, %v1007_v21  ;;  %v577_v34 = vld [vmem:[%s19019_s12 + $0xc1] sm:$0xff]  ;;  %975 = vst [vmem:[#allocation4 + $0x3b0] sm:$0xf] %v16553_v42  ;;  %v580_v54 = vld [vmem:[%s19019_s12 + $0xd9] sm:$0xff]  ;;  %v17802_v63 = vld [vmem:[%s21946_s1 + $0x190] sm:$0xff]  }
  0x4a   : > { %4080 = vmatpush2.bf16.msra.mxu1 %v17706_v37  ;;  %4226 = vmatprep.subr.bf16.mxu0 %v21952_v1  ;;  %v16546_v37 = vpack.c.bf16 %v1002_v35, %v1002_v35  ;;  %v578_v35 = vld [vmem:[%s19019_s12 + $0xc9] sm:$0xff]  ;;  %v17799_v48 = vld [vmem:[%s21946_s1 + $0x160] sm:$0xff]   ;;  %v16484_v57 = vpack.c.bf16 %v580_v54, %v580_v54  ;;  %v17757_v60 = vld [vmem:[#allocation4 + $0x204] ss:$36 sps:$4 sm:$0xff]   ;;  %759 = vst [vmem:[#allocation4 + $0x3ac] sm:$0xf] %v16483_v56 }
  0x4b   : > { %4403 = vmatprep.subr.bf16.mxu1 %v21952_v1  ;;  %1181 = vst [vmem:[#allocation4 + $0x24c] sm:$0xf] %v16545_v36  ;;  %967 = vst [vmem:[#allocation4 + $0x290] sm:$0xf] %v16545_v36  ;;  %v17750_v36 = vld [vmem:[#allocation4 + $0x1bc] ss:$36 sps:$4 sm:$0xff]   ;;  %v16482_v38 = vpack.c.bf16 %v578_v35, %v578_v35 }
  0x4c   : > { %3905 = vmatmul.mubr.bf16.vlgmr.msra.gmra.mxu0 %v17707_v40  ;;  %v571_v40 = vld [vmem:[%s19019_s12 + $0x91] sm:$0xff]  ;;  %1182 = vst [vmem:[#allocation4 + $0x270] sm:$0xf] %v16546_v37  ;;  %968 = vst [vmem:[#allocation4 + $0x2b4] sm:$0xf] %v16546_v37  ;;  %v16481_v37 = vpack.c.bf16 %v577_v34, %v577_v34  ;;  %v1011_v58 = vld [vmem:[%s19019_s12 + $0xe2] sm:$0xff] }
  0x4d   : > { %4227 = vmatpush1.bf16.msra.mxu0 %v17710_v44  ;;  %4082 = vmatmul.mubr.bf16.vlgmr.msra.gmra.mxu1 %v17711_v45  ;;  %v16475_v44 = vpack.c.bf16 %v571_v40, %v571_v40  ;;  %v1003_v45 = vld [vmem:[%s19019_s12 + $0xa2] sm:$0xff]  ;;  %1187 = vst [vmem:[#allocation4 + $0x324] sm:$0xf] %v16551_v24  ;;  %973 = vst [vmem:[#allocation4 + $0x368] sm:$0xf] %v16551_v24  ;;  %v16555_v61 = vpack.c.bf16 %v1011_v58, %v1011_v58  ;;  %v17817_v21 = vld [vmem:[%s21946_s1 + $0x150] sm:$0xff]  }
  0x4e   : > { %3912 = vmatprep.mubr.bf16.mxu0 %v17712_v50  ;;  %4089 = vmatprep.mubr.bf16.mxu1 %v17715_v51  ;;  %v16547_v49 = vpack.c.bf16 %v1003_v45, %v1003_v45  ;;  %v16548_v50 = vpack.c.bf16 %v1004_v46, %v1004_v46  ;;  %v17728_v51 = vld [vmem:[#allocation4 + $0xd8] ss:$36 sps:$4 sm:$0xff]   ;;  %757 = vst [vmem:[#allocation4 + $0x364] sm:$0xf] %v16481_v37  ;;  %758 = vst [vmem:[#allocation4 + $0x388] sm:$0xf] %v16482_v38 }
  0x4f   : > { %4228 = vmatprep.subr.bf16.mxu0 %v21952_v1  ;;  %751 = vst [vmem:[#allocation4 + $0x28c] sm:$0xf] %v16475_v44  ;;  %4404 = vmatpush1.bf16.msra.mxu1 %v17781_v5  ;;  %v17789_v40 = vld [vmem:[%s21946_s1 + $0x168] sm:$0xff]   ;;  %v16554_v44 = vpack.c.bf16 %v1010_v43, %v1010_v43  ;;  %v363_v45 = vld [vmem:[%s19019_s12 + $0xd0] sm:$0xff]  ;;  %v364_v46 = vld [vmem:[%s19019_s12 + $0xd8] sm:$0xff] }
  0x50   : > { %1183 = vst [vmem:[#allocation4 + $0x294] sm:$0xf] %v16547_v49  ;;  %1184 = vst [vmem:[#allocation4 + $0x2b8] sm:$0xf] %v16548_v50  ;;  %4405 = vmatprep.subr.bf16.mxu1 %v21952_v1  ;;  %v17756_v2 = vld [vmem:[#allocation4 + $0x1f8] ss:$36 sps:$4 sm:$0xff]  }
  0x51   : > { %4229 = vmatpush1.bf16.msra.mxu0 %v17718_v4  ;;  %969 = vst [vmem:[#allocation4 + $0x2d8] sm:$0xf] %v16547_v49  ;;  %970 = vst [vmem:[#allocation4 + $0x2fc] sm:$0xf] %v16548_v50  ;;  %v17755_v4 = vld [vmem:[%s21946_s1 + $0x108] sm:$0xff]   ;;  %v16447_v49 = vpack.c.bf16 %v363_v45, %v363_v45  ;;  %v16448_v50 = vpack.c.bf16 %v364_v46, %v364_v46  ;;  %v368_v24 = vld [vmem:[%s19019_s12 + $0xf8] sm:$0xff] }
  0x52   : > { %4230 = vmatprep.subr.bf16.mxu0 %v21952_v1  ;;  %1190 = vst [vmem:[#allocation4 + $0x390] sm:$0xf] %v16554_v44  ;;  %976 = vst [vmem:[#allocation4 + $0x3d4] sm:$0xf] %v16554_v44  ;;  %v366_v5 = vld [vmem:[%s19019_s12 + $0xe8] sm:$0xff]  ;;  %v17820_v38 = vld [vmem:[%s21946_s1 + $0x1f0] sm:$0xff]  }
  0x53   : > { %4406 = vmatpush1.bf16.msra.mxu1 %v17784_v20  ;;  %543 = vst [vmem:[#allocation4 + $0x3a8] sm:$0xf] %v16447_v49  ;;  %544 = vst [vmem:[#allocation4 + $0x3cc] sm:$0xf] %v16448_v50  ;;  %v16450_v7 = vpack.c.bf16 %v366_v5, %v366_v5  ;;  %v581_v8 = vld [vmem:[%s19019_s12 + $0xe1] sm:$0xff]  ;;  %v582_v9 = vld [vmem:[%s19019_s12 + $0xe9] sm:$0xff] }
  0x54   : > { %3913 = vmatmul.mubr.bf16.gmra.mxu0 %v17714_v10  ;;  %v575_v10 = vld [vmem:[%s19019_s12 + $0xb1] sm:$0xff]  ;;  %4407 = vmatprep.subr.bf16.mxu1 %v21952_v1  ;;  %760 = vst [vmem:[#allocation4 + $0x3d0] sm:$0xf] %v16484_v57  ;;  %1191 = vst [vmem:[#allocation4 + $0x3b4] sm:$0xf] %v16555_v61  ;;  %v369_v39 = vld [vmem:[%s19019_s12 + $0x100] sm:$0xff] }
  0x55   : > { %4090 = vmatmul.mubr.bf16.gmra.mxu1 %v17717_v14  ;;  %3920 = vmatprep.mubr.bf16.mxu0 %v17719_v17  ;;  %v16479_v12 = vpack.c.bf16 %v575_v10, %v575_v10  ;;  %v17738_v14 = vld [vmem:[#allocation4 + $0x128] ss:$36 sps:$4 sm:$0xff]   ;;  %v17743_v17 = vld [vmem:[#allocation4 + $0x174] ss:$36 sps:$4 sm:$0xff]   ;;  %977 = vst [vmem:[#allocation4 + $0x3f8] sm:$0xf] %v16555_v61 }
  0x56   : > { %4097 = vmatprep.mubr.bf16.mxu1 %v17722_v18  ;;  %4231 = vmatpush1.bf16.msra.mxu0 %v17725_v19  ;;  %v16480_v18 = vpack.c.bf16 %v576_v15, %v576_v15  ;;  %v17772_v19 = vld [vmem:[%s21946_s1 + $0x178] sm:$0xff]   ;;  %v17759_v10 = vld [vmem:[#allocation4 + $0x200] ss:$36 sps:$4 sm:$0xff]   ;;  %546 = vst [vmem:[#allocation4 + $0x414] sm:$0xf] %v16450_v7  ;;  %v585_v42 = vld [vmem:[%s19019_s12 + $0x101] sm:$0xff] }
  0x57   : > { %4232 = vmatprep.subr.bf16.mxu0 %v21952_v1  ;;  %755 = vst [vmem:[#allocation4 + $0x31c] sm:$0xf] %v16479_v12  ;;  %v16486_v12 = vpack.c.bf16 %v582_v9, %v582_v9  ;;  %v17816_v20 = vld [vmem:[%s21946_s1 + $0x1f8] sm:$0xff]   ;;  %v17770_v37 = vld [vmem:[#allocation4 + $0x294] ss:$36 sps:$4 sm:$0xff]   ;;  %v16489_v46 = vpack.c.bf16 %v585_v42, %v585_v42  ;;  %v371_v58 = vld [vmem:[%s19019_s12 + $0x110] sm:$0xff] }
  0x58   : > { %756 = vst [vmem:[#allocation4 + $0x340] sm:$0xf] %v16480_v18  ;;  %v17811_v18 = vld [vmem:[%s21946_s1 + $0x180] sm:$0xff]   ;;  %v586_v43 = vld [vmem:[%s19019_s12 + $0x109] sm:$0xff]  ;;  %v17769_v44 = vld [vmem:[#allocation4 + $0x288] ss:$36 sps:$4 sm:$0xff]  }
  0x59   : > { %762 = vst [vmem:[#allocation4 + $0x418] sm:$0xf] %v16486_v12  ;;  %v17767_v34 = vld [vmem:[#allocation4 + $0x28c] ss:$36 sps:$4 sm:$0xff]   ;;  %v17825_v49 = vld [vmem:[%s21946_s1 + $0x1e8] sm:$0xff]   ;;  %v1017_v50 = vld [vmem:[%s19019_s12 + $0x112] sm:$0xff] }
  0x5a   : > { %4233 = vmatpush1.bf16.msra.mxu0 %v17732_v22  ;;  %v1008_v22 = vld [vmem:[%s19019_s12 + $0xca] sm:$0xff]  ;;  %765 = vst [vmem:[#allocation4 + $0x484] sm:$0xf] %v16489_v46  ;;  %v16561_v54 = vpack.c.bf16 %v1017_v50, %v1017_v50  ;;  %v17829_v57 = vld [vmem:[%s21946_s1 + $0x1e0] sm:$0xff]   ;;  %v17834_v5 = vld [vmem:[%s21946_s1 + $0x1d8] sm:$0xff]  }
  0x5b   : > { %4234 = vmatprep.subr.bf16.mxu0 %v21952_v1  ;;  %v16552_v25 = vpack.c.bf16 %v1008_v22, %v1008_v22  ;;  %v17762_v22 = vld [vmem:[#allocation4 + $0x240] ss:$36 sps:$4 sm:$0xff]   ;;  %v17774_v53 = vld [vmem:[#allocation4 + $0x2d4] ss:$36 sps:$4 sm:$0xff]  }
  0x5c   : > { %3921 = vmatmul.mubr.bf16.gmra.mxu0 %v17721_v27  ;;  %v17790_v27 = vld [vmem:[%s21946_s1 + $0x1a8] sm:$0xff]   ;;  %1197 = vst [vmem:[#allocation4 + $0x48c] sm:$0xf] %v16561_v54  ;;  %983 = vst [vmem:[#allocation4 + $0x4d0] sm:$0xf] %v16561_v54  ;;  %v17839_v7 = vld [vmem:[%s21946_s1 + $0x140] sm:$0xff]  }
  0x5d   : > { %4098 = vmatmul.mubr.bf16.gmra.mxu1 %v17724_v30  ;;  %3928 = vmatprep.mubr.bf16.mxu0 %v17726_v31  ;;  %1188 = vst [vmem:[#allocation4 + $0x348] sm:$0xf] %v16552_v25  ;;  %v361_v30 = vld [vmem:[%s19019_s12 + $0xc0] sm:$0xff]  ;;  %v362_v31 = vld [vmem:[%s19019_s12 + $0xc8] sm:$0xff]  ;;  %974 = vst [vmem:[#allocation4 + $0x38c] sm:$0xf] %v16552_v25 }
  0x5e   : > { %4105 = vmatprep.mubr.bf16.mxu1 %v17729_v33  ;;  %4235 = vmatpush1.bf16.msra.mxu0 %v17739_v32  ;;  %v16445_v32 = vpack.c.bf16 %v361_v30, %v361_v30  ;;  %v16446_v33 = vpack.c.bf16 %v362_v31, %v362_v31  ;;  %v583_v25 = vld [vmem:[%s19019_s12 + $0xf1] sm:$0xff]  ;;  %v1852_v46 = vld [vmem:[%s19019_s12 + $0x3d] sm:$0xff] }
  0x5f   : > { %4236 = vmatprep.subr.bf16.mxu0 %v21952_v1  ;;  %4408 = vmatpush1.bf16.msra.mxu1 %v17790_v27  ;;  %v16452_v27 = vpack.c.bf16 %v368_v24, %v368_v24  ;;  %v17766_v30 = vld [vmem:[#allocation4 + $0x248] ss:$36 sps:$4 sm:$0xff]   ;;  %v17777_v56 = vld [vmem:[#allocation4 + $0x2dc] ss:$36 sps:$4 sm:$0xff]   ;;  %v1637_v54 = vld [vmem:[%s19019_s12 + $0x44] sm:$0xff] }
  0x60   : > { %541 = vst [vmem:[#allocation4 + $0x360] sm:$0xf] %v16445_v32  ;;  %542 = vst [vmem:[#allocation4 + $0x384] sm:$0xf] %v16446_v33  ;;  %4409 = vmatprep.subr.bf16.mxu1 %v21952_v1  ;;  %v1015_v32 = vld [vmem:[%s19019_s12 + $0x102] sm:$0xff]  ;;  %v1016_v33 = vld [vmem:[%s19019_s12 + $0x10a] sm:$0xff] }
  0x61   : > { %548 = vst [vmem:[#allocation4 + $0x45c] sm:$0xf] %v16452_v27  ;;  %v16559_v35 = vpack.c.bf16 %v1015_v32, %v1015_v32  ;;  %v1020_v9 = vld [vmem:[%s19019_s12 + $0x12a] sm:$0xff]  ;;  %v17791_v24 = vld [vmem:[#allocation4 + $0x364] ss:$36 sps:$4 sm:$0xff]  }
  0x62   : > { %4237 = vmatpush1.bf16.msra.mxu0 %v17746_v47  ;;  %v17749_v47 = vld [vmem:[#allocation4 + $0x1b0] ss:$36 sps:$4 sm:$0xff]   ;;  %v16564_v12 = vpack.c.bf16 %v1020_v9, %v1020_v9  ;;  %v19326_v27 = vld [vmem:[%s21946_s1 + $0x238] sm:$0xff]   ;;  %v1850_v32 = vld [vmem:[%s19019_s12 + $0x2d] sm:$0xff] }
  0x63   : > { %4238 = vmatprep.subr.bf16.mxu0 %v21952_v1  ;;  %4410 = vmatpush1.bf16.msra.mxu1 %v17793_v41  ;;  %1195 = vst [vmem:[#allocation4 + $0x444] sm:$0xf] %v16559_v35  ;;  %981 = vst [vmem:[#allocation4 + $0x488] sm:$0xf] %v16559_v35  ;;  %v370_v41 = vld [vmem:[%s19019_s12 + $0x108] sm:$0xff]  ;;  %v16674_v35 = vpack.c.bf16 %v1850_v32, %v1850_v32 }
  0x64   : > { %3929 = vmatmul.mubr.bf16.gmra.mxu0 %v17728_v51  ;;  %v17752_v51 = vld [vmem:[#allocation4 + $0x1b8] ss:$36 sps:$4 sm:$0xff]   ;;  %4411 = vmatprep.subr.bf16.mxu1 %v21952_v1  ;;  %v16454_v45 = vpack.c.bf16 %v370_v41, %v370_v41  ;;  %1200 = vst [vmem:[#allocation4 + $0x4f8] sm:$0xf] %v16564_v12 }
  0x65   : > { %4106 = vmatmul.mubr.bf16.gmra.mxu1 %v17731_v55  ;;  %3936 = vmatprep.mubr.bf16.mxu0 %v17733_v62  ;;  %v17753_v55 = vld [vmem:[#allocation4 + $0x1fc] ss:$36 sps:$4 sm:$0xff]   ;;  %v16556_v62 = vpack.c.bf16 %v1012_v59, %v1012_v59  ;;  %v372_v59 = vld [vmem:[%s19019_s12 + $0x118] sm:$0xff]  ;;  %2030 = vst [vmem:[#allocation4 + $0x40] sm:$0xf] %v16674_v35  ;;  %v1211_v32 = vld [vmem:[%s19019_s12 + $0x63] sm:$0xff] }
  0x66   : > { %4113 = vmatprep.mubr.bf16.mxu1 %v17736_v3  ;;  %4239 = vmatpush1.bf16.msra.mxu0 %v17755_v4  ;;  %v17808_v3 = vld [vmem:[%s21946_s1 + $0x158] sm:$0xff]   ;;  %v365_v4 = vld [vmem:[%s19019_s12 + $0xe0] sm:$0xff]  ;;  %550 = vst [vmem:[#allocation4 + $0x4a4] sm:$0xf] %v16454_v45  ;;  %v16456_v61 = vpack.c.bf16 %v372_v59, %v372_v59  ;;  %v16575_v35 = vpack.c.bf16 %v1211_v32, %v1211_v32 }
  0x67   : > { %4240 = vmatprep.subr.bf16.mxu0 %v21952_v1  ;;  %4412 = vmatpush1.bf16.msra.mxu1 %v17798_v52  ;;  %1192 = vst [vmem:[#allocation4 + $0x3d8] sm:$0xf] %v16556_v62  ;;  %978 = vst [vmem:[#allocation4 + $0x41c] sm:$0xf] %v16556_v62  ;;  %v16449_v6 = vpack.c.bf16 %v365_v4, %v365_v4  ;;  %v17773_v52 = vld [vmem:[#allocation4 + $0x290] ss:$36 sps:$4 sm:$0xff]  }
  0x68   : > { %4413 = vmatprep.subr.bf16.mxu1 %v21952_v1  ;;  %v587_v62 = vld [vmem:[%s19019_s12 + $0x111] sm:$0xff]  ;;  %v17779_v4 = vld [vmem:[#allocation4 + $0x2d8] ss:$36 sps:$4 sm:$0xff]   ;;  %552 = vst [vmem:[#allocation4 + $0x4ec] sm:$0xf] %v16456_v61 }
  0x69   : > { %545 = vst [vmem:[#allocation4 + $0x3f0] sm:$0xf] %v16449_v6  ;;  %v17782_v6 = vld [vmem:[#allocation4 + $0x31c] ss:$36 sps:$4 sm:$0xff]   ;;  %1391 = vst [vmem:[#allocation4 + $0x178] sm:$0xf] %v16575_v35 }
  0x6a   : > { %4241 = vmatpush1.bf16.msra.mxu0 %v17763_v11  ;;  %v16485_v11 = vpack.c.bf16 %v581_v8, %v581_v8  ;;  %v1019_v8 = vld [vmem:[%s19019_s12 + $0x122] sm:$0xff]  ;;  %v17794_v50 = vld [vmem:[#allocation4 + $0x360] ss:$36 sps:$4 sm:$0xff]  }
  0x6b   : > { %4242 = vmatprep.subr.bf16.mxu0 %v21952_v1  ;;  %4414 = vmatpush1.bf16.msra.mxu1 %v17802_v63  ;;  %v588_v63 = vld [vmem:[%s19019_s12 + $0x119] sm:$0xff]  ;;  %v1854_v61 = vld [vmem:[%s19019_s12 + $0x4d] sm:$0xff] }
  0x6c   : > { %3937 = vmatmul.mubr.bf16.gmra.mxu0 %v17735_v13  ;;  %4415 = vmatprep.subr.bf16.mxu1 %v21952_v1  ;;  %v1013_v13 = vld [vmem:[%s19019_s12 + $0xf2] sm:$0xff]  ;;  %761 = vst [vmem:[#allocation4 + $0x3f4] sm:$0xf] %v16485_v11  ;;  %v16563_v11 = vpack.c.bf16 %v1019_v8, %v1019_v8 }
  0x6d   : > { %4114 = vmatmul.mubr.bf16.gmra.mxu1 %v17738_v14  ;;  %3944 = vmatprep.mubr.bf16.mxu0 %v17740_v16  ;;  %v17760_v14 = vld [vmem:[#allocation4 + $0x244] ss:$36 sps:$4 sm:$0xff]   ;;  %v16557_v15 = vpack.c.bf16 %v1013_v13, %v1013_v13  ;;  %v17764_v16 = vld [vmem:[#allocation4 + $0x24c] ss:$36 sps:$4 sm:$0xff]  }
  0x6e   : > { %4121 = vmatprep.mubr.bf16.mxu1 %v17743_v17  ;;  %4243 = vmatpush2.bf16.msra.mxu0 %v17772_v19  ;;  %v1014_v17 = vld [vmem:[%s19019_s12 + $0xfa] sm:$0xff]  ;;  %v17837_v13 = vld [vmem:[%s21946_s1 + $0x1d0] sm:$0xff]   ;;  %1199 = vst [vmem:[#allocation4 + $0x4d4] sm:$0xf] %v16563_v11 }
  0x6f   : > { %4244 = vmatprep.subr.bf16.mxu0 %v21952_v1  ;;  %4416 = vmatpush1.bf16.msra.mxu1 %v17807_v0  ;;  %v16558_v19 = vpack.c.bf16 %v1014_v17, %v1014_v17  ;;  %1193 = vst [vmem:[#allocation4 + $0x3fc] sm:$0xf] %v16557_v15  ;;  %979 = vst [vmem:[#allocation4 + $0x440] sm:$0xf] %v16557_v15  ;;  %v17776_v0 = vld [vmem:[#allocation4 + $0x2d0] ss:$36 sps:$4 sm:$0xff]  }
  0x70   : > { %4417 = vmatprep.subr.bf16.mxu1 %v21952_v1  ;;  %v1202_v15 = vld [vmem:[%s19019_s12 + $0x1b] sm:$0xff] }
  0x71   : > { %1194 = vst [vmem:[#allocation4 + $0x420] sm:$0xf] %v16558_v19  ;;  %980 = vst [vmem:[#allocation4 + $0x464] sm:$0xf] %v16558_v19  ;;  %v1418_v19 = vld [vmem:[%s19019_s12 + $0x1c] sm:$0xff] }
  0x72   : > { %4245 = vmatpush2.bf16.msra.mxu0 %v17780_v23  ;;  %v367_v23 = vld [vmem:[%s19019_s12 + $0xf0] sm:$0xff]  ;;  %v1856_v11 = vld [vmem:[%s19019_s12 + $0x5d] sm:$0xff] }
  0x73   : > { %4246 = vmatprep.subr.bf16.mxu0 %v21952_v1  ;;  %4418 = vmatpush1.bf16.msra.mxu1 %v17811_v18  ;;  %v16566_v18 = vpack.c.bf16 %v1202_v15, %v1202_v15  ;;  %v16680_v15 = vpack.c.bf16 %v1856_v11, %v1856_v11  ;;  %v1217_v11 = vld [vmem:[%s19019_s12 + $0x93] sm:$0xff] }
  0x74   : > { %3945 = vmatmul.mubr.bf16.gmra.mxu0 %v17742_v26  ;;  %v16451_v26 = vpack.c.bf16 %v367_v23, %v367_v23  ;;  %4419 = vmatprep.subr.bf16.mxu1 %v21952_v1  ;;  %v17788_v23 = vld [vmem:[#allocation4 + $0x320] ss:$36 sps:$4 sm:$0xff]  }
  0x75   : > { %4122 = vmatmul.mubr.bf16.gmra.mxu1 %v17745_v28  ;;  %3952 = vmatprep.mubr.bf16.mxu0 %v17747_v29  ;;  %v584_v28 = vld [vmem:[%s19019_s12 + $0xf9] sm:$0xff]  ;;  %v16487_v29 = vpack.c.bf16 %v583_v25, %v583_v25  ;;  %v17843_v25 = vld [vmem:[%s21946_s1 + $0x1c8] sm:$0xff]   ;;  %1382 = vst [vmem:[#allocation4 + $0x34] sm:$0xf] %v16566_v18  ;;  %2036 = vst [vmem:[#allocation4 + $0x118] sm:$0xf] %v16680_v15 }
  0x76   : > { %4129 = vmatprep.mubr.bf16.mxu1 %v17750_v36  ;;  %4247 = vmatpush2.bf16.msra.mxu0 %v17789_v40  ;;  %v16488_v31 = vpack.c.bf16 %v584_v28, %v584_v28  ;;  %547 = vst [vmem:[#allocation4 + $0x438] sm:$0xf] %v16451_v26  ;;  %v16560_v36 = vpack.c.bf16 %v1016_v33, %v1016_v33  ;;  %v17795_v26 = vld [vmem:[#allocation4 + $0x36c] ss:$36 sps:$4 sm:$0xff]   ;;  %v1633_v28 = vld [vmem:[%s19019_s12 + $0x24] sm:$0xff] }
  0x77   : > { %4248 = vmatprep.subr.bf16.mxu0 %v21952_v1  ;;  %763 = vst [vmem:[#allocation4 + $0x43c] sm:$0xf] %v16487_v29  ;;  %4420 = vmatpush2.bf16.msra.mxu1 %v17816_v20  ;;  %v16453_v40 = vpack.c.bf16 %v369_v39, %v369_v39  ;;  %v1634_v29 = vld [vmem:[%s19019_s12 + $0x2c] sm:$0xff]  ;;  %v17846_v39 = vld [vmem:[%s21946_s1 + $0x1c0] sm:$0xff]  }
  0x78   : > { %764 = vst [vmem:[#allocation4 + $0x460] sm:$0xf] %v16488_v31  ;;  %1196 = vst [vmem:[#allocation4 + $0x468] sm:$0xf] %v16560_v36  ;;  %4421 = vmatprep.subr.bf16.mxu1 %v21952_v1  ;;  %v1849_v31 = vld [vmem:[%s19019_s12 + $0x25] sm:$0xff]  ;;  %v16638_v33 = vpack.c.bf16 %v1634_v29, %v1634_v29  ;;  %v1218_v15 = vld [vmem:[%s19019_s12 + $0x9b] sm:$0xff] }
  0x79   : > { %982 = vst [vmem:[#allocation4 + $0x4ac] sm:$0xf] %v16560_v36  ;;  %549 = vst [vmem:[#allocation4 + $0x480] sm:$0xf] %v16453_v40  ;;  %v1203_v36 = vld [vmem:[%s19019_s12 + $0x23] sm:$0xff] }
  0x7a   : > { %4249 = vmatpush2.bf16.msra.mxu0 %v17799_v48  ;;  %v17828_v48 = vld [vmem:[%s21946_s1 + $0x148] sm:$0xff]   ;;  %v16567_v40 = vpack.c.bf16 %v1203_v36, %v1203_v36  ;;  %1814 = vst [vmem:[#allocation4 + $0x3c] sm:$0xf] %v16638_v33  ;;  %1600 = vst [vmem:[#allocation4 + $0x80] sm:$0xf] %v16638_v33  ;;  %v1643_v36 = vld [vmem:[%s19019_s12 + $0x74] sm:$0xff] }
  0x7b   : > { %4250 = vmatprep.subr.bf16.mxu0 %v21952_v1  ;;  %4422 = vmatpush2.bf16.msra.mxu1 %v17820_v38  ;;  %v1635_v38 = vld [vmem:[%s19019_s12 + $0x34] sm:$0xff]  ;;  %v17809_v18 = vld [vmem:[#allocation4 + $0x3f4] ss:$36 sps:$4 sm:$0xff]  }
  0x7c   : > { %3953 = vmatmul.mubr.bf16.gmra.mxu0 %v17749_v47  ;;  %v16490_v47 = vpack.c.bf16 %v586_v43, %v586_v43  ;;  %4423 = vmatprep.subr.bf16.mxu1 %v21952_v1  ;;  %v16639_v42 = vpack.c.bf16 %v1635_v38, %v1635_v38  ;;  %v1636_v43 = vld [vmem:[%s19019_s12 + $0x3c] sm:$0xff]  ;;  %1383 = vst [vmem:[#allocation4 + $0x58] sm:$0xf] %v16567_v40  ;;  %v17815_v33 = vld [vmem:[#allocation4 + $0x3f8] ss:$36 sps:$4 sm:$0xff]  }
  0x7d   : > { %4130 = vmatmul.mubr.bf16.gmra.mxu1 %v17752_v51  ;;  %3960 = vmatprep.mubr.bf16.mxu0 %v17753_v55  ;;  %v1018_v51 = vld [vmem:[%s19019_s12 + $0x11a] sm:$0xff]  ;;  %v16640_v45 = vpack.c.bf16 %v1636_v43, %v1636_v43  ;;  %v16647_v40 = vpack.c.bf16 %v1643_v36, %v1643_v36 }
  0x7e   : > { %4137 = vmatprep.mubr.bf16.mxu1 %v17757_v60  ;;  %4251 = vmatpush2.bf16.msra.mxu0 %v17808_v3  ;;  %766 = vst [vmem:[#allocation4 + $0x4a8] sm:$0xf] %v16490_v47  ;;  %v16562_v55 = vpack.c.bf16 %v1018_v51, %v1018_v51  ;;  %v16455_v60 = vpack.c.bf16 %v371_v58, %v371_v58  ;;  %1815 = vst [vmem:[#allocation4 + $0x60] sm:$0xf] %v16639_v42  ;;  %v17812_v29 = vld [vmem:[#allocation4 + $0x3f0] ss:$36 sps:$4 sm:$0xff]  }
  0x7f   : > { %4252 = vmatprep.subr.bf16.mxu0 %v21952_v1  ;;  %4424 = vmatpush2.bf16.msra.mxu1 %v17825_v49  ;;  %v16492_v3 = vpack.c.bf16 %v588_v63, %v588_v63  ;;  %v1206_v49 = vld [vmem:[%s19019_s12 + $0x3b] sm:$0xff]  ;;  %1601 = vst [vmem:[#allocation4 + $0xa4] sm:$0xf] %v16639_v42  ;;  %v16676_v51 = vpack.c.bf16 %v1852_v46, %v1852_v46  ;;  %1816 = vst [vmem:[#allocation4 + $0x84] sm:$0xf] %v16640_v45  ;;  %v1213_v46 = vld [vmem:[%s19019_s12 + $0x73] sm:$0xff] }
  0x80   : > { %1198 = vst [vmem:[#allocation4 + $0x4b0] sm:$0xf] %v16562_v55  ;;  %984 = vst [vmem:[#allocation4 + $0x4f4] sm:$0xf] %v16562_v55  ;;  %4425 = vmatprep.subr.bf16.mxu1 %v21952_v1  ;;  %v1638_v55 = vld [vmem:[%s19019_s12 + $0x4c] sm:$0xff]  ;;  %v16641_v58 = vpack.c.bf16 %v1637_v54, %v1637_v54  ;;  %v1859_v42 = vld [vmem:[%s19019_s12 + $0x75] sm:$0xff] }
  0x81   : > { %551 = vst [vmem:[#allocation4 + $0x4c8] sm:$0xf] %v16455_v60  ;;  %768 = vst [vmem:[#allocation4 + $0x4f0] sm:$0xf] %v16492_v3  ;;  %v16642_v59 = vpack.c.bf16 %v1638_v55, %v1638_v55  ;;  %v1853_v60 = vld [vmem:[%s19019_s12 + $0x45] sm:$0xff]  ;;  %v1652_v36 = vld [vmem:[%s19019_s12 + $0xbc] sm:$0xff] }
  0x82   : > { %4253 = vmatpush2.bf16.msra.mxu0 %v17817_v21  ;;  %v17785_v21 = vld [vmem:[#allocation4 + $0x318] ss:$36 sps:$4 sm:$0xff]   ;;  %1602 = vst [vmem:[#allocation4 + $0xc8] sm:$0xf] %v16640_v45  ;;  %2032 = vst [vmem:[#allocation4 + $0x88] sm:$0xf] %v16676_v51  ;;  %v16677_v63 = vpack.c.bf16 %v1853_v60, %v1853_v60  ;;  %v16683_v45 = vpack.c.bf16 %v1859_v42, %v1859_v42 }
  0x83   : > { %4254 = vmatprep.subr.bf16.mxu0 %v21952_v1  ;;  %4426 = vmatpush2.bf16.msra.mxu1 %v17829_v57  ;;  %v17800_v57 = vld [vmem:[#allocation4 + $0x3ac] ss:$36 sps:$4 sm:$0xff]   ;;  %1817 = vst [vmem:[#allocation4 + $0xa8] sm:$0xf] %v16641_v58  ;;  %1818 = vst [vmem:[#allocation4 + $0xcc] sm:$0xf] %v16642_v59 }
  0x84   : > { %3961 = vmatmul.mubr.bf16.gmra.mxu0 %v17756_v2  ;;  %v16491_v2 = vpack.c.bf16 %v587_v62, %v587_v62  ;;  %4427 = vmatprep.subr.bf16.mxu1 %v21952_v1  ;;  %v17804_v62 = vld [vmem:[#allocation4 + $0x3b4] ss:$36 sps:$4 sm:$0xff]   ;;  %1603 = vst [vmem:[#allocation4 + $0xec] sm:$0xf] %v16641_v58  ;;  %1604 = vst [vmem:[#allocation4 + $0x110] sm:$0xf] %v16642_v59 }
  0x85   : > { %4138 = vmatmul.mubr.bf16.gmra.mxu1 %v17759_v10  ;;  %3968 = vmatprep.mubr.bf16.mxu0 %v17760_v14  ;;  %v17786_v10 = vld [vmem:[#allocation4 + $0x324] ss:$36 sps:$4 sm:$0xff]   ;;  %v1208_v3 = vld [vmem:[%s19019_s12 + $0x4b] sm:$0xff]  ;;  %2033 = vst [vmem:[#allocation4 + $0xac] sm:$0xf] %v16677_v63  ;;  %v1215_v59 = vld [vmem:[%s19019_s12 + $0x83] sm:$0xff] }
  0x86   : > { %4145 = vmatprep.mubr.bf16.mxu1 %v17764_v16  ;;  %4255 = vmatpush2.bf16.msra.mxu0 %v17828_v48  ;;  %767 = vst [vmem:[#allocation4 + $0x4cc] sm:$0xf] %v16491_v2  ;;  %v1201_v14 = vld [vmem:[%s19019_s12 + $0x13] sm:$0xff]  ;;  %v1207_v2 = vld [vmem:[%s19019_s12 + $0x43] sm:$0xff]  ;;  %1823 = vst [vmem:[#allocation4 + $0x180] sm:$0xf] %v16647_v40 }
  0x87   : > { %4256 = vmatprep.subr.bf16.mxu0 %v21952_v1  ;;  %4428 = vmatpush2.bf16.msra.mxu1 %v17834_v5  ;;  %v1417_v16 = vld [vmem:[%s19019_s12 + $0x14] sm:$0xff]  ;;  %v16565_v17 = vpack.c.bf16 %v1201_v14, %v1201_v14  ;;  %1609 = vst [vmem:[#allocation4 + $0x1c4] sm:$0xf] %v16647_v40  ;;  %2039 = vst [vmem:[#allocation4 + $0x184] sm:$0xf] %v16683_v45  ;;  %v1645_v51 = vld [vmem:[%s19019_s12 + $0x84] sm:$0xff] }
  0x88   : > { %4429 = vmatprep.subr.bf16.mxu1 %v21952_v1  ;;  %v16601_v20 = vpack.c.bf16 %v1417_v16, %v1417_v16  ;;  %v1205_v48 = vld [vmem:[%s19019_s12 + $0x33] sm:$0xff]  ;;  %v1861_v55 = vld [vmem:[%s19019_s12 + $0x85] sm:$0xff]  ;;  %v1868_v40 = vld [vmem:[%s19019_s12 + $0xbd] sm:$0xff] }
  0x89   : > { %1381 = vst [vmem:[#allocation4 + $0x10] sm:$0xf] %v16565_v17  ;;  %v1639_v5 = vld [vmem:[%s19019_s12 + $0x54] sm:$0xff]  ;;  %v17806_v17 = vld [vmem:[#allocation4 + $0x3b0] ss:$36 sps:$4 sm:$0xff]   ;;  %v1216_v63 = vld [vmem:[%s19019_s12 + $0x8b] sm:$0xff] }
  0x8a   : > { %4257 = vmatpush2.bf16.msra.mxu0 %v17839_v7  ;;  %1597 = vst [vmem:[#allocation4 + $0x14] sm:$0xf] %v16601_v20  ;;  %v16572_v7 = vpack.c.bf16 %v1208_v3, %v1208_v3  ;;  %v16643_v8 = vpack.c.bf16 %v1639_v5, %v1639_v5  ;;  %v17803_v14 = vld [vmem:[#allocation4 + $0x3a8] ss:$36 sps:$4 sm:$0xff]   ;;  %v1641_v20 = vld [vmem:[%s19019_s12 + $0x64] sm:$0xff]  ;;  %v16580_v3 = vpack.c.bf16 %v1216_v63, %v1216_v63 }
  0x8b   : > { %4430 = vmatpush2.bf16.msra.mxu1 %v17837_v13  ;;  %17471 = vmatprep.subr.bf16.mxu0 %v19326_v27  ;;  %v1209_v13 = vld [vmem:[%s19019_s12 + $0x53] sm:$0xff]  ;;  %v17821_v60 = vld [vmem:[#allocation4 + $0x438] ss:$36 sps:$4 sm:$0xff]   ;;  %v1648_v5 = vld [vmem:[%s19019_s12 + $0x9c] sm:$0xff] }
  0x8c   : > { %3969 = vmatmul.mubr.bf16.gmra.mxu0 %v17762_v22  ;;  %v16602_v22 = vpack.c.bf16 %v1418_v19, %v1418_v19  ;;  %4431 = vmatprep.subr.bf16.mxu1 %v21952_v1  ;;  %1388 = vst [vmem:[#allocation4 + $0x10c] sm:$0xf] %v16572_v7  ;;  %1819 = vst [vmem:[#allocation4 + $0xf0] sm:$0xf] %v16643_v8  ;;  %v16573_v16 = vpack.c.bf16 %v1209_v13, %v1209_v13  ;;  %v1210_v19 = vld [vmem:[%s19019_s12 + $0x5b] sm:$0xff]  ;;  %v1221_v42 = vld [vmem:[%s19019_s12 + $0xb3] sm:$0xff] }
  0x8d   : > { %4146 = vmatmul.mubr.bf16.gmra.mxu1 %v17766_v30  ;;  %3976 = vmatprep.mubr.bf16.mxu0 %v17767_v34  ;;  %v16637_v30 = vpack.c.bf16 %v1633_v28, %v1633_v28  ;;  %v16673_v34 = vpack.c.bf16 %v1849_v31, %v1849_v31  ;;  %1605 = vst [vmem:[#allocation4 + $0x134] sm:$0xf] %v16643_v8  ;;  %v1858_v28 = vld [vmem:[%s19019_s12 + $0x6d] sm:$0xff]  ;;  %1396 = vst [vmem:[#allocation4 + $0x22c] sm:$0xf] %v16580_v3  ;;  %v1656_v63 = vld [vmem:[%s19019_s12 + $0xdc] sm:$0xff] }
  0x8e   : > { %4153 = vmatprep.mubr.bf16.mxu1 %v17770_v37  ;;  %1598 = vst [vmem:[#allocation4 + $0x38] sm:$0xf] %v16602_v22  ;;  %v1204_v37 = vld [vmem:[%s19019_s12 + $0x2b] sm:$0xff]  ;;  %1389 = vst [vmem:[#allocation4 + $0x130] sm:$0xf] %v16573_v16  ;;  %v16574_v22 = vpack.c.bf16 %v1210_v19, %v1210_v19  ;;  %v16682_v31 = vpack.c.bf16 %v1858_v28, %v1858_v28  ;;  %v16652_v8 = vpack.c.bf16 %v1648_v5, %v1648_v5 }
  0x8f   : > { %4432 = vmatpush2.bf16.msra.mxu1 %v17843_v25  ;;  %1813 = vst [vmem:[#allocation4 + $0x18] sm:$0xf] %v16637_v30  ;;  %v16568_v41 = vpack.c.bf16 %v1204_v37, %v1204_v37  ;;  %1599 = vst [vmem:[#allocation4 + $0x5c] sm:$0xf] %v16637_v30  ;;  %v17818_v37 = vld [vmem:[#allocation4 + $0x43c] ss:$36 sps:$4 sm:$0xff]   ;;  %v16581_v13 = vpack.c.bf16 %v1217_v11, %v1217_v11 }
  0x90   : > { %4433 = vmatprep.subr.bf16.mxu1 %v21952_v1  ;;  %2029 = vst [vmem:[#allocation4 + $0x1c] sm:$0xf] %v16673_v34  ;;  %1390 = vst [vmem:[#allocation4 + $0x154] sm:$0xf] %v16574_v22  ;;  %v1212_v34 = vld [vmem:[%s19019_s12 + $0x6b] sm:$0xff] }
  0x91   : > { %1384 = vst [vmem:[#allocation4 + $0x7c] sm:$0xf] %v16568_v41  ;;  %v17822_v38 = vld [vmem:[#allocation4 + $0x444] ss:$36 sps:$4 sm:$0xff]   ;;  %2038 = vst [vmem:[#allocation4 + $0x160] sm:$0xf] %v16682_v31 }
  0x92   : > { %v1644_v41 = vld [vmem:[%s19019_s12 + $0x7c] sm:$0xff]  ;;  %1828 = vst [vmem:[#allocation4 + $0x234] sm:$0xf] %v16652_v8  ;;  %1614 = vst [vmem:[#allocation4 + $0x278] sm:$0xf] %v16652_v8  ;;  %v1649_v16 = vld [vmem:[%s19019_s12 + $0xa4] sm:$0xff] }
  0x93   : > { %4434 = vmatpush2.bf16.msra.mxu1 %v17846_v39  ;;  %v16576_v39 = vpack.c.bf16 %v1212_v34, %v1212_v34  ;;  %v16648_v43 = vpack.c.bf16 %v1644_v41, %v1644_v41  ;;  %1397 = vst [vmem:[#allocation4 + $0x250] sm:$0xf] %v16581_v13  ;;  %v16653_v19 = vpack.c.bf16 %v1649_v16, %v1649_v16  ;;  %v1220_v31 = vld [vmem:[%s19019_s12 + $0xab] sm:$0xff]  ;;  %v17838_v35 = vld [vmem:[#allocation4 + $0x4c8] ss:$36 sps:$4 sm:$0xff]  }
  0x94   : > { %3977 = vmatmul.mubr.bf16.gmra.mxu0 %v17769_v44  ;;  %v1851_v44 = vld [vmem:[%s19019_s12 + $0x35] sm:$0xff]  ;;  %8798 = vmatprep.subr.bf16.mxu1 %v21952_v1  ;;  %v16584_v32 = vpack.c.bf16 %v1220_v31, %v1220_v31  ;;  %v17847_v3 = vld [vmem:[#allocation4 + $0x10] ss:$36 sps:$4 sm:$0xff]  }
  0x95   : > { %4154 = vmatmul.mubr.bf16.gmra.mxu1 %v17773_v52  ;;  %3984 = vmatprep.mubr.bf16.mxu0 %v17774_v53  ;;  %v16675_v47 = vpack.c.bf16 %v1851_v44, %v1851_v44  ;;  %v16569_v52 = vpack.c.bf16 %v1205_v48, %v1205_v48  ;;  %v16570_v53 = vpack.c.bf16 %v1206_v49, %v1206_v49  ;;  %v1860_v44 = vld [vmem:[%s19019_s12 + $0x7d] sm:$0xff]  ;;  %v1659_v31 = vld [vmem:[%s19019_s12 + $0xf4] sm:$0xff] }
  0x96   : > { %4161 = vmatprep.mubr.bf16.mxu1 %v17777_v56  ;;  %v17797_v56 = vld [vmem:[#allocation4 + $0x368] ss:$36 sps:$4 sm:$0xff]   ;;  %1392 = vst [vmem:[#allocation4 + $0x19c] sm:$0xf] %v16576_v39  ;;  %v16684_v48 = vpack.c.bf16 %v1860_v44, %v1860_v44  ;;  %v16577_v49 = vpack.c.bf16 %v1213_v46, %v1213_v46  ;;  %1824 = vst [vmem:[#allocation4 + $0x1a4] sm:$0xf] %v16648_v43  ;;  %v16656_v39 = vpack.c.bf16 %v1652_v36, %v1652_v36 }
  0x97   : > { %2031 = vst [vmem:[#allocation4 + $0x64] sm:$0xf] %v16675_v47  ;;  %1385 = vst [vmem:[#allocation4 + $0xa0] sm:$0xf] %v16569_v52  ;;  %v1214_v47 = vld [vmem:[%s19019_s12 + $0x7b] sm:$0xff]  ;;  %v1646_v52 = vld [vmem:[%s19019_s12 + $0x8c] sm:$0xff]  ;;  %v16692_v46 = vpack.c.bf16 %v1868_v40, %v1868_v40 }
  0x98   : > { %1386 = vst [vmem:[#allocation4 + $0xc4] sm:$0xf] %v16570_v53  ;;  %1610 = vst [vmem:[#allocation4 + $0x1e8] sm:$0xf] %v16648_v43  ;;  %v16649_v53 = vpack.c.bf16 %v1645_v51, %v1645_v51  ;;  %v16650_v54 = vpack.c.bf16 %v1646_v52, %v1646_v52  ;;  %v1222_v43 = vld [vmem:[%s19019_s12 + $0xbb] sm:$0xff]  ;;  %v1869_v51 = vld [vmem:[%s19019_s12 + $0xc5] sm:$0xff] }
  0x99   : > { %2040 = vst [vmem:[#allocation4 + $0x1a8] sm:$0xf] %v16684_v48  ;;  %1393 = vst [vmem:[#allocation4 + $0x1c0] sm:$0xf] %v16577_v49  ;;  %v17844_v44 = vld [vmem:[#allocation4 + $0x14] ss:$36 sps:$4 sm:$0xff]   ;;  %v16586_v48 = vpack.c.bf16 %v1222_v43, %v1222_v43 }
  0x9a   : > { %1825 = vst [vmem:[#allocation4 + $0x1c8] sm:$0xf] %v16649_v53  ;;  %1826 = vst [vmem:[#allocation4 + $0x1ec] sm:$0xf] %v16650_v54  ;;  %v17849_v45 = vld [vmem:[#allocation4 + $0x1c] ss:$36 sps:$4 sm:$0xff]  }
  0x9b   : > { %1611 = vst [vmem:[#allocation4 + $0x20c] sm:$0xf] %v16649_v53  ;;  %1612 = vst [vmem:[#allocation4 + $0x230] sm:$0xf] %v16650_v54  ;;  %v1653_v49 = vld [vmem:[%s19019_s12 + $0xc4] sm:$0xff]  ;;  %v1870_v54 = vld [vmem:[%s19019_s12 + $0xcd] sm:$0xff] }
  0x9c   : > { %3985 = vmatmul.mubr.bf16.gmra.mxu0 %v17776_v0  ;;  %v16678_v0 = vpack.c.bf16 %v1854_v61, %v1854_v61  ;;  %v16579_v61 = vpack.c.bf16 %v1215_v59, %v1215_v59  ;;  %1829 = vst [vmem:[#allocation4 + $0x258] sm:$0xf] %v16653_v19  ;;  %1615 = vst [vmem:[#allocation4 + $0x29c] sm:$0xf] %v16653_v19  ;;  %v16657_v52 = vpack.c.bf16 %v1653_v49, %v1653_v49  ;;  %v1226_v8 = vld [vmem:[%s19019_s12 + $0xdb] sm:$0xff]  ;;  %v1658_v19 = vld [vmem:[%s19019_s12 + $0xec] sm:$0xff] }
  0x9d   : > { %4162 = vmatmul.mubr.bf16.gmra.mxu1 %v17779_v4  ;;  %3992 = vmatprep.mubr.bf16.mxu0 %v17782_v6  ;;  %v16571_v4 = vpack.c.bf16 %v1207_v2, %v1207_v2  ;;  %v1640_v6 = vld [vmem:[%s19019_s12 + $0x5c] sm:$0xff]  ;;  %1400 = vst [vmem:[#allocation4 + $0x2bc] sm:$0xf] %v16584_v32  ;;  %1832 = vst [vmem:[#allocation4 + $0x2c4] sm:$0xf] %v16656_v39 }
  0x9e   : > { %4169 = vmatprep.mubr.bf16.mxu1 %v17786_v10  ;;  %2034 = vst [vmem:[#allocation4 + $0xd0] sm:$0xf] %v16678_v0  ;;  %v16644_v9 = vpack.c.bf16 %v1640_v6, %v1640_v6  ;;  %v1855_v10 = vld [vmem:[%s19019_s12 + $0x55] sm:$0xff]  ;;  %1395 = vst [vmem:[#allocation4 + $0x208] sm:$0xf] %v16579_v61  ;;  %v17890_v36 = vld [vmem:[%s21946_s1 + $0x220] sm:$0xff]  }
  0x9f   : > { %1387 = vst [vmem:[#allocation4 + $0xe8] sm:$0xf] %v16571_v4  ;;  %v16679_v12 = vpack.c.bf16 %v1855_v10, %v1855_v10  ;;  %v17826_v0 = vld [vmem:[#allocation4 + $0x484] ss:$36 sps:$4 sm:$0xff]   ;;  %v17831_v2 = vld [vmem:[#allocation4 + $0x48c] ss:$36 sps:$4 sm:$0xff]  }
  0xa0   : > { %1820 = vst [vmem:[#allocation4 + $0x114] sm:$0xf] %v16644_v9  ;;  %1606 = vst [vmem:[#allocation4 + $0x158] sm:$0xf] %v16644_v9  ;;  %v1647_v4 = vld [vmem:[%s19019_s12 + $0x94] sm:$0xff]  ;;  %v1864_v9 = vld [vmem:[%s19019_s12 + $0x9d] sm:$0xff] }
  0xa1   : > { %2035 = vst [vmem:[#allocation4 + $0xf4] sm:$0xf] %v16679_v12  ;;  %v1863_v6 = vld [vmem:[%s19019_s12 + $0x95] sm:$0xff]  ;;  %v16651_v7 = vpack.c.bf16 %v1647_v4, %v1647_v4  ;;  %v16688_v12 = vpack.c.bf16 %v1864_v9, %v1864_v9  ;;  %1618 = vst [vmem:[#allocation4 + $0x308] sm:$0xf] %v16656_v39  ;;  %v16660_v4 = vpack.c.bf16 %v1656_v63, %v1656_v63 }
  0xa2   : > { %v16687_v10 = vpack.c.bf16 %v1863_v6, %v1863_v6  ;;  %2048 = vst [vmem:[#allocation4 + $0x2c8] sm:$0xf] %v16692_v46  ;;  %1402 = vst [vmem:[#allocation4 + $0x304] sm:$0xf] %v16586_v48  ;;  %v1655_v61 = vld [vmem:[%s19019_s12 + $0xd4] sm:$0xff]  ;;  %v1660_v32 = vld [vmem:[%s19019_s12 + $0xfc] sm:$0xff] }
  0xa3   : > { %1827 = vst [vmem:[#allocation4 + $0x210] sm:$0xf] %v16651_v7  ;;  %1613 = vst [vmem:[#allocation4 + $0x254] sm:$0xf] %v16651_v7  ;;  %v1225_v7 = vld [vmem:[%s19019_s12 + $0xd3] sm:$0xff]  ;;  %v1230_v43 = vld [vmem:[%s19019_s12 + $0xfb] sm:$0xff] }
  0xa4   : > { %3993 = vmatmul.mubr.bf16.gmra.mxu0 %v17785_v21  ;;  %v17813_v21 = vld [vmem:[#allocation4 + $0x3fc] ss:$36 sps:$4 sm:$0xff]   ;;  %2043 = vst [vmem:[#allocation4 + $0x214] sm:$0xf] %v16687_v10  ;;  %2044 = vst [vmem:[#allocation4 + $0x238] sm:$0xf] %v16688_v12  ;;  %v16589_v11 = vpack.c.bf16 %v1225_v7, %v1225_v7  ;;  %v16590_v12 = vpack.c.bf16 %v1226_v8, %v1226_v8 }
  0xa5   : > { %4170 = vmatmul.mubr.bf16.gmra.mxu1 %v17788_v23  ;;  %4000 = vmatprep.mubr.bf16.mxu0 %v17791_v24  ;;  %v16645_v23 = vpack.c.bf16 %v1641_v20, %v1641_v20  ;;  %v1642_v24 = vld [vmem:[%s19019_s12 + $0x6c] sm:$0xff]  ;;  %v17835_v20 = vld [vmem:[#allocation4 + $0x4cc] ss:$36 sps:$4 sm:$0xff]   ;;  %1833 = vst [vmem:[#allocation4 + $0x2e8] sm:$0xf] %v16657_v52 }
  0xa6   : > { %4177 = vmatprep.mubr.bf16.mxu1 %v17795_v26  ;;  %v16646_v25 = vpack.c.bf16 %v1642_v24, %v1642_v24  ;;  %v1857_v26 = vld [vmem:[%s19019_s12 + $0x65] sm:$0xff]  ;;  %v1866_v24 = vld [vmem:[%s19019_s12 + $0xad] sm:$0xff]  ;;  %1619 = vst [vmem:[#allocation4 + $0x32c] sm:$0xf] %v16657_v52  ;;  %1836 = vst [vmem:[#allocation4 + $0x354] sm:$0xf] %v16660_v4 }
  0xa7   : > { %1821 = vst [vmem:[#allocation4 + $0x138] sm:$0xf] %v16645_v23  ;;  %1607 = vst [vmem:[#allocation4 + $0x17c] sm:$0xf] %v16645_v23  ;;  %v16681_v30 = vpack.c.bf16 %v1857_v26, %v1857_v26  ;;  %v1865_v23 = vld [vmem:[%s19019_s12 + $0xa5] sm:$0xff]  ;;  %v1233_v8 = vld [vmem:[%s19019_s12 + $0x113] sm:$0xff] }
  0xa8   : > { %1822 = vst [vmem:[#allocation4 + $0x15c] sm:$0xf] %v16646_v25  ;;  %1608 = vst [vmem:[#allocation4 + $0x1a0] sm:$0xf] %v16646_v25  ;;  %v1219_v25 = vld [vmem:[%s19019_s12 + $0xa3] sm:$0xff]  ;;  %v16689_v28 = vpack.c.bf16 %v1865_v23, %v1865_v23  ;;  %v1662_v48 = vld [vmem:[%s19019_s12 + $0x10c] sm:$0xff] }
  0xa9   : > { %2037 = vst [vmem:[#allocation4 + $0x13c] sm:$0xf] %v16681_v30  ;;  %v17840_v26 = vld [vmem:[#allocation4 + $0x4d4] ss:$36 sps:$4 sm:$0xff]   ;;  %v16583_v30 = vpack.c.bf16 %v1219_v25, %v1219_v25  ;;  %v17852_v10 = vld [vmem:[#allocation4 + $0x5c] ss:$36 sps:$4 sm:$0xff]   ;;  %v16666_v52 = vpack.c.bf16 %v1662_v48, %v1662_v48 }
  0xaa   : > { %2045 = vst [vmem:[#allocation4 + $0x25c] sm:$0xf] %v16689_v28  ;;  %v17851_v9 = vld [vmem:[#allocation4 + $0x18] ss:$36 sps:$4 sm:$0xff]   ;;  %1622 = vst [vmem:[#allocation4 + $0x398] sm:$0xf] %v16660_v4 }
  0xab   : > { %1399 = vst [vmem:[#allocation4 + $0x298] sm:$0xf] %v16583_v30  ;;  %v17855_v13 = vld [vmem:[#allocation4 + $0x64] ss:$36 sps:$4 sm:$0xff]   ;;  %1405 = vst [vmem:[#allocation4 + $0x370] sm:$0xf] %v16589_v11 }
  0xac   : > { %4001 = vmatmul.mubr.bf16.gmra.mxu0 %v17794_v50  ;;  %v16578_v50 = vpack.c.bf16 %v1214_v47, %v1214_v47  ;;  %v16585_v47 = vpack.c.bf16 %v1221_v42, %v1221_v42  ;;  %1406 = vst [vmem:[#allocation4 + $0x394] sm:$0xf] %v16590_v12  ;;  %v17857_v25 = vld [vmem:[#allocation4 + $0x60] ss:$36 sps:$4 sm:$0xff]   ;;  %v17863_v63 = vld [vmem:[#allocation4 + $0xa8] ss:$36 sps:$4 sm:$0xff]  }
  0xad   : > { %4178 = vmatmul.mubr.bf16.gmra.mxu1 %v17797_v56  ;;  %4008 = vmatprep.mubr.bf16.mxu0 %v17800_v57  ;;  %v1862_v56 = vld [vmem:[%s19019_s12 + $0x8d] sm:$0xff]  ;;  %v16685_v57 = vpack.c.bf16 %v1861_v55, %v1861_v55  ;;  %v16693_v55 = vpack.c.bf16 %v1869_v51, %v1869_v51  ;;  %1842 = vst [vmem:[#allocation4 + $0x42c] sm:$0xf] %v16666_v52  ;;  %1628 = vst [vmem:[#allocation4 + $0x470] sm:$0xf] %v16666_v52  ;;  %v1665_v11 = vld [vmem:[%s19019_s12 + $0x124] sm:$0xff] }
  0xae   : > { %4185 = vmatprep.mubr.bf16.mxu1 %v17804_v62  ;;  %1394 = vst [vmem:[#allocation4 + $0x1e4] sm:$0xf] %v16578_v50  ;;  %v16686_v58 = vpack.c.bf16 %v1862_v56, %v1862_v56  ;;  %v17824_v62 = vld [vmem:[#allocation4 + $0x440] ss:$36 sps:$4 sm:$0xff]   ;;  %1401 = vst [vmem:[#allocation4 + $0x2e0] sm:$0xf] %v16585_v47  ;;  %v16594_v47 = vpack.c.bf16 %v1230_v43, %v1230_v43 }
  0xaf   : > { %2041 = vst [vmem:[#allocation4 + $0x1cc] sm:$0xf] %v16685_v57  ;;  %v1654_v50 = vld [vmem:[%s19019_s12 + $0xcc] sm:$0xff]  ;;  %v1223_v56 = vld [vmem:[%s19019_s12 + $0xc3] sm:$0xff]  ;;  %2049 = vst [vmem:[#allocation4 + $0x2ec] sm:$0xf] %v16693_v55 }
  0xb0   : > { %2042 = vst [vmem:[#allocation4 + $0x1f0] sm:$0xf] %v16686_v58  ;;  %v16658_v53 = vpack.c.bf16 %v1654_v50, %v1654_v50  ;;  %v1224_v57 = vld [vmem:[%s19019_s12 + $0xcb] sm:$0xff]  ;;  %v16694_v58 = vpack.c.bf16 %v1870_v54, %v1870_v54  ;;  %v16587_v59 = vpack.c.bf16 %v1223_v56, %v1223_v56  ;;  %v17858_v30 = vld [vmem:[#allocation4 + $0xa4] ss:$36 sps:$4 sm:$0xff]   ;;  %v1231_v55 = vld [vmem:[%s19019_s12 + $0x103] sm:$0xff] }
  0xb1   : > { %v1229_v42 = vld [vmem:[%s19019_s12 + $0xf3] sm:$0xff]  ;;  %v1877_v50 = vld [vmem:[%s19019_s12 + $0x105] sm:$0xff]  ;;  %1410 = vst [vmem:[#allocation4 + $0x424] sm:$0xf] %v16594_v47 }
  0xb2   : > { %1834 = vst [vmem:[#allocation4 + $0x30c] sm:$0xf] %v16658_v53  ;;  %1620 = vst [vmem:[#allocation4 + $0x350] sm:$0xf] %v16658_v53  ;;  %v16593_v46 = vpack.c.bf16 %v1229_v42, %v1229_v42  ;;  %v1878_v51 = vld [vmem:[%s19019_s12 + $0x10d] sm:$0xff]  ;;  %v16701_v53 = vpack.c.bf16 %v1877_v50, %v1877_v50  ;;  %v2071_v52 = vld [vmem:[%s19019_s12 + $0x56] sm:$0xff] }
  0xb3   : > { %2050 = vst [vmem:[#allocation4 + $0x310] sm:$0xf] %v16694_v58  ;;  %1403 = vst [vmem:[#allocation4 + $0x328] sm:$0xf] %v16587_v59  ;;  %v16702_v54 = vpack.c.bf16 %v1878_v51, %v1878_v51  ;;  %v1232_v56 = vld [vmem:[%s19019_s12 + $0x10b] sm:$0xff]  ;;  %v16595_v58 = vpack.c.bf16 %v1231_v55, %v1231_v55  ;;  %v2072_v55 = vld [vmem:[%s19019_s12 + $0x5e] sm:$0xff] }
  0xb4   : > { %4009 = vmatmul.mubr.bf16.gmra.mxu0 %v17803_v14  ;;  %v17830_v14 = vld [vmem:[#allocation4 + $0x480] ss:$36 sps:$4 sm:$0xff]   ;;  %1409 = vst [vmem:[#allocation4 + $0x400] sm:$0xf] %v16593_v46  ;;  %v16596_v59 = vpack.c.bf16 %v1232_v56, %v1232_v56  ;;  %2057 = vst [vmem:[#allocation4 + $0x40c] sm:$0xf] %v16701_v53  ;;  %v16715_v56 = vpack.c.bf16 %v2071_v52, %v2071_v52 }
  0xb5   : > { %4186 = vmatmul.mubr.bf16.gmra.mxu1 %v17806_v17  ;;  %4016 = vmatprep.mubr.bf16.mxu0 %v17809_v18  ;;  %v17833_v17 = vld [vmem:[#allocation4 + $0x488] ss:$36 sps:$4 sm:$0xff]   ;;  %v16582_v18 = vpack.c.bf16 %v1218_v15, %v1218_v15  ;;  %v1657_v15 = vld [vmem:[%s19019_s12 + $0xe4] sm:$0xff]  ;;  %2058 = vst [vmem:[#allocation4 + $0x430] sm:$0xf] %v16702_v54  ;;  %v2070_v51 = vld [vmem:[%s19019_s12 + $0x4e] sm:$0xff] }
  0xb6   : > { %4193 = vmatprep.mubr.bf16.mxu1 %v17813_v21  ;;  %v1650_v21 = vld [vmem:[%s19019_s12 + $0xac] sm:$0xff]  ;;  %v16661_v16 = vpack.c.bf16 %v1657_v15, %v1657_v15  ;;  %v17868_v4 = vld [vmem:[#allocation4 + $0xf4] ss:$36 sps:$4 sm:$0xff]   ;;  %1411 = vst [vmem:[#allocation4 + $0x448] sm:$0xf] %v16595_v58  ;;  %v16714_v54 = vpack.c.bf16 %v2070_v51, %v2070_v51  ;;  %v2091_v52 = vld [vmem:[%s19019_s12 + $0xf6] sm:$0xff] }
  0xb7   : > { %1398 = vst [vmem:[#allocation4 + $0x274] sm:$0xf] %v16582_v18  ;;  %v16654_v22 = vpack.c.bf16 %v1650_v21, %v1650_v21  ;;  %v17877_v18 = vld [vmem:[%s21946_s1 + $0x228] sm:$0xff]   ;;  %v16662_v21 = vpack.c.bf16 %v1658_v19, %v1658_v19  ;;  %1412 = vst [vmem:[#allocation4 + $0x46c] sm:$0xf] %v16596_v59  ;;  %v17948_v19 = vld [vmem:[%s21946_s1 + $0x200] sm:$0xff]   ;;  %v16716_v59 = vpack.c.bf16 %v2072_v55, %v2072_v55 }
  0xb8   : > { %1837 = vst [vmem:[#allocation4 + $0x378] sm:$0xf] %v16661_v16  ;;  %1623 = vst [vmem:[#allocation4 + $0x3bc] sm:$0xf] %v16661_v16  ;;  %v17935_v12 = vld [vmem:[%s21946_s1 + $0x208] sm:$0xff]   ;;  %v2068_v46 = vld [vmem:[%s19019_s12 + $0x3e] sm:$0xff] }
  0xb9   : > { %1830 = vst [vmem:[#allocation4 + $0x27c] sm:$0xf] %v16654_v22  ;;  %1616 = vst [vmem:[#allocation4 + $0x2c0] sm:$0xf] %v16654_v22  ;;  %v1874_v22 = vld [vmem:[%s19019_s12 + $0xed] sm:$0xff] }
  0xba   : > { %1838 = vst [vmem:[#allocation4 + $0x39c] sm:$0xf] %v16662_v21  ;;  %1624 = vst [vmem:[#allocation4 + $0x3e0] sm:$0xf] %v16662_v21  ;;  %v17867_v15 = vld [vmem:[#allocation4 + $0xe8] ss:$36 sps:$4 sm:$0xff]  }
  0xbb   : > { %v17870_v16 = vld [vmem:[#allocation4 + $0xf0] ss:$36 sps:$4 sm:$0xff]   ;;  %v2074_v58 = vld [vmem:[%s19019_s12 + $0x6e] sm:$0xff]  ;;  %2250 = vst [vmem:[#allocation4 + $0xd4] sm:$0xf] %v16714_v54 }
  0xbc   : > { %4017 = vmatmul.mubr.bf16.gmra.mxu0 %v17812_v29  ;;  %v16690_v29 = vpack.c.bf16 %v1866_v24, %v1866_v24  ;;  %v1227_v24 = vld [vmem:[%s19019_s12 + $0xe3] sm:$0xff]  ;;  %2251 = vst [vmem:[#allocation4 + $0xf8] sm:$0xf] %v16715_v56  ;;  %2252 = vst [vmem:[#allocation4 + $0x11c] sm:$0xf] %v16716_v59 }
  0xbd   : > { %4194 = vmatmul.mubr.bf16.gmra.mxu1 %v17815_v33  ;;  %4024 = vmatprep.mubr.bf16.mxu0 %v17818_v37  ;;  %v1651_v33 = vld [vmem:[%s19019_s12 + $0xb4] sm:$0xff]  ;;  %v16591_v28 = vpack.c.bf16 %v1227_v24, %v1227_v24  ;;  %v1881_v21 = vld [vmem:[%s19019_s12 + $0x125] sm:$0xff] }
  0xbe   : > { %4201 = vmatprep.mubr.bf16.mxu1 %v17822_v38  ;;  %2046 = vst [vmem:[#allocation4 + $0x280] sm:$0xf] %v16690_v29  ;;  %v16655_v34 = vpack.c.bf16 %v1651_v33, %v1651_v33  ;;  %v1867_v37 = vld [vmem:[%s19019_s12 + $0xb5] sm:$0xff]  ;;  %v17842_v38 = vld [vmem:[#allocation4 + $0x4d0] ss:$36 sps:$4 sm:$0xff]   ;;  %v16705_v24 = vpack.c.bf16 %v1881_v21, %v1881_v21 }
  0xbf   : > { %v16691_v41 = vpack.c.bf16 %v1867_v37, %v1867_v37  ;;  %v17861_v33 = vld [vmem:[#allocation4 + $0xac] ss:$36 sps:$4 sm:$0xff]   ;;  %1407 = vst [vmem:[#allocation4 + $0x3b8] sm:$0xf] %v16591_v28  ;;  %v2069_v50 = vld [vmem:[%s19019_s12 + $0x46] sm:$0xff] }
  0xc0   : > { %1831 = vst [vmem:[#allocation4 + $0x2a0] sm:$0xf] %v16655_v34  ;;  %1617 = vst [vmem:[#allocation4 + $0x2e4] sm:$0xf] %v16655_v34  ;;  %v16663_v34 = vpack.c.bf16 %v1659_v31, %v1659_v31  ;;  %v1875_v37 = vld [vmem:[%s19019_s12 + $0xf5] sm:$0xff]  ;;  %v16713_v53 = vpack.c.bf16 %v2069_v50, %v2069_v50 }
  0xc1   : > { %2047 = vst [vmem:[#allocation4 + $0x2a4] sm:$0xf] %v16691_v41  ;;  %v16699_v39 = vpack.c.bf16 %v1875_v37, %v1875_v37  ;;  %v17906_v41 = vld [vmem:[%s21946_s1 + $0x218] sm:$0xff]   ;;  %2061 = vst [vmem:[#allocation4 + $0x49c] sm:$0xf] %v16705_v24 }
  0xc2   : > { %1839 = vst [vmem:[#allocation4 + $0x3c0] sm:$0xf] %v16663_v34  ;;  %1625 = vst [vmem:[#allocation4 + $0x404] sm:$0xf] %v16663_v34  ;;  %v1667_v31 = vld [vmem:[%s19019_s12 + $0x134] sm:$0xff]  ;;  %v1884_v37 = vld [vmem:[%s19019_s12 + $0x13d] sm:$0xff] }
  0xc3   : > { %2055 = vst [vmem:[#allocation4 + $0x3c4] sm:$0xf] %v16699_v39  ;;  %v16671_v34 = vpack.c.bf16 %v1667_v31, %v1667_v31  ;;  %v17878_v39 = vld [vmem:[#allocation4 + $0x17c] ss:$36 sps:$4 sm:$0xff]   ;;  %v16708_v42 = vpack.c.bf16 %v1884_v37, %v1884_v37  ;;  %2249 = vst [vmem:[#allocation4 + $0xb0] sm:$0xf] %v16713_v53 }
  0xc4   : > { %4025 = vmatmul.mubr.bf16.gmra.mxu0 %v17821_v60  ;;  %v16588_v60 = vpack.c.bf16 %v1224_v57, %v1224_v57  ;;  %v1663_v57 = vld [vmem:[%s19019_s12 + $0x114] sm:$0xff]  ;;  %v2092_v53 = vld [vmem:[%s19019_s12 + $0xfe] sm:$0xff] }
  0xc5   : > { %4202 = vmatmul.mubr.bf16.gmra.mxu1 %v17824_v62  ;;  %4032 = vmatprep.mubr.bf16.mxu0 %v17826_v0  ;;  %v16659_v62 = vpack.c.bf16 %v1655_v61, %v1655_v61  ;;  %v1871_v0 = vld [vmem:[%s19019_s12 + $0xd5] sm:$0xff]  ;;  %v16667_v61 = vpack.c.bf16 %v1663_v57, %v1663_v57  ;;  %1847 = vst [vmem:[#allocation4 + $0x4e0] sm:$0xf] %v16671_v34  ;;  %2064 = vst [vmem:[#allocation4 + $0x508] sm:$0xf] %v16708_v42  ;;  %v2073_v57 = vld [vmem:[%s19019_s12 + $0x66] sm:$0xff] }
  0xc6   : > { %4209 = vmatprep.mubr.bf16.mxu1 %v17831_v2  ;;  %1404 = vst [vmem:[#allocation4 + $0x34c] sm:$0xf] %v16588_v60  ;;  %v1872_v2 = vld [vmem:[%s19019_s12 + $0xdd] sm:$0xff]  ;;  %v16695_v5 = vpack.c.bf16 %v1871_v0, %v1871_v0 }
  0xc7   : > { %1835 = vst [vmem:[#allocation4 + $0x330] sm:$0xf] %v16659_v62  ;;  %v16696_v6 = vpack.c.bf16 %v1872_v2, %v1872_v2  ;;  %1621 = vst [vmem:[#allocation4 + $0x374] sm:$0xf] %v16659_v62  ;;  %v1664_v60 = vld [vmem:[%s19019_s12 + $0x11c] sm:$0xff] }
  0xc8   : > { %2051 = vst [vmem:[#allocation4 + $0x334] sm:$0xf] %v16695_v5  ;;  %v1879_v62 = vld [vmem:[%s19019_s12 + $0x115] sm:$0xff]  ;;  %v16668_v2 = vpack.c.bf16 %v1664_v60, %v1664_v60  ;;  %1843 = vst [vmem:[#allocation4 + $0x450] sm:$0xf] %v16667_v61  ;;  %v16717_v60 = vpack.c.bf16 %v2073_v57, %v2073_v57  ;;  %v16735_v57 = vpack.c.bf16 %v2091_v52, %v2091_v52  ;;  %v2100_v52 = vld [vmem:[%s19019_s12 + $0x13e] sm:$0xff] }
  0xc9   : > { %2052 = vst [vmem:[#allocation4 + $0x358] sm:$0xf] %v16696_v6  ;;  %v17865_v0 = vld [vmem:[#allocation4 + $0xec] ss:$36 sps:$4 sm:$0xff]   ;;  %1629 = vst [vmem:[#allocation4 + $0x494] sm:$0xf] %v16667_v61  ;;  %v16718_v61 = vpack.c.bf16 %v2074_v58, %v2074_v58  ;;  %v16736_v58 = vpack.c.bf16 %v2092_v53, %v2092_v53 }
  0xca   : > { %v17922_v5 = vld [vmem:[%s21946_s1 + $0x210] sm:$0xff]   ;;  %1844 = vst [vmem:[#allocation4 + $0x474] sm:$0xf] %v16668_v2  ;;  %v1880_v6 = vld [vmem:[%s19019_s12 + $0x11d] sm:$0xff]  ;;  %1630 = vst [vmem:[#allocation4 + $0x4b8] sm:$0xf] %v16668_v2 }
  0xcb   : > { %v16704_v7 = vpack.c.bf16 %v1880_v6, %v1880_v6  ;;  %v2079_v6 = vld [vmem:[%s19019_s12 + $0x96] sm:$0xff]  ;;  %2253 = vst [vmem:[#allocation4 + $0x140] sm:$0xf] %v16717_v60  ;;  %2254 = vst [vmem:[#allocation4 + $0x164] sm:$0xf] %v16718_v61 }
  0xcc   : > { %4033 = vmatmul.mubr.bf16.gmra.mxu0 %v17830_v14  ;;  %v17864_v14 = vld [vmem:[%s21946_s1 + $0x230] sm:$0xff]   ;;  %v17889_v21 = vld [vmem:[#allocation4 + $0x1c8] ss:$36 sps:$4 sm:$0xff]   ;;  %2271 = vst [vmem:[#allocation4 + $0x3c8] sm:$0xf] %v16735_v57 }
  0xcd   : > { %4210 = vmatmul.mubr.bf16.gmra.mxu1 %v17833_v17  ;;  %4040 = vmatprep.mubr.bf16.mxu0 %v17835_v20  ;;  %v17854_v17 = vld [vmem:[#allocation4 + $0x58] ss:$36 sps:$4 sm:$0xff]   ;;  %2060 = vst [vmem:[#allocation4 + $0x478] sm:$0xf] %v16704_v7  ;;  %v2083_v24 = vld [vmem:[%s19019_s12 + $0xb6] sm:$0xff] }
  0xce   : > { %4217 = vmatprep.mubr.bf16.mxu1 %v17840_v26  ;;  %v1873_v20 = vld [vmem:[%s19019_s12 + $0xe5] sm:$0xff]  ;;  %v16698_v26 = vpack.c.bf16 %v1874_v22, %v1874_v22  ;;  %2272 = vst [vmem:[#allocation4 + $0x3ec] sm:$0xf] %v16736_v58 }
  0xcf   : > { %v16697_v23 = vpack.c.bf16 %v1873_v20, %v1873_v20  ;;  %v1666_v20 = vld [vmem:[%s19019_s12 + $0x12c] sm:$0xff] }
  0xd0   : > { %2054 = vst [vmem:[#allocation4 + $0x3a0] sm:$0xf] %v16698_v26  ;;  %v16670_v22 = vpack.c.bf16 %v1666_v20, %v1666_v20  ;;  %v19484_v20 = vld [vmem:[%s21947_s2] ss:$0 sm:$0xff] }
  0xd1   : > { %2053 = vst [vmem:[#allocation4 + $0x37c] sm:$0xf] %v16697_v23  ;;  %v1882_v23 = vld [vmem:[%s19019_s12 + $0x12d] sm:$0xff] }
  0xd2   : > { %v16706_v26 = vpack.c.bf16 %v1882_v23, %v1882_v23  ;;  %1846 = vst [vmem:[#allocation4 + $0x4bc] sm:$0xf] %v16670_v22  ;;  %1632 = vst [vmem:[#allocation4 + $0x500] sm:$0xf] %v16670_v22  ;;  %v17891_v22 = vld [vmem:[#allocation4 + $0x20c] ss:$36 sps:$4 sm:$0xff]  }
  0xd3   : > { %v17894_v23 = vld [vmem:[#allocation4 + $0x214] ss:$36 sps:$4 sm:$0xff]  }
  0xd4   : > { %4041 = vmatmul.mubr.bf16.gmra.mxu0 %v17838_v35  ;;  %v16664_v35 = vpack.c.bf16 %v1660_v32, %v1660_v32  ;;  %v1668_v32 = vld [vmem:[%s19019_s12 + $0x13c] sm:$0xff]  ;;  %2062 = vst [vmem:[#allocation4 + $0x4c0] sm:$0xf] %v16706_v26 }
  0xd5   : > { %4218 = vmatmul.mubr.bf16.gmra.mxu1 %v17842_v38  ;;  %4258 = vmatprep.mubr.bf16.mxu0 %v17844_v44  ;;  %v1876_v38 = vld [vmem:[%s19019_s12 + $0xfd] sm:$0xff] }
  0xd6   : > { %4435 = vmatprep.mubr.bf16.mxu1 %v17849_v45  ;;  %1840 = vst [vmem:[#allocation4 + $0x3e4] sm:$0xf] %v16664_v35  ;;  %v16700_v40 = vpack.c.bf16 %v1876_v38, %v1876_v38  ;;  %1626 = vst [vmem:[#allocation4 + $0x428] sm:$0xf] %v16664_v35  ;;  %v1661_v44 = vld [vmem:[%s19019_s12 + $0x104] sm:$0xff]  ;;  %v16672_v35 = vpack.c.bf16 %v1668_v32, %v1668_v32 }
  0xd7   : > { %v17860_v45 = vld [vmem:[#allocation4 + $0xa0] ss:$36 sps:$4 sm:$0xff]   ;;  %v16665_v49 = vpack.c.bf16 %v1661_v44, %v1661_v44  ;;  %v2065_v38 = vld [vmem:[%s19019_s12 + $0x26] sm:$0xff] }
  0xd8   : > { %2056 = vst [vmem:[#allocation4 + $0x3e8] sm:$0xf] %v16700_v40  ;;  %v17881_v40 = vld [vmem:[#allocation4 + $0x184] ss:$36 sps:$4 sm:$0xff]   ;;  %v16709_v43 = vpack.c.bf16 %v2065_v38, %v2065_v38  ;;  %1848 = vst [vmem:[#allocation4 + $0x504] sm:$0xf] %v16672_v35 }
  0xd9   : > { %1841 = vst [vmem:[#allocation4 + $0x408] sm:$0xf] %v16665_v49  ;;  %1627 = vst [vmem:[#allocation4 + $0x44c] sm:$0xf] %v16665_v49  ;;  %v2066_v44 = vld [vmem:[%s19019_s12 + $0x2e] sm:$0xff]  ;;  %v16712_v49 = vpack.c.bf16 %v2068_v46, %v2068_v46  ;;  %v2087_v35 = vld [vmem:[%s19019_s12 + $0xd6] sm:$0xff] }
  0xda   : > { %v16710_v47 = vpack.c.bf16 %v2066_v44, %v2066_v44  ;;  %2245 = vst [vmem:[#allocation4 + $0x20] sm:$0xf] %v16709_v43  ;;  %v17893_v38 = vld [vmem:[#allocation4 + $0x208] ss:$36 sps:$4 sm:$0xff]   ;;  %v17896_v43 = vld [vmem:[#allocation4 + $0x210] ss:$36 sps:$4 sm:$0xff]  }
  0xdb   : > { %2248 = vst [vmem:[#allocation4 + $0x8c] sm:$0xf] %v16712_v49  ;;  %v17897_v44 = vld [vmem:[#allocation4 + $0x254] ss:$36 sps:$4 sm:$0xff]   ;;  %v17900_v49 = vld [vmem:[#allocation4 + $0x25c] ss:$36 sps:$4 sm:$0xff]  }
  0xdc   : > { %4259 = vmatmul.mubr.bf16.vlgmr.msra.gmra.mxu0 %v17847_v3  ;;  %v16703_v3 = vpack.c.bf16 %v1879_v62, %v1879_v62  ;;  %2246 = vst [vmem:[#allocation4 + $0x44] sm:$0xf] %v16710_v47  ;;  %v2075_v62 = vld [vmem:[%s19019_s12 + $0x76] sm:$0xff]  ;;  %v2089_v46 = vld [vmem:[%s19019_s12 + $0xe6] sm:$0xff]  ;;  %v2090_v47 = vld [vmem:[%s19019_s12 + $0xee] sm:$0xff] }
  0xdd   : > { %17472 = vmatpush3.bf16.msra.mxu0 %v19326_v27  ;;  %4436 = vmatmul.mubr.bf16.vlgmr.msra.gmra.mxu1 %v17851_v9  ;;  %v1228_v27 = vld [vmem:[%s19019_s12 + $0xeb] sm:$0xff]  ;;  %v16597_v9 = vpack.c.bf16 %v1233_v8, %v1233_v8  ;;  %v16719_v2 = vpack.c.bf16 %v2075_v62, %v2075_v62  ;;  %v16723_v8 = vpack.c.bf16 %v2079_v6, %v2079_v6 }
  0xde   : > { %4266 = vmatprep.mubr.bf16.mxu0 %v17852_v10  ;;  %4443 = vmatprep.mubr.bf16.mxu1 %v17855_v13  ;;  %v16592_v29 = vpack.c.bf16 %v1228_v27, %v1228_v27  ;;  %2059 = vst [vmem:[#allocation4 + $0x454] sm:$0xf] %v16703_v3  ;;  %v1234_v10 = vld [vmem:[%s19019_s12 + $0x11b] sm:$0xff]  ;;  %v1235_v27 = vld [vmem:[%s19019_s12 + $0x123] sm:$0xff]  ;;  %v16733_v50 = vpack.c.bf16 %v2089_v46, %v2089_v46 }
  0xdf   : > { %17473 = vmatprep.subr.bf16.mxu0 %v17864_v14  ;;  %v16598_v13 = vpack.c.bf16 %v1234_v10, %v1234_v10  ;;  %1413 = vst [vmem:[#allocation4 + $0x490] sm:$0xf] %v16597_v9  ;;  %v16599_v28 = vpack.c.bf16 %v1235_v27, %v1235_v27  ;;  %v17880_v9 = vld [vmem:[#allocation4 + $0x178] ss:$36 sps:$4 sm:$0xff]   ;;  %2255 = vst [vmem:[#allocation4 + $0x188] sm:$0xf] %v16719_v2  ;;  %v16734_v51 = vpack.c.bf16 %v2090_v47, %v2090_v47 }
  0xe0   : > { %1408 = vst [vmem:[#allocation4 + $0x3dc] sm:$0xf] %v16592_v29  ;;  %v17883_v10 = vld [vmem:[#allocation4 + $0x180] ss:$36 sps:$4 sm:$0xff]   ;;  %2259 = vst [vmem:[#allocation4 + $0x218] sm:$0xf] %v16723_v8 }
  0xe1   : > { %17474 = vmatpush3.bf16.msra.mxu0 %v17864_v14  ;;  %v16669_v14 = vpack.c.bf16 %v1665_v11, %v1665_v11  ;;  %1414 = vst [vmem:[#allocation4 + $0x4b4] sm:$0xf] %v16598_v13  ;;  %1415 = vst [vmem:[#allocation4 + $0x4d8] sm:$0xf] %v16599_v28  ;;  %v2080_v11 = vld [vmem:[%s19019_s12 + $0x9e] sm:$0xff]  ;;  %v16727_v28 = vpack.c.bf16 %v2083_v24, %v2083_v24  ;;  %v266_v62 = vld [vmem:[%s21950_s5 + $0x8] sm:$0xff] }
  0xe2   : > { %17475 = vmatprep.subr.bf16.mxu0 %v17877_v18  ;;  %v17884_v13 = vld [vmem:[#allocation4 + $0x1c4] ss:$36 sps:$4 sm:$0xff]   ;;  %v2084_v27 = vld [vmem:[%s19019_s12 + $0xbe] sm:$0xff]  ;;  %2269 = vst [vmem:[#allocation4 + $0x380] sm:$0xf] %v16733_v50  ;;  %vm302_vm1 = vcmp.gt.f32.partialorder %v266_v62, 0.5 }
  0xe3   : > { %1845 = vst [vmem:[#allocation4 + $0x498] sm:$0xf] %v16669_v14  ;;  %1631 = vst [vmem:[#allocation4 + $0x4dc] sm:$0xf] %v16669_v14  ;;  %v16724_v14 = vpack.c.bf16 %v2080_v11, %v2080_v11  ;;  %v17903_v8 = vld [vmem:[#allocation4 + $0x29c] ss:$36 sps:$4 sm:$0xff]  }
  0xe4   : > { %4267 = vmatmul.mubr.bf16.gmra.mxu0 %v17854_v17  ;;  %v17871_v17 = vld [vmem:[#allocation4 + $0x134] ss:$36 sps:$4 sm:$0xff]   ;;  %2263 = vst [vmem:[#allocation4 + $0x2a8] sm:$0xf] %v16727_v28  ;;  %2270 = vst [vmem:[#allocation4 + $0x3a4] sm:$0xf] %v16734_v51 }
  0xe5   : > { %4444 = vmatmul.mubr.bf16.gmra.mxu1 %v17857_v25  ;;  %4274 = vmatprep.mubr.bf16.mxu0 %v17858_v30  ;;  %v1236_v25 = vld [vmem:[%s19019_s12 + $0x12b] sm:$0xff]  ;;  %v17873_v30 = vld [vmem:[#allocation4 + $0x130] ss:$36 sps:$4 sm:$0xff]   ;;  %2260 = vst [vmem:[#allocation4 + $0x23c] sm:$0xf] %v16724_v14  ;;  %v268_v24 = vld [vmem:[%s21950_s5 + $0x18] sm:$0xff] }
  0xe6   : > { %4451 = vmatprep.mubr.bf16.mxu1 %v17861_v33  ;;  %17476 = vmatpush3.bf16.msra.mxu0 %v17877_v18  ;;  %v17874_v18 = vld [vmem:[#allocation4 + $0x13c] ss:$36 sps:$4 sm:$0xff]   ;;  %v16600_v29 = vpack.c.bf16 %v1236_v25, %v1236_v25  ;;  %vm304_vm4 = vcmp.gt.f32.partialorder %v268_v24, 0.5  ;;  %v2095_v28 = vld [vmem:[%s19019_s12 + $0x116] sm:$0xff] }
  0xe7   : > { %17477 = vmatprep.subr.bf16.mxu0 %v17890_v36  ;;  %v17876_v33 = vld [vmem:[#allocation4 + $0x138] ss:$36 sps:$4 sm:$0xff]   ;;  %v267_v11 = vld [vmem:[%s21950_s5 + $0x10] sm:$0xff] }
  0xe8   : > { %1416 = vst [vmem:[#allocation4 + $0x4fc] sm:$0xf] %v16600_v29  ;;  %v2085_v25 = vld [vmem:[%s19019_s12 + $0xc6] sm:$0xff]  ;;  %v16728_v29 = vpack.c.bf16 %v2084_v27, %v2084_v27  ;;  %vm303_vm2 = vcmp.gt.f32.partialorder %v267_v11, 0.5  ;;  %v2099_v51 = vld [vmem:[%s19019_s12 + $0x136] sm:$0xff] }
  0xe9   : > { %v16729_v31 = vpack.c.bf16 %v2085_v25, %v2085_v25  ;;  %v271_v25 = vld [vmem:[%s21950_s5 + $0x30] sm:$0xff]  ;;  %v2097_v46 = vld [vmem:[%s19019_s12 + $0x126] sm:$0xff]  ;;  %v16743_v58 = vpack.c.bf16 %v2099_v51, %v2099_v51 }
  0xea   : > { %17478 = vmatpush3.bf16.msra.mxu0 %v17890_v36  ;;  %v1883_v36 = vld [vmem:[%s19019_s12 + $0x135] sm:$0xff]  ;;  %2264 = vst [vmem:[#allocation4 + $0x2cc] sm:$0xf] %v16728_v29  ;;  %vm307_vm5 = vcmp.gt.f32.partialorder %v271_v25, 0.5  ;;  %v16741_v50 = vpack.c.bf16 %v2097_v46, %v2097_v46 }
  0xeb   : > { %17479 = vmatprep.subr.bf16.mxu0 %v17906_v41  ;;  %2265 = vst [vmem:[#allocation4 + $0x2f0] sm:$0xf] %v16729_v31  ;;  %v5012_v31 = vsel %vm304_vm4, 1, %v21952_v1  ;;  %2279 = vst [vmem:[#allocation4 + $0x4e8] sm:$0xf] %v16743_v58 }
  0xec   : > { %4275 = vmatmul.mubr.bf16.gmra.mxu0 %v17860_v45  ;;  %v2067_v45 = vld [vmem:[%s19019_s12 + $0x36] sm:$0xff]  ;;  %2277 = vst [vmem:[#allocation4 + $0x4a0] sm:$0xf] %v16741_v50 }
  0xed   : > { %4452 = vmatmul.mubr.bf16.gmra.mxu1 %v17863_v63  ;;  %4282 = vmatprep.mubr.bf16.mxu0 %v17865_v0  ;;  %v16711_v48 = vpack.c.bf16 %v2067_v45, %v2067_v45  ;;  %v2076_v63 = vld [vmem:[%s19019_s12 + $0x7e] sm:$0xff]  ;;  %v2077_v0 = vld [vmem:[%s19019_s12 + $0x86] sm:$0xff] }
  0xee   : > { %4459 = vmatprep.mubr.bf16.mxu1 %v17868_v4  ;;  %17480 = vmatpush3.bf16.msra.mxu0 %v17906_v41  ;;  %v16707_v41 = vpack.c.bf16 %v1883_v36, %v1883_v36  ;;  %v16720_v3 = vpack.c.bf16 %v2076_v63, %v2076_v63  ;;  %v2078_v4 = vld [vmem:[%s19019_s12 + $0x8e] sm:$0xff]  ;;  %v2088_v36 = vld [vmem:[%s19019_s12 + $0xde] sm:$0xff] }
  0xef   : > { %17481 = vmatprep.subr.bf16.mxu0 %v17922_v5  ;;  %2247 = vst [vmem:[#allocation4 + $0x68] sm:$0xf] %v16711_v48  ;;  %v16722_v7 = vpack.c.bf16 %v2078_v4, %v2078_v4  ;;  %v265_v45 = vld [vmem:[%s21950_s5] sm:$0xff] }
  0xf0   : > { %2063 = vst [vmem:[#allocation4 + $0x4e4] sm:$0xf] %v16707_v41  ;;  %2256 = vst [vmem:[#allocation4 + $0x1ac] sm:$0xf] %v16720_v3  ;;  %vm301_vm0 = vcmp.gt.f32.partialorder %v265_v45, 0.5  ;;  %v273_v45 = vld [vmem:[%s21950_s5 + $0x40] sm:$0xff] }
  0xf1   : > { %2258 = vst [vmem:[#allocation4 + $0x1f4] sm:$0xf] %v16722_v7  ;;  %v5009_v56 = vsel %vm301_vm0, 1, %v21952_v1  ;;  %v17899_v4 = vld [vmem:[#allocation4 + $0x250] ss:$36 sps:$4 sm:$0xff]   ;;  %vm309_vm7 = vcmp.gt.f32.partialorder %v273_v45, 0.5 }
  0xf2   : > { %17482 = vmatpush3.bf16.msra.mxu0 %v17922_v5  ;;  %v16721_v5 = vpack.c.bf16 %v2077_v0, %v2077_v0  ;;  %5046 = vperm.xlu0 %17671, %v5009_v56   ;;  %v17902_v7 = vld [vmem:[#allocation4 + $0x258] ss:$36 sps:$4 sm:$0xff]   ;;  %v281_v45 = vld [vmem:[%s21950_s5 + $0x80] sm:$0xff] }
  0xf3   : > { %17483 = vmatprep.subr.bf16.mxu0 %v17935_v12  ;;  %vm317_vm15 = vcmp.gt.f32.partialorder %v281_v45, 0.5  ;;  %v289_v45 = vld [vmem:[%s21950_s5 + $0xc0] sm:$0xff] }
  0xf4   : > { %4283 = vmatmul.mubr.bf16.gmra.mxu0 %v17867_v15  ;;  %2257 = vst [vmem:[#allocation4 + $0x1d0] sm:$0xf] %v16721_v5 }
  0xf5   : > { %4460 = vmatmul.mubr.bf16.gmra.mxu1 %v17870_v16  ;;  %4290 = vmatprep.mubr.bf16.mxu0 %v17871_v17  ;;  %v17887_v16 = vld [vmem:[#allocation4 + $0x1cc] ss:$36 sps:$4 sm:$0xff]   ;;  %v2082_v17 = vld [vmem:[%s19019_s12 + $0xae] sm:$0xff] }
  0xf6   : > { %4467 = vmatprep.mubr.bf16.mxu1 %v17874_v18  ;;  %17484 = vmatpush3.bf16.msra.mxu0 %v17935_v12  ;;  %v2081_v12 = vld [vmem:[%s19019_s12 + $0xa6] sm:$0xff]  ;;  %v16726_v18 = vpack.c.bf16 %v2082_v17, %v2082_v17 }
  0xf7   : > { %17485 = vmatprep.subr.bf16.mxu0 %v17948_v19  ;;  %v16725_v15 = vpack.c.bf16 %v2081_v12, %v2081_v12  ;;  %v269_v12 = vld [vmem:[%s21950_s5 + $0x20] sm:$0xff] }
  0xf8   : > { %2262 = vst [vmem:[#allocation4 + $0x284] sm:$0xf] %v16726_v18  ;;  %vm305_vm3 = vcmp.gt.f32.partialorder %v269_v12, 0.5  ;;  %v17907_v18 = vld [vmem:[#allocation4 + $0x2a4] ss:$36 sps:$4 sm:$0xff]  }
  0xf9   : > { %2261 = vst [vmem:[#allocation4 + $0x260] sm:$0xf] %v16725_v15  ;;  %v17915_v12 = vld [vmem:[#allocation4 + $0x2e8] ss:$36 sps:$4 sm:$0xff]  }
  0xfa   : > { %17486 = vmatpush3.bf16.msra.mxu0 %v17948_v19  ;;  %v17886_v19 = vld [vmem:[#allocation4 + $0x1c0] ss:$36 sps:$4 sm:$0xff]  }
  0xfb   : > { %8975 = vmatprep.subr.bf16.mxu0 %v21952_v1 }
  0xfc   : > { %4291 = vmatmul.mubr.bf16.gmra.mxu0 %v17873_v30  ;;  %v2086_v30 = vld [vmem:[%s19019_s12 + $0xce] sm:$0xff] }
  0xfd   : > { %4468 = vmatmul.mubr.bf16.gmra.mxu1 %v17876_v33  ;;  %4298 = vmatprep.mubr.bf16.mxu0 %v17878_v39  ;;  %v16730_v34 = vpack.c.bf16 %v2086_v30, %v2086_v30  ;;  %v16731_v39 = vpack.c.bf16 %v2087_v35, %v2087_v35  ;;  %v17905_v35 = vld [vmem:[#allocation4 + $0x298] ss:$36 sps:$4 sm:$0xff]  }
  0xfe   : > { %4475 = vmatprep.mubr.bf16.mxu1 %v17881_v40  ;;  %v16732_v40 = vpack.c.bf16 %v2088_v36, %v2088_v36  ;;  %v16739_v36 = vpack.c.bf16 %v2095_v28, %v2095_v28 }
  0xff   : > { %2266 = vst [vmem:[#allocation4 + $0x314] sm:$0xf] %v16730_v34  ;;  %2267 = vst [vmem:[#allocation4 + $0x338] sm:$0xf] %v16731_v39 }
 0x100   : > { %2268 = vst [vmem:[#allocation4 + $0x35c] sm:$0xf] %v16732_v40  ;;  %v17909_v40 = vld [vmem:[#allocation4 + $0x2a0] ss:$36 sps:$4 sm:$0xff]   ;;  %2275 = vst [vmem:[#allocation4 + $0x458] sm:$0xf] %v16739_v36 }
 0x104   : > { %4299 = vmatmul.mubr.bf16.gmra.mxu0 %v17880_v9 }
 0x105   : > { %4476 = vmatmul.mubr.bf16.gmra.mxu1 %v17883_v10  ;;  %4306 = vmatprep.mubr.bf16.mxu0 %v17884_v13  ;;  %v5010_v10 = vsel %vm302_vm1, 1, %v21952_v1  ;;  %v2093_v13 = vld [vmem:[%s19019_s12 + $0x106] sm:$0xff] }
 0x106   : > { %4483 = vmatprep.mubr.bf16.mxu1 %v17887_v16  ;;  %5049 = vperm.xlu0 %17671, %v5010_v10   ;;  %v16737_v16 = vpack.c.bf16 %v2093_v13, %v2093_v13  ;;  %v17916_v13 = vld [vmem:[#allocation4 + $0x32c] ss:$36 sps:$4 sm:$0xff]  }
 0x108   : > { %2273 = vst [vmem:[#allocation4 + $0x410] sm:$0xf] %v16737_v16  ;;  %v274_v16 = vld [vmem:[%s21950_s5 + $0x48] sm:$0xff] }
 0x109   : > { %vm310_vm10 = vcmp.gt.f32.partialorder %v274_v16, 0.5 }
 0x10a   : > { %v5018_v24 = vsel %vm310_vm10, 1, %v21952_v1 }
 0x10c   : > { %v3906_v26 = vpop.f32.mrf.mxu0  ;;  %4307 = vmatmul.mubr.bf16.gmra.mxu0 %v17886_v19  ;;  %v5011_v19 = vsel %vm303_vm2, 1, %v21952_v1 }
 0x10d   : > { %v3907_v32 = vadd.f32 %v19484_v20, %v3906_v26  ;;  %v4083_v33 = vpop.f32.mrf.mxu1  ;;  %4484 = vmatmul.mubr.bf16.gmra.mxu1 %v17889_v21  ;;  %4314 = vmatprep.mubr.bf16.mxu0 %v17891_v22  ;;  %v2094_v26 = vld [vmem:[%s19019_s12 + $0x10e] sm:$0xff] }
 0x10e   : > { %v3908_v37 = vpop.f32.mrf.mxu0  ;;  %4491 = vmatprep.mubr.bf16.mxu1 %v17894_v23  ;;  %5052 = vperm.xlu1 %17672, %v5011_v19   ;;  %v5013_v23 = vsel %vm305_vm3, 1, %v21952_v1 }
 0x10f   : > { %v19493_v41 = vadd.f32 %v4083_v33, %v3907_v32  ;;  %v4085_v42 = vpop.f32.mrf.mxu1  ;;  %v16738_v32 = vpack.c.bf16 %v2094_v26, %v2094_v26  ;;  %v2096_v33 = vld [vmem:[%s19019_s12 + $0x11e] sm:$0xff]  ;;  %5058 = vperm.xlu0 %17671, %v5013_v23  }
 0x110   : > { %v3909_v48 = vpop.f32.mrf.mxu0  ;;  %v16740_v37 = vpack.c.bf16 %v2096_v33, %v2096_v33  ;;  %v17910_v42 = vld [vmem:[#allocation4 + $0x2e4] ss:$36 sps:$4 sm:$0xff]   ;;  %v17919_v23 = vld [vmem:[#allocation4 + $0x334] ss:$36 sps:$4 sm:$0xff]  }
 0x111   : > { %v3910_v54 = vadd.f32 %v19484_v20, %v3909_v48  ;;  %v4086_v55 = vpop.f32.mrf.mxu1  ;;  %2274 = vst [vmem:[#allocation4 + $0x434] sm:$0xf] %v16738_v32  ;;  %v17913_v48 = vld [vmem:[#allocation4 + $0x2ec] ss:$36 sps:$4 sm:$0xff]  }
 0x112   : > { %v3911_v59 = vpop.f32.mrf.mxu0  ;;  %5055 = vperm.xlu1 %17672, %v5012_v31   ;;  %2276 = vst [vmem:[#allocation4 + $0x47c] sm:$0xf] %v16740_v37 }
 0x113   : > { %v19504_v60 = vadd.f32 %v4086_v55, %v3910_v54  ;;  %v4088_v61 = vpop.f32.mrf.mxu1  ;;  %v16744_v59 = vpack.c.bf16 %v2100_v52, %v2100_v52 }
 0x114   : > { %v3914_v63 = vpop.f32.mrf.mxu0  ;;  %4315 = vmatmul.mubr.bf16.gmra.mxu0 %v17893_v38 }
 0x115   : > { %v3915_v0 = vadd.f32 %v19484_v20, %v3914_v63  ;;  %v4091_v2 = vpop.f32.mrf.mxu1  ;;  %4492 = vmatmul.mubr.bf16.gmra.mxu1 %v17896_v43  ;;  %4322 = vmatprep.mubr.bf16.mxu0 %v17897_v44  ;;  %v5015_v43 = vsel %vm307_vm5, 1, %v21952_v1  ;;  %v270_v44 = vld [vmem:[%s21950_s5 + $0x28] sm:$0xff]  ;;  %v5017_v63 = vsel %vm309_vm7, 1, %v21952_v1  ;;  %2280 = vst [vmem:[#allocation4 + $0x50c] sm:$0xf] %v16744_v59  ;;  %vm325_vm7 = vcmp.gt.f32.partialorder %v289_v45, 0.5 }
 0x116   : > { %v3916_v3 = vpop.f32.mrf.mxu0  ;;  %4499 = vmatprep.mubr.bf16.mxu1 %v17900_v49  ;;  %vm306_vm6 = vcmp.gt.f32.partialorder %v270_v44, 0.5  ;;  %v2098_v49 = vld [vmem:[%s19019_s12 + $0x12e] sm:$0xff]  ;;  %5064 = vperm.xlu0 %17671, %v5015_v43   ;;  %v297_v45 = vld [vmem:[%s21950_s5 + $0x100] sm:$0xff] }
 0x117   : > { %v19510_v5 = vadd.f32 %v4091_v2, %v3915_v0  ;;  %v4093_v6 = vpop.f32.mrf.mxu1  ;;  %v5014_v55 = vsel %vm306_vm6, 1, %v21952_v1  ;;  %v16742_v56 = vpack.c.bf16 %v2098_v49, %v2098_v49  ;;  %v272_v0 = vld [vmem:[%s21950_s5 + $0x38] sm:$0xff]  ;;  %v275_v2 = vld [vmem:[%s21950_s5 + $0x50] sm:$0xff]  ;;  %v278_v44 = vld [vmem:[%s21950_s5 + $0x68] sm:$0xff] }
 0x118   : > { %v3917_v9 = vpop.f32.mrf.mxu0  ;;  %5061 = vperm.xlu1 %17672, %v5014_v55   ;;  %vm308_vm8 = vcmp.gt.f32.partialorder %v272_v0, 0.5  ;;  %vm311_vm9 = vcmp.gt.f32.partialorder %v275_v2, 0.5  ;;  %vm314_vm14 = vcmp.gt.f32.partialorder %v278_v44, 0.5  ;;  %v280_v55 = vld [vmem:[%s21950_s5 + $0x78] sm:$0xff]  ;;  %v286_v44 = vld [vmem:[%s21950_s5 + $0xa8] sm:$0xff] }
 0x119   : > { %v3918_v14 = vadd.f32 %v19484_v20, %v3917_v9  ;;  %v4094_v15 = vpop.f32.mrf.mxu1  ;;  %2278 = vst [vmem:[#allocation4 + $0x4c4] sm:$0xf] %v16742_v56  ;;  %v17912_v9 = vld [vmem:[#allocation4 + $0x2e0] ss:$36 sps:$4 sm:$0xff]   ;;  %v5022_v50 = vsel %vm314_vm14, 1, %v21952_v1  ;;  %vm316_vm0 = vcmp.gt.f32.partialorder %v280_v55, 0.5 }
 0x11a   : > { %v3919_v17 = vpop.f32.mrf.mxu0  ;;  %5070 = vperm.xlu0 %17671, %v5017_v63   ;;  %v283_v56 = vld [vmem:[%s21950_s5 + $0x90] sm:$0xff]  ;;  %v5024_v2 = vsel %vm316_vm0, 1, %v21952_v1  ;;  %vm322_vm6 = vcmp.gt.f32.partialorder %v286_v44, 0.5  ;;  %v5033_v55 = vsel %vm325_vm7, 1, %v21952_v1  ;;  %v294_v44 = vld [vmem:[%s21950_s5 + $0xe8] sm:$0xff] }
 0x11b   : > { %v19522_v21 = vadd.f32 %v4094_v15, %v3918_v14  ;;  %v4096_v22 = vpop.f32.mrf.mxu1  ;;  %v5019_v14 = vsel %vm311_vm9, 1, %v21952_v1  ;;  %v277_v17 = vld [vmem:[%s21950_s5 + $0x60] sm:$0xff]  ;;  %vm319_vm1 = vcmp.gt.f32.partialorder %v283_v56, 0.5  ;;  %v288_v56 = vld [vmem:[%s21950_s5 + $0xb8] sm:$0xff]  ;;  %vm330_vm14 = vcmp.gt.f32.partialorder %v294_v44, 0.5 }
 0x11c   : > { %v3922_v27 = vpop.f32.mrf.mxu0  ;;  %4323 = vmatmul.mubr.bf16.gmra.mxu0 %v17899_v4  ;;  %vm313_vm11 = vcmp.gt.f32.partialorder %v277_v17, 0.5  ;;  %v17932_v17 = vld [vmem:[#allocation4 + $0x3c4] ss:$36 sps:$4 sm:$0xff]  }
 0x11d   : > { %v3923_v29 = vadd.f32 %v19484_v20, %v3922_v27  ;;  %v4099_v30 = vpop.f32.mrf.mxu1  ;;  %4500 = vmatmul.mubr.bf16.gmra.mxu1 %v17902_v7  ;;  %4330 = vmatprep.mubr.bf16.mxu0 %v17903_v8  ;;  %v5016_v7 = vsel %vm308_vm8, 1, %v21952_v1  ;;  %v5021_v26 = vsel %vm313_vm11, 1, %v21952_v1  ;;  %vm324_vm8 = vcmp.gt.f32.partialorder %v288_v56, 0.5  ;;  %v17961_v44 = vld [vmem:[#allocation4 + $0x20] ss:$36 sps:$4 sm:$0xff]  }
 0x11e   : > { %v3924_v34 = vpop.f32.mrf.mxu0  ;;  %4507 = vmatprep.mubr.bf16.mxu1 %v17907_v18  ;;  %5067 = vperm.xlu1 %17672, %v5016_v7  }
 0x11f   : > { %v19536_v38 = vadd.f32 %v4099_v30, %v3923_v29  ;;  %v4101_v39 = vpop.f32.mrf.mxu1  ;;  %5076 = vperm.xlu0 %17671, %v5019_v14   ;;  %v276_v29 = vld [vmem:[%s21950_s5 + $0x58] sm:$0xff]  ;;  %v279_v30 = vld [vmem:[%s21950_s5 + $0x70] sm:$0xff]  ;;  %v282_v14 = vld [vmem:[%s21950_s5 + $0x88] sm:$0xff] }
 0x120   : > { %v3925_v47 = vpop.f32.mrf.mxu0  ;;  %vm312_vm12 = vcmp.gt.f32.partialorder %v276_v29, 0.5  ;;  %vm315_vm13 = vcmp.gt.f32.partialorder %v279_v30, 0.5  ;;  %v17918_v34 = vld [vmem:[#allocation4 + $0x328] ss:$36 sps:$4 sm:$0xff]   ;;  %vm318_vm2 = vcmp.gt.f32.partialorder %v282_v14, 0.5  ;;  %v287_v29 = vld [vmem:[%s21950_s5 + $0xb0] sm:$0xff] }
 0x121   : > { %v3926_v53 = vadd.f32 %v19484_v20, %v3925_v47  ;;  %v4102_v54 = vpop.f32.mrf.mxu1  ;;  %v5020_v36 = vsel %vm312_vm12, 1, %v21952_v1  ;;  %v5023_v43 = vsel %vm315_vm13, 1, %v21952_v1  ;;  %v17926_v47 = vld [vmem:[#allocation4 + $0x37c] ss:$36 sps:$4 sm:$0xff]   ;;  %vm323_vm5 = vcmp.gt.f32.partialorder %v287_v29, 0.5 }
 0x122   : > { %v3927_v57 = vpop.f32.mrf.mxu0  ;;  %5073 = vperm.xlu1 %17672, %v5018_v24  }
 0x123   : > { %v19551_v61 = vadd.f32 %v4102_v54, %v3926_v53  ;;  %v4104_v62 = vpop.f32.mrf.mxu1  ;;  %5082 = vperm.xlu0 %17671, %v5021_v26   ;;  %v5025_v54 = vsel %vm317_vm15, 1, %v21952_v1  ;;  %vm333_vm15 = vcmp.gt.f32.partialorder %v297_v45, 0.5  ;;  %v17980_v45 = vld [vmem:[%s21946_s1 + $0x270] sm:$0xff]  }
 0x124   : > { %v3930_v3 = vpop.f32.mrf.mxu0  ;;  %4331 = vmatmul.mubr.bf16.gmra.mxu0 %v17905_v35  ;;  %v18899_v35 = vmov 0.0   ;;  %v19609_v62 = vld [vmem:[#allocation4 + $0x4e8] ss:$36 sps:$4 sm:$0xff]   ;;  %v5041_v56 = vsel %vm333_vm15, 1, %v21952_v1 }
 0x125   : > { %v3931_v4 = vadd.f32 %v19484_v20, %v3930_v3  ;;  %v4107_v6 = vpop.f32.mrf.mxu1  ;;  %4508 = vmatmul.mubr.bf16.gmra.mxu1 %v17909_v40  ;;  %4338 = vmatprep.mubr.bf16.mxu0 %v17910_v42  ;;  %256 = vst [vmem:[#allocation2 + $0x133] sm:$0xff] %v18899_v35  ;;  %257 = vst [vmem:[#allocation2 + $0x13b] sm:$0xff] %v18899_v35  ;;  %v17921_v40 = vld [vmem:[#allocation4 + $0x330] ss:$36 sps:$4 sm:$0xff]  }
 0x126   : > { %v3932_v8 = vpop.f32.mrf.mxu0  ;;  %4515 = vmatprep.mubr.bf16.mxu1 %v17913_v48  ;;  %258 = vst [vmem:[#allocation2 + $0x143] sm:$0x1f] %v18899_v35  ;;  %253 = vst [vmem:[#allocation2] sm:$0xff] %v18899_v35  ;;  %v17923_v42 = vld [vmem:[#allocation4 + $0x374] ss:$36 sps:$4 sm:$0xff]   ;;  %5079 = vperm.xlu1 %17672, %v5020_v36  }
 0x127   : > { %v19563_v10 = vadd.f32 %v4107_v6, %v3931_v4  ;;  %v4109_v11 = vpop.f32.mrf.mxu1  ;;  %254 = vst [vmem:[#allocation2 + $0x8] sm:$0xff] %v18899_v35  ;;  %255 = vst [vmem:[#allocation2 + $0x10] sm:$0x7] %v18899_v35  ;;  %5088 = vperm.xlu0 %17671, %v5023_v43   ;;  %v17925_v4 = vld [vmem:[#allocation4 + $0x370] ss:$36 sps:$4 sm:$0xff]   ;;  %v5031_v43 = vsel %vm323_vm5, 1, %v21952_v1 }
 0x128   : > { %v3933_v15 = vpop.f32.mrf.mxu0  ;;  %259 = vst [vmem:[#allocation3] sm:$0xff] %v18899_v35  ;;  %260 = vst [vmem:[#allocation3 + $0x8] sm:$0xff] %v18899_v35  ;;  %v17928_v11 = vld [vmem:[#allocation4 + $0x378] ss:$36 sps:$4 sm:$0xff]  }
 0x129   : > { %v3934_v18 = vadd.f32 %v19484_v20, %v3933_v15  ;;  %v4110_v19 = vpop.f32.mrf.mxu1  ;;  %261 = vst [vmem:[#allocation3 + $0x10] sm:$0x7] %v18899_v35  ;;  %262 = vst [vmem:[#allocation3 + $0x133] sm:$0xff] %v18899_v35  ;;  %v285_v15 = vld [vmem:[%s21950_s5 + $0xa0] sm:$0xff] }
 0x12a   : > { %v3935_v22 = vpop.f32.mrf.mxu0  ;;  %263 = vst [vmem:[#allocation3 + $0x13b] sm:$0xff] %v18899_v35  ;;  %264 = vst [vmem:[#allocation3 + $0x143] sm:$0x1f] %v18899_v35  ;;  %5085 = vperm.xlu1 %17672, %v5022_v50   ;;  %vm321_vm3 = vcmp.gt.f32.partialorder %v285_v15, 0.5  ;;  %v17931_v35 = vld [vmem:[#allocation4 + $0x3b8] ss:$36 sps:$4 sm:$0xff]  }
 0x12b   : > { %v19575_v27 = vadd.f32 %v4110_v19, %v3934_v18  ;;  %v4112_v25 = vpop.f32.mrf.mxu1  ;;  %5094 = vperm.xlu0 %17671, %v5025_v54   ;;  %v5026_v22 = vsel %vm318_vm2, 1, %v21952_v1  ;;  %v5029_v26 = vsel %vm321_vm3, 1, %v21952_v1  ;;  %v5030_v50 = vsel %vm322_vm6, 1, %v21952_v1  ;;  %v17945_v15 = vld [vmem:[#allocation4 + $0x454] ss:$36 sps:$4 sm:$0xff]  }
 0x12c   : > { %v3938_v28 = vpop.f32.mrf.mxu0  ;;  %4339 = vmatmul.mubr.bf16.gmra.mxu0 %v17912_v9  ;;  %v7023_v63 = vld [vmem:[#allocation2 + $0x136] sm:$0xff] }
 0x12d   : > { %v3939_v31 = vadd.f32 %v19484_v20, %v3938_v28  ;;  %v4115_v32 = vpop.f32.mrf.mxu1  ;;  %4516 = vmatmul.mubr.bf16.gmra.mxu1 %v17915_v12  ;;  %4346 = vmatprep.mubr.bf16.mxu0 %v17916_v13  ;;  %v7024_v0 = vld [vmem:[#allocation2 + $0x13e] sm:$0xff]  ;;  %v17067_v6 = vpack.c.bf16 %v7023_v63, %v7023_v63  ;;  %v17929_v12 = vld [vmem:[#allocation4 + $0x3bc] ss:$36 sps:$4 sm:$0xff]   ;;  %v5027_v13 = vsel %vm319_vm1, 1, %v21952_v1 }
 0x12e   : > { %v3940_v33 = vpop.f32.mrf.mxu0  ;;  %4523 = vmatprep.mubr.bf16.mxu1 %v17919_v23  ;;  %v17068_v7 = vpack.c.bf16 %v7024_v0, %v7024_v0  ;;  %5091 = vperm.xlu1 %17672, %v5024_v2   ;;  %v284_v28 = vld [vmem:[%s21950_s5 + $0x98] sm:$0xff]  ;;  %v5032_v0 = vsel %vm324_vm8, 1, %v21952_v1 }
 0x12f   : > { %v19587_v37 = vadd.f32 %v4115_v32, %v3939_v31  ;;  %v4117_v39 = vpop.f32.mrf.mxu1  ;;  %7203 = vst [vmem:[#allocation4 + $0x4e8] sm:$0xf] %v17067_v6  ;;  %5100 = vperm.xlu0 %17671, %v5027_v13   ;;  %vm320_vm4 = vcmp.gt.f32.partialorder %v284_v28, 0.5  ;;  %v293_v13 = vld [vmem:[%s21950_s5 + $0xe0] sm:$0xff]  ;;  %v295_v28 = vld [vmem:[%s21950_s5 + $0xf0] sm:$0xff] }
 0x130   : > { %v3941_v46 = vpop.f32.mrf.mxu0  ;;  %7204 = vst [vmem:[#allocation4 + $0x50c] sm:$0xf] %v17068_v7  ;;  %v5028_v33 = vsel %vm320_vm4, 1, %v21952_v1  ;;  %v17941_v7 = vld [vmem:[#allocation4 + $0x408] ss:$36 sps:$4 sm:$0xff]   ;;  %vm329_vm11 = vcmp.gt.f32.partialorder %v293_v13, 0.5 }
 0x131   : > { %v3942_v48 = vadd.f32 %v19484_v20, %v3941_v46  ;;  %v4118_v49 = vpop.f32.mrf.mxu1  ;;  %vm331_vm13 = vcmp.gt.f32.partialorder %v295_v28, 0.5  ;;  %v17979_v13 = vld [vmem:[%s21946_s1 + $0x278] sm:$0xff]  }
 0x132   : > { %v3943_v51 = vpop.f32.mrf.mxu0  ;;  %5097 = vperm.xlu1 %17672, %v5026_v22   ;;  %8799 = vmatpush1.bf16.msra.mxu1 %v17979_v13 }
 0x133   : > { %v19599_v52 = vadd.f32 %v4118_v49, %v3942_v48  ;;  %v4120_v53 = vpop.f32.mrf.mxu1  ;;  %5106 = vperm.xlu0 %17671, %v5029_v26   ;;  %v292_v26 = vld [vmem:[%s21950_s5 + $0xd8] sm:$0xff]  ;;  %8800 = vmatprep.subr.bf16.mxu1 %v21952_v1 }
 0x134   : > { %v3946_v57 = vpop.f32.mrf.mxu0  ;;  %4347 = vmatmul.mubr.bf16.gmra.mxu0 %v17918_v34  ;;  %vm328_vm12 = vcmp.gt.f32.partialorder %v292_v26, 0.5 }
 0x135   : > { %v3947_v58 = vadd.f32 %v19484_v20, %v3946_v57  ;;  %v4123_v59 = vpop.f32.mrf.mxu1  ;;  %4524 = vmatmul.mubr.bf16.gmra.mxu1 %v17921_v40  ;;  %4354 = vmatprep.mubr.bf16.mxu0 %v17923_v42  ;;  %v17934_v40 = vld [vmem:[#allocation4 + $0x3c0] ss:$36 sps:$4 sm:$0xff]  }
 0x136   : > { %v3948_v3 = vpop.f32.mrf.mxu0  ;;  %4531 = vmatprep.mubr.bf16.mxu1 %v17926_v47  ;;  %v17936_v42 = vld [vmem:[#allocation4 + $0x404] ss:$36 sps:$4 sm:$0xff]   ;;  %5103 = vperm.xlu1 %17672, %v5028_v33   ;;  %v17939_v47 = vld [vmem:[#allocation4 + $0x40c] ss:$36 sps:$4 sm:$0xff]  }
 0x137   : > { %v19612_v8 = vadd.f32 %v4123_v59, %v3947_v58  ;;  %v4125_v9 = vpop.f32.mrf.mxu1  ;;  %5112 = vperm.xlu0 %17671, %v5031_v43   ;;  %v291_v57 = vld [vmem:[%s21950_s5 + $0xd0] sm:$0xff]  ;;  %v5039_v43 = vsel %vm331_vm13, 1, %v21952_v1  ;;  %8801 = vmatpush1.bf16.msra.mxu1 %v17980_v45 }
 0x138   : > { %v3949_v16 = vpop.f32.mrf.mxu0  ;;  %vm327_vm9 = vcmp.gt.f32.partialorder %v291_v57, 0.5  ;;  %v17938_v3 = vld [vmem:[#allocation4 + $0x400] ss:$36 sps:$4 sm:$0xff]   ;;  %v17942_v9 = vld [vmem:[#allocation4 + $0x44c] ss:$36 sps:$4 sm:$0xff]   ;;  %8802 = vmatprep.subr.bf16.mxu1 %v21952_v1 }
 0x139   : > { %v3950_v18 = vadd.f32 %v19484_v20, %v3949_v16  ;;  %v4126_v19 = vpop.f32.mrf.mxu1  ;;  %v296_v57 = vld [vmem:[%s21950_s5 + $0xf8] sm:$0xff] }
 0x13a   : > { %v3951_v23 = vpop.f32.mrf.mxu0  ;;  %5109 = vperm.xlu1 %17672, %v5030_v50   ;;  %v5038_v50 = vsel %vm330_vm14, 1, %v21952_v1  ;;  %vm332_vm0 = vcmp.gt.f32.partialorder %v296_v57, 0.5 }
 0x13b   : > { %v19624_v24 = vadd.f32 %v4126_v19, %v3950_v18  ;;  %v4128_v25 = vpop.f32.mrf.mxu1  ;;  %5118 = vperm.xlu0 %17671, %v5033_v55  }
 0x13c   : > { %v3954_v30 = vpop.f32.mrf.mxu0  ;;  %4355 = vmatmul.mubr.bf16.gmra.mxu0 %v17925_v4  ;;  %v5037_v25 = vsel %vm329_vm11, 1, %v21952_v1 }
 0x13d   : > { %v3955_v31 = vadd.f32 %v19484_v20, %v3954_v30  ;;  %v4131_v32 = vpop.f32.mrf.mxu1  ;;  %4532 = vmatmul.mubr.bf16.gmra.mxu1 %v17928_v11  ;;  %4362 = vmatprep.mubr.bf16.mxu0 %v17929_v12  ;;  %v5035_v11 = vsel %vm327_vm9, 1, %v21952_v1  ;;  %v290_v12 = vld [vmem:[%s21950_s5 + $0xc8] sm:$0xff] }
 0x13e   : > { %v3956_v34 = vpop.f32.mrf.mxu0  ;;  %4539 = vmatprep.mubr.bf16.mxu1 %v17932_v17  ;;  %5115 = vperm.xlu1 %17672, %v5032_v0   ;;  %vm326_vm10 = vcmp.gt.f32.partialorder %v290_v12, 0.5  ;;  %v17955_v12 = vld [vmem:[#allocation4 + $0x4dc] ss:$36 sps:$4 sm:$0xff]  }
 0x13f   : > { %v19635_v36 = vadd.f32 %v4131_v32, %v3955_v31  ;;  %v4133_v39 = vpop.f32.mrf.mxu1  ;;  %v5034_v18 = vsel %vm326_vm10, 1, %v21952_v1  ;;  %5124 = vperm.xlu0 %17671, %v5035_v11   ;;  %v5036_v32 = vsel %vm328_vm12, 1, %v21952_v1  ;;  %v17944_v34 = vld [vmem:[#allocation4 + $0x448] ss:$36 sps:$4 sm:$0xff]   ;;  %v17954_v11 = vld [vmem:[#allocation4 + $0x498] ss:$36 sps:$4 sm:$0xff]  }
 0x140   : > { %v3957_v46 = vpop.f32.mrf.mxu0 }
 0x141   : > { %v3958_v48 = vadd.f32 %v19484_v20, %v3957_v46  ;;  %v4134_v49 = vpop.f32.mrf.mxu1 }
 0x142   : > { %v3959_v51 = vpop.f32.mrf.mxu0  ;;  %5121 = vperm.xlu1 %17672, %v5034_v18  }
 0x143   : > { %v19646_v53 = vadd.f32 %v4134_v49, %v3958_v48  ;;  %v4136_v54 = vpop.f32.mrf.mxu1  ;;  %5130 = vperm.xlu0 %17671, %v5037_v25  }
 0x144   : > { %v3962_v58 = vpop.f32.mrf.mxu0  ;;  %4363 = vmatmul.mubr.bf16.gmra.mxu0 %v17931_v35 }
 0x145   : > { %v3963_v59 = vadd.f32 %v19484_v20, %v3962_v58  ;;  %v4139_v63 = vpop.f32.mrf.mxu1  ;;  %4540 = vmatmul.mubr.bf16.gmra.mxu1 %v17934_v40  ;;  %4370 = vmatprep.mubr.bf16.mxu0 %v17936_v42  ;;  %v17947_v40 = vld [vmem:[#allocation4 + $0x450] ss:$36 sps:$4 sm:$0xff]   ;;  %v299_v58 = vld [vmem:[%s21950_s5 + $0x110] sm:$0xff] }
 0x146   : > { %v3964_v2 = vpop.f32.mrf.mxu0  ;;  %4547 = vmatprep.mubr.bf16.mxu1 %v17939_v47  ;;  %v17949_v42 = vld [vmem:[#allocation4 + $0x494] ss:$36 sps:$4 sm:$0xff]   ;;  %5127 = vperm.xlu1 %17672, %v5036_v32   ;;  %v17952_v47 = vld [vmem:[#allocation4 + $0x49c] ss:$36 sps:$4 sm:$0xff]   ;;  %vm335_vm1 = vcmp.gt.f32.partialorder %v299_v58, 0.5 }
 0x147   : > { %v19657_v4 = vadd.f32 %v4139_v63, %v3963_v59  ;;  %v4141_v6 = vpop.f32.mrf.mxu1  ;;  %5136 = vperm.xlu0 %17671, %v5039_v43   ;;  %v19702_v59 = vld [vmem:[%s21947_s2] ss:$0 sm:$0xff]  ;;  %v5040_v2 = vsel %vm332_vm0, 1, %v21952_v1  ;;  %v17960_v43 = vld [vmem:[#allocation4 + $0x4e0] ss:$36 sps:$4 sm:$0xff]  }
 0x148   : > { %v3965_v14 = vpop.f32.mrf.mxu0  ;;  %v17951_v6 = vld [vmem:[#allocation4 + $0x490] ss:$36 sps:$4 sm:$0xff]  }
 0x149   : > { %v3966_v16 = vadd.f32 %v19484_v20, %v3965_v14  ;;  %v4142_v17 = vpop.f32.mrf.mxu1  ;;  %v5043_v14 = vsel %vm335_vm1, 1, %v21952_v1 }
 0x14a   : > { %v3967_v19 = vpop.f32.mrf.mxu0  ;;  %5133 = vperm.xlu1 %17672, %v5038_v50  }
 0x14b   : > { %v19668_v22 = vadd.f32 %v4142_v17, %v3966_v16  ;;  %v4144_v23 = vpop.f32.mrf.mxu1  ;;  %5142 = vperm.xlu0 %17671, %v5041_v56   ;;  %v17958_v17 = vld [vmem:[#allocation4 + $0x4e4] ss:$36 sps:$4 sm:$0xff]  }
 0x14c   : > { %v3970_v29 = vpop.f32.mrf.mxu0  ;;  %4371 = vmatmul.mubr.bf16.gmra.mxu0 %v17938_v3 }
 0x14d   : > { %v3971_v30 = vadd.f32 %v19484_v20, %v3970_v29  ;;  %v4147_v31 = vpop.f32.mrf.mxu1  ;;  %4548 = vmatmul.mubr.bf16.gmra.mxu1 %v17941_v7  ;;  %4378 = vmatprep.mubr.bf16.mxu0 %v17942_v9  ;;  %v300_v29 = vld [vmem:[%s21950_s5 + $0x118] sm:$0xff] }
 0x14e   : > { %v3972_v33 = vpop.f32.mrf.mxu0  ;;  %4555 = vmatprep.mubr.bf16.mxu1 %v17945_v15  ;;  %5139 = vperm.xlu1 %17672, %v5040_v2   ;;  %v298_v15 = vld [vmem:[%s21950_s5 + $0x108] sm:$0xff]  ;;  %vm336_vm3 = vcmp.gt.f32.partialorder %v300_v29, 0.5  ;;  %v17963_v2 = vld [vmem:[#allocation4 + $0xb0] ss:$36 sps:$4 sm:$0xff]  }
 0x14f   : > { %v19679_v35 = vadd.f32 %v4147_v31, %v3971_v30  ;;  %v4149_v39 = vpop.f32.mrf.mxu1  ;;  %vm334_vm2 = vcmp.gt.f32.partialorder %v298_v15, 0.5  ;;  %5148 = vperm.xlu0 %17671, %v5043_v14   ;;  %v5044_v33 = vsel %vm336_vm3, 1, %v21952_v1 }
 0x150   : > { %v3973_v46 = vpop.f32.mrf.mxu0  ;;  %v5042_v23 = vsel %vm334_vm2, 1, %v21952_v1  ;;  %v17957_v39 = vld [vmem:[#allocation4 + $0x4d8] ss:$36 sps:$4 sm:$0xff]  }
 0x151   : > { %v3974_v48 = vadd.f32 %v19484_v20, %v3973_v46  ;;  %v4150_v49 = vpop.f32.mrf.mxu1 }
 0x152   : > { %v3975_v51 = vpop.f32.mrf.mxu0  ;;  %5145 = vperm.xlu1 %17672, %v5042_v23  }
 0x153   : > { %v19690_v54 = vadd.f32 %v4150_v49, %v3974_v48  ;;  %v4152_v55 = vpop.f32.mrf.mxu1 }
 0x154   : > { %v3978_v20 = vpop.f32.mrf.mxu0  ;;  %4379 = vmatmul.mubr.bf16.gmra.mxu0 %v17944_v34 }
 0x155   : > { %v3979_v63 = vadd.f32 %v19702_v59, %v3978_v20  ;;  %v4155_v0 = vpop.f32.mrf.mxu1  ;;  %4556 = vmatmul.mubr.bf16.gmra.mxu1 %v17947_v40  ;;  %4386 = vmatprep.mubr.bf16.mxu0 %v17949_v42  ;;  %v17962_v20 = vld [vmem:[#allocation4 + $0x68] ss:$36 sps:$4 sm:$0xff]  }
 0x156   : > { %v3980_v3 = vpop.f32.mrf.mxu0  ;;  %4563 = vmatprep.mubr.bf16.mxu1 %v17952_v47  ;;  %5151 = vperm.xlu1 %17672, %v5044_v33  }
 0x157   : > { %v19706_v7 = vadd.f32 %v4155_v0, %v3979_v63  ;;  %v4157_v9 = vpop.f32.mrf.mxu1 }
 0x158   : > { %v3981_v16 = vpop.f32.mrf.mxu0 }
 0x159   : > { %v3982_v18 = vadd.f32 %v19702_v59, %v3981_v16  ;;  %v4158_v19 = vpop.f32.mrf.mxu1 }
 0x15a   : > { %v3983_v25 = vpop.f32.mrf.mxu0 }
 0x15b   : > { %v19719_v26 = vadd.f32 %v4158_v19, %v3982_v18  ;;  %v4160_v28 = vpop.f32.mrf.mxu1  ;;  %v17964_v19 = vld [vmem:[#allocation4 + $0xf8] ss:$36 sps:$4 sm:$0xff]  }
 0x15c   : > { %v3986_v30 = vpop.f32.mrf.mxu0  ;;  %4387 = vmatmul.mubr.bf16.gmra.mxu0 %v17951_v6  ;;  %v17965_v28 = vld [vmem:[#allocation4 + $0x140] ss:$36 sps:$4 sm:$0xff]  }
 0x15d   : > { %v3987_v31 = vadd.f32 %v19702_v59, %v3986_v30  ;;  %v4163_v32 = vpop.f32.mrf.mxu1  ;;  %4564 = vmatmul.mubr.bf16.gmra.mxu1 %v17954_v11  ;;  %4394 = vmatprep.mubr.bf16.mxu0 %v17955_v12  ;;  %v17981_v11 = vld [vmem:[%s21946_s1 + $0x268] sm:$0xff]  }
 0x15e   : > { %v3988_v34 = vpop.f32.mrf.mxu0  ;;  %4571 = vmatprep.mubr.bf16.mxu1 %v17958_v17  ;;  %8803 = vmatpush1.bf16.msra.mxu1 %v17981_v11  ;;  %v17968_v11 = vld [vmem:[#allocation4 + $0x218] ss:$36 sps:$4 sm:$0xff]  }
 0x15f   : > { %v19726_v40 = vadd.f32 %v4163_v32, %v3987_v31  ;;  %v4165_v42 = vpop.f32.mrf.mxu1  ;;  %8804 = vmatprep.subr.bf16.mxu1 %v21952_v1  ;;  %v17982_v32 = vld [vmem:[%s21946_s1 + $0x260] sm:$0xff]  }
 0x160   : > { %v3989_v46 = vpop.f32.mrf.mxu0 }
 0x161   : > { %v3990_v47 = vadd.f32 %v19702_v59, %v3989_v46  ;;  %v4166_v48 = vpop.f32.mrf.mxu1  ;;  %v17966_v46 = vld [vmem:[#allocation4 + $0x188] ss:$36 sps:$4 sm:$0xff]  }
 0x162   : > { %v3991_v49 = vpop.f32.mrf.mxu0  ;;  %8805 = vmatpush1.bf16.msra.mxu1 %v17982_v32 }
 0x163   : > { %v19733_v50 = vadd.f32 %v4166_v48, %v3990_v47  ;;  %v4168_v51 = vpop.f32.mrf.mxu1  ;;  %8806 = vmatprep.subr.bf16.mxu1 %v21952_v1  ;;  %v17967_v49 = vld [vmem:[#allocation4 + $0x1d0] ss:$36 sps:$4 sm:$0xff]  }
 0x164   : > { %v3994_v55 = vpop.f32.mrf.mxu0  ;;  %4395 = vmatmul.mubr.bf16.gmra.mxu0 %v17957_v39 }
 0x165   : > { %v3995_v56 = vadd.f32 %v19702_v59, %v3994_v55  ;;  %v4171_v57 = vpop.f32.mrf.mxu1  ;;  %4572 = vmatmul.mubr.bf16.gmra.mxu1 %v17960_v43  ;;  %17487 = vmatprep.mubr.bf16.mxu0 %v17961_v44 }
 0x166   : > { %v3996_v58 = vpop.f32.mrf.mxu0 }
 0x167   : > { %v19736_v63 = vadd.f32 %v4171_v57, %v3995_v56  ;;  %v4173_v0 = vpop.f32.mrf.mxu1 }
 0x168   : > { %v3997_v3 = vpop.f32.mrf.mxu0  ;;  %v17983_v0 = vld [vmem:[%s21946_s1 + $0x258] sm:$0xff]  }
 0x169   : > { %v3998_v6 = vadd.f32 %v19702_v59, %v3997_v3  ;;  %v4174_v9 = vpop.f32.mrf.mxu1  ;;  %8807 = vmatpush1.bf16.msra.mxu1 %v17983_v0  ;;  %v17985_v0 = vld [vmem:[%s21946_s1 + $0x248] sm:$0xff]  }
 0x16a   : > { %v3999_v12 = vpop.f32.mrf.mxu0  ;;  %8808 = vmatprep.subr.bf16.mxu1 %v21952_v1 }
 0x16b   : > { %v19742_v13 = vadd.f32 %v4174_v9, %v3998_v6  ;;  %v4176_v14 = vpop.f32.mrf.mxu1 }
 0x16c   : > { %v4002_v15 = vpop.f32.mrf.mxu0  ;;  %17488 = vmatmul.mubr.bf16.vlgmr.msra.gmra.mxu0 %v17962_v20 }
 0x16d   : > { %v4003_v16 = vadd.f32 %v19702_v59, %v4002_v15  ;;  %v4179_v17 = vpop.f32.mrf.mxu1  ;;  %17491 = vmatprep.mubr.bf16.mxu0 %v17963_v2  ;;  %v17969_v15 = vld [vmem:[#allocation4 + $0x260] ss:$36 sps:$4 sm:$0xff]  }
 0x16e   : > { %v4004_v18 = vpop.f32.mrf.mxu0 }
 0x16f   : > { %v19746_v23 = vadd.f32 %v4179_v17, %v4003_v16  ;;  %v4181_v25 = vpop.f32.mrf.mxu1 }
 0x170   : > { %v4005_v29 = vpop.f32.mrf.mxu0 }
 0x171   : > { %v4006_v30 = vadd.f32 %v19702_v59, %v4005_v29  ;;  %v4182_v31 = vpop.f32.mrf.mxu1  ;;  %v17984_v29 = vld [vmem:[%s21946_s1 + $0x250] sm:$0xff]  }
 0x172   : > { %v4007_v33 = vpop.f32.mrf.mxu0  ;;  %8809 = vmatpush1.bf16.msra.mxu1 %v17984_v29 }
 0x173   : > { %v19752_v34 = vadd.f32 %v4182_v31, %v4006_v30  ;;  %v4184_v39 = vpop.f32.mrf.mxu1  ;;  %8810 = vmatprep.subr.bf16.mxu1 %v21952_v1 }
 0x174   : > { %v4010_v42 = vpop.f32.mrf.mxu0  ;;  %17492 = vmatmul.mubr.bf16.gmra.mxu0 %v17964_v19  ;;  %v17970_v39 = vld [vmem:[#allocation4 + $0x2a8] ss:$36 sps:$4 sm:$0xff]  }
 0x175   : > { %v4011_v43 = vadd.f32 %v19702_v59, %v4010_v42  ;;  %v4187_v44 = vpop.f32.mrf.mxu1  ;;  %17495 = vmatprep.mubr.bf16.mxu0 %v17965_v28 }
 0x176   : > { %v4012_v45 = vpop.f32.mrf.mxu0  ;;  %8811 = vmatpush1.bf16.msra.mxu1 %v17985_v0 }
 0x177   : > { %v19756_v47 = vadd.f32 %v4187_v44, %v4011_v43  ;;  %v4189_v48 = vpop.f32.mrf.mxu1  ;;  %v17971_v44 = vld [vmem:[#allocation4 + $0x2f0] ss:$36 sps:$4 sm:$0xff]   ;;  %8812 = vmatprep.subr.bf16.mxu1 %v21952_v1 }
 0x178   : > { %v4013_v51 = vpop.f32.mrf.mxu0 }
 0x179   : > { %v4014_v55 = vadd.f32 %v19702_v59, %v4013_v51  ;;  %v4190_v56 = vpop.f32.mrf.mxu1 }
 0x17a   : > { %v4015_v57 = vpop.f32.mrf.mxu0 }
 0x17b   : > { %v19759_v58 = vadd.f32 %v4190_v56, %v4014_v55  ;;  %v4192_v20 = vpop.f32.mrf.mxu1 }
 0x17c   : > { %v4018_v2 = vpop.f32.mrf.mxu0  ;;  %17496 = vmatmul.mubr.bf16.gmra.mxu0 %v17966_v46 }
 0x17d   : > { %v4019_v3 = vadd.f32 %v19702_v59, %v4018_v2  ;;  %v4195_v6 = vpop.f32.mrf.mxu1  ;;  %17499 = vmatprep.mubr.bf16.mxu0 %v17967_v49 }
 0x17e   : > { %v4020_v9 = vpop.f32.mrf.mxu0 }
 0x17f   : > { %v19766_v12 = vadd.f32 %v4195_v6, %v4019_v3  ;;  %v4197_v14 = vpop.f32.mrf.mxu1  ;;  %v17972_v3 = vld [vmem:[#allocation4 + $0x338] ss:$36 sps:$4 sm:$0xff]  }
 0x180   : > { %v4021_v16 = vpop.f32.mrf.mxu0 }
 0x181   : > { %v4022_v17 = vadd.f32 %v19702_v59, %v4021_v16  ;;  %v4198_v18 = vpop.f32.mrf.mxu1 }
 0x182   : > { %v4023_v19 = vpop.f32.mrf.mxu0 }
 0x183   : > { %v19769_v25 = vadd.f32 %v4198_v18, %v4022_v17  ;;  %v4200_v28 = vpop.f32.mrf.mxu1 }
 0x184   : > { %v4026_v30 = vpop.f32.mrf.mxu0  ;;  %17500 = vmatmul.mubr.bf16.gmra.mxu0 %v17968_v11  ;;  %v17973_v11 = vld [vmem:[#allocation4 + $0x380] ss:$36 sps:$4 sm:$0xff]  }
 0x185   : > { %v4027_v31 = vadd.f32 %v19702_v59, %v4026_v30  ;;  %v4203_v32 = vpop.f32.mrf.mxu1  ;;  %17503 = vmatprep.mubr.bf16.mxu0 %v17969_v15 }
 0x186   : > { %v4028_v33 = vpop.f32.mrf.mxu0 }
 0x187   : > { %v19776_v42 = vadd.f32 %v4203_v32, %v4027_v31  ;;  %v4205_v43 = vpop.f32.mrf.mxu1  ;;  %v17986_v31 = vld [vmem:[%s21946_s1 + $0x240] sm:$0xff]  }
 0x188   : > { %v4029_v45 = vpop.f32.mrf.mxu0  ;;  %8813 = vmatpush1.bf16.msra.mxu1 %v17986_v31 }
 0x189   : > { %v4030_v46 = vadd.f32 %v19702_v59, %v4029_v45  ;;  %v4206_v48 = vpop.f32.mrf.mxu1  ;;  %8814 = vmatprep.subr.bf16.mxu1 %v21952_v1 }
 0x18a   : > { %v4031_v49 = vpop.f32.mrf.mxu0 }
 0x18b   : > { %v19779_v51 = vadd.f32 %v4206_v48, %v4030_v46  ;;  %v4208_v55 = vpop.f32.mrf.mxu1  ;;  %v17975_v48 = vld [vmem:[#allocation4 + $0x410] ss:$36 sps:$4 sm:$0xff]  }
 0x18c   : > { %v4034_v56 = vpop.f32.mrf.mxu0  ;;  %17504 = vmatmul.mubr.bf16.gmra.mxu0 %v17970_v39 }
 0x18d   : > { %v4035_v57 = vadd.f32 %v19702_v59, %v4034_v56  ;;  %v4211_v20 = vpop.f32.mrf.mxu1  ;;  %17507 = vmatprep.mubr.bf16.mxu0 %v17971_v44  ;;  %v17974_v44 = vld [vmem:[#allocation4 + $0x3c8] ss:$36 sps:$4 sm:$0xff]  }
 0x18e   : > { %v4036_v2 = vpop.f32.mrf.mxu0 }
 0x18f   : > { %v19785_v6 = vadd.f32 %v4211_v20, %v4035_v57  ;;  %v4213_v9 = vpop.f32.mrf.mxu1 }
 0x190   : > { %v4037_v14 = vpop.f32.mrf.mxu0 }
 0x191   : > { %v4038_v15 = vadd.f32 %v19702_v59, %v4037_v14  ;;  %v4214_v16 = vpop.f32.mrf.mxu1  ;;  %v17976_v14 = vld [vmem:[#allocation4 + $0x458] ss:$36 sps:$4 sm:$0xff]  }
 0x192   : > { %v4039_v17 = vpop.f32.mrf.mxu0 }
 0x193   : > { %v19789_v18 = vadd.f32 %v4214_v16, %v4038_v15  ;;  %v4216_v19 = vpop.f32.mrf.mxu1  ;;  %v17977_v17 = vld [vmem:[#allocation4 + $0x4a0] ss:$36 sps:$4 sm:$0xff]  }
 0x194   : > { %v4042_v28 = vpop.f32.mrf.mxu0  ;;  %17508 = vmatmul.mubr.bf16.gmra.mxu0 %v17972_v3 }
 0x195   : > { %v4043_v29 = vadd.f32 %v19702_v59, %v4042_v28  ;;  %v4219_v30 = vpop.f32.mrf.mxu1  ;;  %17511 = vmatprep.mubr.bf16.mxu0 %v17973_v11 }
 0x196   : > { %v4044_v32 = vpop.f32.mrf.mxu0 }
 0x197   : > { %v19795_v33 = vadd.f32 %v4219_v30, %v4043_v29  ;;  %v4221_v39 = vpop.f32.mrf.mxu1 }
 0x198   : > { %v4045_v43 = vpop.f32.mrf.mxu0 }
 0x199   : > { %v4046_v45 = vadd.f32 %v19702_v59, %v4045_v43  ;;  %v4222_v46 = vpop.f32.mrf.mxu1  ;;  %v17987_v59 = vld [vmem:[%s21946_s1 + $0x2b8] sm:$0xff]  }
 0x19a   : > { %v4047_v49 = vpop.f32.mrf.mxu0  ;;  %8815 = vmatpush2.bf16.msra.mxu1 %v17987_v59 }
 0x19b   : > { %v19799_v55 = vadd.f32 %v4222_v46, %v4046_v45  ;;  %v4224_v56 = vpop.f32.mrf.mxu1  ;;  %8816 = vmatprep.subr.bf16.mxu1 %v21952_v1 }
 0x19c   : > { %v4260_v57 = vpop.f32.mrf.mxu0  ;;  %17512 = vmatmul.mubr.bf16.gmra.mxu0 %v17974_v44  ;;  %v17989_v56 = vld [vmem:[%s21946_s1 + $0x2f8] sm:$0xff]  }
 0x19d   : > { %v4261_v20 = vadd.f32 %v4260_v57, %v19493_v41  ;;  %v4437_v0 = vpop.f32.mrf.mxu1  ;;  %17515 = vmatprep.mubr.bf16.mxu0 %v17975_v48  ;;  %8976 = vmatpush1.bf16.msra.mxu0 %v17989_v56 }
 0x19e   : > { %v4262_v2 = vpop.f32.mrf.mxu0  ;;  %8977 = vmatprep.subr.bf16.mxu0 %v21952_v1 }
 0x19f   : > { %v19802_v3 = vadd.f32 %v4437_v0, %v4261_v20  ;;  %v4439_v9 = vpop.f32.mrf.mxu1 }
 0x1a0   : > { %v4263_v11 = vpop.f32.mrf.mxu0 }
 0x1a1   : > { %v4264_v15 = vadd.f32 %v4263_v11, %v19504_v60  ;;  %v4440_v16 = vpop.f32.mrf.mxu1  ;;  %v17988_v60 = vld [vmem:[%s21946_s1 + $0x2b0] sm:$0xff]  }
 0x1a2   : > { %v4265_v19 = vpop.f32.mrf.mxu0  ;;  %8817 = vmatpush2.bf16.msra.mxu1 %v17988_v60 }
 0x1a3   : > { %v19809_v41 = vadd.f32 %v4440_v16, %v4264_v15  ;;  %v4442_v28 = vpop.f32.mrf.mxu1  ;;  %8818 = vmatprep.subr.bf16.mxu1 %v21952_v1  ;;  %v17991_v15 = vld [vmem:[%s21946_s1 + $0x2f0] sm:$0xff]  }
 0x1a4   : > { %v4268_v29 = vpop.f32.mrf.mxu0  ;;  %17516 = vmatmul.mubr.bf16.gmra.mxu0 %v17976_v14 }
 0x1a5   : > { %v4269_v30 = vadd.f32 %v4268_v29, %v19510_v5  ;;  %v4445_v31 = vpop.f32.mrf.mxu1  ;;  %17519 = vmatprep.mubr.bf16.mxu0 %v17977_v17  ;;  %8978 = vmatpush1.bf16.msra.mxu0 %v17991_v15 }
 0x1a6   : > { %v4270_v32 = vpop.f32.mrf.mxu0  ;;  %8979 = vmatprep.subr.bf16.mxu0 %v21952_v1 }
 0x1a7   : > { %v19812_v39 = vadd.f32 %v4445_v31, %v4269_v30  ;;  %v4447_v43 = vpop.f32.mrf.mxu1 }
 0x1a8   : > { %v4271_v44 = vpop.f32.mrf.mxu0 }
 0x1a9   : > { %v4272_v45 = vadd.f32 %v4271_v44, %v19522_v21  ;;  %v4448_v46 = vpop.f32.mrf.mxu1 }
 0x1aa   : > { %v4273_v48 = vpop.f32.mrf.mxu0 }
 0x1ab   : > { %v19819_v49 = vadd.f32 %v4448_v46, %v4272_v45  ;;  %v4450_v5 = vpop.f32.mrf.mxu1 }
 0x1ac   : > { %v4276_v57 = vpop.f32.mrf.mxu0  ;;  %17520 = vmatmul.mubr.bf16.gmra.mxu0 %v19609_v62 }
 0x1ad   : > { %v4277_v20 = vadd.f32 %v4276_v57, %v19536_v38  ;;  %v4453_v0 = vpop.f32.mrf.mxu1 }
 0x1ae   : > { %v4278_v21 = vpop.f32.mrf.mxu0 }
 0x1af   : > { %v19827_v2 = vadd.f32 %v4453_v0, %v4277_v20  ;;  %v4455_v9 = vpop.f32.mrf.mxu1 }
 0x1b0   : > { %v4279_v59 = vpop.f32.mrf.mxu0 }
 0x1b1   : > { %v4280_v11 = vadd.f32 %v4279_v59, %v19551_v61  ;;  %v4456_v14 = vpop.f32.mrf.mxu1  ;;  %v17992_v61 = vld [vmem:[%s21946_s1 + $0x2e8] sm:$0xff]  }
 0x1b2   : > { %v4281_v16 = vpop.f32.mrf.mxu0  ;;  %8980 = vmatpush1.bf16.msra.mxu0 %v17992_v61 }
 0x1b3   : > { %v19833_v62 = vadd.f32 %v4456_v14, %v4280_v11  ;;  %v4458_v38 = vpop.f32.mrf.mxu1  ;;  %8981 = vmatprep.subr.bf16.mxu0 %v21952_v1 }
 0x1b4   : > { %v4284_v17 = vpop.f32.mrf.mxu0 }
 0x1b5   : > { %v4285_v19 = vadd.f32 %v4284_v17, %v19563_v10  ;;  %v4461_v28 = vpop.f32.mrf.mxu1  ;;  %v17994_v10 = vld [vmem:[%s21946_s1 + $0x2e0] sm:$0xff]  }
 0x1b6   : > { %v4286_v29 = vpop.f32.mrf.mxu0  ;;  %8982 = vmatpush1.bf16.msra.mxu0 %v17994_v10  ;;  %v17993_v10 = vld [vmem:[%s21946_s1 + $0x2a0] sm:$0xff]  }
 0x1b7   : > { %v19840_v30 = vadd.f32 %v4461_v28, %v4285_v19  ;;  %v4463_v31 = vpop.f32.mrf.mxu1  ;;  %8983 = vmatprep.subr.bf16.mxu0 %v21952_v1  ;;  %v17990_v19 = vld [vmem:[%s21946_s1 + $0x2a8] sm:$0xff]  }
 0x1b8   : > { %v4287_v32 = vpop.f32.mrf.mxu0  ;;  %8819 = vmatpush2.bf16.msra.mxu1 %v17990_v19 }
 0x1b9   : > { %v4288_v43 = vadd.f32 %v4287_v32, %v19575_v27  ;;  %v4464_v60 = vpop.f32.mrf.mxu1  ;;  %v17995_v27 = vld [vmem:[%s21946_s1 + $0x2d8] sm:$0xff]   ;;  %8820 = vmatprep.subr.bf16.mxu1 %v21952_v1 }
 0x1ba   : > { %v4289_v44 = vpop.f32.mrf.mxu0  ;;  %8984 = vmatpush1.bf16.msra.mxu0 %v17995_v27 }
 0x1bb   : > { %v19847_v45 = vadd.f32 %v4464_v60, %v4288_v43  ;;  %v4466_v46 = vpop.f32.mrf.mxu1  ;;  %8985 = vmatprep.subr.bf16.mxu0 %v21952_v1  ;;  %v17998_v43 = vld [vmem:[%s21946_s1 + $0x2c8] sm:$0xff]  }
 0x1bc   : > { %v4292_v48 = vpop.f32.mrf.mxu0  ;;  %8821 = vmatpush2.bf16.msra.mxu1 %v17993_v10 }
 0x1bd   : > { %v4293_v5 = vadd.f32 %v4292_v48, %v19587_v37  ;;  %v4469_v56 = vpop.f32.mrf.mxu1  ;;  %8822 = vmatprep.subr.bf16.mxu1 %v21952_v1 }
 0x1be   : > { %v4294_v57 = vpop.f32.mrf.mxu0 }
 0x1bf   : > { %v19854_v20 = vadd.f32 %v4469_v56, %v4293_v5  ;;  %v4471_v0 = vpop.f32.mrf.mxu1 }
 0x1c0   : > { %v4295_v21 = vpop.f32.mrf.mxu0 }
 0x1c1   : > { %v4296_v9 = vadd.f32 %v4295_v21, %v19599_v52  ;;  %v4472_v59 = vpop.f32.mrf.mxu1  ;;  %v17997_v52 = vld [vmem:[%s21946_s1 + $0x2d0] sm:$0xff]  }
 0x1c2   : > { %v4297_v11 = vpop.f32.mrf.mxu0  ;;  %8986 = vmatpush1.bf16.msra.mxu0 %v17997_v52 }
 0x1c3   : > { %v19858_v37 = vadd.f32 %v4472_v59, %v4296_v9  ;;  %v4474_v14 = vpop.f32.mrf.mxu1  ;;  %8987 = vmatprep.subr.bf16.mxu0 %v21952_v1 }
 0x1c4   : > { %v4300_v15 = vpop.f32.mrf.mxu0 }
 0x1c5   : > { %v4301_v16 = vadd.f32 %v4300_v15, %v19612_v8  ;;  %v4477_v38 = vpop.f32.mrf.mxu1 }
 0x1c6   : > { %v4302_v17 = vpop.f32.mrf.mxu0  ;;  %8988 = vmatpush1.bf16.msra.mxu0 %v17998_v43 }
 0x1c7   : > { %v19867_v28 = vadd.f32 %v4477_v38, %v4301_v16  ;;  %v4479_v61 = vpop.f32.mrf.mxu1  ;;  %8989 = vmatprep.subr.bf16.mxu0 %v21952_v1 }
 0x1c8   : > { %v4303_v29 = vpop.f32.mrf.mxu0 }
 0x1c9   : > { %v4304_v31 = vadd.f32 %v4303_v29, %v19624_v24  ;;  %v4480_v32 = vpop.f32.mrf.mxu1 }
 0x1ca   : > { %v4305_v8 = vpop.f32.mrf.mxu0 }
 0x1cb   : > { %v19875_v60 = vadd.f32 %v4480_v32, %v4304_v31  ;;  %v4482_v44 = vpop.f32.mrf.mxu1  ;;  %v18001_v8 = vld [vmem:[%s21946_s1 + $0x338] sm:$0xff]  }
 0x1cc   : > { %v4308_v46 = vpop.f32.mrf.mxu0 }
 0x1cd   : > { %v4309_v24 = vadd.f32 %v4308_v46, %v19635_v36  ;;  %v4485_v48 = vpop.f32.mrf.mxu1  ;;  %v17996_v36 = vld [vmem:[%s21946_s1 + $0x298] sm:$0xff]  }
 0x1ce   : > { %v4310_v5 = vpop.f32.mrf.mxu0  ;;  %8823 = vmatpush2.bf16.msra.mxu1 %v17996_v36 }
 0x1cf   : > { %v19883_v56 = vadd.f32 %v4485_v48, %v4309_v24  ;;  %v4487_v57 = vpop.f32.mrf.mxu1  ;;  %8824 = vmatprep.subr.bf16.mxu1 %v21952_v1  ;;  %v18002_v48 = vld [vmem:[%s21946_s1 + $0x330] sm:$0xff]  }
 0x1d0   : > { %v4311_v27 = vpop.f32.mrf.mxu0 }
 0x1d1   : > { %v4312_v0 = vadd.f32 %v4311_v27, %v19646_v53  ;;  %v4488_v21 = vpop.f32.mrf.mxu1  ;;  %v17999_v53 = vld [vmem:[%s21946_s1 + $0x2c0] sm:$0xff]  }
 0x1d2   : > { %v4313_v9 = vpop.f32.mrf.mxu0  ;;  %8990 = vmatpush1.bf16.msra.mxu0 %v17999_v53 }
 0x1d3   : > { %v19886_v59 = vadd.f32 %v4488_v21, %v4312_v0  ;;  %v4490_v11 = vpop.f32.mrf.mxu1  ;;  %8991 = vmatprep.subr.bf16.mxu0 %v21952_v1 }
 0x1d4   : > { %v4316_v14 = vpop.f32.mrf.mxu0  ;;  %v18004_v11 = vld [vmem:[%s21946_s1 + $0x328] sm:$0xff]  }
 0x1d5   : > { %v4317_v15 = vadd.f32 %v4316_v14, %v19657_v4  ;;  %v4493_v16 = vpop.f32.mrf.mxu1 }
 0x1d6   : > { %v4318_v38 = vpop.f32.mrf.mxu0  ;;  %8992 = vmatpush2.bf16.msra.mxu0 %v18001_v8 }
 0x1d7   : > { %v19892_v17 = vadd.f32 %v4493_v16, %v4317_v15  ;;  %v4495_v19 = vpop.f32.mrf.mxu1  ;;  %8993 = vmatprep.subr.bf16.mxu0 %v21952_v1  ;;  %v18003_v15 = vld [vmem:[%s21946_s1 + $0x288] sm:$0xff]  }
 0x1d8   : > { %v4319_v52 = vpop.f32.mrf.mxu0 }
 0x1d9   : > { %v4320_v61 = vadd.f32 %v4319_v52, %v19668_v22  ;;  %v4496_v29 = vpop.f32.mrf.mxu1 }
 0x1da   : > { %v4321_v31 = vpop.f32.mrf.mxu0  ;;  %8994 = vmatpush2.bf16.msra.mxu0 %v18002_v48 }
 0x1db   : > { %v19900_v4 = vadd.f32 %v4496_v29, %v4320_v61  ;;  %v4498_v32 = vpop.f32.mrf.mxu1  ;;  %8995 = vmatprep.subr.bf16.mxu0 %v21952_v1 }
 0x1dc   : > { %v4324_v43 = vpop.f32.mrf.mxu0 }
 0x1dd   : > { %v4325_v44 = vadd.f32 %v4324_v43, %v19679_v35  ;;  %v4501_v10 = vpop.f32.mrf.mxu1  ;;  %v18000_v35 = vld [vmem:[%s21946_s1 + $0x290] sm:$0xff]  }
 0x1de   : > { %v4326_v46 = vpop.f32.mrf.mxu0  ;;  %8825 = vmatpush2.bf16.msra.mxu1 %v18000_v35  ;;  %8996 = vmatpush2.bf16.msra.mxu0 %v18004_v11  ;;  %v5477_v35 = vld [vmem:[#allocation2 + $0x1] sm:$0xff]  ;;  %v18879_v11 = vld [vmem:[#allocation2 + $0x133] sm:$0xff] }
 0x1df   : > { %v19907_v22 = vadd.f32 %v4501_v10, %v4325_v44  ;;  %v4503_v24 = vpop.f32.mrf.mxu1  ;;  %8826 = vmatprep.subr.bf16.mxu1 %v21952_v1  ;;  %8997 = vmatprep.subr.bf16.mxu0 %v21952_v1 }
 0x1e0   : > { %v4327_v5 = vpop.f32.mrf.mxu0 }
 0x1e1   : > { %v4328_v57 = vadd.f32 %v4327_v5, %v19690_v54  ;;  %v4504_v27 = vpop.f32.mrf.mxu1 }
 0x1e2   : > { %v4329_v0 = vpop.f32.mrf.mxu0  ;;  %8827 = vmatpush2.bf16.msra.mxu1 %v18003_v15 }
 0x1e3   : > { %v19917_v21 = vadd.f32 %v4504_v27, %v4328_v57  ;;  %v4506_v9 = vpop.f32.mrf.mxu1  ;;  %8828 = vmatprep.subr.bf16.mxu1 %v21952_v1  ;;  %v5478_v0 = vld [vmem:[#allocation2 + $0x9] sm:$0xff] }
 0x1e4   : > { %v4332_v14 = vpop.f32.mrf.mxu0 }
 0x1e5   : > { %v4333_v54 = vadd.f32 %v4332_v14, %v19706_v7  ;;  %v4509_v36 = vpop.f32.mrf.mxu1  ;;  %v16745_v14 = vpack.c.bf16 %v18879_v11, %v18879_v11 }
 0x1e6   : > { %v4334_v16 = vpop.f32.mrf.mxu0 }
 0x1e7   : > { %v19928_v38 = vadd.f32 %v4509_v36, %v4333_v54  ;;  %v4511_v19 = vpop.f32.mrf.mxu1  ;;  %v16781_v54 = vpack.c.bf16 %v5477_v35, %v5477_v35  ;;  %5441 = vst [vmem:[#allocation4] sm:$0xf] %v16745_v14  ;;  %5442 = vst [vmem:[#allocation4 + $0x24] sm:$0xf] %v16745_v14 }
 0x1e8   : > { %v4335_v53 = vpop.f32.mrf.mxu0 }
 0x1e9   : > { %v4336_v52 = vadd.f32 %v4335_v53, %v19719_v26  ;;  %v4512_v61 = vpop.f32.mrf.mxu1  ;;  %5657 = vst [vmem:[#allocation4 + $0x4] sm:$0xf] %v16781_v54 }
 0x1ea   : > { %v4337_v7 = vpop.f32.mrf.mxu0 }
 0x1eb   : > { %v19932_v29 = vadd.f32 %v4512_v61, %v4336_v52  ;;  %v4514_v31 = vpop.f32.mrf.mxu1  ;;  %v18005_v7 = vld [vmem:[%s21946_s1 + $0x320] sm:$0xff]  }
 0x1ec   : > { %v4340_v32 = vpop.f32.mrf.mxu0  ;;  %8998 = vmatpush2.bf16.msra.mxu0 %v18005_v7 }
 0x1ed   : > { %v4341_v8 = vadd.f32 %v4340_v32, %v19726_v40  ;;  %v4517_v43 = vpop.f32.mrf.mxu1  ;;  %v16782_v40 = vpack.c.bf16 %v5478_v0, %v5478_v0  ;;  %8999 = vmatprep.subr.bf16.mxu0 %v21952_v1 }
 0x1ee   : > { %v4342_v44 = vpop.f32.mrf.mxu0 }
 0x1ef   : > { %v19935_v10 = vadd.f32 %v4517_v43, %v4341_v8  ;;  %v4519_v46 = vpop.f32.mrf.mxu1  ;;  %5658 = vst [vmem:[#allocation4 + $0x28] sm:$0xf] %v16782_v40  ;;  %v18006_v8 = vld [vmem:[%s21946_s1 + $0x280] sm:$0xff]  }
 0x1f0   : > { %v4343_v24 = vpop.f32.mrf.mxu0  ;;  %8829 = vmatpush2.bf16.msra.mxu1 %v18006_v8  ;;  %v18007_v46 = vld [vmem:[%s21946_s1 + $0x318] sm:$0xff]  }
 0x1f1   : > { %v4344_v48 = vadd.f32 %v4343_v24, %v19733_v50  ;;  %v4520_v5 = vpop.f32.mrf.mxu1  ;;  %9152 = vmatprep.subr.bf16.mxu1 %v21952_v1  ;;  %9000 = vmatpush2.bf16.msra.mxu0 %v18007_v46 }
 0x1f2   : > { %v4345_v57 = vpop.f32.mrf.mxu0  ;;  %9001 = vmatprep.subr.bf16.mxu0 %v21952_v1 }
 0x1f3   : > { %v19938_v27 = vadd.f32 %v4520_v5, %v4344_v48  ;;  %v4522_v26 = vpop.f32.mrf.mxu1  ;;  %v18008_v48 = vld [vmem:[#allocation4] ss:$36 sps:$4 sm:$0xff]  }
 0x1f4   : > { %v4348_v9 = vpop.f32.mrf.mxu0  ;;  %10187 = vst [vmem:[#allocation4] sm:$0xf] %v16745_v14  ;;  %10188 = vst [vmem:[#allocation4 + $0x24] sm:$0xf] %v16745_v14 }
 0x1f5   : > { %v4349_v36 = vadd.f32 %v4348_v9, %v19736_v63  ;;  %v4525_v15 = vpop.f32.mrf.mxu1  ;;  %v18011_v9 = vld [vmem:[%s21946_s1 + $0x310] sm:$0xff]  }
 0x1f6   : > { %v4350_v16 = vpop.f32.mrf.mxu0  ;;  %v18010_v5 = vld [vmem:[#allocation4 + $0x4] ss:$36 sps:$4 sm:$0xff]   ;;  %9002 = vmatpush2.bf16.msra.mxu0 %v18011_v9 }
 0x1f7   : > { %v19941_v50 = vadd.f32 %v4525_v15, %v4349_v36  ;;  %v4527_v19 = vpop.f32.mrf.mxu1  ;;  %8830 = vmatprep.mubr.bf16.mxu1 %v18010_v5  ;;  %9003 = vmatprep.subr.bf16.mxu0 %v21952_v1 }
 0x1f8   : > { %v4351_v53 = vpop.f32.mrf.mxu0  ;;  %8831 = vmatmul.mubr.bf16.vlgmr.msra.gmra.mxu1 %v18008_v48 }
 0x1f9   : > { %v4352_v52 = vadd.f32 %v4351_v53, %v19742_v13  ;;  %v4528_v61 = vpop.f32.mrf.mxu1 }
 0x1fa   : > { %v4353_v31 = vpop.f32.mrf.mxu0 }
 0x1fb   : > { %v19947_v32 = vadd.f32 %v4528_v61, %v4352_v52  ;;  %v4530_v63 = vpop.f32.mrf.mxu1 }
 0x1fc   : > { %v4356_v43 = vpop.f32.mrf.mxu0 }
 0x1fd   : > { %v4357_v44 = vadd.f32 %v4356_v43, %v19746_v23  ;;  %v4533_v13 = vpop.f32.mrf.mxu1 }
 0x1fe   : > { %v4358_v24 = vpop.f32.mrf.mxu0 }
 0x1ff   : > { %v19958_v57 = vadd.f32 %v4533_v13, %v4357_v44  ;;  %v4535_v26 = vpop.f32.mrf.mxu1  ;;  %v5693_v13 = vld [vmem:[#allocation2 + $0x2] sm:$0xff] }
 0x200   : > { %v4359_v35 = vpop.f32.mrf.mxu0  ;;  %v16817_v24 = vpack.c.bf16 %v5693_v13, %v5693_v13 }
 0x201   : > { %v4360_v23 = vadd.f32 %v4359_v35, %v19752_v34  ;;  %v4536_v0 = vpop.f32.mrf.mxu1  ;;  %v18012_v34 = vld [vmem:[%s21946_s1 + $0x308] sm:$0xff]  }
 0x202   : > { %v4361_v11 = vpop.f32.mrf.mxu0  ;;  %9004 = vmatpush2.bf16.msra.mxu0 %v18012_v34  ;;  %5873 = vst [vmem:[#allocation4 + $0x8] sm:$0xf] %v16817_v24 }
 0x203   : > { %v19965_v54 = vadd.f32 %v4536_v0, %v4360_v23  ;;  %v4538_v40 = vpop.f32.mrf.mxu1  ;;  %9005 = vmatprep.subr.bf16.mxu0 %v21952_v1  ;;  %v5694_v23 = vld [vmem:[#allocation2 + $0xa] sm:$0xff] }
 0x204   : > { %v4364_v36 = vpop.f32.mrf.mxu0  ;;  %v16818_v9 = vpack.c.bf16 %v5694_v23, %v5694_v23 }
 0x205   : > { %v4365_v14 = vadd.f32 %v4364_v36, %v19756_v47  ;;  %v4541_v15 = vpop.f32.mrf.mxu1 }
 0x206   : > { %v4366_v16 = vpop.f32.mrf.mxu0  ;;  %5874 = vst [vmem:[#allocation4 + $0x2c] sm:$0xf] %v16818_v9 }
 0x207   : > { %v19972_v19 = vadd.f32 %v4541_v15, %v4365_v14  ;;  %v4543_v53 = vpop.f32.mrf.mxu1 }
 0x208   : > { %v4367_v52 = vpop.f32.mrf.mxu0 }
 0x209   : > { %v4368_v61 = vadd.f32 %v4367_v52, %v19759_v58  ;;  %v4544_v7 = vpop.f32.mrf.mxu1 }
 0x20a   : > { %v4369_v31 = vpop.f32.mrf.mxu0 }
 0x20b   : > { %v19976_v63 = vadd.f32 %v4544_v7, %v4368_v61  ;;  %v4546_v47 = vpop.f32.mrf.mxu1  ;;  %v18014_v61 = vld [vmem:[%s21946_s1 + $0x300] sm:$0xff]  }
 0x20c   : > { %v4372_v8 = vpop.f32.mrf.mxu0  ;;  %9006 = vmatpush2.bf16.msra.mxu0 %v18014_v61 }
 0x20d   : > { %v4373_v43 = vadd.f32 %v4372_v8, %v19766_v12  ;;  %v4549_v44 = vpop.f32.mrf.mxu1  ;;  %9329 = vmatprep.subr.bf16.mxu0 %v21952_v1 }
 0x20e   : > { %v4374_v46 = vpop.f32.mrf.mxu0 }
 0x20f   : > { %v19979_v48 = vadd.f32 %v4549_v44, %v4373_v43  ;;  %v4551_v5 = vpop.f32.mrf.mxu1 }
 0x210   : > { %v4375_v26 = vpop.f32.mrf.mxu0 }
 0x211   : > { %v4376_v35 = vadd.f32 %v4375_v26, %v19769_v25  ;;  %v4552_v58 = vpop.f32.mrf.mxu1 }
 0x212   : > { %v4377_v0 = vpop.f32.mrf.mxu0 }
 0x213   : > { %v19982_v11 = vadd.f32 %v4552_v58, %v4376_v35  ;;  %v4554_v40 = vpop.f32.mrf.mxu1 }
 0x214   : > { %v4380_v36 = vpop.f32.mrf.mxu0 }
 0x215   : > { %v4381_v12 = vadd.f32 %v4380_v36, %v19776_v42  ;;  %v4557_v14 = vpop.f32.mrf.mxu1 }
 0x216   : > { %v4382_v15 = vpop.f32.mrf.mxu0 }
 0x217   : > { %v19985_v34 = vadd.f32 %v4557_v14, %v4381_v12  ;;  %v4559_v16 = vpop.f32.mrf.mxu1 }
 0x218   : > { %v4383_v53 = vpop.f32.mrf.mxu0 }
 0x219   : > { %v4384_v52 = vadd.f32 %v4383_v53, %v19779_v51  ;;  %v4560_v25 = vpop.f32.mrf.mxu1 }
 0x21a   : > { %v4385_v7 = vpop.f32.mrf.mxu0 }
 0x21b   : > { %v19991_v31 = vadd.f32 %v4560_v25, %v4384_v52  ;;  %v4562_v47 = vpop.f32.mrf.mxu1  ;;  %v10223_v7 = vld [vmem:[#allocation3 + $0x1] sm:$0xff] }
 0x21c   : > { %v4388_v8 = vpop.f32.mrf.mxu0 }
 0x21d   : > { %v4389_v42 = vadd.f32 %v4388_v8, %v19785_v6  ;;  %v4565_v43 = vpop.f32.mrf.mxu1 }
 0x21e   : > { %v4390_v44 = vpop.f32.mrf.mxu0 }
 0x21f   : > { %v19995_v13 = vadd.f32 %v4565_v43, %v4389_v42  ;;  %v4567_v51 = vpop.f32.mrf.mxu1  ;;  %v17105_v42 = vpack.c.bf16 %v10223_v7, %v10223_v7 }
 0x220   : > { %v4391_v46 = vpop.f32.mrf.mxu0 }
 0x221   : > { %v4392_v24 = vadd.f32 %v4391_v46, %v19789_v18  ;;  %v4568_v5 = vpop.f32.mrf.mxu1  ;;  %10403 = vst [vmem:[#allocation4 + $0x4] sm:$0xf] %v17105_v42 }
 0x222   : > { %v4393_v26 = vpop.f32.mrf.mxu0 }
 0x223   : > { %v19998_v35 = vadd.f32 %v4568_v5, %v4392_v24  ;;  %v4570_v58 = vpop.f32.mrf.mxu1 }
 0x224   : > { %v4396_v23 = vpop.f32.mrf.mxu0 }
 0x225   : > { %22004 = vst [vmem:[#allocation5_spill] sm:$0xff] %v19998_v35  ;;  %v4397_v0 = vadd.f32 %v4396_v23, %v19795_v33  ;;  %v4573_v9 = vpop.f32.mrf.mxu1  ;;  %v10224_v33 = vld [vmem:[#allocation3 + $0x9] sm:$0xff] }
 0x226   : > { %v4398_v40 = vpop.f32.mrf.mxu0  ;;  %v17106_v43 = vpack.c.bf16 %v10224_v33, %v10224_v33 }
 0x227   : > { %v20001_v36 = vadd.f32 %v4573_v9, %v4397_v0  ;;  %v4575_v6 = vpop.f32.mrf.mxu1 }
 0x228   : > { %v4399_v12 = vpop.f32.mrf.mxu0  ;;  %10404 = vst [vmem:[#allocation4 + $0x28] sm:$0xf] %v17106_v43 }
 0x229   : > { %v4400_v14 = vadd.f32 %v4399_v12, %v19799_v55  ;;  %v4576_v15 = vpop.f32.mrf.mxu1 }
 0x22a   : > { %v4401_v16 = vpop.f32.mrf.mxu0 }
 0x22b   : > { %v20004_v53 = vadd.f32 %v4576_v15, %v4400_v14  ;;  %v4578_v18 = vpop.f32.mrf.mxu1 }
 0x22c   : > { %v17489_v52 = vpop.f32.mrf.mxu0  ;;  %v20047_v18 = vpop.permute.xlu1 %5052 }
 0x22d   : > { %22005 = vst [vmem:[#allocation6_spill] sm:$0xff] %v20004_v53  ;;  %v20007_v25 = vadd.f32 %v17489_v52, %v19812_v39  ;;  %22007 = vst [vmem:[#allocation8_spill] sm:$0xff] %v20047_v18  ;;  %vm5155_vm6 = vcmp.eq.s32.totalorder %v20047_v18, 1 }
 0x22e   : > { %v4614_v61 = vpop.f32.mrf.mxu0 }
 0x22f   : > { %v15086_v47 = vmul.f32 -1.442695, %v20007_v25  ;;  %v20011_v8 = vadd.f32 %v4614_v61, %v19802_v3 }
 0x230   : > { %v17490_v55 = vpop.f32.mrf.mxu0 }
 0x231   : > { %18590 = vpow2.f32 %v15086_v47  ;;  %v15084_v44 = vmul.f32 -1.442695, %v20011_v8  ;;  %v20015_v51 = vadd.f32 %v17490_v55, %v19819_v49 }
 0x232   : > { %v4617_v39 = vpop.f32.mrf.mxu0 }
 0x233   : > { %18592 = vpow2.f32 %v15084_v44  ;;  %v15087_v46 = vmul.f32 -1.442695, %v20015_v51  ;;  %v20019_v24 = vadd.f32 %v4617_v39, %v19809_v41  ;;  %v18013_v41 = vld [vmem:[%s21946_s1 + $0x378] sm:$0xff]  }
 0x234   : > { %v17493_v3 = vpop.f32.mrf.mxu0  ;;  %9153 = vmatpush1.bf16.msra.mxu1 %v18013_v41 }
 0x235   : > { %18594 = vpow2.f32 %v15087_v46  ;;  %v15085_v5 = vmul.f32 -1.442695, %v20019_v24  ;;  %v20023_v26 = vadd.f32 %v17493_v3, %v19840_v30  ;;  %v20036_v30 = vpop.permute.xlu0 %5046  ;;  %9154 = vmatprep.subr.bf16.mxu1 %v21952_v1 }
 0x236   : > { %v4630_v58 = vpop.f32.mrf.mxu0  ;;  %22006 = vst [vmem:[#allocation7_spill] sm:$0xff] %v20036_v30  ;;  %vm5153_vm4 = vcmp.eq.s32.totalorder %v20036_v30, 1 }
 0x237   : > { %18596 = vpow2.f32 %v15085_v5  ;;  %v15090_v49 = vmul.f32 -1.442695, %v20023_v26  ;;  %v20027_v23 = vadd.f32 %v4630_v58, %v19827_v2  ;;  %v20063_v58 = vpop.permute.xlu1 %5055 }
 0x238   : > { %v17494_v0 = vpop.f32.mrf.mxu0  ;;  %22009 = vst [vmem:[#allocation10_spill] sm:$0xff] %v20063_v58  ;;  %vm5156_vm7 = vcmp.eq.s32.totalorder %v20063_v58, 1 }
 0x239   : > { %18598 = vpow2.f32 %v15090_v49  ;;  %v15088_v9 = vmul.f32 -1.442695, %v20027_v23  ;;  %v20034_v40 = vadd.f32 %v17494_v0, %v19847_v45  ;;  %v20053_v47 = vpop.permute.xlu0 %5049 }
 0x23a   : > { %v4633_v6 = vpop.f32.mrf.mxu0  ;;  %22008 = vst [vmem:[#allocation9_spill] sm:$0xff] %v20053_v47  ;;  %vm5154_vm5 = vcmp.eq.s32.totalorder %v20053_v47, 1 }
 0x23b   : > { %18600 = vpow2.f32 %v15088_v9  ;;  %v15091_v12 = vmul.f32 -1.442695, %v20034_v40  ;;  %v20040_v2 = vadd.f32 %v4633_v6, %v19833_v62 }
 0x23c   : > { %v17497_v14 = vpop.f32.mrf.mxu0 }
 0x23d   : > { %18602 = vpow2.f32 %v15091_v12  ;;  %v15089_v15 = vmul.f32 -1.442695, %v20040_v2  ;;  %v20045_v16 = vadd.f32 %v17497_v14, %v19867_v28  ;;  %v20069_v6 = vpop.permute.xlu0 %5058 }
 0x23e   : > { %v18591_v45 = vpop.eup %18590  ;;  %v4646_v52 = vpop.f32.mrf.mxu0  ;;  %22010 = vst [vmem:[#allocation11_spill] sm:$0xff] %v20069_v6  ;;  %vm5157_vm9 = vcmp.eq.s32.totalorder %v20069_v6, 1  ;;  %v22018_v6 = vmov 0  }
 0x23f   : > { %v4867_v61 = vadd.f32 1.0, %v18591_v45  ;;  %18604 = vpow2.f32 %v15089_v15  ;;  %v15094_v7 = vmul.f32 -1.442695, %v20045_v16  ;;  %v20051_v62 = vadd.f32 %v4646_v52, %v19854_v20 }
 0x240   : > { %v18593_v33 = vpop.eup %18592  ;;  %v17498_v42 = vpop.f32.mrf.mxu0 }
 0x241   : > { %18606 = vrcp.f32 %v4867_v61  ;;  %v4865_v43 = vadd.f32 1.0, %v18593_v33  ;;  %v15092_v28 = vmul.f32 -1.442695, %v20051_v62  ;;  %v20057_v55 = vadd.f32 %v17498_v42, %v19875_v60  ;;  %v20079_v42 = vpop.permute.xlu1 %5061 }
 0x242   : > { %v18595_v44 = vpop.eup %18594  ;;  %18608 = vpow2.f32 %v15094_v7  ;;  %v4649_v39 = vpop.f32.mrf.mxu0  ;;  %22011 = vst [vmem:[#allocation12_spill] sm:$0xff] %v20079_v42  ;;  %vm5158_vm11 = vcmp.eq.s32.totalorder %v20079_v42, 1 }
 0x243   : > { %18610 = vrcp.f32 %v4865_v43  ;;  %v4868_v46 = vadd.f32 1.0, %v18595_v44  ;;  %v15095_v3 = vmul.f32 -1.442695, %v20057_v55  ;;  %v20061_v20 = vadd.f32 %v4649_v39, %v19858_v37 }
 0x244   : > { %v18597_v5 = vpop.eup %18596  ;;  %18612 = vpow2.f32 %v15092_v28  ;;  %v17501_v49 = vpop.f32.mrf.mxu0 }
 0x245   : > { %18614 = vrcp.f32 %v4868_v46  ;;  %v4866_v0 = vadd.f32 1.0, %v18597_v5  ;;  %v15093_v60 = vmul.f32 -1.442695, %v20061_v20  ;;  %v20067_v41 = vadd.f32 %v17501_v49, %v19892_v17  ;;  %v20086_v46 = vpop.permute.xlu0 %5064 }
 0x246   : > { %v18599_v9 = vpop.eup %18598  ;;  %18616 = vpow2.f32 %v15095_v3  ;;  %v4662_v12 = vpop.f32.mrf.mxu0  ;;  %22012 = vst [vmem:[#allocation13_spill] sm:$0xff] %v20086_v46  ;;  %vm5159_vm8 = vcmp.eq.s32.totalorder %v20086_v46, 1 }
 0x247   : > { %18618 = vrcp.f32 %v4866_v0  ;;  %v4871_v37 = vadd.f32 1.0, %v18599_v9  ;;  %v15098_v14 = vmul.f32 -1.442695, %v20067_v41  ;;  %v20073_v15 = vadd.f32 %v4662_v12, %v19883_v56  ;;  %v20092_v0 = vld [vmem:[#allocation3 + $0x2] sm:$0xff] }
 0x248   : > { %v18601_v45 = vpop.eup %18600  ;;  %18620 = vpow2.f32 %v15093_v60  ;;  %v17502_v52 = vpop.f32.mrf.mxu0 }
 0x249   : > { %18622 = vrcp.f32 %v4871_v37  ;;  %v4869_v61 = vadd.f32 1.0, %v18601_v45  ;;  %v15096_v17 = vmul.f32 -1.442695, %v20073_v15  ;;  %v20077_v7 = vadd.f32 %v17502_v52, %v19900_v4  ;;  %v20106_v52 = vpop.permute.xlu1 %5067 }
 0x24a   : > { %v18603_v33 = vpop.eup %18602  ;;  %18624 = vpow2.f32 %v15098_v14  ;;  %v4665_v43 = vpop.f32.mrf.mxu0  ;;  %v18025_v14 = vld [vmem:[%s21946_s1 + $0x370] sm:$0xff]   ;;  %22013 = vst [vmem:[#allocation14_spill] sm:$0xff] %v20106_v52  ;;  %vm5160_vm10 = vcmp.eq.s32.totalorder %v20106_v52, 1 }
 0x24b   : > { %18626 = vrcp.f32 %v4869_v61  ;;  %v4872_v28 = vadd.f32 1.0, %v18603_v33  ;;  %v15099_v56 = vmul.f32 -1.442695, %v20077_v7  ;;  %v20083_v44 = vadd.f32 %v4665_v43, %v19886_v59  ;;  %9155 = vmatpush1.bf16.msra.mxu1 %v18025_v14 }
 0x24c   : > { %v18605_v39 = vpop.eup %18604  ;;  %18628 = vpow2.f32 %v15096_v17  ;;  %v17505_v4 = vpop.f32.mrf.mxu0  ;;  %9156 = vmatprep.subr.bf16.mxu1 %v21952_v1 }
 0x24d   : > { %18630 = vrcp.f32 %v4872_v28  ;;  %v4870_v3 = vadd.f32 1.0, %v18605_v39  ;;  %v15097_v5 = vmul.f32 -1.442695, %v20083_v44  ;;  %v20090_v49 = vadd.f32 %v17505_v4, %v19928_v38  ;;  %v20115_v39 = vpop.permute.xlu0 %5070 }
 0x24e   : > { %v18607_v60 = vpop.eup %18606  ;;  %18632 = vpow2.f32 %v15099_v56  ;;  %v4678_v59 = vpop.f32.mrf.mxu0  ;;  %22014 = vst [vmem:[#allocation15_spill] sm:$0xff] %v20115_v39  ;;  %vm5161_vm13 = vcmp.eq.s32.totalorder %v20115_v39, 1 }
 0x24f   : > { %v18609_v9 = vpop.eup %18608  ;;  %v4975_v12 = vmul.f32 %v18607_v60, %v20007_v25  ;;  %18634 = vrcp.f32 %v4870_v3  ;;  %v15102_v37 = vmul.f32 -1.442695, %v20090_v49  ;;  %v20100_v38 = vadd.f32 %v4678_v59, %v19907_v22 }
 0x250   : > { %v18611_v45 = vpop.eup %18610  ;;  %v4875_v61 = vadd.f32 1.0, %v18609_v9  ;;  %18636 = vpow2.f32 %v15097_v5  ;;  %v17506_v17 = vpop.f32.mrf.mxu0 }
 0x251   : > { %v18613_v33 = vpop.eup %18612  ;;  %v5191_v22 = vsel %vm5155_vm6, %v4975_v12, 0.0  ;;  %v4973_v43 = vmul.f32 %v18611_v45, %v20011_v8  ;;  %18638 = vpow2.f32 %v15102_v37  ;;  %v15100_v28 = vmul.f32 -1.442695, %v20100_v38  ;;  %v20127_v37 = vld [vmem:[#allocation3 + $0xa] sm:$0xff] }
 0x252   : > { %v18615_v56 = vpop.eup %18614  ;;  %5227 = vst [vmem:[#allocation2 + $0x23] sm:$0xff] %v5191_v22  ;;  %v16891_v4 = vpack.c.bf16 %v5191_v22, %v5191_v22  ;;  %18640 = vrcp.f32 %v4875_v61  ;;  %v4873_v3 = vadd.f32 1.0, %v18613_v33  ;;  %v20118_v5 = vadd.f32 %v17506_v17, %v19932_v29  ;;  %v4681_v60 = vpop.f32.mrf.mxu0 }
 0x253   : > { %v18617_v8 = vpop.eup %18616  ;;  %v5189_v59 = vsel %vm5153_vm4, %v4973_v43, 0.0  ;;  %v4976_v9 = vmul.f32 %v18615_v56, %v20015_v51  ;;  %18642 = vpow2.f32 %v15100_v28  ;;  %v20125_v12 = vadd.f32 %v4681_v60, %v19917_v21  ;;  %v18032_v28 = vld [vmem:[%s21946_s1 + $0x368] sm:$0xff]  }
 0x254   : > { %v18619_v14 = vpop.eup %18618  ;;  %6307 = vst [vmem:[#allocation4 + $0x58] sm:$0xf] %v16891_v4  ;;  %5225 = vst [vmem:[#allocation2 + $0x13] sm:$0xff] %v5189_v59  ;;  %v16889_v29 = vpack.c.bf16 %v5189_v59, %v5189_v59  ;;  %18644 = vrcp.f32 %v4873_v3  ;;  %v4876_v45 = vadd.f32 1.0, %v18617_v8  ;;  %v15103_v61 = vmul.f32 -1.442695, %v20118_v5  ;;  %v17509_v17 = vpop.f32.mrf.mxu0  ;;  %9157 = vmatpush1.bf16.msra.mxu1 %v18032_v28 }
 0x255   : > { %v18621_v33 = vpop.eup %18620  ;;  %v5192_v51 = vsel %vm5156_vm7, %v4976_v9, 0.0  ;;  %v4974_v21 = vmul.f32 %v18619_v14, %v20019_v24  ;;  %v15101_v22 = vmul.f32 -1.442695, %v20125_v12  ;;  %v20136_v43 = vadd.f32 %v17509_v17, %v19941_v50  ;;  %v20142_v4 = vpop.permute.xlu1 %5073  ;;  %9158 = vmatprep.subr.bf16.mxu1 %v21952_v1 }
 0x256   : > { %v18623_v56 = vpop.eup %18622  ;;  %6305 = vst [vmem:[#allocation4 + $0x10] sm:$0xf] %v16889_v29  ;;  %5228 = vst [vmem:[#allocation2 + $0x2b] sm:$0xff] %v5192_v51  ;;  %v16892_v3 = vpack.c.bf16 %v5192_v51, %v5192_v51  ;;  %18646 = vrcp.f32 %v4876_v45  ;;  %v4874_v60 = vadd.f32 1.0, %v18621_v33  ;;  %v4694_v24 = vpop.f32.mrf.mxu0  ;;  %v18039_v29 = vld [vmem:[%s21946_s1 + $0x360] sm:$0xff]   ;;  %vm5162_vm15 = vcmp.eq.s32.totalorder %v20142_v4, 1 }
 0x257   : > { %v18625_v50 = vpop.eup %18624  ;;  %v5190_v59 = vsel %vm5154_vm5, %v4974_v21, 0.0  ;;  %v4979_v9 = vmul.f32 %v18623_v56, %v20023_v26  ;;  %18648 = vpow2.f32 %v15103_v61  ;;  %v15106_v14 = vmul.f32 -1.442695, %v20136_v43  ;;  %v20153_v17 = vpop.permute.xlu0 %5076 }
 0x258   : > { %v18627_v45 = vpop.eup %18626  ;;  %22015 = vst [vmem:[#allocation16_spill] sm:$0xff] %v20153_v17  ;;  %6308 = vst [vmem:[#allocation4 + $0x7c] sm:$0xf] %v16892_v3  ;;  %v16890_v33 = vpack.c.bf16 %v5190_v59, %v5190_v59  ;;  %18650 = vrcp.f32 %v4874_v60  ;;  %v4879_v51 = vadd.f32 1.0, %v18625_v50  ;;  %v20156_v21 = vadd.f32 %v4694_v24, %v19935_v10  ;;  %v17510_v26 = vpop.f32.mrf.mxu0  ;;  %v18046_v50 = vld [vmem:[%s21946_s1 + $0x358] sm:$0xff]   ;;  %9159 = vmatpush1.bf16.msra.mxu1 %v18039_v29 }
 0x259   : > { %5226 = vst [vmem:[#allocation2 + $0x1b] sm:$0xff] %v5190_v59  ;;  %v18629_v61 = vpop.eup %18628  ;;  %v5195_v28 = vsel %vm5159_vm8, %v4979_v9, 0.0  ;;  %v4977_v56 = vmul.f32 %v18627_v45, %v20027_v23  ;;  %18652 = vpow2.f32 %v15101_v22  ;;  %v20163_v8 = vadd.f32 %v17510_v26, %v19947_v32  ;;  %v20179_v26 = vpop.permute.xlu1 %5079  ;;  %9160 = vmatprep.subr.bf16.mxu1 %v22018_v6 }
 0x25a   : > { %v18631_v3 = vpop.eup %18630  ;;  %vm5163_vm12 = vcmp.eq.s32.totalorder %v20153_v17, 1  ;;  %6306 = vst [vmem:[#allocation4 + $0x34] sm:$0xf] %v16890_v33  ;;  %5231 = vst [vmem:[#allocation2 + $0x43] sm:$0xff] %v5195_v28  ;;  %v16895_v10 = vpack.c.bf16 %v5195_v28, %v5195_v28  ;;  %18654 = vrcp.f32 %v4879_v51  ;;  %v4877_v60 = vadd.f32 1.0, %v18629_v61 }
 0x25b   : > { %22016 = vst [vmem:[#allocation17_spill] sm:$0xff] %v20163_v8  ;;  %v20167_v24 = vmul.f32 -1.442695, %v20156_v21  ;;  %v18633_v23 = vpop.eup %18632  ;;  %v5263_v22 = vld [vmem:[#allocation2 + $0x10] sm:$0xff]  ;;  %v5193_v9 = vsel %vm5157_vm9, %v4977_v56, 0.0  ;;  %v4980_v45 = vmul.f32 %v18631_v3, %v20034_v40  ;;  %18656 = vpow2.f32 %v15106_v14  ;;  %22017 = vst [vmem:[#allocation18_spill] sm:$0xff] %v20179_v26 }
 0x25c   : > { %v5479_v59 = vld [vmem:[#allocation2 + $0x11] sm:$0xff]  ;;  %v20176_v33 = vmul.f32 -1.442695, %v20163_v8  ;;  %v18635_v51 = vpop.eup %18634  ;;  %v16747_v61 = vpack.c.bf16 %v5263_v22, %v5263_v22  ;;  %6311 = vst [vmem:[#allocation4 + $0xe8] sm:$0xf] %v16895_v10  ;;  %5229 = vst [vmem:[#allocation2 + $0x33] sm:$0xff] %v5193_v9  ;;  %v16893_v1 = vpack.c.bf16 %v5193_v9, %v5193_v9  ;;  %18658 = vrcp.f32 %v4877_v60  ;;  %9161 = vmatpush1.bf16.msra.mxu1 %v18046_v50 }
 0x25d   : > { %v5695_v32 = vld [vmem:[#allocation2 + $0x12] sm:$0xff]  ;;  %v16783_v28 = vpack.c.bf16 %v5479_v59, %v5479_v59  ;;  %v20182_v56 = vpop.eup %18636  ;;  %v5266_v40 = vld [vmem:[#allocation2 + $0x28] sm:$0xff]  ;;  %v5196_v29 = vsel %vm5160_vm10, %v4980_v45, 0.0  ;;  %v4978_v46 = vmul.f32 %v18635_v51, %v20040_v2  ;;  %v20187_v47 = vadd.f32 1.0, %v18633_v23  ;;  %v20196_v59 = vpop.permute.xlu0 %5082  ;;  %9162 = vmatprep.subr.bf16.mxu1 %v22018_v6 }
 0x25e   : > { %v16819_v25 = vpack.c.bf16 %v5695_v32, %v5695_v32  ;;  %v5482_v14 = vld [vmem:[#allocation2 + $0x29] sm:$0xff]  ;;  %v20194_v22 = vpop.eup %18638  ;;  %5443 = vst [vmem:[#allocation4 + $0x48] sm:$0xf] %v16747_v61  ;;  %v16750_v32 = vpack.c.bf16 %v5266_v40, %v5266_v40  ;;  %6309 = vst [vmem:[#allocation4 + $0xa0] sm:$0xf] %v16893_v1  ;;  %v16896_v51 = vpack.c.bf16 %v5196_v29, %v5196_v29  ;;  %vm5164_vm14 = vcmp.eq.s32.totalorder %v20179_v26, 1 }
 0x25f   : > { %v5698_v3 = vld [vmem:[#allocation2 + $0x2a] sm:$0xff]  ;;  %5659 = vst [vmem:[#allocation4 + $0x4c] sm:$0xf] %v16783_v28  ;;  %v16786_v9 = vpack.c.bf16 %v5482_v14, %v5482_v14  ;;  %5232 = vst [vmem:[#allocation2 + $0x4b] sm:$0xff] %v5196_v29  ;;  %v18641_v52 = vpop.eup %18640  ;;  %v5194_v61 = vsel %vm5158_vm11, %v4978_v46, 0.0  ;;  %18660 = vrcp.f32 %v20187_v47  ;;  %v20222_v47 = vadd.f32 1.0, %v20182_v56 }
 0x260   : > { %v20192_v10 = vld [vmem:[%s21946_s1 + $0x350] sm:$0xff]   ;;  %5875 = vst [vmem:[#allocation4 + $0x50] sm:$0xf] %v16819_v25  ;;  %6089 = vst [vmem:[#allocation4 + $0xc] sm:$0xf] %v16819_v25  ;;  %v16822_v45 = vpack.c.bf16 %v5698_v3, %v5698_v3  ;;  %v6343_v2 = vld [vmem:[#allocation2 + $0x24] sm:$0xff]  ;;  %v20200_v25 = vpop.eup %18642  ;;  %18662 = vpow2.f32 %v20167_v24 }
 0x261   : > { %v6773_v60 = vld [vmem:[#allocation2 + $0x25] sm:$0xff]  ;;  %v16927_v58 = vpack.c.bf16 %v6343_v2, %v6343_v2  ;;  %v5264_v35 = vld [vmem:[#allocation2 + $0x18] sm:$0xff]  ;;  %5446 = vst [vmem:[#allocation4 + $0xb4] sm:$0xf] %v16750_v32  ;;  %5662 = vst [vmem:[#allocation4 + $0xb8] sm:$0xf] %v16786_v9  ;;  %v16894_v2 = vpack.c.bf16 %v5194_v61, %v5194_v61  ;;  %v18645_v46 = vpop.eup %18644  ;;  %9163 = vmatpush1.bf16.msra.mxu1 %v20192_v10  ;;  %18664 = vrcp.f32 %v20222_v47 }
 0x262   : > { %v6989_v23 = vld [vmem:[#allocation2 + $0x26] sm:$0xff]  ;;  %v16997_v30 = vpack.c.bf16 %v6773_v60, %v6773_v60  ;;  %v5480_v53 = vld [vmem:[#allocation2 + $0x19] sm:$0xff]  ;;  %5878 = vst [vmem:[#allocation4 + $0xbc] sm:$0xf] %v16822_v45  ;;  %6092 = vst [vmem:[#allocation4 + $0x78] sm:$0xf] %v16822_v45  ;;  %v16748_v1 = vpack.c.bf16 %v5264_v35, %v5264_v35  ;;  %v20208_v60 = vpop.permute.xlu1 %5085  ;;  %9164 = vmatprep.subr.bf16.mxu1 %v22018_v6 }
 0x263   : > { %v17033_v18 = vpack.c.bf16 %v6989_v23, %v6989_v23  ;;  %v5265_v8 = vld [vmem:[#allocation2 + $0x20] sm:$0xff]  ;;  %v16784_v14 = vpack.c.bf16 %v5480_v53, %v5480_v53  ;;  %6312 = vst [vmem:[#allocation4 + $0x10c] sm:$0xf] %v16896_v51  ;;  %5230 = vst [vmem:[#allocation2 + $0x3b] sm:$0xff] %v5194_v61  ;;  %v6341_v45 = vld [vmem:[#allocation2 + $0x14] sm:$0xff]  ;;  %v20205_v53 = vpop.f32.mrf.mxu0  ;;  %vm21967_vm1 = vcmp.eq.s32.totalorder %v20196_v59, 1 }
 0x264   : > { %v16749_v28 = vpack.c.bf16 %v5265_v8, %v5265_v8  ;;  %v5481_v40 = vld [vmem:[#allocation2 + $0x21] sm:$0xff]  ;;  %6523 = vst [vmem:[#allocation4 + $0x5c] sm:$0xf] %v16927_v58  ;;  %6737 = vst [vmem:[#allocation4 + $0x18] sm:$0xf] %v16927_v58  ;;  %v4983_v8 = vmul.f32 %v18641_v52, %v20045_v16  ;;  %v16925_v23 = vpack.c.bf16 %v6341_v45, %v6341_v45  ;;  %v5267_v58 = vld [vmem:[#allocation2 + $0x30] sm:$0xff] }
 0x265   : > { %v5696_v3 = vld [vmem:[#allocation2 + $0x1a] sm:$0xff]  ;;  %v5697_v29 = vld [vmem:[#allocation2 + $0x22] sm:$0xff]  ;;  %6953 = vst [vmem:[#allocation4 + $0x1c] sm:$0xf] %v16997_v30  ;;  %7169 = vst [vmem:[#allocation4 + $0x20] sm:$0xf] %v17033_v18  ;;  %v16785_v50 = vpack.c.bf16 %v5481_v40, %v5481_v40  ;;  %v4981_v30 = vmul.f32 %v18645_v46, %v20051_v62  ;;  %v20217_v18 = vpop.eup %18646  ;;  %v20231_v40 = vpop.permute.xlu0 %5088 }
 0x266   : > { %v16820_v32 = vpack.c.bf16 %v5696_v3, %v5696_v3  ;;  %v16821_v9 = vpack.c.bf16 %v5697_v29, %v5697_v29  ;;  %v6342_v35 = vld [vmem:[#allocation2 + $0x1c] sm:$0xff]  ;;  %5444 = vst [vmem:[#allocation4 + $0x6c] sm:$0xf] %v16748_v1  ;;  %5445 = vst [vmem:[#allocation4 + $0x90] sm:$0xf] %v16749_v28  ;;  %v20215_v16 = vld [vmem:[%s21946_s1 + $0x348] sm:$0xff]   ;;  %v20229_v28 = vpop.eup %18648  ;;  %v4984_v17 = vmul.f32 %v20217_v18, %v20057_v55 }
 0x267   : > { %v16926_v51 = vpack.c.bf16 %v6342_v35, %v6342_v35  ;;  %5660 = vst [vmem:[#allocation4 + $0x70] sm:$0xf] %v16784_v14  ;;  %6310 = vst [vmem:[#allocation4 + $0xc4] sm:$0xf] %v16894_v2  ;;  %v5483_v52 = vld [vmem:[#allocation2 + $0x31] sm:$0xff]  ;;  %v5199_v62 = vsel %vm5163_vm12, %v4983_v8, 0.0  ;;  %v16751_v14 = vpack.c.bf16 %v5267_v58, %v5267_v58  ;;  %9165 = vmatpush1.bf16.msra.mxu1 %v20215_v16 }
 0x268   : > { %5661 = vst [vmem:[#allocation4 + $0x94] sm:$0xf] %v16785_v50  ;;  %5876 = vst [vmem:[#allocation4 + $0x74] sm:$0xf] %v16820_v32  ;;  %v5699_v61 = vld [vmem:[#allocation2 + $0x32] sm:$0xff]  ;;  %v20225_v1 = vadd.f32 1.0, %v20194_v22  ;;  %v16787_v3 = vpack.c.bf16 %v5483_v52, %v5483_v52  ;;  %v16899_v50 = vpack.c.bf16 %v5199_v62, %v5199_v62  ;;  %v18651_v22 = vpop.eup %18650  ;;  %9166 = vmatprep.subr.bf16.mxu1 %v22018_v6 }
 0x269   : > { %5877 = vst [vmem:[#allocation4 + $0x98] sm:$0xf] %v16821_v9  ;;  %6090 = vst [vmem:[#allocation4 + $0x30] sm:$0xf] %v16820_v32  ;;  %v16823_v29 = vpack.c.bf16 %v5699_v61, %v5699_v61  ;;  %v6344_v2 = vld [vmem:[#allocation2 + $0x2c] sm:$0xff]  ;;  %vm21968_vm0 = vcmp.eq.s32.totalorder %v20231_v40, 1  ;;  %v20244_v58 = vpop.eup %18652  ;;  %v4982_v42 = vmul.f32 %v18651_v22, %v20061_v20 }
 0x26a   : > { %6091 = vst [vmem:[#allocation4 + $0x54] sm:$0xf] %v16821_v9  ;;  %6521 = vst [vmem:[#allocation4 + $0x14] sm:$0xf] %v16925_v23  ;;  %v6774_v46 = vld [vmem:[#allocation2 + $0x2d] sm:$0xff]  ;;  %v16928_v24 = vpack.c.bf16 %v6344_v2, %v6344_v2  ;;  %v5197_v8 = vsel %vm5161_vm13, %v4981_v30, 0.0  ;;  %v20237_v23 = vpop.f32.mrf.mxu0  ;;  %v20246_v39 = vpop.eup %18654  ;;  %18666 = vrcp.f32 %v20225_v1 }
 0x26b   : > { %6522 = vst [vmem:[#allocation4 + $0x38] sm:$0xf] %v16926_v51  ;;  %v6990_v56 = vld [vmem:[#allocation2 + $0x2e] sm:$0xff]  ;;  %5235 = vst [vmem:[#allocation2 + $0x63] sm:$0xff] %v5199_v62  ;;  %v16998_v10 = vpack.c.bf16 %v6774_v46, %v6774_v46  ;;  %v20242_v51 = vld [vmem:[%s21946_s1 + $0x340] sm:$0xff]   ;;  %v16897_v30 = vpack.c.bf16 %v5197_v8, %v5197_v8  ;;  %vm21979_vm3 = vcmp.eq.s32.totalorder %v20208_v60, 1 }
 0x26c   : > { %v17034_v32 = vpack.c.bf16 %v6990_v56, %v6990_v56  ;;  %v5270_v9 = vld [vmem:[#allocation2 + $0x48] sm:$0xff]  ;;  %5447 = vst [vmem:[#allocation4 + $0xd8] sm:$0xf] %v16751_v14  ;;  %5663 = vst [vmem:[#allocation4 + $0xdc] sm:$0xf] %v16787_v3  ;;  %v20266_v20 = vld [vmem:[%s21946_s1 + $0x3b8] sm:$0xff]   ;;  %9167 = vmatpush1.bf16.msra.mxu1 %v20242_v51 }
 0x26d   : > { %v5486_v45 = vld [vmem:[#allocation2 + $0x49] sm:$0xff]  ;;  %5879 = vst [vmem:[#allocation4 + $0xe0] sm:$0xf] %v16823_v29  ;;  %6093 = vst [vmem:[#allocation4 + $0x9c] sm:$0xf] %v16823_v29  ;;  %v16754_v52 = vpack.c.bf16 %v5270_v9, %v5270_v9  ;;  %v5268_v9 = vld [vmem:[#allocation2 + $0x38] sm:$0xff]  ;;  %9168 = vmatprep.subr.bf16.mxu1 %v22018_v6 }
 0x26e   : > { %v5702_v35 = vld [vmem:[#allocation2 + $0x4a] sm:$0xff]  ;;  %v16790_v61 = vpack.c.bf16 %v5486_v45, %v5486_v45  ;;  %6315 = vst [vmem:[#allocation4 + $0x178] sm:$0xf] %v16899_v50  ;;  %5233 = vst [vmem:[#allocation2 + $0x53] sm:$0xff] %v5197_v8  ;;  %v5269_v45 = vld [vmem:[#allocation2 + $0x40] sm:$0xff]  ;;  %v20252_v50 = vpop.eup %18656  ;;  %v20254_v8 = vpop.permute.xlu1 %5091 }
 0x26f   : > { %v16826_v62 = vpack.c.bf16 %v5702_v35, %v5702_v35  ;;  %v6347_v2 = vld [vmem:[#allocation2 + $0x44] sm:$0xff]  ;;  %6524 = vst [vmem:[#allocation4 + $0x80] sm:$0xf] %v16928_v24  ;;  %6738 = vst [vmem:[#allocation4 + $0x3c] sm:$0xf] %v16928_v24  ;;  %v5484_v35 = vld [vmem:[#allocation2 + $0x39] sm:$0xff]  ;;  %v16752_v24 = vpack.c.bf16 %v5268_v9, %v5268_v9  ;;  %v18659_v22 = vpop.eup %18658 }
 0x270   : > { %v6777_v46 = vld [vmem:[#allocation2 + $0x45] sm:$0xff]  ;;  %6954 = vst [vmem:[#allocation4 + $0x40] sm:$0xf] %v16998_v10  ;;  %7170 = vst [vmem:[#allocation4 + $0x44] sm:$0xf] %v17034_v32  ;;  %v16931_v14 = vpack.c.bf16 %v6347_v2, %v6347_v2  ;;  %v16753_v10 = vpack.c.bf16 %v5269_v45, %v5269_v45  ;;  %v16788_v2 = vpack.c.bf16 %v5484_v35, %v5484_v35  ;;  %vm21966_vm2 = vcmp.eq.s32.totalorder %v20254_v8, 1 }
 0x271   : > { %v6993_v56 = vld [vmem:[#allocation2 + $0x46] sm:$0xff]  ;;  %v17001_v3 = vpack.c.bf16 %v6777_v46, %v6777_v46  ;;  %5450 = vst [vmem:[#allocation4 + $0x144] sm:$0xf] %v16754_v52  ;;  %5666 = vst [vmem:[#allocation4 + $0x148] sm:$0xf] %v16790_v61  ;;  %v5700_v46 = vld [vmem:[#allocation2 + $0x3a] sm:$0xff]  ;;  %9169 = vmatpush2.bf16.msra.mxu1 %v20266_v20 }
 0x272   : > { %v17037_v29 = vpack.c.bf16 %v6993_v56, %v6993_v56  ;;  %5882 = vst [vmem:[#allocation4 + $0x14c] sm:$0xf] %v16826_v62  ;;  %6096 = vst [vmem:[#allocation4 + $0x108] sm:$0xf] %v16826_v62  ;;  %v5485_v32 = vld [vmem:[#allocation2 + $0x41] sm:$0xff]  ;;  %v16824_v16 = vpack.c.bf16 %v5700_v46, %v5700_v46  ;;  %v6345_v52 = vld [vmem:[#allocation2 + $0x34] sm:$0xff]  ;;  %9170 = vmatprep.subr.bf16.mxu1 %v22018_v6 }
 0x273   : > { %v5701_v56 = vld [vmem:[#allocation2 + $0x42] sm:$0xff]  ;;  %6313 = vst [vmem:[#allocation4 + $0x130] sm:$0xf] %v16897_v30  ;;  %6527 = vst [vmem:[#allocation4 + $0xec] sm:$0xf] %v16931_v14  ;;  %v16789_v55 = vpack.c.bf16 %v5485_v32, %v5485_v32  ;;  %v6775_v62 = vld [vmem:[#allocation2 + $0x35] sm:$0xff]  ;;  %v20261_v30 = vpop.f32.mrf.mxu0 }
 0x274   : > { %6741 = vst [vmem:[#allocation4 + $0xa8] sm:$0xf] %v16931_v14  ;;  %6957 = vst [vmem:[#allocation4 + $0xac] sm:$0xf] %v17001_v3  ;;  %v16825_v18 = vpack.c.bf16 %v5701_v56, %v5701_v56  ;;  %v6346_v61 = vld [vmem:[#allocation2 + $0x3c] sm:$0xff]  ;;  %v5200_v9 = vsel %vm5164_vm14, %v4984_v17, 0.0  ;;  %v16929_v14 = vpack.c.bf16 %v6345_v52, %v6345_v52  ;;  %v16999_v45 = vpack.c.bf16 %v6775_v62, %v6775_v62 }
 0x275   : > { %7173 = vst [vmem:[#allocation4 + $0xb0] sm:$0xf] %v17037_v29  ;;  %v16930_v3 = vpack.c.bf16 %v6346_v61, %v6346_v61  ;;  %v6776_v29 = vld [vmem:[#allocation2 + $0x3d] sm:$0xff]  ;;  %5448 = vst [vmem:[#allocation4 + $0xfc] sm:$0xf] %v16752_v24  ;;  %v16900_v46 = vpack.c.bf16 %v5200_v9, %v5200_v9  ;;  %v5198_v52 = vsel %vm5162_vm15, %v4982_v42, 0.0  ;;  %v20278_v42 = vpop.permute.xlu0 %5094  ;;  %v20286_v47 = vpop.f32.mrf.mxu0  ;;  %v22019_v62 = vpack.c.bf16 %v20092_v0, %v20092_v0 }
 0x276   : > { %v6991_v35 = vld [vmem:[#allocation2 + $0x36] sm:$0xff]  ;;  %v6992_v32 = vld [vmem:[#allocation2 + $0x3e] sm:$0xff]  ;;  %5449 = vst [vmem:[#allocation4 + $0x120] sm:$0xf] %v16753_v10  ;;  %5664 = vst [vmem:[#allocation4 + $0x100] sm:$0xf] %v16788_v2  ;;  %v17000_v17 = vpack.c.bf16 %v6776_v29, %v6776_v29  ;;  %v16898_v24 = vpack.c.bf16 %v5198_v52, %v5198_v52  ;;  %v4987_v10 = vmul.f32 %v20246_v39, %v20067_v41 }
 0x277   : > { %5236 = vst [vmem:[#allocation2 + $0x6b] sm:$0xff] %v5200_v9  ;;  %v17035_v56 = vpack.c.bf16 %v6991_v35, %v6991_v35  ;;  %v17036_v26 = vpack.c.bf16 %v6992_v32, %v6992_v32  ;;  %5665 = vst [vmem:[#allocation4 + $0x124] sm:$0xf] %v16789_v55  ;;  %v18015_v61 = vld [vmem:[#allocation4 + $0x4c] ss:$36 sps:$4 sm:$0xff]   ;;  %v4985_v2 = vmul.f32 %v18659_v22, %v20073_v15  ;;  %v5271_v51 = vld [vmem:[#allocation2 + $0x50] sm:$0xff] }
 0x278   : > { %5880 = vst [vmem:[#allocation4 + $0x104] sm:$0xf] %v16824_v16  ;;  %5881 = vst [vmem:[#allocation4 + $0x128] sm:$0xf] %v16825_v18  ;;  %v20275_v55 = vld [vmem:[#allocation4 + $0x8] ss:$36 sps:$4 sm:$0xff]   ;;  %8838 = vmatprep.mubr.bf16.mxu1 %v18015_v61  ;;  %v16755_v1 = vpack.c.bf16 %v5271_v51, %v5271_v51  ;;  %v20314_v51 = vpop.permute.xlu1 %5097 }
 0x279   : > { %6094 = vst [vmem:[#allocation4 + $0xc0] sm:$0xf] %v16824_v16  ;;  %6095 = vst [vmem:[#allocation4 + $0xe4] sm:$0xf] %v16825_v18  ;;  %v5487_v16 = vld [vmem:[#allocation2 + $0x51] sm:$0xff]  ;;  %v4881_v41 = vadd.f32 1.0, %v20200_v25 }
 0x27a   : > { %6525 = vst [vmem:[#allocation4 + $0xa4] sm:$0xf] %v16929_v14  ;;  %6526 = vst [vmem:[#allocation4 + $0xc8] sm:$0xf] %v16930_v3  ;;  %v5703_v18 = vld [vmem:[#allocation2 + $0x52] sm:$0xff]  ;;  %v4884_v15 = vadd.f32 1.0, %v20229_v28  ;;  %v16791_v28 = vpack.c.bf16 %v5487_v16, %v5487_v16 }
 0x27b   : > { %6739 = vst [vmem:[#allocation4 + $0x60] sm:$0xf] %v16929_v14  ;;  %6740 = vst [vmem:[#allocation4 + $0x84] sm:$0xf] %v16930_v3  ;;  %v20284_v39 = vadd.f32 1.0, %v20244_v58  ;;  %v20297_v25 = vld [vmem:[%s21946_s1 + $0x3b0] sm:$0xff]   ;;  %v16827_v58 = vpack.c.bf16 %v5703_v18, %v5703_v18  ;;  %v18661_v3 = vpop.eup %18660  ;;  %18668 = vrcp.f32 %v4881_v41  ;;  %v20322_v41 = vpop.f32.mrf.mxu0 }
 0x27c   : > { %6955 = vst [vmem:[#allocation4 + $0x64] sm:$0xf] %v16999_v45  ;;  %6316 = vst [vmem:[#allocation4 + $0x19c] sm:$0xf] %v16900_v46  ;;  %v6348_v9 = vld [vmem:[#allocation2 + $0x4c] sm:$0xff]  ;;  %v5203_v0 = vsel %vm21968_vm0, %v4987_v10, 0.0  ;;  %v4988_v61 = vmul.f32 %v18661_v3, %v20077_v7  ;;  %18670 = vrcp.f32 %v4884_v15  ;;  %9171 = vmatpush2.bf16.msra.mxu1 %v20297_v25 }
 0x27d   : > { %5234 = vst [vmem:[#allocation2 + $0x5b] sm:$0xff] %v5198_v52  ;;  %7171 = vst [vmem:[#allocation4 + $0x68] sm:$0xf] %v17035_v56  ;;  %v6778_v22 = vld [vmem:[#allocation2 + $0x4d] sm:$0xff]  ;;  %v16932_v29 = vpack.c.bf16 %v6348_v9, %v6348_v9  ;;  %v16903_v32 = vpack.c.bf16 %v5203_v0, %v5203_v0  ;;  %v18019_v46 = vld [vmem:[#allocation4 + $0xc] ss:$36 sps:$4 sm:$0xff]   ;;  %v18663_v56 = vpop.eup %18662  ;;  %18672 = vrcp.f32 %v20284_v39  ;;  %9172 = vmatprep.subr.bf16.mxu1 %v22018_v6 }
 0x27e   : > { %7172 = vst [vmem:[#allocation4 + $0x8c] sm:$0xf] %v17036_v26  ;;  %6956 = vst [vmem:[#allocation4 + $0x88] sm:$0xf] %v17000_v17  ;;  %v22020_v26 = vpack.c.bf16 %v20127_v37, %v20127_v37  ;;  %v6994_v14 = vld [vmem:[#allocation2 + $0x4e] sm:$0xff]  ;;  %v20304_v37 = vld [vmem:[%s21946_s1 + $0x3f8] sm:$0xff]   ;;  %v17002_v45 = vpack.c.bf16 %v6778_v22, %v6778_v22  ;;  %9007 = vmatprep.mubr.bf16.mxu0 %v18019_v46 }
 0x27f   : > { %10619 = vst [vmem:[#allocation4 + $0x8] sm:$0xf] %v22019_v62  ;;  %6314 = vst [vmem:[#allocation4 + $0x154] sm:$0xf] %v16898_v24  ;;  %v17038_v35 = vpack.c.bf16 %v6994_v14, %v6994_v14  ;;  %v18020_v17 = vld [vmem:[#allocation4 + $0x48] ss:$36 sps:$4 sm:$0xff]   ;;  %9008 = vmatmul.mubr.bf16.vlgmr.msra.gmra.mxu0 %v20275_v55 }
 0x280   : > { %10620 = vst [vmem:[#allocation4 + $0x2c] sm:$0xf] %v22020_v26  ;;  %5239 = vst [vmem:[#allocation2 + $0x83] sm:$0xff] %v5203_v0  ;;  %v5201_v52 = vsel %vm21967_vm1, %v4985_v2, 0.0  ;;  %v20311_v24 = vadd.f32 1.0, %v20252_v50  ;;  %v5274_v20 = vld [vmem:[#allocation2 + $0x68] sm:$0xff]  ;;  %v20320_v50 = vadd.f32 %v20205_v53, %v19938_v27  ;;  %8839 = vmatmul.mubr.bf16.gmra.mxu1 %v18020_v17  ;;  %v20338_v53 = vpop.permute.xlu0 %5100  ;;  %9330 = vmatpush1.bf16.msra.mxu0 %v20304_v37 }
 0x281   : > { %5451 = vst [vmem:[#allocation4 + $0x168] sm:$0xf] %v16755_v1  ;;  %5667 = vst [vmem:[#allocation4 + $0x16c] sm:$0xf] %v16791_v28  ;;  %v18021_v10 = vld [vmem:[#allocation4 + $0x94] ss:$36 sps:$4 sm:$0xff]   ;;  %v16901_v2 = vpack.c.bf16 %v5201_v52, %v5201_v52  ;;  %v16758_v26 = vpack.c.bf16 %v5274_v20, %v5274_v20  ;;  %9331 = vmatprep.subr.bf16.mxu0 %v22018_v6 }
 0x282   : > { %5883 = vst [vmem:[#allocation4 + $0x170] sm:$0xf] %v16827_v58  ;;  %6097 = vst [vmem:[#allocation4 + $0x12c] sm:$0xf] %v16827_v58  ;;  %v5490_v16 = vld [vmem:[#allocation2 + $0x69] sm:$0xff]  ;;  %v20316_v7 = vadd.f32 1.0, %v18663_v56  ;;  %8846 = vmatprep.mubr.bf16.mxu1 %v18021_v10  ;;  %18674 = vrcp.f32 %v20311_v24 }
 0x283   : > { %6528 = vst [vmem:[#allocation4 + $0x110] sm:$0xf] %v16932_v29  ;;  %6742 = vst [vmem:[#allocation4 + $0xcc] sm:$0xf] %v16932_v29  ;;  %v5706_v18 = vld [vmem:[#allocation2 + $0x6a] sm:$0xff]  ;;  %v16794_v1 = vpack.c.bf16 %v5490_v16, %v5490_v16  ;;  %v5204_v22 = vsel %vm21966_vm2, %v4988_v61, 0.0 }
 0x284   : > { %6958 = vst [vmem:[#allocation4 + $0xd0] sm:$0xf] %v17002_v45  ;;  %7174 = vst [vmem:[#allocation4 + $0xd4] sm:$0xf] %v17038_v35  ;;  %v20327_v62 = vld [vmem:[%s21946_s1 + $0x3a8] sm:$0xff]   ;;  %v16830_v28 = vpack.c.bf16 %v5706_v18, %v5706_v18  ;;  %v20335_v27 = vld [vmem:[%s21946_s1 + $0x3f0] sm:$0xff]   ;;  %18676 = vrcp.f32 %v20316_v7 }
 0x285   : > { %6319 = vst [vmem:[#allocation4 + $0x208] sm:$0xf] %v16903_v32  ;;  %5237 = vst [vmem:[#allocation2 + $0x73] sm:$0xff] %v5201_v52  ;;  %v6351_v58 = vld [vmem:[#allocation2 + $0x64] sm:$0xff]  ;;  %v5272_v29 = vld [vmem:[#allocation2 + $0x58] sm:$0xff]  ;;  %v16904_v32 = vpack.c.bf16 %v5204_v22, %v5204_v22  ;;  %vm21969_vm2 = vcmp.eq.s32.totalorder %v20338_v53, 1  ;;  %18678 = vpow2.f32 %v20176_v33  ;;  %9173 = vmatpush2.bf16.msra.mxu1 %v20327_v62  ;;  %v20373_v33 = vadd.f32 %v20261_v30, %v19958_v57 }
 0x286   : > { %v6781_v15 = vld [vmem:[#allocation2 + $0x65] sm:$0xff]  ;;  %v16935_v14 = vpack.c.bf16 %v6351_v58, %v6351_v58  ;;  %v5488_v35 = vld [vmem:[#allocation2 + $0x59] sm:$0xff]  ;;  %6317 = vst [vmem:[#allocation4 + $0x1c0] sm:$0xf] %v16901_v2  ;;  %5240 = vst [vmem:[#allocation2 + $0x8b] sm:$0xff] %v5204_v22  ;;  %v16756_v55 = vpack.c.bf16 %v5272_v29, %v5272_v29  ;;  %vm21971_vm1 = vcmp.eq.s32.totalorder %v20278_v42, 1  ;;  %v20361_v22 = vpop.permute.xlu1 %5103  ;;  %v20377_v62 = vadd.f32 %v20286_v47, %v19976_v63 }
 0x287   : > { %v6997_v9 = vld [vmem:[#allocation2 + $0x66] sm:$0xff]  ;;  %v17005_v0 = vpack.c.bf16 %v6781_v15, %v6781_v15  ;;  %5454 = vst [vmem:[#allocation4 + $0x1d4] sm:$0xf] %v16758_v26  ;;  %5670 = vst [vmem:[#allocation4 + $0x1d8] sm:$0xf] %v16794_v1  ;;  %v16792_v56 = vpack.c.bf16 %v5488_v35, %v5488_v35  ;;  %v5704_v52 = vld [vmem:[#allocation2 + $0x5a] sm:$0xff]  ;;  %v20346_v26 = vpop.f32.mrf.mxu0  ;;  %9332 = vmatpush1.bf16.msra.mxu0 %v20335_v27  ;;  %9174 = vmatprep.subr.bf16.mxu1 %v22018_v6 }
 0x288   : > { %v17041_v3 = vpack.c.bf16 %v6997_v9, %v6997_v9  ;;  %v5273_v45 = vld [vmem:[#allocation2 + $0x60] sm:$0xff]  ;;  %5886 = vst [vmem:[#allocation4 + $0x1dc] sm:$0xf] %v16830_v28  ;;  %6100 = vst [vmem:[#allocation4 + $0x198] sm:$0xf] %v16830_v28  ;;  %v16828_v10 = vpack.c.bf16 %v5704_v52, %v5704_v52  ;;  %v6349_v16 = vld [vmem:[#allocation2 + $0x54] sm:$0xff]  ;;  %v20383_v57 = vadd.f32 %v20322_v41, %v19965_v54  ;;  %9333 = vmatprep.subr.bf16.mxu0 %v22018_v6 }
 0x289   : > { %v16757_v46 = vpack.c.bf16 %v5273_v45, %v5273_v45  ;;  %v5489_v17 = vld [vmem:[#allocation2 + $0x61] sm:$0xff]  ;;  %6531 = vst [vmem:[#allocation4 + $0x17c] sm:$0xf] %v16935_v14  ;;  %6745 = vst [vmem:[#allocation4 + $0x138] sm:$0xf] %v16935_v14  ;;  %v6779_v2 = vld [vmem:[#allocation2 + $0x55] sm:$0xff]  ;;  %v16933_v39 = vpack.c.bf16 %v6349_v16, %v6349_v16  ;;  %v20385_v63 = vpop.f32.mrf.mxu0 }
 0x28a   : > { %v5705_v61 = vld [vmem:[#allocation2 + $0x62] sm:$0xff]  ;;  %6961 = vst [vmem:[#allocation4 + $0x13c] sm:$0xf] %v17005_v0  ;;  %7177 = vst [vmem:[#allocation4 + $0x140] sm:$0xf] %v17041_v3  ;;  %v16793_v25 = vpack.c.bf16 %v5489_v17, %v5489_v17  ;;  %v17003_v28 = vpack.c.bf16 %v6779_v2, %v6779_v2  ;;  %v6995_v58 = vld [vmem:[#allocation2 + $0x56] sm:$0xff]  ;;  %v18665_v17 = vpop.eup %18664 }
 0x28b   : > { %v16829_v20 = vpack.c.bf16 %v5705_v61, %v5705_v61  ;;  %v6350_v18 = vld [vmem:[#allocation2 + $0x5c] sm:$0xff]  ;;  %6320 = vst [vmem:[#allocation4 + $0x22c] sm:$0xf] %v16904_v32  ;;  %5452 = vst [vmem:[#allocation4 + $0x18c] sm:$0xf] %v16756_v55  ;;  %v20353_v9 = vld [vmem:[%s21946_s1 + $0x3e8] sm:$0xff]   ;;  %v17039_v0 = vpack.c.bf16 %v6995_v58, %v6995_v58  ;;  %v18667_v30 = vpop.eup %18666  ;;  %v4986_v2 = vmul.f32 %v18665_v17, %v20083_v44 }
 0x28c   : > { %v16934_v37 = vpack.c.bf16 %v6350_v18, %v6350_v18  ;;  %v6780_v1 = vld [vmem:[#allocation2 + $0x5d] sm:$0xff]  ;;  %5453 = vst [vmem:[#allocation4 + $0x1b0] sm:$0xf] %v16757_v46  ;;  %5668 = vst [vmem:[#allocation4 + $0x190] sm:$0xf] %v16792_v56  ;;  %vm21970_vm0 = vcmp.eq.s32.totalorder %v20361_v22, 1  ;;  %v20369_v46 = vadd.f32 %v20237_v23, %v19972_v19  ;;  %9334 = vmatpush1.bf16.msra.mxu0 %v20353_v9 }
 0x28d   : > { %v6996_v15 = vld [vmem:[#allocation2 + $0x5e] sm:$0xff]  ;;  %v17004_v14 = vpack.c.bf16 %v6780_v1, %v6780_v1  ;;  %5669 = vst [vmem:[#allocation4 + $0x1b4] sm:$0xf] %v16793_v25  ;;  %5884 = vst [vmem:[#allocation4 + $0x194] sm:$0xf] %v16828_v10  ;;  %v5275_v45 = vld [vmem:[#allocation2 + $0x70] sm:$0xff]  ;;  %9335 = vmatprep.subr.bf16.mxu0 %v22018_v6 }
 0x28e   : > { %v20358_v24 = vld [vmem:[%s21946_s1 + $0x3a0] sm:$0xff]   ;;  %v17040_v3 = vpack.c.bf16 %v6996_v15, %v6996_v15  ;;  %5885 = vst [vmem:[#allocation4 + $0x1b8] sm:$0xf] %v16829_v20  ;;  %6098 = vst [vmem:[#allocation4 + $0x150] sm:$0xf] %v16828_v10  ;;  %v5491_v35 = vld [vmem:[#allocation2 + $0x71] sm:$0xff]  ;;  %v16759_v56 = vpack.c.bf16 %v5275_v45, %v5275_v45  ;;  %v4991_v15 = vmul.f32 %v18667_v30, %v20090_v49  ;;  %v18669_v49 = vpop.eup %18668 }
 0x28f   : > { %6099 = vst [vmem:[#allocation4 + $0x174] sm:$0xf] %v16829_v20  ;;  %v18023_v7 = vld [vmem:[#allocation4 + $0x54] ss:$36 sps:$4 sm:$0xff]   ;;  %6529 = vst [vmem:[#allocation4 + $0x134] sm:$0xf] %v16933_v39  ;;  %v16795_v52 = vpack.c.bf16 %v5491_v35, %v5491_v35  ;;  %9175 = vmatpush2.bf16.msra.mxu1 %v20358_v24  ;;  %v18671_v9 = vpop.eup %18670  ;;  %v20419_v30 = vadd.f32 %v20346_v26, %v19985_v34 }
 0x290   : > { %v18026_v29 = vld [vmem:[#allocation4 + $0x90] ss:$36 sps:$4 sm:$0xff]   ;;  %6530 = vst [vmem:[#allocation4 + $0x158] sm:$0xf] %v16934_v37  ;;  %6743 = vst [vmem:[#allocation4 + $0xf0] sm:$0xf] %v16933_v39  ;;  %9015 = vmatprep.mubr.bf16.mxu0 %v18023_v7  ;;  %9176 = vmatprep.subr.bf16.mxu1 %v22018_v6 }
 0x291   : > { %6744 = vst [vmem:[#allocation4 + $0x114] sm:$0xf] %v16934_v37  ;;  %6959 = vst [vmem:[#allocation4 + $0xf4] sm:$0xf] %v17003_v28  ;;  %v5707_v32 = vld [vmem:[#allocation2 + $0x72] sm:$0xff]  ;;  %v5278_v20 = vld [vmem:[#allocation2 + $0x88] sm:$0xff]  ;;  %8847 = vmatmul.mubr.bf16.gmra.mxu1 %v18026_v29 }
 0x292   : > { %v15105_v55 = vmul.f32 -1.442695, %v20320_v50  ;;  %6960 = vst [vmem:[#allocation4 + $0x118] sm:$0xf] %v17004_v14  ;;  %7175 = vst [vmem:[#allocation4 + $0xf8] sm:$0xf] %v17039_v0  ;;  %v16831_v19 = vpack.c.bf16 %v5707_v32, %v5707_v32  ;;  %v16762_v41 = vpack.c.bf16 %v5278_v20, %v5278_v20  ;;  %v20400_v14 = vpop.permute.xlu0 %5106 }
 0x293   : > { %7176 = vst [vmem:[#allocation4 + $0x11c] sm:$0xf] %v17040_v3  ;;  %v6352_v23 = vld [vmem:[#allocation2 + $0x6c] sm:$0xff]  ;;  %v20391_v39 = vld [vmem:[%s21946_s1 + $0x3e0] sm:$0xff]   ;;  %v20396_v54 = vld [vmem:[%s21946_s1 + $0x398] sm:$0xff]   ;;  %v5202_v29 = vsel %vm21979_vm3, %v4986_v2, 0.0 }
 0x294   : > { %v6782_v61 = vld [vmem:[#allocation2 + $0x6d] sm:$0xff]  ;;  %v16936_v47 = vpack.c.bf16 %v6352_v23, %v6352_v23  ;;  %5455 = vst [vmem:[#allocation4 + $0x1f8] sm:$0xf] %v16759_v56  ;;  %5671 = vst [vmem:[#allocation4 + $0x1fc] sm:$0xf] %v16795_v52  ;;  %v6355_v28 = vld [vmem:[#allocation2 + $0x84] sm:$0xff]  ;;  %v16902_v35 = vpack.c.bf16 %v5202_v29, %v5202_v29  ;;  %18680 = vpow2.f32 %v15105_v55  ;;  %v17518_v56 = vpop.f32.mrf.mxu0  ;;  %9336 = vmatpush1.bf16.msra.mxu0 %v20391_v39  ;;  %9177 = vmatpush2.bf16.msra.mxu1 %v20396_v54 }
 0x295   : > { %v6998_v25 = vld [vmem:[#allocation2 + $0x6e] sm:$0xff]  ;;  %v17006_v27 = vpack.c.bf16 %v6782_v61, %v6782_v61  ;;  %5887 = vst [vmem:[#allocation4 + $0x200] sm:$0xf] %v16831_v19  ;;  %6101 = vst [vmem:[#allocation4 + $0x1bc] sm:$0xf] %v16831_v19  ;;  %v6785_v44 = vld [vmem:[#allocation2 + $0x85] sm:$0xff]  ;;  %v16939_v0 = vpack.c.bf16 %v6355_v28, %v6355_v28  ;;  %v4989_v19 = vmul.f32 %v18669_v49, %v20100_v38  ;;  %9337 = vmatprep.subr.bf16.mxu0 %v22018_v6 }
 0x296   : > { %v17042_v10 = vpack.c.bf16 %v6998_v25, %v6998_v25  ;;  %v5494_v16 = vld [vmem:[#allocation2 + $0x89] sm:$0xff]  ;;  %22021 = vst [vmem:[#allocation19_spill] sm:$0xff] %v20400_v14  ;;  %6532 = vst [vmem:[#allocation4 + $0x1a0] sm:$0xf] %v16936_v47  ;;  %v17009_v3 = vpack.c.bf16 %v6785_v44, %v6785_v44  ;;  %v18027_v45 = vld [vmem:[#allocation4 + $0x50] ss:$36 sps:$4 sm:$0xff]   ;;  %v4992_v61 = vmul.f32 %v18671_v9, %v20118_v5  ;;  %9178 = vmatprep.subr.bf16.mxu1 %v22018_v6 }
 0x297   : > { %v5710_v18 = vld [vmem:[#allocation2 + $0x8a] sm:$0xff]  ;;  %v16798_v37 = vpack.c.bf16 %v5494_v16, %v5494_v16  ;;  %6746 = vst [vmem:[#allocation4 + $0x15c] sm:$0xf] %v16936_v47  ;;  %6962 = vst [vmem:[#allocation4 + $0x160] sm:$0xf] %v17006_v27  ;;  %v5207_v32 = vsel %vm21969_vm2, %v4991_v15, 0.0  ;;  %9016 = vmatmul.mubr.bf16.gmra.mxu0 %v18027_v45  ;;  %v20434_v34 = vadd.f32 %v17518_v56, %v19991_v31  ;;  %v18673_v16 = vpop.eup %18672  ;;  %v20442_v31 = vpop.permute.xlu0 %5112 }
 0x298   : > { %v16834_v1 = vpack.c.bf16 %v5710_v18, %v5710_v18  ;;  %v7001_v58 = vld [vmem:[#allocation2 + $0x86] sm:$0xff]  ;;  %7178 = vst [vmem:[#allocation4 + $0x164] sm:$0xf] %v17042_v10  ;;  %5458 = vst [vmem:[#allocation4 + $0x264] sm:$0xf] %v16762_v41  ;;  %v16907_v24 = vpack.c.bf16 %v5207_v32, %v5207_v32  ;;  %vm21972_vm2 = vcmp.eq.s32.totalorder %v20400_v14, 1  ;;  %v20431_v10 = vadd.f32 %v20385_v63, %v19979_v48  ;;  %v18675_v48 = vpop.eup %18674 }
 0x299   : > { %v17045_v7 = vpack.c.bf16 %v7001_v58, %v7001_v58  ;;  %5674 = vst [vmem:[#allocation4 + $0x268] sm:$0xf] %v16798_v37  ;;  %5238 = vst [vmem:[#allocation2 + $0x7b] sm:$0xff] %v5202_v29  ;;  %v15110_v17 = vmul.f32 -1.442695, %v20369_v46  ;;  %v18112_v38 = vld [vmem:[%s21946_s1 + $0x3d8] sm:$0xff]   ;;  %v4990_v39 = vmul.f32 %v18673_v16, %v20125_v12  ;;  %v18677_v28 = vpop.eup %18676  ;;  %v4995_v12 = vmul.f32 %v18675_v48, %v20136_v43 }
 0x29a   : > { %5890 = vst [vmem:[#allocation4 + $0x26c] sm:$0xf] %v16834_v1  ;;  %6104 = vst [vmem:[#allocation4 + $0x228] sm:$0xf] %v16834_v1  ;;  %v18028_v52 = vld [vmem:[#allocation4 + $0xdc] ss:$36 sps:$4 sm:$0xff]   ;;  %v20455_v58 = vpop.eup %18678  ;;  %v4993_v29 = vmul.f32 %v18677_v28, %v20156_v21  ;;  %9338 = vmatpush1.bf16.msra.mxu0 %v18112_v38 }
 0x29b   : > { %6535 = vst [vmem:[#allocation4 + $0x20c] sm:$0xf] %v16939_v0  ;;  %6749 = vst [vmem:[#allocation4 + $0x1c8] sm:$0xf] %v16939_v0  ;;  %v15108_v23 = vmul.f32 -1.442695, %v20373_v33  ;;  %18682 = vpow2.f32 %v15110_v17  ;;  %8854 = vmatprep.mubr.bf16.mxu1 %v18028_v52  ;;  %9339 = vmatprep.subr.bf16.mxu0 %v22018_v6 }
 0x29c   : > { %6965 = vst [vmem:[#allocation4 + $0x1cc] sm:$0xf] %v17009_v3  ;;  %7181 = vst [vmem:[#allocation4 + $0x1d0] sm:$0xf] %v17045_v7  ;;  %v15111_v55 = vmul.f32 -1.442695, %v20377_v62 }
 0x29d   : > { %5243 = vst [vmem:[#allocation2 + $0xa3] sm:$0xff] %v5207_v32  ;;  %6318 = vst [vmem:[#allocation4 + $0x1e4] sm:$0xf] %v16902_v35  ;;  %v15109_v25 = vmul.f32 -1.442695, %v20383_v57  ;;  %v18123_v27 = vld [vmem:[%s21946_s1 + $0x390] sm:$0xff]   ;;  %18684 = vpow2.f32 %v15108_v23 }
 0x29e   : > { %v18030_v47 = vld [vmem:[#allocation4 + $0x9c] ss:$36 sps:$4 sm:$0xff]   ;;  %6323 = vst [vmem:[#allocation4 + $0x298] sm:$0xf] %v16907_v24  ;;  %v5205_v5 = vsel %vm21971_vm1, %v4989_v19, 0.0  ;;  %v5208_v2 = vsel %vm21970_vm0, %v4992_v61, 0.0  ;;  %18686 = vpow2.f32 %v15111_v55  ;;  %9179 = vmatpush2.bf16.msra.mxu1 %v18123_v27 }
 0x29f   : > { %v18033_v26 = vld [vmem:[#allocation4 + $0xd8] ss:$36 sps:$4 sm:$0xff]   ;;  %v18035_v20 = vld [vmem:[#allocation4 + $0x124] ss:$36 sps:$4 sm:$0xff]   ;;  %5241 = vst [vmem:[#allocation2 + $0x93] sm:$0xff] %v5205_v5  ;;  %v16905_v18 = vpack.c.bf16 %v5205_v5, %v5205_v5  ;;  %9023 = vmatprep.mubr.bf16.mxu0 %v18030_v47  ;;  %22022 = vst [vmem:[#allocation20_spill] sm:$0xff] %v20442_v31  ;;  %v16908_v63 = vpack.c.bf16 %v5208_v2, %v5208_v2  ;;  %18688 = vpow2.f32 %v15109_v25  ;;  %9180 = vmatprep.subr.bf16.mxu1 %v22018_v6 }
 0x2a0   : > { %v15114_v41 = vmul.f32 -1.442695, %v20419_v30  ;;  %5244 = vst [vmem:[#allocation2 + $0xab] sm:$0xff] %v5208_v2  ;;  %v15112_v54 = vmul.f32 -1.442695, %v20431_v10  ;;  %8855 = vmatmul.mubr.bf16.gmra.mxu1 %v18033_v26  ;;  %v20449_v1 = vld [vmem:[%s21946_s1 + $0x3d0] sm:$0xff]   ;;  %v20472_v2 = vpop.f32.mrf.mxu0 }
 0x2a1   : > { %v18034_v37 = vld [vmem:[#allocation4 + $0x98] ss:$36 sps:$4 sm:$0xff]   ;;  %vm21977_vm0 = vcmp.eq.s32.totalorder %v20314_v51, 1  ;;  %vm21973_vm1 = vcmp.eq.s32.totalorder %v20442_v31, 1  ;;  %6321 = vst [vmem:[#allocation4 + $0x250] sm:$0xf] %v16905_v18  ;;  %8862 = vmatprep.mubr.bf16.mxu1 %v18035_v20  ;;  %9340 = vmatpush1.bf16.msra.mxu0 %v20449_v1 }
 0x2a2   : > { %18690 = vpow2.f32 %v15114_v41  ;;  %v18037_v44 = vld [vmem:[#allocation4 + $0xe4] ss:$36 sps:$4 sm:$0xff]   ;;  %v5277_v0 = vld [vmem:[#allocation2 + $0x80] sm:$0xff]  ;;  %6324 = vst [vmem:[#allocation4 + $0x2bc] sm:$0xf] %v16908_v63  ;;  %v5206_v7 = vsel %vm21977_vm0, %v4990_v39, 0.0  ;;  %9024 = vmatmul.mubr.bf16.gmra.mxu0 %v18034_v37  ;;  %9341 = vmatprep.subr.bf16.mxu0 %v22018_v6 }
 0x2a3   : > { %v5276_v15 = vld [vmem:[#allocation2 + $0x78] sm:$0xff]  ;;  %18692 = vpow2.f32 %v15112_v54  ;;  %v20461_v45 = vmul.f32 -1.442695, %v20434_v34  ;;  %v16761_v49 = vpack.c.bf16 %v5277_v0, %v5277_v0  ;;  %v5493_v35 = vld [vmem:[#allocation2 + $0x81] sm:$0xff]  ;;  %5242 = vst [vmem:[#allocation2 + $0x9b] sm:$0xff] %v5206_v7  ;;  %v16906_v52 = vpack.c.bf16 %v5206_v7, %v5206_v7  ;;  %9031 = vmatprep.mubr.bf16.mxu0 %v18037_v44 }
 0x2a4   : > { %v5492_v3 = vld [vmem:[#allocation2 + $0x79] sm:$0xff]  ;;  %v16760_v43 = vpack.c.bf16 %v5276_v15, %v5276_v15  ;;  %v5709_v56 = vld [vmem:[#allocation2 + $0x82] sm:$0xff]  ;;  %v16797_v9 = vpack.c.bf16 %v5493_v35, %v5493_v35  ;;  %v5211_v61 = vsel %vm21973_vm1, %v4995_v12, 0.0  ;;  %v18040_v25 = vld [vmem:[#allocation4 + $0x120] ss:$36 sps:$4 sm:$0xff]   ;;  %v5209_v28 = vsel %vm21972_vm2, %v4993_v29, 0.0 }
 0x2a5   : > { %v16796_v32 = vpack.c.bf16 %v5492_v3, %v5492_v3  ;;  %v5708_v17 = vld [vmem:[#allocation2 + $0x7a] sm:$0xff]  ;;  %v16833_v19 = vpack.c.bf16 %v5709_v56, %v5709_v56  ;;  %v20469_v47 = vld [vmem:[%s21946_s1 + $0x3c8] sm:$0xff]   ;;  %5457 = vst [vmem:[#allocation4 + $0x240] sm:$0xf] %v16761_v49  ;;  %6322 = vst [vmem:[#allocation4 + $0x274] sm:$0xf] %v16906_v52  ;;  %v16911_v18 = vpack.c.bf16 %v5211_v61, %v5211_v61  ;;  %v18681_v49 = vpop.eup %18680 }
 0x2a6   : > { %v16832_v24 = vpack.c.bf16 %v5708_v17, %v5708_v17  ;;  %v6353_v21 = vld [vmem:[#allocation2 + $0x74] sm:$0xff]  ;;  %v6354_v23 = vld [vmem:[#allocation2 + $0x7c] sm:$0xff]  ;;  %5456 = vst [vmem:[#allocation4 + $0x21c] sm:$0xf] %v16760_v43  ;;  %5247 = vst [vmem:[#allocation2 + $0xc3] sm:$0xff] %v5211_v61  ;;  %v16909_v43 = vpack.c.bf16 %v5209_v28, %v5209_v28  ;;  %v4888_v52 = vadd.f32 1.0, %v20455_v58  ;;  %9342 = vmatpush1.bf16.msra.mxu0 %v20469_v47 }
 0x2a7   : > { %v6783_v55 = vld [vmem:[#allocation2 + $0x75] sm:$0xff]  ;;  %v16937_v38 = vpack.c.bf16 %v6353_v21, %v6353_v21  ;;  %v16938_v27 = vpack.c.bf16 %v6354_v23, %v6354_v23  ;;  %v6784_v5 = vld [vmem:[#allocation2 + $0x7d] sm:$0xff]  ;;  %5672 = vst [vmem:[#allocation4 + $0x220] sm:$0xf] %v16796_v32  ;;  %5673 = vst [vmem:[#allocation4 + $0x244] sm:$0xf] %v16797_v9  ;;  %9343 = vmatprep.subr.bf16.mxu0 %v22018_v6 }
 0x2a8   : > { %v17007_v26 = vpack.c.bf16 %v6783_v55, %v6783_v55  ;;  %v6999_v20 = vld [vmem:[#allocation2 + $0x76] sm:$0xff]  ;;  %v7000_v16 = vld [vmem:[#allocation2 + $0x7e] sm:$0xff]  ;;  %v17008_v41 = vpack.c.bf16 %v6784_v5, %v6784_v5  ;;  %5888 = vst [vmem:[#allocation4 + $0x224] sm:$0xf] %v16832_v24  ;;  %5889 = vst [vmem:[#allocation4 + $0x248] sm:$0xf] %v16833_v19  ;;  %8863 = vmatmul.mubr.bf16.gmra.mxu1 %v18040_v25  ;;  %v20486_v25 = vpop.f32.mrf.mxu0  ;;  %v18683_v5 = vpop.eup %18682  ;;  %18694 = vrcp.f32 %v4888_v52 }
 0x2a9   : > { %v17043_v48 = vpack.c.bf16 %v6999_v20, %v6999_v20  ;;  %v17044_v63 = vpack.c.bf16 %v7000_v16, %v7000_v16  ;;  %6102 = vst [vmem:[#allocation4 + $0x1e0] sm:$0xf] %v16832_v24  ;;  %6103 = vst [vmem:[#allocation4 + $0x204] sm:$0xf] %v16833_v19  ;;  %v5279_v39 = vld [vmem:[#allocation2 + $0x90] sm:$0xff]  ;;  %v5282_v32 = vld [vmem:[#allocation2 + $0xa8] sm:$0xff]  ;;  %v20484_v19 = vpop.permute.xlu1 %5109 }
 0x2aa   : > { %v5495_v54 = vld [vmem:[#allocation2 + $0x91] sm:$0xff]  ;;  %6533 = vst [vmem:[#allocation4 + $0x1c4] sm:$0xf] %v16937_v38  ;;  %6534 = vst [vmem:[#allocation4 + $0x1e8] sm:$0xf] %v16938_v27  ;;  %v16763_v12 = vpack.c.bf16 %v5279_v39, %v5279_v39  ;;  %v5498_v17 = vld [vmem:[#allocation2 + $0xa9] sm:$0xff]  ;;  %v16766_v21 = vpack.c.bf16 %v5282_v32, %v5282_v32 }
 0x2ab   : > { %v5711_v37 = vld [vmem:[#allocation2 + $0x92] sm:$0xff]  ;;  %6747 = vst [vmem:[#allocation4 + $0x180] sm:$0xf] %v16937_v38  ;;  %6748 = vst [vmem:[#allocation4 + $0x1a4] sm:$0xf] %v16938_v27  ;;  %v16799_v44 = vpack.c.bf16 %v5495_v54, %v5495_v54  ;;  %v5714_v56 = vld [vmem:[#allocation2 + $0xaa] sm:$0xff]  ;;  %v16802_v23 = vpack.c.bf16 %v5498_v17, %v5498_v17 }
 0x2ac   : > { %6963 = vst [vmem:[#allocation4 + $0x184] sm:$0xf] %v17007_v26  ;;  %v16835_v15 = vpack.c.bf16 %v5711_v37, %v5711_v37  ;;  %v6356_v0 = vld [vmem:[#allocation2 + $0x8c] sm:$0xff]  ;;  %6327 = vst [vmem:[#allocation4 + $0x328] sm:$0xf] %v16911_v18  ;;  %v20482_v24 = vld [vmem:[%s21946_s1 + $0x3c0] sm:$0xff]   ;;  %v16838_v55 = vpack.c.bf16 %v5714_v56, %v5714_v56 }
 0x2ad   : > { %v6786_v3 = vld [vmem:[#allocation2 + $0x8d] sm:$0xff]  ;;  %5245 = vst [vmem:[#allocation2 + $0xb3] sm:$0xff] %v5209_v28  ;;  %6964 = vst [vmem:[#allocation4 + $0x1a8] sm:$0xf] %v17008_v41  ;;  %v16940_v1 = vpack.c.bf16 %v6356_v0, %v6356_v0  ;;  %v6359_v61 = vld [vmem:[#allocation2 + $0xa4] sm:$0xff]  ;;  %v4886_v58 = vadd.f32 1.0, %v18681_v49  ;;  %9344 = vmatpush1.bf16.msra.mxu0 %v20482_v24 }
 0x2ae   : > { %v7002_v7 = vld [vmem:[#allocation2 + $0x8e] sm:$0xff]  ;;  %7179 = vst [vmem:[#allocation4 + $0x188] sm:$0xf] %v17043_v48  ;;  %7180 = vst [vmem:[#allocation4 + $0x1ac] sm:$0xf] %v17044_v63  ;;  %v17010_v29 = vpack.c.bf16 %v6786_v3, %v6786_v3  ;;  %v6789_v38 = vld [vmem:[#allocation2 + $0xa5] sm:$0xff]  ;;  %v16943_v26 = vpack.c.bf16 %v6359_v61, %v6359_v61  ;;  %v18685_v63 = vpop.eup %18684  ;;  %9345 = vmatprep.subr.bf16.mxu0 %v22018_v6 }
 0x2af   : > { %v17046_v35 = vpack.c.bf16 %v7002_v7, %v7002_v7  ;;  %v18041_v9 = vld [vmem:[#allocation4 + $0xe0] ss:$36 sps:$4 sm:$0xff]   ;;  %22023 = vst [vmem:[#allocation21_spill] sm:$0xff] %v20484_v19  ;;  %5459 = vst [vmem:[#allocation4 + $0x288] sm:$0xf] %v16763_v12  ;;  %v7005_v27 = vld [vmem:[#allocation2 + $0xa6] sm:$0xff]  ;;  %v17013_v20 = vpack.c.bf16 %v6789_v38, %v6789_v38  ;;  %18696 = vrcp.f32 %v4886_v58  ;;  %v20492_v38 = vpop.permute.xlu0 %5118 }
 0x2b0   : > { %5675 = vst [vmem:[#allocation4 + $0x28c] sm:$0xf] %v16799_v44  ;;  %5891 = vst [vmem:[#allocation4 + $0x290] sm:$0xf] %v16835_v15  ;;  %v17049_v16 = vpack.c.bf16 %v7005_v27, %v7005_v27  ;;  %v5280_v18 = vld [vmem:[#allocation2 + $0x98] sm:$0xff]  ;;  %v5281_v41 = vld [vmem:[#allocation2 + $0xa0] sm:$0xff]  ;;  %9032 = vmatmul.mubr.bf16.gmra.mxu0 %v18041_v9 }
 0x2b1   : > { %6105 = vst [vmem:[#allocation4 + $0x24c] sm:$0xf] %v16835_v15  ;;  %6325 = vst [vmem:[#allocation4 + $0x2e0] sm:$0xf] %v16909_v43  ;;  %v5496_v48 = vld [vmem:[#allocation2 + $0x99] sm:$0xff]  ;;  %v16764_v39 = vpack.c.bf16 %v5280_v18, %v5280_v18  ;;  %v16765_v54 = vpack.c.bf16 %v5281_v41, %v5281_v41  ;;  %v5497_v37 = vld [vmem:[#allocation2 + $0xa1] sm:$0xff]  ;;  %v18687_v15 = vpop.eup %18686  ;;  %v20495_v18 = vpop.permute.xlu1 %5115 }
 0x2b2   : > { %6536 = vst [vmem:[#allocation4 + $0x230] sm:$0xf] %v16940_v1  ;;  %6750 = vst [vmem:[#allocation4 + $0x1ec] sm:$0xf] %v16940_v1  ;;  %v16800_v28 = vpack.c.bf16 %v5496_v48, %v5496_v48  ;;  %v5712_v12 = vld [vmem:[#allocation2 + $0x9a] sm:$0xff]  ;;  %v5713_v44 = vld [vmem:[#allocation2 + $0xa2] sm:$0xff]  ;;  %v16801_v47 = vpack.c.bf16 %v5497_v37, %v5497_v37 }
 0x2b3   : > { %6966 = vst [vmem:[#allocation4 + $0x1f0] sm:$0xf] %v17010_v29  ;;  %7182 = vst [vmem:[#allocation4 + $0x1f4] sm:$0xf] %v17046_v35  ;;  %v16836_v0 = vpack.c.bf16 %v5712_v12, %v5712_v12  ;;  %v16837_v3 = vpack.c.bf16 %v5713_v44, %v5713_v44  ;;  %v6357_v7 = vld [vmem:[#allocation2 + $0x94] sm:$0xff]  ;;  %v6358_v43 = vld [vmem:[#allocation2 + $0x9c] sm:$0xff]  ;;  %v18689_v29 = vpop.eup %18688 }
 0x2b4   : > { %5462 = vst [vmem:[#allocation4 + $0x2f4] sm:$0xf] %v16766_v21  ;;  %5678 = vst [vmem:[#allocation4 + $0x2f8] sm:$0xf] %v16802_v23  ;;  %v6787_v49 = vld [vmem:[#allocation2 + $0x95] sm:$0xff]  ;;  %v4891_v1 = vadd.f32 1.0, %v18683_v5  ;;  %v16941_v35 = vpack.c.bf16 %v6357_v7, %v6357_v7  ;;  %v16942_v32 = vpack.c.bf16 %v6358_v43, %v6358_v43  ;;  %v18691_v61 = vpop.eup %18690  ;;  %v20501_v43 = vadd.f32 %v20472_v2, %v19982_v11 }
 0x2b5   : > { %5894 = vst [vmem:[#allocation4 + $0x2fc] sm:$0xf] %v16838_v55  ;;  %6108 = vst [vmem:[#allocation4 + $0x2b8] sm:$0xf] %v16838_v55  ;;  %v6788_v17 = vld [vmem:[#allocation2 + $0x9d] sm:$0xff]  ;;  %v17011_v56 = vpack.c.bf16 %v6787_v49, %v6787_v49  ;;  %v4889_v23 = vadd.f32 1.0, %v18685_v63  ;;  %v20490_v55 = vpop.f32.mrf.mxu0 }
 0x2b6   : > { %6539 = vst [vmem:[#allocation4 + $0x29c] sm:$0xf] %v16943_v26  ;;  %6753 = vst [vmem:[#allocation4 + $0x258] sm:$0xf] %v16943_v26  ;;  %v7003_v52 = vld [vmem:[#allocation2 + $0x96] sm:$0xff]  ;;  %v7004_v21 = vld [vmem:[#allocation2 + $0x9e] sm:$0xff]  ;;  %v17012_v27 = vpack.c.bf16 %v6788_v17, %v6788_v17  ;;  %18698 = vrcp.f32 %v4891_v1  ;;  %v20511_v2 = vadd.f32 %v20490_v55, %v19995_v13  ;;  %v20513_v17 = vpop.permute.xlu1 %5121 }
 0x2b7   : > { %6969 = vst [vmem:[#allocation4 + $0x25c] sm:$0xf] %v17013_v20  ;;  %7185 = vst [vmem:[#allocation4 + $0x260] sm:$0xf] %v17049_v16  ;;  %v17047_v58 = vpack.c.bf16 %v7003_v52, %v7003_v52  ;;  %v17048_v5 = vpack.c.bf16 %v7004_v21, %v7004_v21  ;;  %v5283_v9 = vld [vmem:[#allocation2 + $0xb0] sm:$0xff]  ;;  %v18693_v16 = vpop.eup %18692  ;;  %18700 = vrcp.f32 %v4889_v23  ;;  %v4892_v44 = vadd.f32 1.0, %v18687_v15  ;;  %v17522_v49 = vpop.f32.mrf.mxu0 }
 0x2b8   : > { %5460 = vst [vmem:[#allocation4 + $0x2ac] sm:$0xf] %v16764_v39  ;;  %5461 = vst [vmem:[#allocation4 + $0x2d0] sm:$0xf] %v16765_v54  ;;  %v5499_v26 = vld [vmem:[#allocation2 + $0xb1] sm:$0xff]  ;;  %v16767_v41 = vpack.c.bf16 %v5283_v9, %v5283_v9  ;;  %v4895_v7 = vadd.f32 1.0, %v18691_v61  ;;  %18702 = vpow2.f32 %v20461_v45 }
 0x2b9   : > { %5676 = vst [vmem:[#allocation4 + $0x2b0] sm:$0xf] %v16800_v28  ;;  %22024 = vst [vmem:[#allocation22_spill] sm:$0xff] %v20492_v38  ;;  %v5715_v20 = vld [vmem:[#allocation2 + $0xb2] sm:$0xff]  ;;  %v16803_v48 = vpack.c.bf16 %v5499_v26, %v5499_v26  ;;  %18704 = vrcp.f32 %v4892_v44  ;;  %v18049_v45 = vld [vmem:[#allocation4 + $0x1b4] ss:$36 sps:$4 sm:$0xff]  }
 0x2ba   : > { %5677 = vst [vmem:[#allocation4 + $0x2d4] sm:$0xf] %v16801_v47  ;;  %5892 = vst [vmem:[#allocation4 + $0x2b4] sm:$0xf] %v16836_v0  ;;  %v16839_v63 = vpack.c.bf16 %v5715_v20, %v5715_v20  ;;  %v6360_v39 = vld [vmem:[#allocation2 + $0xac] sm:$0xff]  ;;  %v4893_v11 = vadd.f32 1.0, %v18693_v16 }
 0x2bb   : > { %5893 = vst [vmem:[#allocation4 + $0x2d8] sm:$0xf] %v16837_v3  ;;  %6106 = vst [vmem:[#allocation4 + $0x270] sm:$0xf] %v16836_v0  ;;  %v6790_v54 = vld [vmem:[#allocation2 + $0xad] sm:$0xff]  ;;  %v16944_v24 = vpack.c.bf16 %v6360_v39, %v6360_v39  ;;  %vm21975_vm2 = vcmp.eq.s32.totalorder %v20484_v19, 1 }
 0x2bc   : > { %6107 = vst [vmem:[#allocation4 + $0x294] sm:$0xf] %v16837_v3  ;;  %22025 = vst [vmem:[#allocation23_spill] sm:$0xff] %v20495_v18  ;;  %v7006_v37 = vld [vmem:[#allocation2 + $0xae] sm:$0xff]  ;;  %v17014_v28 = vpack.c.bf16 %v6790_v54, %v6790_v54  ;;  %v18042_v47 = vld [vmem:[#allocation4 + $0x16c] ss:$36 sps:$4 sm:$0xff]   ;;  %v20533_v54 = vpop.permute.xlu1 %5127 }
 0x2bd   : > { %6537 = vst [vmem:[#allocation4 + $0x254] sm:$0xf] %v16941_v35  ;;  %6538 = vst [vmem:[#allocation4 + $0x278] sm:$0xf] %v16942_v32  ;;  %v17050_v12 = vpack.c.bf16 %v7006_v37, %v7006_v37  ;;  %v18044_v0 = vld [vmem:[#allocation4 + $0x12c] ss:$36 sps:$4 sm:$0xff]   ;;  %8870 = vmatprep.mubr.bf16.mxu1 %v18042_v47 }
 0x2be   : > { %6751 = vst [vmem:[#allocation4 + $0x210] sm:$0xf] %v16941_v35  ;;  %6752 = vst [vmem:[#allocation4 + $0x234] sm:$0xf] %v16942_v32  ;;  %v4890_v3 = vadd.f32 1.0, %v18689_v29  ;;  %9039 = vmatprep.mubr.bf16.mxu0 %v18044_v0  ;;  %v20505_v29 = vadd.f32 %v20486_v25, %v20001_v36  ;;  %v20507_v35 = vpop.permute.xlu0 %5124  ;;  %v22028_v52 = vld [vmem:[#allocation6_spill] sm:$0xff]  ;;  %v4745_v36 = vpop.f32.mrf.mxu0 }
 0x2bf   : > { %6967 = vst [vmem:[#allocation4 + $0x214] sm:$0xf] %v17011_v56  ;;  %6968 = vst [vmem:[#allocation4 + $0x238] sm:$0xf] %v17012_v27  ;;  %v18047_v1 = vld [vmem:[#allocation4 + $0x168] ss:$36 sps:$4 sm:$0xff]   ;;  %v20517_v21 = vadd.f32 %v17522_v49, %v22028_v52  ;;  %v18695_v25 = vpop.eup %18694 }
 0x2c0   : > { %7183 = vst [vmem:[#allocation4 + $0x218] sm:$0xf] %v17047_v58  ;;  %7184 = vst [vmem:[#allocation4 + $0x23c] sm:$0xf] %v17048_v5  ;;  %v18048_v15 = vld [vmem:[#allocation4 + $0x128] ss:$36 sps:$4 sm:$0xff]   ;;  %18706 = vrcp.f32 %v4890_v3  ;;  %8871 = vmatmul.mubr.bf16.gmra.mxu1 %v18047_v1  ;;  %v18697_v23 = vpop.eup %18696 }
 0x2c1   : > { %5463 = vst [vmem:[#allocation4 + $0x318] sm:$0xf] %v16767_v41  ;;  %5679 = vst [vmem:[#allocation4 + $0x31c] sm:$0xf] %v16803_v48  ;;  %18708 = vrcp.f32 %v4895_v7  ;;  %9040 = vmatmul.mubr.bf16.gmra.mxu0 %v18048_v15  ;;  %v18051_v32 = vld [vmem:[#allocation4 + $0x174] ss:$36 sps:$4 sm:$0xff]   ;;  %8878 = vmatprep.mubr.bf16.mxu1 %v18049_v45  ;;  %v4994_v9 = vmul.f32 %v18697_v23, %v20320_v50 }
 0x2c2   : > { %5895 = vst [vmem:[#allocation4 + $0x320] sm:$0xf] %v16839_v63  ;;  %6109 = vst [vmem:[#allocation4 + $0x2dc] sm:$0xf] %v16839_v63  ;;  %v15113_v56 = vmul.f32 -1.442695, %v20501_v43  ;;  %9047 = vmatprep.mubr.bf16.mxu0 %v18051_v32  ;;  %18710 = vrcp.f32 %v4893_v11  ;;  %v20531_v39 = vpop.permute.xlu0 %5130 }
 0x2c3   : > { %6540 = vst [vmem:[#allocation4 + $0x2c0] sm:$0xf] %v16944_v24  ;;  %6754 = vst [vmem:[#allocation4 + $0x27c] sm:$0xf] %v16944_v24  ;;  %vm21974_vm1 = vcmp.eq.s32.totalorder %v20495_v18, 1  ;;  %v22029_v55 = vld [vmem:[#allocation17_spill] sm:$0xff]  ;;  %v18699_v63 = vpop.eup %18698 }
 0x2c4   : > { %6970 = vst [vmem:[#allocation4 + $0x280] sm:$0xf] %v17014_v28  ;;  %7186 = vst [vmem:[#allocation4 + $0x284] sm:$0xf] %v17050_v12  ;;  %v15118_v13 = vmul.f32 -1.442695, %v20505_v29  ;;  %v4996_v61 = vmul.f32 %v18695_v25, %v22029_v55  ;;  %18712 = vpow2.f32 %v15113_v56  ;;  %v18701_v28 = vpop.eup %18700  ;;  %v4999_v44 = vmul.f32 %v18699_v63, %v20369_v46 }
 0x2c5   : > { %22026 = vst [vmem:[#allocation24_spill] sm:$0xff] %v20507_v35  ;;  %22027 = vst [vmem:[#allocation25_spill] sm:$0xff] %v20513_v17  ;;  %v15116_v27 = vmul.f32 -1.442695, %v20511_v2  ;;  %v22030_v58 = vld [vmem:[#allocation5_spill] sm:$0xff]  ;;  %v5210_v24 = vsel %vm21975_vm2, %v4994_v9, 0.0  ;;  %v4997_v0 = vmul.f32 %v18701_v28, %v20373_v33  ;;  %v18703_v3 = vpop.eup %18702 }
 0x2c6   : > { %v20525_v5 = vadd.f32 %v4745_v36, %v22030_v58  ;;  %v15119_v26 = vmul.f32 -1.442695, %v20517_v21  ;;  %v18054_v20 = vld [vmem:[#allocation4 + $0x1b0] ss:$36 sps:$4 sm:$0xff]   ;;  %v5212_v16 = vsel %vm21974_vm1, %v4996_v61, 0.0  ;;  %22031 = vst [vmem:[#allocation6_spill] sm:$0xff] %v20531_v39  ;;  %v16910_v12 = vpack.c.bf16 %v5210_v24, %v5210_v24  ;;  %v18705_v46 = vpop.eup %18704  ;;  %v20549_v25 = vpop.permute.xlu0 %5136 }
 0x2c7   : > { %v18055_v41 = vld [vmem:[#allocation4 + $0x170] ss:$36 sps:$4 sm:$0xff]   ;;  %v18056_v48 = vld [vmem:[#allocation4 + $0x1fc] ss:$36 sps:$4 sm:$0xff]   ;;  %22032 = vst [vmem:[#allocation17_spill] sm:$0xff] %v20533_v54  ;;  %5248 = vst [vmem:[#allocation2 + $0xcb] sm:$0xff] %v5212_v16  ;;  %v16912_v37 = vpack.c.bf16 %v5212_v16, %v5212_v16  ;;  %18714 = vpow2.f32 %v15118_v13  ;;  %v5000_v32 = vmul.f32 %v18705_v46, %v20377_v62  ;;  %v20551_v13 = vpop.permute.xlu1 %5133 }
 0x2c8   : > { %8879 = vmatmul.mubr.bf16.gmra.mxu1 %v18054_v20  ;;  %v18058_v50 = vld [vmem:[#allocation4 + $0x1bc] ss:$36 sps:$4 sm:$0xff]   ;;  %5246 = vst [vmem:[#allocation2 + $0xbb] sm:$0xff] %v5210_v24  ;;  %v15117_v47 = vmul.f32 -1.442695, %v20525_v5  ;;  %vm21976_vm1 = vcmp.eq.s32.totalorder %v20507_v35, 1  ;;  %18716 = vpow2.f32 %v15116_v27 }
 0x2c9   : > { %9048 = vmatmul.mubr.bf16.gmra.mxu0 %v18055_v41  ;;  %8886 = vmatprep.mubr.bf16.mxu1 %v18056_v48  ;;  %6328 = vst [vmem:[#allocation4 + $0x34c] sm:$0xf] %v16912_v37  ;;  %vm21978_vm2 = vcmp.eq.s32.totalorder %v20492_v38, 1  ;;  %6326 = vst [vmem:[#allocation4 + $0x304] sm:$0xf] %v16910_v12  ;;  %v5215_v7 = vsel %vm21976_vm1, %v4999_v44, 0.0  ;;  %18718 = vpow2.f32 %v15119_v26 }
 0x2ca   : > { %9055 = vmatprep.mubr.bf16.mxu0 %v18058_v50  ;;  %5251 = vst [vmem:[#allocation2 + $0xe3] sm:$0xff] %v5215_v7  ;;  %v16915_v49 = vpack.c.bf16 %v5215_v7, %v5215_v7  ;;  %v5213_v1 = vsel %vm21978_vm2, %v4997_v0, 0.0  ;;  %v4896_v15 = vadd.f32 1.0, %v18703_v3  ;;  %v18061_v45 = vld [vmem:[#allocation4 + $0x1f8] ss:$36 sps:$4 sm:$0xff]   ;;  %18720 = vpow2.f32 %v15117_v47  ;;  %22033 = vst [vmem:[#allocation5_spill] sm:$0xff] %v20549_v25 }
 0x2cb   : > { %5249 = vst [vmem:[#allocation2 + $0xd3] sm:$0xff] %v5213_v1  ;;  %v16913_v11 = vpack.c.bf16 %v5213_v1, %v5213_v1  ;;  %v18062_v56 = vld [vmem:[#allocation4 + $0x1b8] ss:$36 sps:$4 sm:$0xff]   ;;  %v18063_v52 = vld [vmem:[#allocation4 + $0x244] ss:$36 sps:$4 sm:$0xff]   ;;  %vm21982_vm1 = vcmp.eq.s32.totalorder %v20531_v39, 1 }
 0x2cc   : > { %vm5180_vm0 = vcmp.eq.s32.totalorder %v20533_v54, 1  ;;  %22034 = vst [vmem:[#allocation26_spill] sm:$0xff] %v20551_v13  ;;  %6331 = vst [vmem:[#allocation4 + $0x3b8] sm:$0xf] %v16915_v49  ;;  %18722 = vrcp.f32 %v4896_v15  ;;  %v18065_v55 = vld [vmem:[#allocation4 + $0x204] ss:$36 sps:$4 sm:$0xff]  }
 0x2cd   : > { %v18707_v33 = vpop.eup %18706  ;;  %v18130_v62 = vld [vmem:[%s21946_s1 + $0x438] sm:$0xff]   ;;  %vm5178_vm2 = vcmp.eq.s32.totalorder %v20513_v17, 1  ;;  %vm21980_vm3 = vcmp.eq.s32.totalorder %v20549_v25, 1  ;;  %6329 = vst [vmem:[#allocation4 + $0x370] sm:$0xf] %v16913_v11  ;;  %v5216_v9 = vsel %vm5180_vm0, %v5000_v32, 0.0 }
 0x2ce   : > { %v18709_v36 = vpop.eup %18708  ;;  %v4998_v23 = vmul.f32 %v18707_v33, %v20383_v57  ;;  %v5286_v61 = vld [vmem:[#allocation2 + $0xc8] sm:$0xff]  ;;  %5252 = vst [vmem:[#allocation2 + $0xeb] sm:$0xff] %v5216_v9  ;;  %v16916_v37 = vpack.c.bf16 %v5216_v9, %v5216_v9  ;;  %9346 = vmatpush2.bf16.msra.mxu0 %v18130_v62  ;;  %v18267_v54 = vld [vmem:[#allocation4 + $0x68] ss:$36 sps:$4 sm:$0xff]   ;;  %v18270_v35 = vld [vmem:[#allocation4 + $0x140] ss:$36 sps:$4 sm:$0xff]  }
 0x2cf   : > { %v5502_v27 = vld [vmem:[#allocation2 + $0xc9] sm:$0xff]  ;;  %v5003_v26 = vmul.f32 %v18709_v36, %v20419_v30  ;;  %v16770_v57 = vpack.c.bf16 %v5286_v61, %v5286_v61  ;;  %v5284_v12 = vld [vmem:[#allocation2 + $0xb8] sm:$0xff]  ;;  %v5285_v44 = vld [vmem:[#allocation2 + $0xc0] sm:$0xff]  ;;  %v18711_v3 = vpop.eup %18710  ;;  %9347 = vmatprep.subr.bf16.mxu0 %v22018_v6 }
 0x2d0   : > { %v5718_v58 = vld [vmem:[#allocation2 + $0xca] sm:$0xff]  ;;  %v16806_v20 = vpack.c.bf16 %v5502_v27, %v5502_v27  ;;  %8887 = vmatmul.mubr.bf16.gmra.mxu1 %v18061_v45  ;;  %v5500_v47 = vld [vmem:[#allocation2 + $0xb9] sm:$0xff]  ;;  %v5214_v0 = vsel %vm5178_vm2, %v4998_v23, 0.0  ;;  %v16768_v7 = vpack.c.bf16 %v5284_v12, %v5284_v12  ;;  %v16769_v46 = vpack.c.bf16 %v5285_v44, %v5285_v44  ;;  %v5501_v49 = vld [vmem:[#allocation2 + $0xc1] sm:$0xff]  ;;  %6332 = vst [vmem:[#allocation4 + $0x3dc] sm:$0xf] %v16916_v37 }
 0x2d1   : > { %v16842_v16 = vpack.c.bf16 %v5718_v58, %v5718_v58  ;;  %v6363_v41 = vld [vmem:[#allocation2 + $0xc4] sm:$0xff]  ;;  %9056 = vmatmul.mubr.bf16.gmra.mxu0 %v18062_v56  ;;  %8894 = vmatprep.mubr.bf16.mxu1 %v18063_v52  ;;  %v20567_v30 = vld [vmem:[%s21946_s1 + $0x430] sm:$0xff]   ;;  %5466 = vst [vmem:[#allocation4 + $0x384] sm:$0xf] %v16770_v57  ;;  %v16804_v1 = vpack.c.bf16 %v5500_v47, %v5500_v47  ;;  %v5716_v15 = vld [vmem:[#allocation2 + $0xba] sm:$0xff]  ;;  %v18713_v11 = vpop.eup %18712  ;;  %v5219_v27 = vsel %vm21980_vm3, %v5003_v26, 0.0  ;;  %v20571_v58 = vpop.permute.xlu1 %5139 }
 0x2d2   : > { %v6793_v48 = vld [vmem:[#allocation2 + $0xc5] sm:$0xff]  ;;  %v16947_v24 = vpack.c.bf16 %v6363_v41, %v6363_v41  ;;  %5682 = vst [vmem:[#allocation4 + $0x388] sm:$0xf] %v16806_v20  ;;  %5250 = vst [vmem:[#allocation2 + $0xdb] sm:$0xff] %v5214_v0  ;;  %v16914_v33 = vpack.c.bf16 %v5214_v0, %v5214_v0  ;;  %9063 = vmatprep.mubr.bf16.mxu0 %v18065_v55  ;;  %v16805_v32 = vpack.c.bf16 %v5501_v49, %v5501_v49  ;;  %v6361_v36 = vld [vmem:[#allocation2 + $0xb4] sm:$0xff] }
 0x2d3   : > { %v7009_v63 = vld [vmem:[#allocation2 + $0xc6] sm:$0xff]  ;;  %v17017_v50 = vpack.c.bf16 %v6793_v48, %v6793_v48  ;;  %5898 = vst [vmem:[#allocation4 + $0x38c] sm:$0xf] %v16842_v16  ;;  %6112 = vst [vmem:[#allocation4 + $0x348] sm:$0xf] %v16842_v16  ;;  %v16840_v56 = vpack.c.bf16 %v5716_v15, %v5716_v15  ;;  %v6362_v23 = vld [vmem:[#allocation2 + $0xbc] sm:$0xff]  ;;  %v16945_v9 = vpack.c.bf16 %v6361_v36, %v6361_v36  ;;  %9348 = vmatpush2.bf16.msra.mxu0 %v20567_v30 }
 0x2d4   : > { %v17053_v28 = vpack.c.bf16 %v7009_v63, %v7009_v63  ;;  %v5717_v45 = vld [vmem:[#allocation2 + $0xc2] sm:$0xff]  ;;  %6543 = vst [vmem:[#allocation4 + $0x32c] sm:$0xf] %v16947_v24  ;;  %6757 = vst [vmem:[#allocation4 + $0x2e8] sm:$0xf] %v16947_v24  ;;  %v6791_v61 = vld [vmem:[#allocation2 + $0xb5] sm:$0xff]  ;;  %v16946_v57 = vpack.c.bf16 %v6362_v23, %v6362_v23  ;;  %v16919_v48 = vpack.c.bf16 %v5219_v27, %v5219_v27  ;;  %9349 = vmatprep.subr.bf16.mxu0 %v22018_v6 }
 0x2d5   : > { %6973 = vst [vmem:[#allocation4 + $0x2ec] sm:$0xf] %v17017_v50  ;;  %v16841_v52 = vpack.c.bf16 %v5717_v45, %v5717_v45  ;;  %22035 = vst [vmem:[#allocation27_spill] sm:$0xff] %v20571_v58  ;;  %v6792_v55 = vld [vmem:[#allocation2 + $0xbd] sm:$0xff]  ;;  %v17015_v20 = vpack.c.bf16 %v6791_v61, %v6791_v61  ;;  %v18067_v63 = vld [vmem:[#allocation4 + $0x240] ss:$36 sps:$4 sm:$0xff]   ;;  %v5001_v12 = vmul.f32 %v18711_v3, %v20431_v10 }
 0x2d6   : > { %7189 = vst [vmem:[#allocation4 + $0x2f0] sm:$0xf] %v17053_v28  ;;  %v7007_v16 = vld [vmem:[#allocation2 + $0xb6] sm:$0xff]  ;;  %v7008_v41 = vld [vmem:[#allocation2 + $0xbe] sm:$0xff]  ;;  %5464 = vst [vmem:[#allocation4 + $0x33c] sm:$0xf] %v16768_v7  ;;  %v17016_v62 = vpack.c.bf16 %v6792_v55, %v6792_v55 }
 0x2d7   : > { %5465 = vst [vmem:[#allocation4 + $0x360] sm:$0xf] %v16769_v46  ;;  %5680 = vst [vmem:[#allocation4 + $0x340] sm:$0xf] %v16804_v1  ;;  %vm21981_vm3 = vcmp.eq.s32.totalorder %v20571_v58, 1  ;;  %v17051_v26 = vpack.c.bf16 %v7007_v16, %v7007_v16  ;;  %v17052_v37 = vpack.c.bf16 %v7008_v41, %v7008_v41  ;;  %v5287_v24 = vld [vmem:[#allocation2 + $0xd0] sm:$0xff] }
 0x2d8   : > { %6330 = vst [vmem:[#allocation4 + $0x394] sm:$0xf] %v16914_v33  ;;  %5255 = vst [vmem:[#allocation2 + $0x103] sm:$0xff] %v5219_v27  ;;  %v5503_v50 = vld [vmem:[#allocation2 + $0xd1] sm:$0xff]  ;;  %v18070_v47 = vld [vmem:[#allocation4 + $0x28c] ss:$36 sps:$4 sm:$0xff]   ;;  %v16771_v0 = vpack.c.bf16 %v5287_v24, %v5287_v24  ;;  %8895 = vmatmul.mubr.bf16.gmra.mxu1 %v18067_v63 }
 0x2d9   : > { %5681 = vst [vmem:[#allocation4 + $0x364] sm:$0xf] %v16805_v32  ;;  %5896 = vst [vmem:[#allocation4 + $0x344] sm:$0xf] %v16840_v56  ;;  %v5719_v28 = vld [vmem:[#allocation2 + $0xd2] sm:$0xff]  ;;  %v16807_v7 = vpack.c.bf16 %v5503_v50, %v5503_v50  ;;  %v4894_v45 = vadd.f32 1.0, %v18713_v11  ;;  %v18715_v32 = vpop.eup %18714  ;;  %8902 = vmatprep.mubr.bf16.mxu1 %v18070_v47 }
 0x2da   : > { %5897 = vst [vmem:[#allocation4 + $0x368] sm:$0xf] %v16841_v52  ;;  %6110 = vst [vmem:[#allocation4 + $0x300] sm:$0xf] %v16840_v56  ;;  %v18068_v44 = vld [vmem:[#allocation4 + $0x200] ss:$36 sps:$4 sm:$0xff]   ;;  %v16843_v46 = vpack.c.bf16 %v5719_v28, %v5719_v28  ;;  %v18717_v27 = vpop.eup %18716 }
 0x2db   : > { %6111 = vst [vmem:[#allocation4 + $0x324] sm:$0xf] %v16841_v52  ;;  %6541 = vst [vmem:[#allocation4 + $0x2e4] sm:$0xf] %v16945_v9  ;;  %v6364_v49 = vld [vmem:[#allocation2 + $0xcc] sm:$0xff]  ;;  %v5217_v61 = vsel %vm21982_vm1, %v5001_v12, 0.0  ;;  %18724 = vrcp.f32 %v4894_v45  ;;  %9064 = vmatmul.mubr.bf16.gmra.mxu0 %v18068_v44 }
 0x2dc   : > { %6542 = vst [vmem:[#allocation4 + $0x308] sm:$0xf] %v16946_v57  ;;  %6755 = vst [vmem:[#allocation4 + $0x2a0] sm:$0xf] %v16945_v9  ;;  %v6794_v1 = vld [vmem:[#allocation2 + $0xcd] sm:$0xff]  ;;  %v16948_v10 = vpack.c.bf16 %v6364_v49, %v6364_v49  ;;  %v6367_v55 = vld [vmem:[#allocation2 + $0xe4] sm:$0xff]  ;;  %v16917_v41 = vpack.c.bf16 %v5217_v61, %v5217_v61 }
 0x2dd   : > { %6756 = vst [vmem:[#allocation4 + $0x2c4] sm:$0xf] %v16946_v57  ;;  %6971 = vst [vmem:[#allocation4 + $0x2a4] sm:$0xf] %v17015_v20  ;;  %v7010_v15 = vld [vmem:[#allocation2 + $0xce] sm:$0xff]  ;;  %v17018_v3 = vpack.c.bf16 %v6794_v1, %v6794_v1  ;;  %v6797_v20 = vld [vmem:[#allocation2 + $0xe5] sm:$0xff]  ;;  %v16951_v30 = vpack.c.bf16 %v6367_v55, %v6367_v55 }
 0x2de   : > { %6335 = vst [vmem:[#allocation4 + $0x448] sm:$0xf] %v16919_v48  ;;  %v18072_v33 = vld [vmem:[#allocation4 + $0x24c] ss:$36 sps:$4 sm:$0xff]   ;;  %6972 = vst [vmem:[#allocation4 + $0x2c8] sm:$0xf] %v17016_v62  ;;  %v17054_v56 = vpack.c.bf16 %v7010_v15, %v7010_v15  ;;  %v20579_v48 = vpop.eup %18718  ;;  %v17021_v62 = vpack.c.bf16 %v6797_v20, %v6797_v20 }
 0x2df   : > { %7187 = vst [vmem:[#allocation4 + $0x2a8] sm:$0xf] %v17051_v26  ;;  %7188 = vst [vmem:[#allocation4 + $0x2cc] sm:$0xf] %v17052_v37  ;;  %v5290_v52 = vld [vmem:[#allocation2 + $0xe8] sm:$0xff]  ;;  %v5288_v37 = vld [vmem:[#allocation2 + $0xd8] sm:$0xff]  ;;  %v18721_v28 = vpop.eup %18720  ;;  %9071 = vmatprep.mubr.bf16.mxu0 %v18072_v33 }
 0x2e0   : > { %v5506_v36 = vld [vmem:[#allocation2 + $0xe9] sm:$0xff]  ;;  %5467 = vst [vmem:[#allocation4 + $0x3a8] sm:$0xf] %v16771_v0  ;;  %5683 = vst [vmem:[#allocation4 + $0x3ac] sm:$0xf] %v16807_v7  ;;  %v16774_v11 = vpack.c.bf16 %v5290_v52, %v5290_v52  ;;  %v5289_v24 = vld [vmem:[#allocation2 + $0xe0] sm:$0xff]  ;;  %v16772_v63 = vpack.c.bf16 %v5288_v37, %v5288_v37  ;;  %v18723_v15 = vpop.eup %18722 }
 0x2e1   : > { %v5722_v23 = vld [vmem:[#allocation2 + $0xea] sm:$0xff]  ;;  %5899 = vst [vmem:[#allocation4 + $0x3b0] sm:$0xf] %v16843_v46  ;;  %6113 = vst [vmem:[#allocation4 + $0x36c] sm:$0xf] %v16843_v46  ;;  %v16810_v9 = vpack.c.bf16 %v5506_v36, %v5506_v36  ;;  %v5504_v50 = vld [vmem:[#allocation2 + $0xd9] sm:$0xff]  ;;  %v16773_v12 = vpack.c.bf16 %v5289_v24, %v5289_v24 }
 0x2e2   : > { %v16846_v57 = vpack.c.bf16 %v5722_v23, %v5722_v23  ;;  %v7013_v16 = vld [vmem:[#allocation2 + $0xe6] sm:$0xff]  ;;  %5253 = vst [vmem:[#allocation2 + $0xf3] sm:$0xff] %v5217_v61  ;;  %6544 = vst [vmem:[#allocation4 + $0x350] sm:$0xf] %v16948_v10  ;;  %v16808_v7 = vpack.c.bf16 %v5504_v50, %v5504_v50  ;;  %v5720_v46 = vld [vmem:[#allocation2 + $0xda] sm:$0xff]  ;;  %v4899_v1 = vadd.f32 1.0, %v18715_v32 }
 0x2e3   : > { %6758 = vst [vmem:[#allocation4 + $0x30c] sm:$0xf] %v16948_v10  ;;  %6974 = vst [vmem:[#allocation4 + $0x310] sm:$0xf] %v17018_v3  ;;  %v17057_v26 = vpack.c.bf16 %v7013_v16, %v7013_v16  ;;  %v5505_v0 = vld [vmem:[#allocation2 + $0xe1] sm:$0xff]  ;;  %v16844_v47 = vpack.c.bf16 %v5720_v46, %v5720_v46  ;;  %v6365_v10 = vld [vmem:[#allocation2 + $0xd4] sm:$0xff] }
 0x2e4   : > { %7190 = vst [vmem:[#allocation4 + $0x314] sm:$0xf] %v17054_v56  ;;  %5470 = vst [vmem:[#allocation4 + $0x414] sm:$0xf] %v16774_v11  ;;  %v5721_v49 = vld [vmem:[#allocation2 + $0xe2] sm:$0xff]  ;;  %v16809_v44 = vpack.c.bf16 %v5505_v0, %v5505_v0  ;;  %v6795_v56 = vld [vmem:[#allocation2 + $0xd5] sm:$0xff]  ;;  %v16949_v36 = vpack.c.bf16 %v6365_v10, %v6365_v10  ;;  %18726 = vrcp.f32 %v4899_v1 }
 0x2e5   : > { %5686 = vst [vmem:[#allocation4 + $0x418] sm:$0xf] %v16810_v9  ;;  %5902 = vst [vmem:[#allocation4 + $0x41c] sm:$0xf] %v16846_v57  ;;  %v16845_v45 = vpack.c.bf16 %v5721_v49, %v5721_v49  ;;  %v6366_v3 = vld [vmem:[#allocation2 + $0xdc] sm:$0xff]  ;;  %v4897_v52 = vadd.f32 1.0, %v18717_v27  ;;  %v17019_v11 = vpack.c.bf16 %v6795_v56, %v6795_v56  ;;  %v5004_v9 = vmul.f32 %v18723_v15, %v20434_v34  ;;  %v20588_v56 = vpop.permute.xlu1 %5145 }
 0x2e6   : > { %6116 = vst [vmem:[#allocation4 + $0x3d8] sm:$0xf] %v16846_v57  ;;  %6333 = vst [vmem:[#allocation4 + $0x400] sm:$0xf] %v16917_v41  ;;  %v16950_v23 = vpack.c.bf16 %v6366_v3, %v6366_v3  ;;  %v6796_v61 = vld [vmem:[#allocation2 + $0xdd] sm:$0xff] }
 0x2e7   : > { %6547 = vst [vmem:[#allocation4 + $0x3bc] sm:$0xf] %v16951_v30  ;;  %6761 = vst [vmem:[#allocation4 + $0x378] sm:$0xf] %v16951_v30  ;;  %v7011_v32 = vld [vmem:[#allocation2 + $0xd6] sm:$0xff]  ;;  %v7012_v33 = vld [vmem:[#allocation2 + $0xde] sm:$0xff]  ;;  %v17020_v55 = vpack.c.bf16 %v6796_v61, %v6796_v61  ;;  %18728 = vrcp.f32 %v4897_v52 }
 0x2e8   : > { %6977 = vst [vmem:[#allocation4 + $0x37c] sm:$0xf] %v17021_v62  ;;  %7193 = vst [vmem:[#allocation4 + $0x380] sm:$0xf] %v17057_v26  ;;  %v18074_v57 = vld [vmem:[#allocation4 + $0x288] ss:$36 sps:$4 sm:$0xff]   ;;  %v17055_v20 = vpack.c.bf16 %v7011_v32, %v7011_v32  ;;  %v17056_v16 = vpack.c.bf16 %v7012_v33, %v7012_v33  ;;  %v18725_v3 = vpop.eup %18724 }
 0x2e9   : > { %5468 = vst [vmem:[#allocation4 + $0x3cc] sm:$0xf] %v16772_v63  ;;  %5469 = vst [vmem:[#allocation4 + $0x3f0] sm:$0xf] %v16773_v12  ;;  %v18075_v27 = vld [vmem:[#allocation4 + $0x248] ss:$36 sps:$4 sm:$0xff]   ;;  %8903 = vmatmul.mubr.bf16.gmra.mxu1 %v18074_v57 }
 0x2ea   : > { %5684 = vst [vmem:[#allocation4 + $0x3d0] sm:$0xf] %v16808_v7  ;;  %5685 = vst [vmem:[#allocation4 + $0x3f4] sm:$0xf] %v16809_v44  ;;  %v18076_v41 = vld [vmem:[#allocation4 + $0x2d4] ss:$36 sps:$4 sm:$0xff]   ;;  %9072 = vmatmul.mubr.bf16.gmra.mxu0 %v18075_v27  ;;  %v20586_v44 = vpop.permute.xlu0 %5142 }
 0x2eb   : > { %5900 = vst [vmem:[#allocation4 + $0x3d4] sm:$0xf] %v16844_v47  ;;  %5901 = vst [vmem:[#allocation4 + $0x3f8] sm:$0xf] %v16845_v45  ;;  %v5220_v34 = vsel %vm21981_vm3, %v5004_v9, 0.0  ;;  %v4900_v30 = vadd.f32 1.0, %v20579_v48  ;;  %8910 = vmatprep.mubr.bf16.mxu1 %v18076_v41 }
 0x2ec   : > { %6114 = vst [vmem:[#allocation4 + $0x390] sm:$0xf] %v16844_v47  ;;  %6115 = vst [vmem:[#allocation4 + $0x3b4] sm:$0xf] %v16845_v45  ;;  %v4898_v62 = vadd.f32 1.0, %v18721_v28  ;;  %v5291_v37 = vld [vmem:[#allocation2 + $0xf0] sm:$0xff]  ;;  %v16920_v63 = vpack.c.bf16 %v5220_v34, %v5220_v34 }
 0x2ed   : > { %6545 = vst [vmem:[#allocation4 + $0x374] sm:$0xf] %v16949_v36  ;;  %6546 = vst [vmem:[#allocation4 + $0x398] sm:$0xf] %v16950_v23  ;;  %v18078_v26 = vld [vmem:[#allocation4 + $0x294] ss:$36 sps:$4 sm:$0xff]   ;;  %v16775_v12 = vpack.c.bf16 %v5291_v37, %v5291_v37  ;;  %18730 = vrcp.f32 %v4900_v30 }
 0x2ee   : > { %6759 = vst [vmem:[#allocation4 + $0x330] sm:$0xf] %v16949_v36  ;;  %6760 = vst [vmem:[#allocation4 + $0x354] sm:$0xf] %v16950_v23  ;;  %v5507_v24 = vld [vmem:[#allocation2 + $0xf1] sm:$0xff]  ;;  %18732 = vrcp.f32 %v4898_v62  ;;  %9079 = vmatprep.mubr.bf16.mxu0 %v18078_v26  ;;  %vm21983_vm3 = vcmp.eq.s32.totalorder %v20551_v13, 1 }
 0x2ef   : > { %6975 = vst [vmem:[#allocation4 + $0x334] sm:$0xf] %v17019_v11  ;;  %6976 = vst [vmem:[#allocation4 + $0x358] sm:$0xf] %v17020_v55  ;;  %v5723_v50 = vld [vmem:[#allocation2 + $0xf2] sm:$0xff]  ;;  %v16811_v0 = vpack.c.bf16 %v5507_v24, %v5507_v24  ;;  %v5002_v55 = vmul.f32 %v18725_v3, %v20501_v43  ;;  %v20598_v24 = vpop.permute.xlu1 %5151 }
 0x2f0   : > { %7191 = vst [vmem:[#allocation4 + $0x338] sm:$0xf] %v17055_v20  ;;  %7192 = vst [vmem:[#allocation4 + $0x35c] sm:$0xf] %v17056_v16  ;;  %v16847_v7 = vpack.c.bf16 %v5723_v50, %v5723_v50  ;;  %v6368_v46 = vld [vmem:[#allocation2 + $0xec] sm:$0xff] }
 0x2f1   : > { %5256 = vst [vmem:[#allocation2 + $0x10b] sm:$0xff] %v5220_v34  ;;  %v6798_v49 = vld [vmem:[#allocation2 + $0xed] sm:$0xff]  ;;  %v16952_v15 = vpack.c.bf16 %v6368_v46, %v6368_v46  ;;  %6336 = vst [vmem:[#allocation4 + $0x46c] sm:$0xf] %v16920_v63  ;;  %v18081_v47 = vld [vmem:[#allocation4 + $0x2d0] ss:$36 sps:$4 sm:$0xff]   ;;  %v20592_v34 = vpop.permute.xlu0 %5148  ;;  %v18727_v62 = vpop.eup %18726 }
 0x2f2   : > { %v7014_v1 = vld [vmem:[#allocation2 + $0xee] sm:$0xff]  ;;  %v17022_v48 = vpack.c.bf16 %v6798_v49, %v6798_v49  ;;  %5471 = vst [vmem:[#allocation4 + $0x438] sm:$0xf] %v16775_v12  ;;  %5687 = vst [vmem:[#allocation4 + $0x43c] sm:$0xf] %v16811_v0  ;;  %8911 = vmatmul.mubr.bf16.gmra.mxu1 %v18081_v47  ;;  %v5218_v30 = vsel %vm21983_vm3, %v5002_v55, 0.0  ;;  %v5007_v37 = vmul.f32 %v18727_v62, %v20505_v29  ;;  %v20609_v0 = vpop.f32.mrf.mxu1 }
 0x2f3   : > { %v17058_v28 = vpack.c.bf16 %v7014_v1, %v7014_v1  ;;  %5903 = vst [vmem:[#allocation4 + $0x440] sm:$0xf] %v16847_v7  ;;  %6117 = vst [vmem:[#allocation4 + $0x3fc] sm:$0xf] %v16847_v7  ;;  %v18082_v45 = vld [vmem:[#allocation4 + $0x290] ss:$36 sps:$4 sm:$0xff]   ;;  %v16918_v43 = vpack.c.bf16 %v5218_v30, %v5218_v30 }
 0x2f4   : > { %22036 = vst [vmem:[#allocation28_spill] sm:$0xff] %v20586_v44  ;;  %6548 = vst [vmem:[#allocation4 + $0x3e0] sm:$0xf] %v16952_v15  ;;  %v18083_v10 = vld [vmem:[#allocation4 + $0x31c] ss:$36 sps:$4 sm:$0xff]   ;;  %9080 = vmatmul.mubr.bf16.gmra.mxu0 %v18082_v45  ;;  %v18729_v26 = vpop.eup %18728  ;;  %vm21984_vm1 = vcmp.eq.s32.totalorder %v20592_v34, 1  ;;  %v8834_v45 = vpop.f32.mrf.mxu1 }
 0x2f5   : > { %6762 = vst [vmem:[#allocation4 + $0x39c] sm:$0xf] %v16952_v15  ;;  %6978 = vst [vmem:[#allocation4 + $0x3a0] sm:$0xf] %v17022_v48  ;;  %v18085_v41 = vld [vmem:[#allocation4 + $0x2dc] ss:$36 sps:$4 sm:$0xff]   ;;  %8918 = vmatprep.mubr.bf16.mxu1 %v18083_v10  ;;  %v5005_v50 = vmul.f32 %v18729_v26, %v20511_v2 }
 0x2f6   : > { %7194 = vst [vmem:[#allocation4 + $0x3a4] sm:$0xf] %v17058_v28  ;;  %22037 = vst [vmem:[#allocation29_spill] sm:$0xff] %v20588_v56  ;;  %9087 = vmatprep.mubr.bf16.mxu0 %v18085_v41  ;;  %v18132_v63 = vld [vmem:[%s21946_s1 + $0x388] sm:$0xff]   ;;  %vm21985_vm3 = vcmp.eq.s32.totalorder %v20586_v44, 1  ;;  %v5223_v29 = vsel %vm21984_vm1, %v5007_v37, 0.0 }
 0x2f7   : > { %22038 = vst [vmem:[#allocation30_spill] sm:$0xff] %v20592_v34  ;;  %5254 = vst [vmem:[#allocation2 + $0xfb] sm:$0xff] %v5218_v30  ;;  %v20607_v12 = vld [vmem:[%s21946_s1 + $0x428] sm:$0xff]   ;;  %v16923_v2 = vpack.c.bf16 %v5223_v29, %v5223_v29  ;;  %v5221_v1 = vsel %vm21985_vm3, %v5005_v50, 0.0  ;;  %v18090_v28 = vld [vmem:[#allocation4 + $0x364] ss:$36 sps:$4 sm:$0xff]   ;;  %9181 = vmatpush2.bf16.msra.mxu1 %v18132_v63 }
 0x2f8   : > { %v5294_v52 = vld [vmem:[#allocation2 + $0x108] sm:$0xff]  ;;  %22039 = vst [vmem:[#allocation31_spill] sm:$0xff] %v20598_v24  ;;  %6334 = vst [vmem:[#allocation4 + $0x424] sm:$0xf] %v16918_v43  ;;  %9350 = vmatpush2.bf16.msra.mxu0 %v20607_v12  ;;  %v20621_v47 = vld [vmem:[%s21946_s1 + $0x420] sm:$0xff]   ;;  %vm5188_vm1 = vcmp.eq.s32.totalorder %v20598_v24, 1  ;;  %v16921_v10 = vpack.c.bf16 %v5221_v1, %v5221_v1  ;;  %9182 = vmatprep.subr.bf16.mxu1 %v22018_v6 }
 0x2f9   : > { %v5510_v36 = vld [vmem:[#allocation2 + $0x109] sm:$0xff]  ;;  %v16778_v61 = vpack.c.bf16 %v5294_v52, %v5294_v52  ;;  %5259 = vst [vmem:[#allocation2 + $0x123] sm:$0xff] %v5223_v29  ;;  %5257 = vst [vmem:[#allocation2 + $0x113] sm:$0xff] %v5221_v1  ;;  %9351 = vmatprep.subr.bf16.mxu0 %v22018_v6  ;;  %vm5186_vm3 = vcmp.eq.s32.totalorder %v20588_v56, 1 }
 0x2fa   : > { %v5726_v23 = vld [vmem:[#allocation2 + $0x10a] sm:$0xff]  ;;  %v16814_v11 = vpack.c.bf16 %v5510_v36, %v5510_v36  ;;  %v18731_v7 = vpop.eup %18730  ;;  %6339 = vst [vmem:[#allocation4 + $0x4d8] sm:$0xf] %v16923_v2  ;;  %v18092_v36 = vld [vmem:[#allocation4 + $0x324] ss:$36 sps:$4 sm:$0xff]  }
 0x2fb   : > { %v16850_v32 = vpack.c.bf16 %v5726_v23, %v5726_v23  ;;  %v6371_v33 = vld [vmem:[#allocation2 + $0x104] sm:$0xff]  ;;  %5474 = vst [vmem:[#allocation4 + $0x4a4] sm:$0xf] %v16778_v61  ;;  %v18733_v49 = vpop.eup %18732  ;;  %v5008_v15 = vmul.f32 %v18731_v7, %v20517_v21  ;;  %v20633_v23 = vpop.f32.mrf.mxu1  ;;  %6337 = vst [vmem:[#allocation4 + $0x490] sm:$0xf] %v16921_v10 }
 0x2fc   : > { %v6801_v9 = vld [vmem:[#allocation2 + $0x105] sm:$0xff]  ;;  %v16955_v20 = vpack.c.bf16 %v6371_v33, %v6371_v33  ;;  %5690 = vst [vmem:[#allocation4 + $0x4a8] sm:$0xf] %v16814_v11  ;;  %v5006_v3 = vmul.f32 %v18733_v49, %v20525_v5  ;;  %9352 = vmatpush2.bf16.msra.mxu0 %v20621_v47  ;;  %v18274_v18 = vld [vmem:[#allocation4 + $0x260] ss:$36 sps:$4 sm:$0xff]  }
 0x2fd   : > { %v7017_v57 = vld [vmem:[#allocation2 + $0x106] sm:$0xff]  ;;  %v17025_v16 = vpack.c.bf16 %v6801_v9, %v6801_v9  ;;  %5906 = vst [vmem:[#allocation4 + $0x4ac] sm:$0xf] %v16850_v32  ;;  %6120 = vst [vmem:[#allocation4 + $0x468] sm:$0xf] %v16850_v32  ;;  %v5224_v52 = vsel %vm5188_vm1, %v5008_v15, 0.0  ;;  %v8837_v62 = vpop.f32.mrf.mxu1  ;;  %9353 = vmatprep.subr.bf16.mxu0 %v22018_v6 }
 0x2fe   : > { %v17061_v27 = vpack.c.bf16 %v7017_v57, %v7017_v57  ;;  %6551 = vst [vmem:[#allocation4 + $0x44c] sm:$0xf] %v16955_v20  ;;  %6765 = vst [vmem:[#allocation4 + $0x408] sm:$0xf] %v16955_v20  ;;  %v18088_v46 = vld [vmem:[#allocation4 + $0x318] ss:$36 sps:$4 sm:$0xff]   ;;  %v16924_v32 = vpack.c.bf16 %v5224_v52, %v5224_v52 }
 0x2ff   : > { %6981 = vst [vmem:[#allocation4 + $0x40c] sm:$0xf] %v17025_v16  ;;  %v18089_v48 = vld [vmem:[#allocation4 + $0x2d8] ss:$36 sps:$4 sm:$0xff]   ;;  %v18143_v21 = vld [vmem:[%s21946_s1 + $0x380] sm:$0xff]   ;;  %8919 = vmatmul.mubr.bf16.gmra.mxu1 %v18088_v46  ;;  %v5292_v61 = vld [vmem:[#allocation2 + $0xf8] sm:$0xff] }
 0x300   : > { %7197 = vst [vmem:[#allocation4 + $0x410] sm:$0xf] %v17061_v27  ;;  %v5293_v5 = vld [vmem:[#allocation2 + $0x100] sm:$0xff]  ;;  %5260 = vst [vmem:[#allocation2 + $0x12b] sm:$0xff] %v5224_v52  ;;  %v5222_v33 = vsel %vm5186_vm3, %v5006_v3, 0.0  ;;  %9088 = vmatmul.mubr.bf16.gmra.mxu0 %v18089_v48  ;;  %8926 = vmatprep.mubr.bf16.mxu1 %v18090_v28  ;;  %v20640_v9 = vld [vmem:[%s21946_s1 + $0x418] sm:$0xff]   ;;  %v16776_v57 = vpack.c.bf16 %v5292_v61, %v5292_v61 }
 0x301   : > { %v5508_v11 = vld [vmem:[#allocation2 + $0xf9] sm:$0xff]  ;;  %v16777_v55 = vpack.c.bf16 %v5293_v5, %v5293_v5  ;;  %v5509_v20 = vld [vmem:[#allocation2 + $0x101] sm:$0xff]  ;;  %5258 = vst [vmem:[#allocation2 + $0x11b] sm:$0xff] %v5222_v33  ;;  %v16922_v30 = vpack.c.bf16 %v5222_v33, %v5222_v33  ;;  %9095 = vmatprep.mubr.bf16.mxu0 %v18092_v36  ;;  %6340 = vst [vmem:[#allocation4 + $0x4fc] sm:$0xf] %v16924_v32  ;;  %9183 = vmatpush2.bf16.msra.mxu1 %v18143_v21 }
 0x302   : > { %v16812_v16 = vpack.c.bf16 %v5508_v11, %v5508_v11  ;;  %v5724_v27 = vld [vmem:[#allocation2 + $0xfa] sm:$0xff]  ;;  %v5725_v41 = vld [vmem:[#allocation2 + $0x102] sm:$0xff]  ;;  %v16813_v43 = vpack.c.bf16 %v5509_v20, %v5509_v20  ;;  %5472 = vst [vmem:[#allocation4 + $0x45c] sm:$0xf] %v16776_v57  ;;  %v18097_v48 = vld [vmem:[#allocation4 + $0x360] ss:$36 sps:$4 sm:$0xff]   ;;  %17627 = vmatprep.subr.bf16.mxu1 %v22018_v6  ;;  %9354 = vmatpush2.bf16.msra.mxu0 %v20640_v9 }
 0x303   : > { %v16848_v26 = vpack.c.bf16 %v5724_v27, %v5724_v27  ;;  %v16849_v37 = vpack.c.bf16 %v5725_v41, %v5725_v41  ;;  %v6369_v50 = vld [vmem:[#allocation2 + $0xf4] sm:$0xff]  ;;  %v6370_v63 = vld [vmem:[#allocation2 + $0xfc] sm:$0xff]  ;;  %5473 = vst [vmem:[#allocation4 + $0x480] sm:$0xf] %v16777_v55  ;;  %6338 = vst [vmem:[#allocation4 + $0x4b4] sm:$0xf] %v16922_v30  ;;  %9355 = vmatprep.subr.bf16.mxu0 %v22018_v6 }
 0x304   : > { %v6799_v7 = vld [vmem:[#allocation2 + $0xf5] sm:$0xff]  ;;  %v16953_v29 = vpack.c.bf16 %v6369_v50, %v6369_v50  ;;  %v16954_v46 = vpack.c.bf16 %v6370_v63, %v6370_v63  ;;  %v6800_v49 = vld [vmem:[#allocation2 + $0xfd] sm:$0xff]  ;;  %5688 = vst [vmem:[#allocation4 + $0x460] sm:$0xf] %v16812_v16  ;;  %5689 = vst [vmem:[#allocation4 + $0x484] sm:$0xf] %v16813_v43 }
 0x305   : > { %v17023_v2 = vpack.c.bf16 %v6799_v7, %v6799_v7  ;;  %v7015_v1 = vld [vmem:[#allocation2 + $0xf6] sm:$0xff]  ;;  %v7016_v15 = vld [vmem:[#allocation2 + $0xfe] sm:$0xff]  ;;  %v17024_v28 = vpack.c.bf16 %v6800_v49, %v6800_v49  ;;  %5904 = vst [vmem:[#allocation4 + $0x464] sm:$0xf] %v16848_v26  ;;  %5905 = vst [vmem:[#allocation4 + $0x488] sm:$0xf] %v16849_v37 }
 0x306   : > { %v17059_v45 = vpack.c.bf16 %v7015_v1, %v7015_v1  ;;  %v17060_v10 = vpack.c.bf16 %v7016_v15, %v7016_v15  ;;  %6118 = vst [vmem:[#allocation4 + $0x420] sm:$0xf] %v16848_v26  ;;  %6119 = vst [vmem:[#allocation4 + $0x444] sm:$0xf] %v16849_v37  ;;  %v18098_v3 = vld [vmem:[#allocation4 + $0x320] ss:$36 sps:$4 sm:$0xff]  }
 0x307   : > { %v18099_v21 = vld [vmem:[#allocation4 + $0x3ac] ss:$36 sps:$4 sm:$0xff]   ;;  %v20648_v52 = vld [vmem:[%s21946_s1 + $0x410] sm:$0xff]   ;;  %6549 = vst [vmem:[#allocation4 + $0x404] sm:$0xf] %v16953_v29  ;;  %v6375_v43 = vld [vmem:[#allocation2 + $0x124] sm:$0xff]  ;;  %8927 = vmatmul.mubr.bf16.gmra.mxu1 %v18097_v48 }
 0x308   : > { %6550 = vst [vmem:[#allocation4 + $0x428] sm:$0xf] %v16954_v46  ;;  %6763 = vst [vmem:[#allocation4 + $0x3c0] sm:$0xf] %v16953_v29  ;;  %v5295_v36 = vld [vmem:[#allocation2 + $0x110] sm:$0xff]  ;;  %v16959_v50 = vpack.c.bf16 %v6375_v43, %v6375_v43  ;;  %v6805_v7 = vld [vmem:[#allocation2 + $0x125] sm:$0xff]  ;;  %9096 = vmatmul.mubr.bf16.gmra.mxu0 %v18098_v3  ;;  %8934 = vmatprep.mubr.bf16.mxu1 %v18099_v21 }
 0x309   : > { %6764 = vst [vmem:[#allocation4 + $0x3e4] sm:$0xf] %v16954_v46  ;;  %6979 = vst [vmem:[#allocation4 + $0x3c4] sm:$0xf] %v17023_v2  ;;  %v5511_v61 = vld [vmem:[#allocation2 + $0x111] sm:$0xff]  ;;  %v16779_v32 = vpack.c.bf16 %v5295_v36, %v5295_v36  ;;  %v7021_v46 = vld [vmem:[#allocation2 + $0x126] sm:$0xff]  ;;  %v17029_v2 = vpack.c.bf16 %v6805_v7, %v6805_v7  ;;  %9356 = vmatpush2.bf16.msra.mxu0 %v20648_v52 }
 0x30a   : > { %v5727_v5 = vld [vmem:[#allocation2 + $0x112] sm:$0xff]  ;;  %v18101_v11 = vld [vmem:[#allocation4 + $0x36c] ss:$36 sps:$4 sm:$0xff]   ;;  %6980 = vst [vmem:[#allocation4 + $0x3e8] sm:$0xf] %v17024_v28  ;;  %v16815_v33 = vpack.c.bf16 %v5511_v61, %v5511_v61  ;;  %v5944_v62 = vld [vmem:[#allocation2 + $0x12a] sm:$0xff]  ;;  %v17065_v48 = vpack.c.bf16 %v7021_v46, %v7021_v46  ;;  %9357 = vmatprep.subr.bf16.mxu0 %v22018_v6 }
 0x30b   : > { %7195 = vst [vmem:[#allocation4 + $0x3c8] sm:$0xf] %v17059_v45  ;;  %7196 = vst [vmem:[#allocation4 + $0x3ec] sm:$0xf] %v17060_v10  ;;  %v16851_v57 = vpack.c.bf16 %v5727_v5, %v5727_v5  ;;  %v6372_v55 = vld [vmem:[#allocation2 + $0x10c] sm:$0xff]  ;;  %v16888_v37 = vpack.c.bf16 %v5944_v62, %v5944_v62  ;;  %v5296_v28 = vld [vmem:[#allocation2 + $0x118] sm:$0xff]  ;;  %9103 = vmatprep.mubr.bf16.mxu0 %v18101_v11 }
 0x30c   : > { %v6802_v20 = vld [vmem:[#allocation2 + $0x10d] sm:$0xff]  ;;  %v16956_v27 = vpack.c.bf16 %v6372_v55, %v6372_v55  ;;  %5475 = vst [vmem:[#allocation4 + $0x4c8] sm:$0xf] %v16779_v32  ;;  %5691 = vst [vmem:[#allocation4 + $0x4cc] sm:$0xf] %v16815_v33  ;;  %v5512_v45 = vld [vmem:[#allocation2 + $0x119] sm:$0xff]  ;;  %v16780_v3 = vpack.c.bf16 %v5296_v28, %v5296_v28 }
 0x30d   : > { %v7018_v16 = vld [vmem:[#allocation2 + $0x10e] sm:$0xff]  ;;  %v17026_v41 = vpack.c.bf16 %v6802_v20, %v6802_v20  ;;  %5907 = vst [vmem:[#allocation4 + $0x4d0] sm:$0xf] %v16851_v57  ;;  %6121 = vst [vmem:[#allocation4 + $0x48c] sm:$0xf] %v16851_v57  ;;  %v16816_v21 = vpack.c.bf16 %v5512_v45, %v5512_v45  ;;  %v5728_v36 = vld [vmem:[#allocation2 + $0x11a] sm:$0xff] }
 0x30e   : > { %v17062_v30 = vpack.c.bf16 %v7018_v16, %v7018_v16  ;;  %v6376_v26 = vld [vmem:[#allocation2 + $0x12c] sm:$0xff]  ;;  %6552 = vst [vmem:[#allocation4 + $0x470] sm:$0xf] %v16956_v27  ;;  %6766 = vst [vmem:[#allocation4 + $0x42c] sm:$0xf] %v16956_v27  ;;  %v5943_v61 = vld [vmem:[#allocation2 + $0x122] sm:$0xff]  ;;  %v16852_v32 = vpack.c.bf16 %v5728_v36, %v5728_v36 }
 0x30f   : > { %v16960_v63 = vpack.c.bf16 %v6376_v26, %v6376_v26  ;;  %v6806_v29 = vld [vmem:[#allocation2 + $0x12d] sm:$0xff]  ;;  %6982 = vst [vmem:[#allocation4 + $0x430] sm:$0xf] %v17026_v41  ;;  %6124 = vst [vmem:[#allocation4 + $0x4f8] sm:$0xf] %v16888_v37  ;;  %v16887_v33 = vpack.c.bf16 %v5943_v61, %v5943_v61  ;;  %v6374_v57 = vld [vmem:[#allocation2 + $0x11c] sm:$0xff] }
 0x310   : > { %v20655_v49 = vld [vmem:[%s21946_s1 + $0x408] sm:$0xff]   ;;  %7198 = vst [vmem:[#allocation4 + $0x434] sm:$0xf] %v17062_v30  ;;  %v17030_v1 = vpack.c.bf16 %v6806_v29, %v6806_v29  ;;  %6555 = vst [vmem:[#allocation4 + $0x4dc] sm:$0xf] %v16959_v50  ;;  %v6373_v5 = vld [vmem:[#allocation2 + $0x114] sm:$0xff]  ;;  %v16958_v16 = vpack.c.bf16 %v6374_v57, %v6374_v57 }
 0x311   : > { %v7022_v15 = vld [vmem:[#allocation2 + $0x12e] sm:$0xff]  ;;  %6556 = vst [vmem:[#allocation4 + $0x500] sm:$0xf] %v16960_v63  ;;  %6769 = vst [vmem:[#allocation4 + $0x498] sm:$0xf] %v16959_v50  ;;  %v16957_v11 = vpack.c.bf16 %v6373_v5, %v6373_v5  ;;  %v6804_v20 = vld [vmem:[#allocation2 + $0x11d] sm:$0xff]  ;;  %9358 = vmatpush2.bf16.msra.mxu0 %v20655_v49 }
 0x312   : > { %v17066_v10 = vpack.c.bf16 %v7022_v15, %v7022_v15  ;;  %6770 = vst [vmem:[#allocation4 + $0x4bc] sm:$0xf] %v16960_v63  ;;  %6985 = vst [vmem:[#allocation4 + $0x49c] sm:$0xf] %v17029_v2  ;;  %v6803_v55 = vld [vmem:[#allocation2 + $0x115] sm:$0xff]  ;;  %v17028_v41 = vpack.c.bf16 %v6804_v20, %v6804_v20  ;;  %v7020_v62 = vld [vmem:[#allocation2 + $0x11e] sm:$0xff]  ;;  %9359 = vmatprep.subr.bf16.mxu0 %v22018_v6 }
 0x313   : > { %6986 = vst [vmem:[#allocation4 + $0x4c0] sm:$0xf] %v17030_v1  ;;  %7201 = vst [vmem:[#allocation4 + $0x4a0] sm:$0xf] %v17065_v48  ;;  %v17027_v27 = vpack.c.bf16 %v6803_v55, %v6803_v55  ;;  %v7019_v30 = vld [vmem:[#allocation2 + $0x116] sm:$0xff]  ;;  %v17064_v26 = vpack.c.bf16 %v7020_v62, %v7020_v62  ;;  %v20664_v29 = vld [vmem:[%s21946_s1 + $0x400] sm:$0xff]  }
 0x314   : > { %7202 = vst [vmem:[#allocation4 + $0x4c4] sm:$0xf] %v17066_v10  ;;  %5476 = vst [vmem:[#allocation4 + $0x4ec] sm:$0xf] %v16780_v3  ;;  %v17063_v43 = vpack.c.bf16 %v7019_v30, %v7019_v30  ;;  %v18106_v37 = vld [vmem:[#allocation4 + $0x3a8] ss:$36 sps:$4 sm:$0xff]  }
 0x315   : > { %5692 = vst [vmem:[#allocation4 + $0x4f0] sm:$0xf] %v16816_v21  ;;  %5908 = vst [vmem:[#allocation4 + $0x4f4] sm:$0xf] %v16852_v32  ;;  %v18107_v50 = vld [vmem:[#allocation4 + $0x368] ss:$36 sps:$4 sm:$0xff]   ;;  %8935 = vmatmul.mubr.bf16.gmra.mxu1 %v18106_v37  ;;  %9360 = vmatpush2.bf16.msra.mxu0 %v20664_v29 }
 0x316   : > { %6122 = vst [vmem:[#allocation4 + $0x4b0] sm:$0xf] %v16852_v32  ;;  %6123 = vst [vmem:[#allocation4 + $0x4d4] sm:$0xf] %v16887_v33  ;;  %v18108_v63 = vld [vmem:[#allocation4 + $0x3f4] ss:$36 sps:$4 sm:$0xff]   ;;  %9104 = vmatmul.mubr.bf16.gmra.mxu0 %v18107_v50  ;;  %13542 = vmatprep.subr.bf16.mxu0 %v22018_v6 }
 0x317   : > { %6553 = vst [vmem:[#allocation4 + $0x494] sm:$0xf] %v16957_v11  ;;  %6767 = vst [vmem:[#allocation4 + $0x450] sm:$0xf] %v16957_v11  ;;  %v18110_v7 = vld [vmem:[#allocation4 + $0x3b4] ss:$36 sps:$4 sm:$0xff]   ;;  %8942 = vmatprep.mubr.bf16.mxu1 %v18108_v63 }
 0x318   : > { %6554 = vst [vmem:[#allocation4 + $0x4b8] sm:$0xf] %v16958_v16  ;;  %6768 = vst [vmem:[#allocation4 + $0x474] sm:$0xf] %v16958_v16  ;;  %9111 = vmatprep.mubr.bf16.mxu0 %v18110_v7  ;;  %v18115_v46 = vld [vmem:[#allocation4 + $0x3f0] ss:$36 sps:$4 sm:$0xff]  }
 0x319   : > { %6983 = vst [vmem:[#allocation4 + $0x454] sm:$0xf] %v17027_v27  ;;  %6984 = vst [vmem:[#allocation4 + $0x478] sm:$0xf] %v17028_v41  ;;  %v18116_v2 = vld [vmem:[#allocation4 + $0x3b0] ss:$36 sps:$4 sm:$0xff]  }
 0x31a   : > { %7199 = vst [vmem:[#allocation4 + $0x458] sm:$0xf] %v17063_v43  ;;  %7200 = vst [vmem:[#allocation4 + $0x47c] sm:$0xf] %v17064_v26  ;;  %v18117_v1 = vld [vmem:[#allocation4 + $0x43c] ss:$36 sps:$4 sm:$0xff]  }
 0x31b   : > { %v18119_v15 = vld [vmem:[#allocation4 + $0x3fc] ss:$36 sps:$4 sm:$0xff]   ;;  %v18126_v45 = vld [vmem:[#allocation4 + $0x484] ss:$36 sps:$4 sm:$0xff]   ;;  %v18148_v32 = vld [vmem:[#allocation4 + $0x14] ss:$36 sps:$4 sm:$0xff]  }
 0x31c   : > { %v18124_v48 = vld [vmem:[#allocation4 + $0x438] ss:$36 sps:$4 sm:$0xff]   ;;  %v18128_v10 = vld [vmem:[#allocation4 + $0x444] ss:$36 sps:$4 sm:$0xff]   ;;  %v18135_v36 = vld [vmem:[#allocation4 + $0x4cc] ss:$36 sps:$4 sm:$0xff]  }
 0x31d   : > { %8943 = vmatmul.mubr.bf16.gmra.mxu1 %v18115_v46  ;;  %v18125_v28 = vld [vmem:[#allocation4 + $0x3f8] ss:$36 sps:$4 sm:$0xff]   ;;  %v18133_v3 = vld [vmem:[#allocation4 + $0x480] ss:$36 sps:$4 sm:$0xff]   ;;  %v18137_v61 = vld [vmem:[#allocation4 + $0x48c] ss:$36 sps:$4 sm:$0xff]  }
 0x31e   : > { %9112 = vmatmul.mubr.bf16.gmra.mxu0 %v18116_v2  ;;  %8950 = vmatprep.mubr.bf16.mxu1 %v18117_v1  ;;  %v18134_v21 = vld [vmem:[#allocation4 + $0x440] ss:$36 sps:$4 sm:$0xff]   ;;  %v18141_v5 = vld [vmem:[#allocation4 + $0x4c8] ss:$36 sps:$4 sm:$0xff]   ;;  %v18144_v57 = vld [vmem:[#allocation4 + $0x4d4] ss:$36 sps:$4 sm:$0xff]  }
 0x31f   : > { %9119 = vmatprep.mubr.bf16.mxu0 %v18119_v15  ;;  %v18142_v33 = vld [vmem:[#allocation4 + $0x488] ss:$36 sps:$4 sm:$0xff]   ;;  %v18146_v11 = vld [vmem:[#allocation4 + $0x10] ss:$36 sps:$4 sm:$0xff]   ;;  %v18152_v55 = vld [vmem:[#allocation4 + $0x5c] ss:$36 sps:$4 sm:$0xff]  }
 0x320   : > { %v18151_v20 = vld [vmem:[#allocation4 + $0x4d0] ss:$36 sps:$4 sm:$0xff]   ;;  %v18157_v16 = vld [vmem:[#allocation4 + $0x1c] ss:$36 sps:$4 sm:$0xff]   ;;  %v18880_v27 = vld [vmem:[%s21946_s1 + $0x3f8] sm:$0xff]  }
 0x321   : > { %v18155_v41 = vld [vmem:[#allocation4 + $0x18] ss:$36 sps:$4 sm:$0xff]   ;;  %v18881_v62 = vld [vmem:[%s21946_s1 + $0x3f0] sm:$0xff]   ;;  %v18883_v7 = vld [vmem:[%s21946_s1 + $0x3e0] sm:$0xff]  }
 0x322   : > { %v18159_v30 = vld [vmem:[#allocation4 + $0x58] ss:$36 sps:$4 sm:$0xff]   ;;  %v18160_v43 = vld [vmem:[#allocation4 + $0xa4] ss:$36 sps:$4 sm:$0xff]   ;;  %v18166_v46 = vld [vmem:[#allocation4 + $0xec] ss:$36 sps:$4 sm:$0xff]  }
 0x323   : > { %v18162_v26 = vld [vmem:[#allocation4 + $0x64] ss:$36 sps:$4 sm:$0xff]   ;;  %v18882_v37 = vld [vmem:[%s21946_s1 + $0x3e8] sm:$0xff]   ;;  %v18168_v2 = vld [vmem:[#allocation4 + $0xac] ss:$36 sps:$4 sm:$0xff]  }
 0x324   : > { %v18164_v50 = vld [vmem:[#allocation4 + $0xa0] ss:$36 sps:$4 sm:$0xff]   ;;  %v18884_v1 = vld [vmem:[%s21946_s1 + $0x3d8] sm:$0xff]   ;;  %v18259_v58 = vld [vmem:[#allocation4 + $0x498] ss:$36 sps:$4 sm:$0xff]  }
 0x325   : > { %8951 = vmatmul.mubr.bf16.gmra.mxu1 %v18124_v48  ;;  %v18165_v63 = vld [vmem:[#allocation4 + $0x60] ss:$36 sps:$4 sm:$0xff]   ;;  %v18170_v15 = vld [vmem:[#allocation4 + $0xe8] ss:$36 sps:$4 sm:$0xff]   ;;  %v18269_v38 = vld [vmem:[#allocation4 + $0xf8] ss:$36 sps:$4 sm:$0xff]  }
 0x326   : > { %9120 = vmatmul.mubr.bf16.gmra.mxu0 %v18125_v28  ;;  %8958 = vmatprep.mubr.bf16.mxu1 %v18126_v45  ;;  %v18171_v48 = vld [vmem:[#allocation4 + $0xa8] ss:$36 sps:$4 sm:$0xff]   ;;  %v18885_v28 = vld [vmem:[%s21946_s1 + $0x3d0] sm:$0xff]   ;;  %v18172_v45 = vld [vmem:[#allocation4 + $0x134] ss:$36 sps:$4 sm:$0xff]  }
 0x327   : > { %9127 = vmatprep.mubr.bf16.mxu0 %v18128_v10  ;;  %v18174_v10 = vld [vmem:[#allocation4 + $0xf4] ss:$36 sps:$4 sm:$0xff]   ;;  %v18249_v24 = vld [vmem:[#allocation4 + $0x40c] ss:$36 sps:$4 sm:$0xff]  }
 0x32d   : > { %8959 = vmatmul.mubr.bf16.gmra.mxu1 %v18133_v3  ;;  %v18886_v3 = vld [vmem:[%s21946_s1 + $0x3c8] sm:$0xff]  }
 0x32e   : > { %9128 = vmatmul.mubr.bf16.gmra.mxu0 %v18134_v21  ;;  %8966 = vmatprep.mubr.bf16.mxu1 %v18135_v36  ;;  %v18176_v21 = vld [vmem:[#allocation4 + $0x130] ss:$36 sps:$4 sm:$0xff]  }
 0x32f   : > { %9135 = vmatprep.mubr.bf16.mxu0 %v18137_v61  ;;  %v18887_v36 = vld [vmem:[%s21946_s1 + $0x3c0] sm:$0xff]  }
 0x330   : > { %v18177_v61 = vld [vmem:[#allocation4 + $0xf0] ss:$36 sps:$4 sm:$0xff]  }
 0x335   : > { %8967 = vmatmul.mubr.bf16.gmra.mxu1 %v18141_v5  ;;  %v18178_v5 = vld [vmem:[#allocation4 + $0x17c] ss:$36 sps:$4 sm:$0xff]  }
 0x336   : > { %9136 = vmatmul.mubr.bf16.gmra.mxu0 %v18142_v33  ;;  %9184 = vmatprep.mubr.bf16.mxu1 %v18148_v32  ;;  %v18180_v32 = vld [vmem:[#allocation4 + $0x13c] ss:$36 sps:$4 sm:$0xff]   ;;  %v18888_v33 = vld [vmem:[%s21946_s1 + $0x438] sm:$0xff]  }
 0x337   : > { %9143 = vmatprep.mubr.bf16.mxu0 %v18144_v57  ;;  %v18182_v57 = vld [vmem:[#allocation4 + $0x178] ss:$36 sps:$4 sm:$0xff]  }
 0x33d   : > { %9185 = vmatmul.mubr.bf16.vlgmr.msra.gmra.mxu1 %v18146_v11  ;;  %v18183_v11 = vld [vmem:[#allocation4 + $0x138] ss:$36 sps:$4 sm:$0xff]  }
 0x33e   : > { %9144 = vmatmul.mubr.bf16.gmra.mxu0 %v18151_v20  ;;  %9192 = vmatprep.mubr.bf16.mxu1 %v18152_v55  ;;  %v18184_v55 = vld [vmem:[#allocation4 + $0x1c4] ss:$36 sps:$4 sm:$0xff]  }
 0x33f   : > { %17643 = vmatpush1.bf16.msra.mxu1 %v18880_v27  ;;  %9361 = vmatprep.mubr.bf16.mxu0 %v18157_v16  ;;  %v18889_v20 = vld [vmem:[%s21946_s1 + $0x430] sm:$0xff]   ;;  %v6592_v27 = vld [vmem:[#allocation2 + $0x13c] sm:$0xff] }
 0x340   : > { %17628 = vmatprep.subr.bf16.mxu1 %v22018_v6  ;;  %v6591_v16 = vld [vmem:[#allocation2 + $0x134] sm:$0xff] }
 0x343   : > { %17644 = vmatpush1.bf16.msra.mxu1 %v18881_v62  ;;  %v16995_v62 = vpack.c.bf16 %v6591_v16, %v6591_v16  ;;  %v18198_v16 = vld [vmem:[#allocation4 + $0x214] ss:$36 sps:$4 sm:$0xff]  }
 0x344   : > { %17629 = vmatprep.subr.bf16.mxu1 %v22018_v6 }
 0x345   : > { %9193 = vmatmul.mubr.bf16.gmra.mxu1 %v18159_v30  ;;  %v18186_v30 = vld [vmem:[#allocation4 + $0x184] ss:$36 sps:$4 sm:$0xff]   ;;  %6771 = vst [vmem:[#allocation4 + $0x4e0] sm:$0xf] %v16995_v62 }
 0x346   : > { %9362 = vmatmul.mubr.bf16.vlgmr.msra.gmra.mxu0 %v18155_v41  ;;  %9200 = vmatprep.mubr.bf16.mxu1 %v18160_v43  ;;  %v6807_v41 = vld [vmem:[#allocation2 + $0x135] sm:$0xff]  ;;  %v16996_v43 = vpack.c.bf16 %v6592_v27, %v6592_v27 }
 0x347   : > { %9369 = vmatprep.mubr.bf16.mxu0 %v18162_v26  ;;  %17645 = vmatpush1.bf16.msra.mxu1 %v18882_v37  ;;  %v6808_v26 = vld [vmem:[#allocation2 + $0x13d] sm:$0xff]  ;;  %v17031_v37 = vpack.c.bf16 %v6807_v41, %v6807_v41 }
 0x348   : > { %17630 = vmatprep.subr.bf16.mxu1 %v22018_v6  ;;  %6772 = vst [vmem:[#allocation4 + $0x504] sm:$0xf] %v16996_v43  ;;  %v20736_v62 = vld [vmem:[%s21946_s1 + $0x478] sm:$0xff]   ;;  %v18200_v43 = vld [vmem:[#allocation4 + $0x250] ss:$36 sps:$4 sm:$0xff]  }
 0x349   : > { %6987 = vst [vmem:[#allocation4 + $0x4e4] sm:$0xf] %v17031_v37  ;;  %v18202_v37 = vld [vmem:[#allocation4 + $0x29c] ss:$36 sps:$4 sm:$0xff]  }
 0x34b   : > { %17646 = vmatpush1.bf16.msra.mxu1 %v18883_v7  ;;  %v11338_v7 = vld [vmem:[#allocation3 + $0x13c] sm:$0xff] }
 0x34c   : > { %17631 = vmatprep.subr.bf16.mxu1 %v22018_v6 }
 0x34d   : > { %9201 = vmatmul.mubr.bf16.gmra.mxu1 %v18164_v50  ;;  %v17032_v50 = vpack.c.bf16 %v6808_v26, %v6808_v26  ;;  %v18201_v26 = vld [vmem:[#allocation4 + $0x210] ss:$36 sps:$4 sm:$0xff]  }
 0x34e   : > { %9370 = vmatmul.mubr.bf16.gmra.mxu0 %v18165_v63  ;;  %9208 = vmatprep.mubr.bf16.mxu1 %v18166_v46  ;;  %v11337_v63 = vld [vmem:[#allocation3 + $0x134] sm:$0xff] }
 0x34f   : > { %9377 = vmatprep.mubr.bf16.mxu0 %v18168_v2  ;;  %17647 = vmatpush1.bf16.msra.mxu1 %v18884_v1  ;;  %6988 = vst [vmem:[#allocation4 + $0x508] sm:$0xf] %v17032_v50  ;;  %v11553_v46 = vld [vmem:[#allocation3 + $0x135] sm:$0xff]  ;;  %v11554_v2 = vld [vmem:[#allocation3 + $0x13d] sm:$0xff]  ;;  %v18188_v1 = vld [vmem:[#allocation4 + $0x1c0] ss:$36 sps:$4 sm:$0xff]  }
 0x350   : > { %17632 = vmatprep.subr.bf16.mxu1 %v22018_v6 }
 0x353   : > { %17648 = vmatpush1.bf16.msra.mxu1 %v18885_v28  ;;  %v17319_v28 = vpack.c.bf16 %v11337_v63, %v11337_v63 }
 0x354   : > { %17633 = vmatprep.subr.bf16.mxu1 %v22018_v6 }
 0x355   : > { %9209 = vmatmul.mubr.bf16.gmra.mxu1 %v18170_v15  ;;  %v18189_v15 = vld [vmem:[#allocation4 + $0x180] ss:$36 sps:$4 sm:$0xff]   ;;  %11517 = vst [vmem:[#allocation4 + $0x4e0] sm:$0xf] %v17319_v28 }
 0x356   : > { %9378 = vmatmul.mubr.bf16.gmra.mxu0 %v18171_v48  ;;  %9216 = vmatprep.mubr.bf16.mxu1 %v18172_v45  ;;  %v18190_v48 = vld [vmem:[#allocation4 + $0x20c] ss:$36 sps:$4 sm:$0xff]   ;;  %v17320_v45 = vpack.c.bf16 %v11338_v7, %v11338_v7 }
 0x357   : > { %9385 = vmatprep.mubr.bf16.mxu0 %v18174_v10  ;;  %17649 = vmatpush1.bf16.msra.mxu1 %v18886_v3  ;;  %v17356_v10 = vpack.c.bf16 %v11554_v2, %v11554_v2  ;;  %v18192_v3 = vld [vmem:[#allocation4 + $0x1cc] ss:$36 sps:$4 sm:$0xff]  }
 0x358   : > { %17634 = vmatprep.subr.bf16.mxu1 %v22018_v6  ;;  %11518 = vst [vmem:[#allocation4 + $0x504] sm:$0xf] %v17320_v45 }
 0x35b   : > { %17650 = vmatpush1.bf16.msra.mxu1 %v18887_v36 }
 0x35c   : > { %17635 = vmatprep.subr.bf16.mxu1 %v22018_v6 }
 0x35d   : > { %9217 = vmatmul.mubr.bf16.gmra.mxu1 %v18176_v21  ;;  %v20715_v21 = vld [vmem:[%s21947_s2 + $0x1] ss:$0 sm:$0xff] }
 0x35e   : > { %9386 = vmatmul.mubr.bf16.gmra.mxu0 %v18177_v61  ;;  %9224 = vmatprep.mubr.bf16.mxu1 %v18178_v5  ;;  %v8833_v36 = vadd.f32 %v20715_v21, %v20609_v0  ;;  %v8840_v61 = vpop.f32.mrf.mxu1  ;;  %v9009_v5 = vpop.f32.mrf.mxu0 }
 0x35f   : > { %9393 = vmatprep.mubr.bf16.mxu0 %v18180_v32  ;;  %17651 = vmatpush2.bf16.msra.mxu1 %v18888_v33  ;;  %v18194_v33 = vld [vmem:[#allocation4 + $0x208] ss:$36 sps:$4 sm:$0xff]   ;;  %v8841_v63 = vadd.f32 %v20715_v21, %v8840_v61 }
 0x360   : > { %17636 = vmatprep.subr.bf16.mxu1 %v22018_v6  ;;  %v20723_v32 = vadd.f32 %v9009_v5, %v8833_v36  ;;  %v18208_v36 = vld [vmem:[#allocation4 + $0x2e4] ss:$36 sps:$4 sm:$0xff]  }
 0x363   : > { %17652 = vmatpush2.bf16.msra.mxu1 %v18889_v20  ;;  %v8836_v20 = vadd.f32 %v20715_v21, %v20633_v23 }
 0x364   : > { %17637 = vmatprep.subr.bf16.mxu1 %v22018_v6 }
 0x365   : > { %9225 = vmatmul.mubr.bf16.gmra.mxu1 %v18182_v57  ;;  %v8842_v57 = vpop.f32.mrf.mxu1 }
 0x366   : > { %9394 = vmatmul.mubr.bf16.gmra.mxu0 %v18183_v11  ;;  %9232 = vmatprep.mubr.bf16.mxu1 %v18184_v55  ;;  %v18196_v11 = vld [vmem:[#allocation4 + $0x254] ss:$36 sps:$4 sm:$0xff]   ;;  %v9011_v55 = vpop.f32.mrf.mxu0 }
 0x367   : > { %9401 = vmatprep.mubr.bf16.mxu0 %v18186_v30  ;;  %17653 = vmatpush2.bf16.msra.mxu1 %v20607_v12  ;;  %v17355_v12 = vpack.c.bf16 %v11553_v46, %v11553_v46  ;;  %v8843_v27 = vpop.f32.mrf.mxu1 }
 0x368   : > { %17638 = vmatprep.subr.bf16.mxu1 %v22018_v6  ;;  %v9012_v0 = vpop.f32.mrf.mxu0 }
 0x369   : > { %v20729_v41 = vadd.f32 %v9012_v0, %v8836_v20  ;;  %v8845_v30 = vpop.f32.mrf.mxu1 }
 0x36b   : > { %17654 = vmatpush2.bf16.msra.mxu1 %v20621_v47  ;;  %v20718_v47 = vld [vmem:[#allocation4 + $0x4e4] ss:$36 sps:$4 sm:$0xff]   ;;  %v8848_v23 = vpop.f32.mrf.mxu1 }
 0x36c   : > { %17639 = vmatprep.subr.bf16.mxu1 %v22018_v6  ;;  %11733 = vst [vmem:[#allocation4 + $0x4e4] sm:$0xf] %v17355_v12  ;;  %11734 = vst [vmem:[#allocation4 + $0x508] sm:$0xf] %v17356_v10  ;;  %v18206_v12 = vld [vmem:[#allocation4 + $0x298] ss:$36 sps:$4 sm:$0xff]   ;;  %v8849_v5 = vadd.f32 %v20715_v21, %v8848_v23 }
 0x36d   : > { %9233 = vmatmul.mubr.bf16.gmra.mxu1 %v18188_v1  ;;  %v8850_v50 = vpop.f32.mrf.mxu1  ;;  %v18213_v23 = vld [vmem:[#allocation4 + $0x2a0] ss:$36 sps:$4 sm:$0xff]  }
 0x36e   : > { %9402 = vmatmul.mubr.bf16.gmra.mxu0 %v18189_v15  ;;  %9240 = vmatprep.mubr.bf16.mxu1 %v18190_v48 }
 0x36f   : > { %9409 = vmatprep.mubr.bf16.mxu0 %v18192_v3  ;;  %17655 = vmatpush2.bf16.msra.mxu1 %v20640_v9  ;;  %v18195_v9 = vld [vmem:[#allocation4 + $0x1c8] ss:$36 sps:$4 sm:$0xff]   ;;  %v8851_v46 = vpop.f32.mrf.mxu1  ;;  %v18207_v3 = vld [vmem:[#allocation4 + $0x258] ss:$36 sps:$4 sm:$0xff]  }
 0x370   : > { %17640 = vmatprep.subr.bf16.mxu1 %v22018_v6 }
 0x371   : > { %v8853_v15 = vpop.f32.mrf.mxu1 }
 0x373   : > { %17656 = vmatpush2.bf16.msra.mxu1 %v20648_v52  ;;  %v9014_v52 = vpop.f32.mrf.mxu0  ;;  %v8856_v28 = vpop.f32.mrf.mxu1 }
 0x374   : > { %17641 = vmatprep.subr.bf16.mxu1 %v22018_v6  ;;  %v18212_v52 = vld [vmem:[#allocation4 + $0x2e0] ss:$36 sps:$4 sm:$0xff]   ;;  %v8857_v50 = vadd.f32 %v20715_v21, %v8856_v28  ;;  %v18220_v28 = vld [vmem:[#allocation4 + $0x374] ss:$36 sps:$4 sm:$0xff]  }
 0x375   : > { %9241 = vmatmul.mubr.bf16.gmra.mxu1 %v18194_v33  ;;  %v9017_v7 = vpop.f32.mrf.mxu0  ;;  %v8858_v61 = vpop.f32.mrf.mxu1  ;;  %v18210_v33 = vld [vmem:[#allocation4 + $0x2a4] ss:$36 sps:$4 sm:$0xff]  }
 0x376   : > { %9410 = vmatmul.mubr.bf16.gmra.mxu0 %v18195_v9  ;;  %9248 = vmatprep.mubr.bf16.mxu1 %v18196_v11  ;;  %v20741_v2 = vadd.f32 %v9017_v7, %v8841_v63  ;;  %v18216_v63 = vld [vmem:[#allocation4 + $0x2ec] ss:$36 sps:$4 sm:$0xff]  }
 0x377   : > { %9417 = vmatprep.mubr.bf16.mxu0 %v18198_v16  ;;  %17657 = vmatpush2.bf16.msra.mxu1 %v20655_v49  ;;  %v18204_v49 = vld [vmem:[#allocation4 + $0x25c] ss:$36 sps:$4 sm:$0xff]   ;;  %v9019_v1 = vpop.f32.mrf.mxu0  ;;  %v8859_v9 = vpop.f32.mrf.mxu1  ;;  %v8852_v16 = vadd.f32 %v20715_v21, %v8851_v46 }
 0x378   : > { %17642 = vmatprep.subr.bf16.mxu1 %v22018_v6 }
 0x379   : > { %v9020_v48 = vpop.f32.mrf.mxu0  ;;  %v8861_v20 = vpop.f32.mrf.mxu1 }
 0x37b   : > { %17658 = vmatpush2.bf16.msra.mxu1 %v20664_v29  ;;  %v8844_v29 = vadd.f32 %v20715_v21, %v8843_v27  ;;  %v9022_v10 = vpop.f32.mrf.mxu0  ;;  %v8864_v0 = vpop.f32.mrf.mxu1 }
 0x37c   : > { %17523 = vmatprep.subr.bf16.mxu1 %v20736_v62  ;;  %v18218_v10 = vld [vmem:[#allocation4 + $0x328] ss:$36 sps:$4 sm:$0xff]   ;;  %v8865_v61 = vadd.f32 %v20715_v21, %v8864_v0 }
 0x37d   : > { %9249 = vmatmul.mubr.bf16.gmra.mxu1 %v18200_v43  ;;  %v20744_v45 = vadd.f32 %v9020_v48, %v8844_v29  ;;  %v9025_v57 = vpop.f32.mrf.mxu0  ;;  %v8860_v29 = vadd.f32 %v20715_v21, %v8859_v9 }
 0x37e   : > { %9418 = vmatmul.mubr.bf16.gmra.mxu0 %v18201_v26  ;;  %9256 = vmatprep.mubr.bf16.mxu1 %v18202_v37  ;;  %v20747_v11 = vadd.f32 %v9025_v57, %v8849_v5  ;;  %v18214_v26 = vld [vmem:[#allocation4 + $0x32c] ss:$36 sps:$4 sm:$0xff]   ;;  %v8866_v37 = vpop.f32.mrf.mxu1 }
 0x37f   : > { %9425 = vmatprep.mubr.bf16.mxu0 %v18204_v49  ;;  %v9027_v55 = vpop.f32.mrf.mxu0  ;;  %v18225_v37 = vld [vmem:[#allocation4 + $0x330] ss:$36 sps:$4 sm:$0xff]  }
 0x380   : > { %v8867_v7 = vpop.f32.mrf.mxu1 }
 0x381   : > { %v9028_v27 = vpop.f32.mrf.mxu0 }
 0x382   : > { %v20750_v30 = vadd.f32 %v9028_v27, %v8852_v16  ;;  %v8869_v15 = vpop.f32.mrf.mxu1  ;;  %v8868_v16 = vadd.f32 %v20715_v21, %v8867_v7 }
 0x383   : > { %v9030_v43 = vpop.f32.mrf.mxu0 }
 0x384   : > { %v8872_v5 = vpop.f32.mrf.mxu1 }
 0x385   : > { %9257 = vmatmul.mubr.bf16.gmra.mxu1 %v18206_v12  ;;  %v9033_v49 = vpop.f32.mrf.mxu0 }
 0x386   : > { %9426 = vmatmul.mubr.bf16.gmra.mxu0 %v18207_v3  ;;  %9264 = vmatprep.mubr.bf16.mxu1 %v18208_v36  ;;  %v20753_v1 = vadd.f32 %v9033_v49, %v8857_v50  ;;  %v18219_v36 = vld [vmem:[#allocation4 + $0x2e8] ss:$36 sps:$4 sm:$0xff]   ;;  %v8874_v20 = vpop.f32.mrf.mxu1  ;;  %v18226_v50 = vld [vmem:[#allocation4 + $0x3bc] ss:$36 sps:$4 sm:$0xff]  }
 0x387   : > { %9433 = vmatprep.mubr.bf16.mxu0 %v18210_v33  ;;  %v9035_v46 = vpop.f32.mrf.mxu0  ;;  %v18222_v33 = vld [vmem:[#allocation4 + $0x334] ss:$36 sps:$4 sm:$0xff]   ;;  %v18232_v20 = vld [vmem:[#allocation4 + $0x404] ss:$36 sps:$4 sm:$0xff]  }
 0x388   : > { %v8875_v27 = vpop.f32.mrf.mxu1  ;;  %v18228_v46 = vld [vmem:[#allocation4 + $0x37c] ss:$36 sps:$4 sm:$0xff]  }
 0x389   : > { %v9036_v48 = vpop.f32.mrf.mxu0 }
 0x38a   : > { %v20756_v12 = vadd.f32 %v9036_v48, %v8860_v29 }
 0x38b   : > { %v9038_v3 = vpop.f32.mrf.mxu0 }
 0x38d   : > { %9265 = vmatmul.mubr.bf16.gmra.mxu1 %v18212_v52  ;;  %v9041_v57 = vpop.f32.mrf.mxu0 }
 0x38e   : > { %9434 = vmatmul.mubr.bf16.gmra.mxu0 %v18213_v23  ;;  %9272 = vmatprep.mubr.bf16.mxu1 %v18214_v26  ;;  %v20759_v55 = vadd.f32 %v9041_v57, %v8865_v61  ;;  %v8877_v23 = vpop.f32.mrf.mxu1  ;;  %v18224_v26 = vld [vmem:[#allocation4 + $0x370] ss:$36 sps:$4 sm:$0xff]   ;;  %v18231_v57 = vld [vmem:[#allocation4 + $0x378] ss:$36 sps:$4 sm:$0xff]  }
 0x38f   : > { %9441 = vmatprep.mubr.bf16.mxu0 %v18216_v63  ;;  %v9043_v9 = vpop.f32.mrf.mxu0  ;;  %v8873_v63 = vadd.f32 %v20715_v21, %v8872_v5 }
 0x390   : > { %v8880_v49 = vpop.f32.mrf.mxu1 }
 0x391   : > { %v9044_v52 = vpop.f32.mrf.mxu0  ;;  %v8881_v9 = vadd.f32 %v20715_v21, %v8880_v49 }
 0x392   : > { %v20762_v43 = vadd.f32 %v9044_v52, %v8868_v16  ;;  %v8882_v7 = vpop.f32.mrf.mxu1  ;;  %v18234_v52 = vld [vmem:[#allocation4 + $0x3c4] ss:$36 sps:$4 sm:$0xff]  }
 0x393   : > { %v9046_v0 = vpop.f32.mrf.mxu0  ;;  %v18236_v7 = vld [vmem:[#allocation4 + $0x400] ss:$36 sps:$4 sm:$0xff]  }
 0x394   : > { %v8883_v3 = vpop.f32.mrf.mxu1 }
 0x395   : > { %9273 = vmatmul.mubr.bf16.gmra.mxu1 %v18218_v10  ;;  %v9049_v15 = vpop.f32.mrf.mxu0  ;;  %v8876_v10 = vadd.f32 %v20715_v21, %v8875_v27 }
 0x396   : > { %9442 = vmatmul.mubr.bf16.gmra.mxu0 %v18219_v36  ;;  %9280 = vmatprep.mubr.bf16.mxu1 %v18220_v28  ;;  %v20765_v29 = vadd.f32 %v9049_v15, %v8873_v63  ;;  %v8885_v61 = vpop.f32.mrf.mxu1 }
 0x397   : > { %9449 = vmatprep.mubr.bf16.mxu0 %v18222_v33  ;;  %v9051_v48 = vpop.f32.mrf.mxu0  ;;  %v18230_v33 = vld [vmem:[#allocation4 + $0x3b8] ss:$36 sps:$4 sm:$0xff]  }
 0x398   : > { %v8888_v16 = vpop.f32.mrf.mxu1  ;;  %v18237_v48 = vld [vmem:[#allocation4 + $0x3c0] ss:$36 sps:$4 sm:$0xff]  }
 0x399   : > { %v9052_v36 = vpop.f32.mrf.mxu0 }
 0x39a   : > { %v20768_v28 = vadd.f32 %v9052_v36, %v8876_v10  ;;  %v8890_v27 = vpop.f32.mrf.mxu1  ;;  %v18238_v10 = vld [vmem:[#allocation4 + $0x44c] ss:$36 sps:$4 sm:$0xff]   ;;  %v8889_v36 = vadd.f32 %v20715_v21, %v8888_v16 }
 0x39b   : > { %v9054_v5 = vpop.f32.mrf.mxu0 }
 0x39d   : > { %9281 = vmatmul.mubr.bf16.gmra.mxu1 %v18224_v26  ;;  %v9057_v23 = vpop.f32.mrf.mxu0 }
 0x39e   : > { %9450 = vmatmul.mubr.bf16.gmra.mxu0 %v18225_v37  ;;  %9288 = vmatprep.mubr.bf16.mxu1 %v18226_v50  ;;  %v20771_v26 = vadd.f32 %v9057_v23, %v8881_v9  ;;  %v8884_v37 = vadd.f32 %v20715_v21, %v8883_v3  ;;  %v8891_v50 = vpop.f32.mrf.mxu1  ;;  %v11769_v3 = vld [vmem:[#allocation3 + $0x136] sm:$0xff] }
 0x39f   : > { %9457 = vmatprep.mubr.bf16.mxu0 %v18228_v46  ;;  %v9059_v0 = vpop.f32.mrf.mxu0  ;;  %v8892_v27 = vadd.f32 %v20715_v21, %v8891_v50 }
 0x3a0   : > { %v8893_v15 = vpop.f32.mrf.mxu1 }
 0x3a1   : > { %v9060_v63 = vpop.f32.mrf.mxu0 }
 0x3a2   : > { %v20774_v46 = vadd.f32 %v9060_v63, %v8884_v37  ;;  %v8896_v61 = vpop.f32.mrf.mxu1  ;;  %v20780_v37 = vld [vmem:[#allocation4 + $0x4e8] ss:$36 sps:$4 sm:$0xff]  }
 0x3a3   : > { %v9062_v49 = vpop.f32.mrf.mxu0 }
 0x3a5   : > { %9289 = vmatmul.mubr.bf16.gmra.mxu1 %v18230_v33  ;;  %v9065_v33 = vpop.f32.mrf.mxu0 }
 0x3a6   : > { %9458 = vmatmul.mubr.bf16.gmra.mxu0 %v18231_v57  ;;  %9296 = vmatprep.mubr.bf16.mxu1 %v18232_v20  ;;  %v20777_v5 = vadd.f32 %v9065_v33, %v8889_v36  ;;  %v8898_v57 = vpop.f32.mrf.mxu1  ;;  %v11770_v20 = vld [vmem:[#allocation3 + $0x13e] sm:$0xff] }
 0x3a7   : > { %9465 = vmatprep.mubr.bf16.mxu0 %v18234_v52  ;;  %v9067_v9 = vpop.f32.mrf.mxu0  ;;  %v17391_v52 = vpack.c.bf16 %v11769_v3, %v11769_v3  ;;  %v17392_v23 = vpack.c.bf16 %v11770_v20, %v11770_v20 }
 0x3a8   : > { %v8899_v0 = vpop.f32.mrf.mxu1 }
 0x3a9   : > { %v9068_v63 = vpop.f32.mrf.mxu0  ;;  %11949 = vst [vmem:[#allocation4 + $0x4e8] sm:$0xf] %v17391_v52  ;;  %11950 = vst [vmem:[#allocation4 + $0x50c] sm:$0xf] %v17392_v23  ;;  %v8900_v20 = vadd.f32 %v20715_v21, %v8899_v0 }
 0x3aa   : > { %v20782_v16 = vadd.f32 %v9068_v63, %v8892_v27  ;;  %v8901_v15 = vpop.f32.mrf.mxu1  ;;  %v18243_v63 = vld [vmem:[#allocation4 + $0x490] ss:$36 sps:$4 sm:$0xff]  }
 0x3ab   : > { %v9070_v49 = vpop.f32.mrf.mxu0 }
 0x3ac   : > { %v8904_v36 = vpop.f32.mrf.mxu1  ;;  %v18244_v49 = vld [vmem:[#allocation4 + $0x4dc] ss:$36 sps:$4 sm:$0xff]  }
 0x3ad   : > { %9297 = vmatmul.mubr.bf16.gmra.mxu1 %v18236_v7  ;;  %v18240_v7 = vld [vmem:[#allocation4 + $0x448] ss:$36 sps:$4 sm:$0xff]   ;;  %v9073_v33 = vpop.f32.mrf.mxu0 }
 0x3ae   : > { %9466 = vmatmul.mubr.bf16.gmra.mxu0 %v18237_v48  ;;  %9304 = vmatprep.mubr.bf16.mxu1 %v18238_v10  ;;  %v18241_v48 = vld [vmem:[#allocation4 + $0x494] ss:$36 sps:$4 sm:$0xff]   ;;  %v8897_v10 = vadd.f32 %v20715_v21, %v8896_v61  ;;  %v8906_v50 = vpop.f32.mrf.mxu1  ;;  %v8905_v61 = vadd.f32 %v20715_v21, %v8904_v36 }
 0x3af   : > { %v9075_v3 = vpop.f32.mrf.mxu0 }
 0x3b0   : > { %v20785_v57 = vadd.f32 %v9073_v33, %v8897_v10  ;;  %v8907_v9 = vpop.f32.mrf.mxu1 }
 0x3b1   : > { %v9076_v52 = vpop.f32.mrf.mxu0  ;;  %v8908_v0 = vadd.f32 %v20715_v21, %v8907_v9 }
 0x3b2   : > { %v20788_v23 = vadd.f32 %v9076_v52, %v8900_v20  ;;  %v8909_v27 = vpop.f32.mrf.mxu1 }
 0x3b3   : > { %v9078_v15 = vpop.f32.mrf.mxu0  ;;  %v18246_v27 = vld [vmem:[#allocation4 + $0x4d8] ss:$36 sps:$4 sm:$0xff]  }
 0x3b4   : > { %v8912_v56 = vpop.f32.mrf.mxu1 }
 0x3b5   : > { %9305 = vmatmul.mubr.bf16.gmra.mxu1 %v18240_v7  ;;  %v9081_v7 = vpop.f32.mrf.mxu0  ;;  %v8913_v36 = vadd.f32 %v20715_v21, %v8912_v56  ;;  %v18253_v56 = vld [vmem:[%s21946_s1 + $0x470] sm:$0xff]  }
 0x3b6   : > { %9312 = vmatprep.mubr.bf16.mxu1 %v18241_v48  ;;  %v20791_v48 = vadd.f32 %v9081_v7, %v8905_v61  ;;  %v8914_v10 = vpop.f32.mrf.mxu1 }
 0x3b7   : > { %v9083_v33 = vpop.f32.mrf.mxu0 }
 0x3b8   : > { %v8915_v50 = vpop.f32.mrf.mxu1 }
 0x3b9   : > { %v9084_v3 = vpop.f32.mrf.mxu0  ;;  %v8916_v9 = vadd.f32 %v20715_v21, %v8915_v50 }
 0x3ba   : > { %v20794_v20 = vadd.f32 %v9084_v3, %v8908_v0  ;;  %v8917_v52 = vpop.f32.mrf.mxu1  ;;  %v18247_v0 = vld [vmem:[#allocation4 + $0x408] ss:$36 sps:$4 sm:$0xff]  }
 0x3bb   : > { %v9086_v15 = vpop.f32.mrf.mxu0 }
 0x3bd   : > { %9313 = vmatmul.mubr.bf16.gmra.mxu1 %v18243_v63 }
 0x3be   : > { %9320 = vmatprep.mubr.bf16.mxu1 %v18244_v49 }
 0x3bf   : > { %v8920_v44 = vpop.f32.mrf.mxu1 }
 0x3c0   : > { %v9089_v63 = vpop.f32.mrf.mxu0 }
 0x3c1   : > { %v20797_v49 = vadd.f32 %v9089_v63, %v8913_v36  ;;  %v8922_v61 = vpop.f32.mrf.mxu1 }
 0x3c2   : > { %v9091_v7 = vpop.f32.mrf.mxu0 }
 0x3c3   : > { %v8923_v10 = vpop.f32.mrf.mxu1  ;;  %v18255_v7 = vld [vmem:[%s21946_s1 + $0x468] sm:$0xff]  }
 0x3c4   : > { %v9092_v33 = vpop.f32.mrf.mxu0 }
 0x3c5   : > { %9321 = vmatmul.mubr.bf16.gmra.mxu1 %v18246_v27  ;;  %v20800_v3 = vadd.f32 %v9092_v33, %v8916_v9  ;;  %v8925_v52 = vpop.f32.mrf.mxu1  ;;  %v18251_v27 = vld [vmem:[#allocation4 + $0x454] ss:$36 sps:$4 sm:$0xff]   ;;  %v8924_v33 = vadd.f32 %v20715_v21, %v8923_v10 }
 0x3c6   : > { %9473 = vmatprep.mubr.bf16.mxu1 %v18249_v24  ;;  %v9094_v15 = vpop.f32.mrf.mxu0  ;;  %v8921_v24 = vadd.f32 %v20715_v21, %v8920_v44 }
 0x3c7   : > { %v8928_v36 = vpop.f32.mrf.mxu1 }
 0x3c8   : > { %v9097_v63 = vpop.f32.mrf.mxu0 }
 0x3c9   : > { %v20807_v50 = vadd.f32 %v9097_v63, %v8921_v24  ;;  %v8930_v61 = vpop.f32.mrf.mxu1  ;;  %v18256_v63 = vld [vmem:[#allocation4 + $0x49c] ss:$36 sps:$4 sm:$0xff]  }
 0x3ca   : > { %v9099_v9 = vpop.f32.mrf.mxu0  ;;  %v8929_v61 = vadd.f32 %v20715_v21, %v8928_v36 }
 0x3cb   : > { %v8931_v52 = vpop.f32.mrf.mxu1 }
 0x3cc   : > { %v9100_v15 = vpop.f32.mrf.mxu0 }
 0x3cd   : > { %9474 = vmatmul.mubr.bf16.vlgmr.msra.gmra.mxu1 %v18247_v0  ;;  %v20813_v44 = vadd.f32 %v9100_v15, %v8924_v33  ;;  %v8933_v0 = vpop.f32.mrf.mxu1  ;;  %v18260_v33 = vld [vmem:[%s21946_s1 + $0x458] sm:$0xff]  }
 0x3ce   : > { %9481 = vmatprep.mubr.bf16.mxu1 %v18251_v27  ;;  %17524 = vmatpush3.bf16.msra.mxu1 %v20736_v62  ;;  %v18254_v27 = vld [vmem:[#allocation4 + $0x450] ss:$36 sps:$4 sm:$0xff]   ;;  %v9102_v24 = vpop.f32.mrf.mxu0  ;;  %v8932_v0 = vadd.f32 %v20715_v21, %v8931_v52  ;;  %v7378_v52 = vld [vmem:[#allocation4 + $0x4e0] sm:$0xff] }
 0x3cf   : > { %17525 = vmatprep.subr.bf16.mxu1 %v18253_v56  ;;  %v18258_v62 = vld [vmem:[%s21946_s1 + $0x460] sm:$0xff]  }
 0x3d2   : > { %17526 = vmatpush3.bf16.msra.mxu1 %v18253_v56 }
 0x3d3   : > { %17527 = vmatprep.subr.bf16.mxu1 %v18255_v7 }
 0x3d5   : > { %v8936_v34 = vpop.f32.mrf.mxu1  ;;  %9482 = vmatmul.mubr.bf16.gmra.mxu1 %v18254_v27 }
 0x3d6   : > { %v9105_v9 = vpop.f32.mrf.mxu0  ;;  %9489 = vmatprep.mubr.bf16.mxu1 %v18256_v63  ;;  %17528 = vmatpush3.bf16.msra.mxu1 %v18255_v7  ;;  %v18261_v7 = vld [vmem:[%s21946_s1 + $0x450] sm:$0xff]  }
 0x3d7   : > { %v20819_v10 = vadd.f32 %v9105_v9, %v8929_v61  ;;  %v8938_v56 = vpop.f32.mrf.mxu1  ;;  %17529 = vmatprep.subr.bf16.mxu1 %v18258_v62  ;;  %v8937_v61 = vadd.f32 %v20715_v21, %v8936_v34 }
 0x3d8   : > { %v9107_v15 = vpop.f32.mrf.mxu0 }
 0x3d9   : > { %v8939_v24 = vpop.f32.mrf.mxu1  ;;  %v7383_v15 = vld [vmem:[#allocation4 + $0x504] sm:$0xff] }
 0x3da   : > { %v9108_v13 = vpop.f32.mrf.mxu0  ;;  %17530 = vmatpush3.bf16.msra.mxu1 %v18258_v62  ;;  %v15749_v39 = vcombine.low %v7378_v52, %v7383_v15 }
 0x3db   : > { %v20825_v36 = vadd.f32 %v9108_v13, %v8932_v0  ;;  %v8941_v27 = vpop.f32.mrf.mxu1  ;;  %17531 = vmatprep.subr.bf16.mxu1 %v18260_v33  ;;  %v18264_v0 = vld [vmem:[%s21946_s1 + $0x448] sm:$0xff]  }
 0x3dc   : > { %v9110_v63 = vpop.f32.mrf.mxu0 }
 0x3dd   : > { %v8944_v9 = vpop.f32.mrf.mxu1  ;;  %9490 = vmatmul.mubr.bf16.gmra.mxu1 %v18259_v58  ;;  %v8940_v63 = vadd.f32 %v20715_v21, %v8939_v24 }
 0x3de   : > { %v9113_v56 = vpop.f32.mrf.mxu0  ;;  %17532 = vmatpush3.bf16.msra.mxu1 %v18260_v33  ;;  %9497 = vmatprep.mubr.bf16.mxu1 %v20718_v47  ;;  %v18266_v47 = vld [vmem:[%s21946_s1 + $0x440] sm:$0xff]  }
 0x3df   : > { %v20832_v13 = vadd.f32 %v9113_v56, %v8937_v61  ;;  %v8946_v62 = vpop.f32.mrf.mxu1  ;;  %17533 = vmatprep.subr.bf16.mxu1 %v18261_v7  ;;  %v18265_v56 = vld [vmem:[#allocation4 + $0x20] ss:$36 sps:$4 sm:$0xff]  }
 0x3e0   : > { %v9115_v27 = vpop.f32.mrf.mxu0  ;;  %v8945_v62 = vadd.f32 %v20715_v21, %v8944_v9  ;;  %v18268_v9 = vld [vmem:[#allocation4 + $0xb0] ss:$36 sps:$4 sm:$0xff]  }
 0x3e1   : > { %v8947_v34 = vpop.f32.mrf.mxu1 }
 0x3e2   : > { %v9116_v58 = vpop.f32.mrf.mxu0  ;;  %17534 = vmatpush3.bf16.msra.mxu1 %v18261_v7 }
 0x3e3   : > { %v20838_v33 = vadd.f32 %v9116_v58, %v8940_v63  ;;  %v8949_v25 = vpop.f32.mrf.mxu1  ;;  %17535 = vmatprep.subr.bf16.mxu1 %v18264_v0 }
 0x3e4   : > { %v9118_v61 = vpop.f32.mrf.mxu0  ;;  %v8948_v25 = vadd.f32 %v20715_v21, %v8947_v34 }
 0x3e5   : > { %v8952_v17 = vpop.f32.mrf.mxu1  ;;  %9498 = vmatmul.mubr.bf16.gmra.mxu1 %v15749_v39 }
 0x3e6   : > { %v9121_v27 = vpop.f32.mrf.mxu0  ;;  %17536 = vmatpush3.bf16.msra.mxu1 %v18264_v0  ;;  %17539 = vmatprep.mubr.bf16.mxu1 %v18265_v56  ;;  %v8953_v0 = vadd.f32 %v20715_v21, %v8952_v17 }
 0x3e7   : > { %v20844_v24 = vadd.f32 %v9121_v27, %v8945_v62  ;;  %v8954_v7 = vpop.f32.mrf.mxu1  ;;  %17537 = vmatprep.subr.bf16.mxu1 %v18266_v47 }
 0x3e8   : > { %v9123_v52 = vpop.f32.mrf.mxu0 }
 0x3e9   : > { %v8955_v15 = vpop.f32.mrf.mxu1 }
 0x3ea   : > { %v9124_v63 = vpop.f32.mrf.mxu0  ;;  %17538 = vmatpush3.bf16.msra.mxu1 %v18266_v47  ;;  %v8956_v47 = vadd.f32 %v20715_v21, %v8955_v15  ;;  %v18284_v15 = vld [vmem:[%s21948_s3 + $0x38] sm:$0xff]  }
 0x3eb   : > { %v20847_v58 = vadd.f32 %v9124_v63, %v8948_v25  ;;  %v8957_v61 = vpop.f32.mrf.mxu1  ;;  %13719 = vmatprep.subr.bf16.mxu1 %v22018_v6  ;;  %13543 = vmatpush1.bf16.msra.mxu0 %v18284_v15 }
 0x3ec   : > { %v9126_v39 = vpop.f32.mrf.mxu0  ;;  %13544 = vmatprep.subr.bf16.mxu0 %v22018_v6 }
 0x3ed   : > { %v8960_v56 = vpop.f32.mrf.mxu1  ;;  %17540 = vmatmul.mubr.bf16.vlgmr.msra.gmra.mxu1 %v18267_v54 }
 0x3ee   : > { %v9129_v62 = vpop.f32.mrf.mxu0  ;;  %17543 = vmatprep.mubr.bf16.mxu1 %v18268_v9  ;;  %v8961_v17 = vadd.f32 %v20715_v21, %v8960_v56 }
 0x3ef   : > { %v20851_v27 = vadd.f32 %v9129_v62, %v8953_v0  ;;  %v8962_v34 = vpop.f32.mrf.mxu1 }
 0x3f0   : > { %v9131_v7 = vpop.f32.mrf.mxu0 }
 0x3f1   : > { %v8963_v52 = vpop.f32.mrf.mxu1 }
 0x3f2   : > { %v9132_v25 = vpop.f32.mrf.mxu0  ;;  %v8964_v34 = vadd.f32 %v20715_v21, %v8963_v52  ;;  %v18285_v52 = vld [vmem:[%s21948_s3 + $0x30] sm:$0xff]  }
 0x3f3   : > { %v20854_v63 = vadd.f32 %v9132_v25, %v8956_v47  ;;  %v8965_v61 = vpop.f32.mrf.mxu1  ;;  %v18271_v25 = vld [vmem:[#allocation4 + $0x188] ss:$36 sps:$4 sm:$0xff]   ;;  %13545 = vmatpush1.bf16.msra.mxu0 %v18285_v52 }
 0x3f4   : > { %v9134_v39 = vpop.f32.mrf.mxu0  ;;  %v18272_v61 = vld [vmem:[#allocation4 + $0x1d0] ss:$36 sps:$4 sm:$0xff]   ;;  %13546 = vmatprep.subr.bf16.mxu0 %v22018_v6 }
 0x3f5   : > { %v8968_v19 = vpop.f32.mrf.mxu1  ;;  %17544 = vmatmul.mubr.bf16.gmra.mxu1 %v18269_v38 }
 0x3f6   : > { %v9137_v54 = vpop.f32.mrf.mxu0  ;;  %17547 = vmatprep.mubr.bf16.mxu1 %v18270_v35  ;;  %v8969_v39 = vadd.f32 %v20715_v21, %v8968_v19 }
 0x3f7   : > { %v20857_v9 = vadd.f32 %v9137_v54, %v8961_v17  ;;  %v8970_v0 = vpop.f32.mrf.mxu1 }
 0x3f8   : > { %v9139_v62 = vpop.f32.mrf.mxu0 }
 0x3f9   : > { %v8971_v7 = vpop.f32.mrf.mxu1 }
 0x3fa   : > { %v9140_v47 = vpop.f32.mrf.mxu0 }
 0x3fb   : > { %v20864_v56 = vadd.f32 %v9140_v47, %v8964_v34  ;;  %v8973_v38 = vpop.f32.mrf.mxu1  ;;  %v8972_v47 = vadd.f32 %v20715_v21, %v8971_v7  ;;  %v18286_v21 = vld [vmem:[%s21948_s3 + $0x28] sm:$0xff]  }
 0x3fc   : > { %v9142_v35 = vpop.f32.mrf.mxu0  ;;  %13547 = vmatpush1.bf16.msra.mxu0 %v18286_v21 }
 0x3fd   : > { %v9186_v17 = vpop.f32.mrf.mxu1  ;;  %17548 = vmatmul.mubr.bf16.gmra.mxu1 %v18271_v25  ;;  %13548 = vmatprep.subr.bf16.mxu0 %v22018_v6 }
 0x3fe   : > { %v9145_v54 = vpop.f32.mrf.mxu0  ;;  %v9187_v0 = vadd.f32 %v9186_v17, %v20723_v32  ;;  %17551 = vmatprep.mubr.bf16.mxu1 %v18272_v61  ;;  %v18273_v61 = vld [vmem:[#allocation4 + $0x218] ss:$36 sps:$4 sm:$0xff]  }
 0x3ff   : > { %v20871_v15 = vadd.f32 %v9145_v54, %v8969_v39  ;;  %v9188_v62 = vpop.f32.mrf.mxu1 }
 0x400   : > { %v9147_v34 = vpop.f32.mrf.mxu0 }
 0x401   : > { %v9189_v38 = vpop.f32.mrf.mxu1 }
 0x402   : > { %v9148_v19 = vpop.f32.mrf.mxu0  ;;  %v9190_v25 = vadd.f32 %v9189_v38, %v20729_v41 }
 0x403   : > { %v20876_v35 = vadd.f32 %v9148_v19, %v8972_v47  ;;  %v9191_v32 = vpop.f32.mrf.mxu1 }
 0x404   : > { %v9150_v17 = vpop.f32.mrf.mxu0 }
 0x405   : > { %v9194_v14 = vpop.f32.mrf.mxu1  ;;  %17552 = vmatmul.mubr.bf16.gmra.mxu1 %v18273_v61 }
 0x406   : > { %v9195_v39 = vadd.f32 %v9194_v14, %v20741_v2  ;;  %v9363_v54 = vpop.f32.mrf.mxu0  ;;  %17555 = vmatprep.mubr.bf16.mxu1 %v18274_v18  ;;  %v18275_v2 = vld [vmem:[#allocation4 + $0x2a8] ss:$36 sps:$4 sm:$0xff]   ;;  %v18287_v18 = vld [vmem:[%s21948_s3 + $0x20] sm:$0xff]  }
 0x407   : > { %v20882_v7 = vadd.f32 %v9363_v54, %v9187_v0  ;;  %v9196_v52 = vpop.f32.mrf.mxu1  ;;  %v18276_v0 = vld [vmem:[#allocation4 + $0x2f0] ss:$36 sps:$4 sm:$0xff]   ;;  %13549 = vmatpush1.bf16.msra.mxu0 %v18287_v18  ;;  %v18278_v18 = vld [vmem:[#allocation4 + $0x380] ss:$36 sps:$4 sm:$0xff]  }
 0x408   : > { %v9365_v41 = vpop.f32.mrf.mxu0  ;;  %13550 = vmatprep.subr.bf16.mxu0 %v22018_v6 }
 0x409   : > { %v9197_v62 = vpop.f32.mrf.mxu1 }
 0x40a   : > { %v9198_v34 = vadd.f32 %v9197_v62, %v20744_v45  ;;  %v9366_v47 = vpop.f32.mrf.mxu0 }
 0x40b   : > { %v20886_v38 = vadd.f32 %v9366_v47, %v9190_v25  ;;  %v9199_v14 = vpop.f32.mrf.mxu1 }
 0x40c   : > { %v9368_v19 = vpop.f32.mrf.mxu0  ;;  %v18277_v14 = vld [vmem:[#allocation4 + $0x338] ss:$36 sps:$4 sm:$0xff]  }
 0x40d   : > { %v9202_v32 = vpop.f32.mrf.mxu1  ;;  %17556 = vmatmul.mubr.bf16.gmra.mxu1 %v18275_v2 }
 0x40e   : > { %v9203_v61 = vadd.f32 %v9202_v32, %v20747_v11  ;;  %v9371_v17 = vpop.f32.mrf.mxu0  ;;  %17559 = vmatprep.mubr.bf16.mxu1 %v18276_v0  ;;  %v18288_v11 = vld [vmem:[%s21948_s3 + $0x18] sm:$0xff]  }
 0x40f   : > { %v20893_v45 = vadd.f32 %v9371_v17, %v9195_v39  ;;  %v9204_v25 = vpop.f32.mrf.mxu1  ;;  %13551 = vmatpush1.bf16.msra.mxu0 %v18288_v11  ;;  %v18280_v11 = vld [vmem:[#allocation4 + $0x410] ss:$36 sps:$4 sm:$0xff]  }
 0x410   : > { %v9373_v54 = vpop.f32.mrf.mxu0  ;;  %13552 = vmatprep.subr.bf16.mxu0 %v22018_v6 }
 0x411   : > { %v9205_v21 = vpop.f32.mrf.mxu1 }
 0x412   : > { %v9206_v52 = vadd.f32 %v9205_v21, %v20750_v30  ;;  %v9374_v41 = vpop.f32.mrf.mxu0  ;;  %v18289_v21 = vld [vmem:[%s21948_s3 + $0x10] sm:$0xff]  }
 0x413   : > { %v20896_v62 = vadd.f32 %v9374_v41, %v9198_v34  ;;  %v9207_v47 = vpop.f32.mrf.mxu1  ;;  %13553 = vmatpush1.bf16.msra.mxu0 %v18289_v21 }
 0x414   : > { %v9376_v2 = vpop.f32.mrf.mxu0  ;;  %13554 = vmatprep.subr.bf16.mxu0 %v22018_v6 }
 0x415   : > { %v9210_v19 = vpop.f32.mrf.mxu1  ;;  %17560 = vmatmul.mubr.bf16.gmra.mxu1 %v18277_v14 }
 0x416   : > { %v9211_v39 = vadd.f32 %v9210_v19, %v20753_v1  ;;  %v9379_v0 = vpop.f32.mrf.mxu0  ;;  %17563 = vmatprep.mubr.bf16.mxu1 %v18278_v18  ;;  %v18279_v1 = vld [vmem:[#allocation4 + $0x3c8] ss:$36 sps:$4 sm:$0xff]  }
 0x417   : > { %v20903_v30 = vadd.f32 %v9379_v0, %v9203_v61  ;;  %v9212_v34 = vpop.f32.mrf.mxu1 }
 0x418   : > { %v9381_v32 = vpop.f32.mrf.mxu0 }
 0x419   : > { %v9213_v17 = vpop.f32.mrf.mxu1 }
 0x41a   : > { %v9214_v25 = vadd.f32 %v9213_v17, %v20756_v12  ;;  %v9382_v54 = vpop.f32.mrf.mxu0  ;;  %v18290_v17 = vld [vmem:[%s21948_s3 + $0x8] sm:$0xff]  }
 0x41b   : > { %v20909_v41 = vadd.f32 %v9382_v54, %v9206_v52  ;;  %v9215_v47 = vpop.f32.mrf.mxu1  ;;  %13555 = vmatpush1.bf16.msra.mxu0 %v18290_v17 }
 0x41c   : > { %v9384_v14 = vpop.f32.mrf.mxu0  ;;  %v18281_v47 = vld [vmem:[#allocation4 + $0x458] ss:$36 sps:$4 sm:$0xff]   ;;  %13556 = vmatprep.subr.bf16.mxu0 %v22018_v6 }
 0x41d   : > { %v9218_v2 = vpop.f32.mrf.mxu1  ;;  %17564 = vmatmul.mubr.bf16.gmra.mxu1 %v18279_v1 }
 0x41e   : > { %v9219_v61 = vadd.f32 %v9218_v2, %v20759_v55  ;;  %v9387_v18 = vpop.f32.mrf.mxu0  ;;  %17567 = vmatprep.mubr.bf16.mxu1 %v18280_v11  ;;  %v18282_v55 = vld [vmem:[#allocation4 + $0x4a0] ss:$36 sps:$4 sm:$0xff]  }
 0x41f   : > { %v20913_v12 = vadd.f32 %v9387_v18, %v9211_v39  ;;  %v9220_v19 = vpop.f32.mrf.mxu1 }
 0x420   : > { %v9389_v0 = vpop.f32.mrf.mxu0 }
 0x421   : > { %v9221_v34 = vpop.f32.mrf.mxu1 }
 0x422   : > { %v9222_v52 = vadd.f32 %v9221_v34, %v20762_v43  ;;  %v9390_v32 = vpop.f32.mrf.mxu0 }
 0x423   : > { %v20919_v54 = vadd.f32 %v9390_v32, %v9214_v25  ;;  %v9223_v21 = vpop.f32.mrf.mxu1  ;;  %v18291_v25 = vld [vmem:[%s21948_s3] sm:$0xff]  }
 0x424   : > { %v9392_v1 = vpop.f32.mrf.mxu0  ;;  %13557 = vmatpush1.bf16.msra.mxu0 %v18291_v25 }
 0x425   : > { %v9226_v14 = vpop.f32.mrf.mxu1  ;;  %17568 = vmatmul.mubr.bf16.gmra.mxu1 %v18281_v47  ;;  %13558 = vmatprep.subr.bf16.mxu0 %v22018_v6 }
 0x426   : > { %v9227_v39 = vadd.f32 %v9226_v14, %v20765_v29  ;;  %v9395_v11 = vpop.f32.mrf.mxu0  ;;  %17571 = vmatprep.mubr.bf16.mxu1 %v18282_v55 }
 0x427   : > { %v20923_v43 = vadd.f32 %v9395_v11, %v9219_v61  ;;  %v9228_v2 = vpop.f32.mrf.mxu1 }
 0x428   : > { %v9397_v18 = vpop.f32.mrf.mxu0 }
 0x429   : > { %v9229_v19 = vpop.f32.mrf.mxu1 }
 0x42a   : > { %v9230_v0 = vadd.f32 %v9229_v19, %v20768_v28  ;;  %v9398_v34 = vpop.f32.mrf.mxu0 }
 0x42b   : > { %v20930_v32 = vadd.f32 %v9398_v34, %v9222_v52  ;;  %v9231_v29 = vpop.f32.mrf.mxu1 }
 0x42c   : > { %v9400_v17 = vpop.f32.mrf.mxu0 }
 0x42d   : > { %v9234_v21 = vpop.f32.mrf.mxu1  ;;  %17572 = vmatmul.mubr.bf16.gmra.mxu1 %v20780_v37 }
 0x42e   : > { %v9235_v61 = vadd.f32 %v9234_v21, %v20771_v26  ;;  %v9403_v47 = vpop.f32.mrf.mxu0 }
 0x42f   : > { %v20934_v1 = vadd.f32 %v9403_v47, %v9227_v39  ;;  %v9236_v55 = vpop.f32.mrf.mxu1 }
 0x430   : > { %v9405_v14 = vpop.f32.mrf.mxu0 }
 0x431   : > { %v9237_v11 = vpop.f32.mrf.mxu1 }
 0x432   : > { %v9238_v28 = vadd.f32 %v9237_v11, %v20774_v46  ;;  %v9406_v2 = vpop.f32.mrf.mxu0 }
 0x433   : > { %v20937_v25 = vadd.f32 %v9406_v2, %v9230_v0  ;;  %v9239_v52 = vpop.f32.mrf.mxu1 }
 0x434   : > { %v9408_v18 = vpop.f32.mrf.mxu0 }
 0x435   : > { %v9242_v19 = vpop.f32.mrf.mxu1 }
 0x436   : > { %v9243_v34 = vadd.f32 %v9242_v19, %v20777_v5  ;;  %v9411_v29 = vpop.f32.mrf.mxu0 }
 0x437   : > { %v20940_v37 = vadd.f32 %v9411_v29, %v9235_v61  ;;  %v9244_v26 = vpop.f32.mrf.mxu1 }
 0x438   : > { %v9413_v17 = vpop.f32.mrf.mxu0 }
 0x439   : > { %v9245_v39 = vpop.f32.mrf.mxu1 }
 0x43a   : > { %v9246_v21 = vadd.f32 %v9245_v39, %v20782_v16  ;;  %v9414_v47 = vpop.f32.mrf.mxu0 }
 0x43b   : > { %v20943_v55 = vadd.f32 %v9414_v47, %v9238_v28  ;;  %v9247_v46 = vpop.f32.mrf.mxu1 }
 0x43c   : > { %v9416_v14 = vpop.f32.mrf.mxu0 }
 0x43d   : > { %v9250_v0 = vpop.f32.mrf.mxu1 }
 0x43e   : > { %v9251_v11 = vadd.f32 %v9250_v0, %v20785_v57  ;;  %v9419_v2 = vpop.f32.mrf.mxu0 }
 0x43f   : > { %v20946_v52 = vadd.f32 %v9419_v2, %v9243_v34  ;;  %v9252_v5 = vpop.f32.mrf.mxu1 }
 0x440   : > { %v9421_v18 = vpop.f32.mrf.mxu0 }
 0x441   : > { %v9253_v61 = vpop.f32.mrf.mxu1 }
 0x442   : > { %v9254_v19 = vadd.f32 %v9253_v61, %v20788_v23  ;;  %v9422_v29 = vpop.f32.mrf.mxu0 }
 0x443   : > { %v20949_v26 = vadd.f32 %v9422_v29, %v9246_v21  ;;  %v9255_v16 = vpop.f32.mrf.mxu1 }
 0x444   : > { %v9424_v17 = vpop.f32.mrf.mxu0 }
 0x445   : > { %v9258_v28 = vpop.f32.mrf.mxu1 }
 0x446   : > { %v9259_v39 = vadd.f32 %v9258_v28, %v20791_v48  ;;  %v9427_v47 = vpop.f32.mrf.mxu0 }
 0x447   : > { %v20952_v46 = vadd.f32 %v9427_v47, %v9251_v11  ;;  %v9260_v57 = vpop.f32.mrf.mxu1 }
 0x448   : > { %v9429_v14 = vpop.f32.mrf.mxu0 }
 0x449   : > { %v9261_v34 = vpop.f32.mrf.mxu1 }
 0x44a   : > { %v9262_v0 = vadd.f32 %v9261_v34, %v20794_v20  ;;  %v9430_v2 = vpop.f32.mrf.mxu0 }
 0x44b   : > { %v20955_v5 = vadd.f32 %v9430_v2, %v9254_v19  ;;  %v9263_v23 = vpop.f32.mrf.mxu1 }
 0x44c   : > { %v9432_v18 = vpop.f32.mrf.mxu0 }
 0x44d   : > { %v9266_v21 = vpop.f32.mrf.mxu1 }
 0x44e   : > { %v9267_v61 = vadd.f32 %v9266_v21, %v20797_v49  ;;  %v9435_v29 = vpop.f32.mrf.mxu0 }
 0x44f   : > { %v20958_v16 = vadd.f32 %v9435_v29, %v9259_v39  ;;  %v9268_v48 = vpop.f32.mrf.mxu1 }
 0x450   : > { %v9437_v17 = vpop.f32.mrf.mxu0 }
 0x451   : > { %v9269_v11 = vpop.f32.mrf.mxu1 }
 0x452   : > { %v9270_v28 = vadd.f32 %v9269_v11, %v20800_v3  ;;  %v9438_v47 = vpop.f32.mrf.mxu0 }
 0x453   : > { %v20961_v57 = vadd.f32 %v9438_v47, %v9262_v0  ;;  %v9271_v20 = vpop.f32.mrf.mxu1 }
 0x454   : > { %v9440_v14 = vpop.f32.mrf.mxu0 }
 0x455   : > { %v9274_v19 = vpop.f32.mrf.mxu1 }
 0x456   : > { %v9275_v34 = vadd.f32 %v9274_v19, %v20807_v50  ;;  %v9443_v2 = vpop.f32.mrf.mxu0 }
 0x457   : > { %v20964_v23 = vadd.f32 %v9443_v2, %v9267_v61  ;;  %v9276_v49 = vpop.f32.mrf.mxu1  ;;  %v18292_v61 = vld [vmem:[%s21948_s3 + $0x78] sm:$0xff]  }
 0x458   : > { %v9445_v18 = vpop.f32.mrf.mxu0  ;;  %13559 = vmatpush2.bf16.msra.mxu0 %v18292_v61 }
 0x459   : > { %v9277_v39 = vpop.f32.mrf.mxu1  ;;  %13560 = vmatprep.subr.bf16.mxu0 %v22018_v6 }
 0x45a   : > { %v9278_v21 = vadd.f32 %v9277_v39, %v20813_v44  ;;  %v9446_v29 = vpop.f32.mrf.mxu0  ;;  %v18293_v44 = vld [vmem:[%s21948_s3 + $0xb8] sm:$0xff]   ;;  %v18294_v39 = vld [vmem:[%s21948_s3 + $0xb0] sm:$0xff]  }
 0x45b   : > { %v20967_v48 = vadd.f32 %v9446_v29, %v9270_v28  ;;  %v9279_v3 = vpop.f32.mrf.mxu1  ;;  %13720 = vmatpush1.bf16.msra.mxu1 %v18293_v44  ;;  %v18295_v29 = vld [vmem:[%s21948_s3 + $0x70] sm:$0xff]  }
 0x45c   : > { %v9448_v17 = vpop.f32.mrf.mxu0  ;;  %13721 = vmatprep.subr.bf16.mxu1 %v22018_v6  ;;  %13561 = vmatpush2.bf16.msra.mxu0 %v18295_v29 }
 0x45d   : > { %v9282_v0 = vpop.f32.mrf.mxu1  ;;  %13562 = vmatprep.subr.bf16.mxu0 %v22018_v6 }
 0x45e   : > { %v9283_v11 = vadd.f32 %v9282_v0, %v20819_v10  ;;  %v9451_v47 = vpop.f32.mrf.mxu0 }
 0x45f   : > { %v20970_v20 = vadd.f32 %v9451_v47, %v9275_v34  ;;  %v9284_v50 = vpop.f32.mrf.mxu1  ;;  %13722 = vmatpush1.bf16.msra.mxu1 %v18294_v39  ;;  %v18296_v47 = vld [vmem:[%s21948_s3 + $0xa8] sm:$0xff]  }
 0x460   : > { %v9453_v14 = vpop.f32.mrf.mxu0  ;;  %13723 = vmatprep.subr.bf16.mxu1 %v22018_v6 }
 0x461   : > { %v9285_v28 = vpop.f32.mrf.mxu1 }
 0x462   : > { %v9286_v19 = vadd.f32 %v9285_v28, %v20825_v36  ;;  %v9454_v2 = vpop.f32.mrf.mxu0 }
 0x463   : > { %v20981_v10 = vadd.f32 %v9454_v2, %v9278_v21  ;;  %v9287_v34 = vpop.f32.mrf.mxu1  ;;  %13724 = vmatpush1.bf16.msra.mxu1 %v18296_v47 }
 0x464   : > { %v9456_v49 = vpop.f32.mrf.mxu0  ;;  %13725 = vmatprep.subr.bf16.mxu1 %v22018_v6 }
 0x465   : > { %v9290_v18 = vpop.f32.mrf.mxu1  ;;  %v18297_v49 = vld [vmem:[%s21948_s3 + $0xa0] sm:$0xff]  }
 0x466   : > { %v9291_v36 = vadd.f32 %v9290_v18, %v20832_v13  ;;  %v9459_v3 = vpop.f32.mrf.mxu0 }
 0x467   : > { %v20990_v17 = vadd.f32 %v9459_v3, %v9283_v11  ;;  %v9292_v0 = vpop.f32.mrf.mxu1  ;;  %13726 = vmatpush1.bf16.msra.mxu1 %v18297_v49 }
 0x468   : > { %v9461_v21 = vpop.f32.mrf.mxu0  ;;  %13727 = vmatprep.subr.bf16.mxu1 %v22018_v6  ;;  %v18299_v0 = vld [vmem:[%s21948_s3 + $0x98] sm:$0xff]  }
 0x469   : > { %v9293_v50 = vpop.f32.mrf.mxu1 }
 0x46a   : > { %v9294_v61 = vadd.f32 %v9293_v50, %v20838_v33  ;;  %v9462_v44 = vpop.f32.mrf.mxu0  ;;  %v18298_v33 = vld [vmem:[%s21948_s3 + $0x68] sm:$0xff]  }
 0x46b   : > { %v20998_v13 = vadd.f32 %v9462_v44, %v9286_v19  ;;  %v9295_v11 = vpop.f32.mrf.mxu1  ;;  %13563 = vmatpush2.bf16.msra.mxu0 %v18298_v33  ;;  %13728 = vmatpush1.bf16.msra.mxu1 %v18299_v0 }
 0x46c   : > { %v9464_v14 = vpop.f32.mrf.mxu0  ;;  %13564 = vmatprep.subr.bf16.mxu0 %v22018_v6  ;;  %13729 = vmatprep.subr.bf16.mxu1 %v22018_v6 }
 0x46d   : > { %v9298_v28 = vpop.f32.mrf.mxu1 }
 0x46e   : > { %v9299_v2 = vadd.f32 %v9298_v28, %v20844_v24  ;;  %v9467_v34 = vpop.f32.mrf.mxu0 }
 0x46f   : > { %v21008_v18 = vadd.f32 %v9467_v34, %v9291_v36  ;;  %v9300_v19 = vpop.f32.mrf.mxu1 }
 0x470   : > { %v9469_v39 = vpop.f32.mrf.mxu0 }
 0x471   : > { %v9301_v29 = vpop.f32.mrf.mxu1 }
 0x472   : > { %v9302_v24 = vadd.f32 %v9301_v29, %v20847_v58  ;;  %v9470_v3 = vpop.f32.mrf.mxu0  ;;  %v18300_v58 = vld [vmem:[%s21948_s3 + $0x90] sm:$0xff]  }
 0x473   : > { %v21016_v21 = vadd.f32 %v9470_v3, %v9294_v61  ;;  %v9303_v36 = vpop.f32.mrf.mxu1  ;;  %v18301_v61 = vld [vmem:[%s21948_s3 + $0x60] sm:$0xff]   ;;  %13730 = vmatpush1.bf16.msra.mxu1 %v18300_v58 }
 0x474   : > { %v9472_v47 = vpop.f32.mrf.mxu0  ;;  %13565 = vmatpush2.bf16.msra.mxu0 %v18301_v61  ;;  %13731 = vmatprep.subr.bf16.mxu1 %v22018_v6  ;;  %v18306_v61 = vld [vmem:[%s21948_s3 + $0x50] sm:$0xff]  }
 0x475   : > { %v9306_v50 = vpop.f32.mrf.mxu1  ;;  %13566 = vmatprep.subr.bf16.mxu0 %v22018_v6 }
 0x476   : > { %v9307_v44 = vadd.f32 %v9306_v50, %v20851_v27  ;;  %v18302_v27 = vld [vmem:[%s21948_s3 + $0x88] sm:$0xff]  }
 0x477   : > { %v9308_v11 = vpop.f32.mrf.mxu1  ;;  %13732 = vmatpush1.bf16.msra.mxu1 %v18302_v27  ;;  %v18307_v27 = vld [vmem:[%s21948_s3 + $0xf0] sm:$0xff]  }
 0x478   : > { %13733 = vmatprep.subr.bf16.mxu1 %v22018_v6 }
 0x479   : > { %v9309_v14 = vpop.f32.mrf.mxu1 }
 0x47a   : > { %v9310_v28 = vadd.f32 %v9309_v14, %v20854_v63  ;;  %v18304_v14 = vld [vmem:[%s21948_s3 + $0x80] sm:$0xff]  }
 0x47b   : > { %v9311_v34 = vpop.f32.mrf.mxu1  ;;  %13734 = vmatpush1.bf16.msra.mxu1 %v18304_v14 }
 0x47c   : > { %13735 = vmatprep.subr.bf16.mxu1 %v22018_v6 }
 0x47d   : > { %v9314_v49 = vpop.f32.mrf.mxu1 }
 0x47e   : > { %v9315_v63 = vadd.f32 %v9314_v49, %v20857_v9  ;;  %v18303_v9 = vld [vmem:[%s21948_s3 + $0x58] sm:$0xff]  }
 0x47f   : > { %v9316_v33 = vpop.f32.mrf.mxu1  ;;  %13567 = vmatpush2.bf16.msra.mxu0 %v18303_v9 }
 0x480   : > { %13568 = vmatprep.subr.bf16.mxu0 %v22018_v6 }
 0x481   : > { %v9317_v19 = vpop.f32.mrf.mxu1 }
 0x482   : > { %v9318_v39 = vadd.f32 %v9317_v19, %v20864_v56  ;;  %v18305_v56 = vld [vmem:[%s21948_s3 + $0xf8] sm:$0xff]   ;;  %v18308_v19 = vld [vmem:[%s21948_s3 + $0xe8] sm:$0xff]  }
 0x483   : > { %v9319_v29 = vpop.f32.mrf.mxu1  ;;  %13736 = vmatpush2.bf16.msra.mxu1 %v18305_v56  ;;  %13569 = vmatpush2.bf16.msra.mxu0 %v18306_v61 }
 0x484   : > { %13737 = vmatprep.subr.bf16.mxu1 %v22018_v6  ;;  %13570 = vmatprep.subr.bf16.mxu0 %v22018_v6 }
 0x485   : > { %v9322_v3 = vpop.f32.mrf.mxu1 }
 0x486   : > { %v9323_v0 = vadd.f32 %v9322_v3, %v20871_v15 }
 0x487   : > { %v9324_v36 = vpop.f32.mrf.mxu1  ;;  %13738 = vmatpush2.bf16.msra.mxu1 %v18307_v27 }
 0x488   : > { %13739 = vmatprep.subr.bf16.mxu1 %v22018_v6 }
 0x489   : > { %v9325_v47 = vpop.f32.mrf.mxu1 }
 0x48a   : > { %v9326_v50 = vadd.f32 %v9325_v47, %v20876_v35 }
 0x48b   : > { %v9327_v11 = vpop.f32.mrf.mxu1  ;;  %13740 = vmatpush2.bf16.msra.mxu1 %v18308_v19 }
 0x48c   : > { %13741 = vmatprep.subr.bf16.mxu1 %v22018_v6 }
 0x48d   : > { %v9475_v58 = vpop.f32.mrf.mxu1 }
 0x48e   : > { %v21046_v15 = vadd.f32 %v9475_v58, %v9299_v2 }
 0x48f   : > { %v9477_v35 = vpop.f32.mrf.mxu1 }
 0x491   : > { %v9478_v34 = vpop.f32.mrf.mxu1 }
 0x492   : > { %v21053_v49 = vadd.f32 %v9478_v34, %v9302_v24 }
 0x493   : > { %v9480_v2 = vpop.f32.mrf.mxu1 }
 0x494   : > { %22040 = vst [vmem:[#allocation32_spill] sm:$0xff] %v21053_v49 }
 0x495   : > { %v9483_v33 = vpop.f32.mrf.mxu1 }
 0x496   : > { %v21063_v29 = vadd.f32 %v9483_v33, %v9307_v44 }
 0x497   : > { %v9485_v24 = vpop.f32.mrf.mxu1 }
 0x499   : > { %v9486_v3 = vpop.f32.mrf.mxu1 }
 0x49a   : > { %v21066_v36 = vadd.f32 %v9486_v3, %v9310_v28  ;;  %v18309_v28 = vld [vmem:[%s21948_s3 + $0x48] sm:$0xff]   ;;  %v18313_v3 = vld [vmem:[#allocation4] ss:$36 sps:$4 sm:$0xff]  }
 0x49b   : > { %v9488_v47 = vpop.f32.mrf.mxu1  ;;  %13571 = vmatpush2.bf16.msra.mxu0 %v18309_v28  ;;  %v18316_v28 = vld [vmem:[%s21948_s3 + $0xd0] sm:$0xff]  }
 0x49c   : > { %13572 = vmatprep.subr.bf16.mxu0 %v22018_v6  ;;  %v18315_v47 = vld [vmem:[#allocation4 + $0x4] ss:$36 sps:$4 sm:$0xff]  }
 0x49d   : > { %v9491_v11 = vpop.f32.mrf.mxu1  ;;  %13574 = vmatprep.mubr.bf16.mxu0 %v18315_v47 }
 0x49e   : > { %v21069_v9 = vadd.f32 %v9491_v11, %v9315_v63 }
 0x49f   : > { %v9493_v14 = vpop.f32.mrf.mxu1 }
 0x4a0   : > { %22041 = vst [vmem:[#allocation33_spill] sm:$0xff] %v21069_v9 }
 0x4a1   : > { %v9494_v58 = vpop.f32.mrf.mxu1 }
 0x4a2   : > { %v21071_v56 = vadd.f32 %v9494_v58, %v9318_v39  ;;  %v18310_v39 = vld [vmem:[%s21948_s3 + $0xe0] sm:$0xff]  }
 0x4a3   : > { %v9496_v35 = vpop.f32.mrf.mxu1  ;;  %13742 = vmatpush2.bf16.msra.mxu1 %v18310_v39 }
 0x4a4   : > { %22042 = vst [vmem:[#allocation34_spill] sm:$0xff] %v21071_v56  ;;  %13743 = vmatprep.subr.bf16.mxu1 %v22018_v6 }
 0x4a5   : > { %v9499_v44 = vpop.f32.mrf.mxu1 }
 0x4a6   : > { %v21073_v61 = vadd.f32 %v9499_v44, %v9323_v0  ;;  %v18311_v0 = vld [vmem:[%s21948_s3 + $0x40] sm:$0xff]  }
 0x4a7   : > { %v9501_v34 = vpop.f32.mrf.mxu1  ;;  %13573 = vmatpush2.bf16.msra.mxu0 %v18311_v0 }
 0x4a8   : > { %22043 = vst [vmem:[#allocation35_spill] sm:$0xff] %v21073_v61  ;;  %13896 = vmatprep.subr.bf16.mxu0 %v22018_v6 }
 0x4a9   : > { %v9502_v2 = vpop.f32.mrf.mxu1 }
 0x4aa   : > { %v21078_v27 = vadd.f32 %v9502_v2, %v9326_v50  ;;  %v18312_v50 = vld [vmem:[%s21948_s3 + $0xd8] sm:$0xff]   ;;  %13575 = vmatmul.mubr.bf16.vlgmr.msra.gmra.mxu0 %v18313_v3 }
 0x4ab   : > { %v9504_v33 = vpop.f32.mrf.mxu1  ;;  %13744 = vmatpush2.bf16.msra.mxu1 %v18312_v50 }
 0x4ac   : > { %22044 = vst [vmem:[#allocation36_spill] sm:$0xff] %v21078_v27  ;;  %13745 = vmatprep.subr.bf16.mxu1 %v22018_v6 }
 0x4ad   : > { %v17541_v63 = vpop.f32.mrf.mxu1 }
 0x4ae   : > { %v21088_v19 = vadd.f32 %v17541_v63, %v20893_v45 }
 0x4af   : > { %v9540_v24 = vpop.f32.mrf.mxu1  ;;  %13746 = vmatpush2.bf16.msra.mxu1 %v18316_v28 }
 0x4b0   : > { %v15826_v11 = vmul.f32 -1.442695, %v21088_v19  ;;  %v21095_v14 = vadd.f32 %v9540_v24, %v20882_v7  ;;  %13747 = vmatprep.subr.bf16.mxu1 %v22018_v6  ;;  %v18317_v24 = vld [vmem:[%s21948_s3 + $0xc8] sm:$0xff]  }
 0x4b1   : > { %v17542_v45 = vpop.f32.mrf.mxu1 }
 0x4b2   : > { %18734 = vpow2.f32 %v15826_v11  ;;  %v15824_v58 = vmul.f32 -1.442695, %v21095_v14  ;;  %v21101_v35 = vadd.f32 %v17542_v45, %v20896_v62 }
 0x4b3   : > { %v9543_v44 = vpop.f32.mrf.mxu1  ;;  %13748 = vmatpush2.bf16.msra.mxu1 %v18317_v24 }
 0x4b4   : > { %18736 = vpow2.f32 %v15824_v58  ;;  %v15827_v34 = vmul.f32 -1.442695, %v21101_v35  ;;  %v21105_v7 = vadd.f32 %v9543_v44, %v20886_v38  ;;  %13749 = vmatprep.subr.bf16.mxu1 %v22018_v6 }
 0x4b5   : > { %v17545_v2 = vpop.f32.mrf.mxu1 }
 0x4b6   : > { %18738 = vpow2.f32 %v15827_v34  ;;  %v15825_v62 = vmul.f32 -1.442695, %v21105_v7  ;;  %v21113_v33 = vadd.f32 %v17545_v2, %v20913_v12  ;;  %v18318_v12 = vld [vmem:[%s21948_s3 + $0x138] sm:$0xff]  }
 0x4b7   : > { %v9556_v63 = vpop.f32.mrf.mxu1  ;;  %13897 = vmatpush1.bf16.msra.mxu0 %v18318_v12 }
 0x4b8   : > { %18740 = vpow2.f32 %v15825_v62  ;;  %v15830_v39 = vmul.f32 -1.442695, %v21113_v33  ;;  %v21117_v38 = vadd.f32 %v9556_v63, %v20903_v30  ;;  %13898 = vmatprep.subr.bf16.mxu0 %v22018_v6 }
 0x4b9   : > { %v17546_v0 = vpop.f32.mrf.mxu1 }
 0x4ba   : > { %18742 = vpow2.f32 %v15830_v39  ;;  %v15828_v50 = vmul.f32 -1.442695, %v21117_v38  ;;  %v21128_v3 = vadd.f32 %v17546_v0, %v20919_v54 }
 0x4bb   : > { %v9559_v47 = vpop.f32.mrf.mxu1 }
 0x4bc   : > { %18744 = vpow2.f32 %v15828_v50  ;;  %v15831_v30 = vmul.f32 -1.442695, %v21128_v3  ;;  %v21132_v11 = vadd.f32 %v9559_v47, %v20909_v41 }
 0x4bd   : > { %v17549_v45 = vpop.f32.mrf.mxu1 }
 0x4be   : > { %18746 = vpow2.f32 %v15831_v30  ;;  %v15829_v58 = vmul.f32 -1.442695, %v21132_v11  ;;  %v21138_v54 = vadd.f32 %v17549_v45, %v20934_v1 }
 0x4bf   : > { %v18735_v44 = vpop.eup %18734  ;;  %v9572_v34 = vpop.f32.mrf.mxu1 }
 0x4c0   : > { %v9793_v2 = vadd.f32 1.0, %v18735_v44  ;;  %18748 = vpow2.f32 %v15829_v58  ;;  %v15834_v28 = vmul.f32 -1.442695, %v21138_v54  ;;  %v21142_v41 = vadd.f32 %v9572_v34, %v20923_v43 }
 0x4c1   : > { %v18737_v62 = vpop.eup %18736  ;;  %v17550_v63 = vpop.f32.mrf.mxu1 }
 0x4c2   : > { %18750 = vrcp.f32 %v9793_v2  ;;  %v9791_v39 = vadd.f32 1.0, %v18737_v62  ;;  %v15832_v0 = vmul.f32 -1.442695, %v21142_v41  ;;  %v21146_v24 = vadd.f32 %v17550_v63, %v20937_v25 }
 0x4c3   : > { %v18739_v1 = vpop.eup %18738  ;;  %18752 = vpow2.f32 %v15834_v28  ;;  %v9575_v12 = vpop.f32.mrf.mxu1 }
 0x4c4   : > { %18754 = vrcp.f32 %v9791_v39  ;;  %v9794_v50 = vadd.f32 1.0, %v18739_v1  ;;  %v15835_v47 = vmul.f32 -1.442695, %v21146_v24  ;;  %v21150_v30 = vadd.f32 %v9575_v12, %v20930_v32 }
 0x4c5   : > { %v18741_v43 = vpop.eup %18740  ;;  %18756 = vpow2.f32 %v15832_v0  ;;  %v17553_v45 = vpop.f32.mrf.mxu1 }
 0x4c6   : > { %18758 = vrcp.f32 %v9794_v50  ;;  %v9792_v58 = vadd.f32 1.0, %v18741_v43  ;;  %v15833_v44 = vmul.f32 -1.442695, %v21150_v30  ;;  %v21154_v25 = vadd.f32 %v17553_v45, %v20946_v52 }
 0x4c7   : > { %v18743_v34 = vpop.eup %18742  ;;  %18760 = vpow2.f32 %v15835_v47  ;;  %v9588_v2 = vpop.f32.mrf.mxu1 }
 0x4c8   : > { %18762 = vrcp.f32 %v9792_v58  ;;  %v9797_v28 = vadd.f32 1.0, %v18743_v34  ;;  %v15838_v62 = vmul.f32 -1.442695, %v21154_v25  ;;  %v21158_v32 = vadd.f32 %v9588_v2, %v20940_v37 }
 0x4c9   : > { %v18745_v63 = vpop.eup %18744  ;;  %18764 = vpow2.f32 %v15833_v44  ;;  %v17554_v39 = vpop.f32.mrf.mxu1  ;;  %v18319_v44 = vld [vmem:[%s21948_s3 + $0xc0] sm:$0xff]  }
 0x4ca   : > { %18766 = vrcp.f32 %v9797_v28  ;;  %v9795_v0 = vadd.f32 1.0, %v18745_v63  ;;  %v15836_v1 = vmul.f32 -1.442695, %v21158_v32  ;;  %v21162_v52 = vadd.f32 %v17554_v39, %v20949_v26  ;;  %13750 = vmatpush2.bf16.msra.mxu1 %v18319_v44 }
 0x4cb   : > { %v18747_v12 = vpop.eup %18746  ;;  %18768 = vpow2.f32 %v15838_v62  ;;  %v9591_v50 = vpop.f32.mrf.mxu1  ;;  %14073 = vmatprep.subr.bf16.mxu1 %v22018_v6 }
 0x4cc   : > { %18770 = vrcp.f32 %v9795_v0  ;;  %v9798_v47 = vadd.f32 1.0, %v18747_v12  ;;  %v15839_v43 = vmul.f32 -1.442695, %v21162_v52  ;;  %v21166_v37 = vadd.f32 %v9591_v50, %v20943_v55 }
 0x4cd   : > { %v18749_v45 = vpop.eup %18748  ;;  %18772 = vpow2.f32 %v15836_v1  ;;  %v17557_v58 = vpop.f32.mrf.mxu1  ;;  %v18332_v1 = vld [vmem:[%s21948_s3 + $0x130] sm:$0xff]  }
 0x4ce   : > { %18774 = vrcp.f32 %v9798_v47  ;;  %v9796_v26 = vadd.f32 1.0, %v18749_v45  ;;  %v15837_v34 = vmul.f32 -1.442695, %v21166_v37  ;;  %v21173_v2 = vadd.f32 %v17557_v58, %v20958_v16  ;;  %13899 = vmatpush1.bf16.msra.mxu0 %v18332_v1 }
 0x4cf   : > { %v18751_v28 = vpop.eup %18750  ;;  %18776 = vpow2.f32 %v15839_v43  ;;  %v9604_v62 = vpop.f32.mrf.mxu1  ;;  %13900 = vmatprep.subr.bf16.mxu0 %v22018_v6 }
 0x4d0   : > { %v18753_v55 = vpop.eup %18752  ;;  %v9901_v63 = vmul.f32 %v18751_v28, %v21088_v19  ;;  %18778 = vrcp.f32 %v9796_v26  ;;  %v15842_v39 = vmul.f32 -1.442695, %v21173_v2  ;;  %v21178_v0 = vadd.f32 %v9604_v62, %v20952_v46 }
 0x4d1   : > { %v18755_v16 = vpop.eup %18754  ;;  %v9801_v12 = vadd.f32 1.0, %v18753_v55  ;;  %18780 = vpow2.f32 %v15837_v34  ;;  %v17558_v50 = vpop.f32.mrf.mxu1 }
 0x4d2   : > { %v18757_v47 = vpop.eup %18756  ;;  %v9937_v19 = vsel %vm5155_vm6, %v9901_v63, 0.0  ;;  %v9899_v45 = vmul.f32 %v18755_v16, %v21095_v14  ;;  %18782 = vpow2.f32 %v15842_v39  ;;  %v15840_v46 = vmul.f32 -1.442695, %v21178_v0 }
 0x4d3   : > { %v18759_v58 = vpop.eup %18758  ;;  %9973 = vst [vmem:[#allocation3 + $0x23] sm:$0xff] %v9937_v19  ;;  %v17215_v44 = vpack.c.bf16 %v9937_v19, %v9937_v19  ;;  %18784 = vrcp.f32 %v9801_v12  ;;  %v9799_v26 = vadd.f32 1.0, %v18757_v47  ;;  %v21189_v28 = vadd.f32 %v17558_v50, %v20961_v57  ;;  %v9607_v34 = vpop.f32.mrf.mxu1 }
 0x4d4   : > { %v18761_v62 = vpop.eup %18760  ;;  %v9935_v63 = vsel %vm5153_vm4, %v9899_v45, 0.0  ;;  %v9902_v14 = vmul.f32 %v18759_v58, %v21101_v35  ;;  %18786 = vpow2.f32 %v15840_v46  ;;  %v21196_v39 = vadd.f32 %v9607_v34, %v20955_v5  ;;  %v18339_v46 = vld [vmem:[%s21948_s3 + $0x128] sm:$0xff]  }
 0x4d5   : > { %v18763_v1 = vpop.eup %18762  ;;  %11053 = vst [vmem:[#allocation4 + $0x58] sm:$0xf] %v17215_v44  ;;  %9971 = vst [vmem:[#allocation3 + $0x13] sm:$0xff] %v9935_v63  ;;  %v17213_v16 = vpack.c.bf16 %v9935_v63, %v9935_v63  ;;  %18788 = vrcp.f32 %v9799_v26  ;;  %v9802_v57 = vadd.f32 1.0, %v18761_v62  ;;  %v15843_v12 = vmul.f32 -1.442695, %v21189_v28  ;;  %v17561_v50 = vpop.f32.mrf.mxu1  ;;  %13901 = vmatpush1.bf16.msra.mxu0 %v18339_v46 }
 0x4d6   : > { %v18765_v47 = vpop.eup %18764  ;;  %v9938_v19 = vsel %vm5156_vm7, %v9902_v14, 0.0  ;;  %v9900_v45 = vmul.f32 %v18763_v1, %v21105_v7  ;;  %v15841_v35 = vmul.f32 -1.442695, %v21196_v39  ;;  %v21204_v5 = vadd.f32 %v17561_v50, %v20970_v20  ;;  %v18346_v14 = vld [vmem:[%s21948_s3 + $0x120] sm:$0xff]   ;;  %13902 = vmatprep.subr.bf16.mxu0 %v22018_v6 }
 0x4d7   : > { %v18767_v58 = vpop.eup %18766  ;;  %11051 = vst [vmem:[#allocation4 + $0x10] sm:$0xf] %v17213_v16  ;;  %9974 = vst [vmem:[#allocation3 + $0x2b] sm:$0xff] %v9938_v19  ;;  %v17216_v44 = vpack.c.bf16 %v9938_v19, %v9938_v19  ;;  %18790 = vrcp.f32 %v9802_v57  ;;  %v9800_v26 = vadd.f32 1.0, %v18765_v47  ;;  %v9620_v34 = vpop.f32.mrf.mxu1  ;;  %vm22058_vm4 = vcmp.eq.s32.totalorder %v20231_v40, 1 }
 0x4d8   : > { %v18769_v62 = vpop.eup %18768  ;;  %v9936_v7 = vsel %vm5154_vm5, %v9900_v45, 0.0  ;;  %v9905_v63 = vmul.f32 %v18767_v58, %v21113_v33  ;;  %18792 = vpow2.f32 %v15843_v12  ;;  %v15846_v20 = vmul.f32 -1.442695, %v21204_v5 }
 0x4d9   : > { %v18771_v1 = vpop.eup %18770  ;;  %11054 = vst [vmem:[#allocation4 + $0x7c] sm:$0xf] %v17216_v44  ;;  %9972 = vst [vmem:[#allocation3 + $0x1b] sm:$0xff] %v9936_v7  ;;  %v17214_v16 = vpack.c.bf16 %v9936_v7, %v9936_v7  ;;  %18794 = vrcp.f32 %v9800_v26  ;;  %v9805_v57 = vadd.f32 1.0, %v18769_v62  ;;  %v21217_v50 = vadd.f32 %v9620_v34, %v20964_v23  ;;  %v17562_v47 = vpop.f32.mrf.mxu1  ;;  %v18353_v26 = vld [vmem:[%s21948_s3 + $0x118] sm:$0xff]   ;;  %13903 = vmatpush1.bf16.msra.mxu0 %v18346_v14 }
 0x4da   : > { %v18773_v33 = vpop.eup %18772  ;;  %v9941_v43 = vsel %vm5159_vm8, %v9905_v63, 0.0  ;;  %v9903_v19 = vmul.f32 %v18771_v1, %v21117_v38  ;;  %18796 = vpow2.f32 %v15841_v35  ;;  %v21224_v45 = vadd.f32 %v17562_v47, %v20981_v10  ;;  %13904 = vmatprep.subr.bf16.mxu0 %v22018_v6 }
 0x4db   : > { %22049 = vst [vmem:[#allocation8_spill] sm:$0xff] %v21217_v50  ;;  %v18775_v46 = vpop.eup %18774  ;;  %11052 = vst [vmem:[#allocation4 + $0x34] sm:$0xf] %v17214_v16  ;;  %v17219_v58 = vpack.c.bf16 %v9941_v43, %v9941_v43  ;;  %18798 = vrcp.f32 %v9805_v57  ;;  %v9803_v23 = vadd.f32 1.0, %v18773_v33  ;;  %v21227_v44 = vmul.f32 -1.442695, %v21217_v50 }
 0x4dc   : > { %22051 = vst [vmem:[#allocation7_spill] sm:$0xff] %v21224_v45  ;;  %9977 = vst [vmem:[#allocation3 + $0x43] sm:$0xff] %v9941_v43  ;;  %v18777_v34 = vpop.eup %18776  ;;  %v10009_v62 = vld [vmem:[#allocation3 + $0x10] sm:$0xff]  ;;  %v9939_v10 = vsel %vm5157_vm9, %v9903_v19, 0.0  ;;  %v9906_v7 = vmul.f32 %v18775_v46, %v21128_v3  ;;  %18800 = vpow2.f32 %v15846_v20  ;;  %v21236_v63 = vmul.f32 -1.442695, %v21224_v45 }
 0x4dd   : > { %v10225_v38 = vld [vmem:[#allocation3 + $0x11] sm:$0xff]  ;;  %v18779_v1 = vpop.eup %18778  ;;  %v17071_v16 = vpack.c.bf16 %v10009_v62, %v10009_v62  ;;  %11057 = vst [vmem:[#allocation4 + $0xe8] sm:$0xf] %v17219_v58  ;;  %9975 = vst [vmem:[#allocation3 + $0x33] sm:$0xff] %v9939_v10  ;;  %v17217_v33 = vpack.c.bf16 %v9939_v10, %v9939_v10  ;;  %18802 = vrcp.f32 %v9803_v23  ;;  %v9806_v14 = vadd.f32 1.0, %v18777_v34  ;;  %v21247_v58 = vld [vmem:[%s21948_s3 + $0x110] sm:$0xff]   ;;  %13905 = vmatpush1.bf16.msra.mxu0 %v18353_v26 }
 0x4de   : > { %v10441_v35 = vld [vmem:[#allocation3 + $0x12] sm:$0xff]  ;;  %v17107_v57 = vpack.c.bf16 %v10225_v38, %v10225_v38  ;;  %v21239_v12 = vpop.eup %18780  ;;  %v10012_v43 = vld [vmem:[#allocation3 + $0x28] sm:$0xff]  ;;  %v9942_v20 = vsel %vm5160_vm10, %v9906_v7, 0.0  ;;  %v9904_v46 = vmul.f32 %v18779_v1, %v21132_v11  ;;  %13906 = vmatprep.subr.bf16.mxu0 %v22018_v6  ;;  %vm22059_vm5 = vcmp.eq.s32.totalorder %v20196_v59, 1 }
 0x4df   : > { %v17143_v47 = vpack.c.bf16 %v10441_v35, %v10441_v35  ;;  %v10228_v19 = vld [vmem:[#allocation3 + $0x29] sm:$0xff]  ;;  %v21249_v62 = vpop.eup %18782  ;;  %10189 = vst [vmem:[#allocation4 + $0x48] sm:$0xf] %v17071_v16  ;;  %v17074_v38 = vpack.c.bf16 %v10012_v43, %v10012_v43  ;;  %11055 = vst [vmem:[#allocation4 + $0xa0] sm:$0xf] %v17217_v33  ;;  %v17220_v11 = vpack.c.bf16 %v9942_v20, %v9942_v20  ;;  %18804 = vrcp.f32 %v9806_v14 }
 0x4e0   : > { %v10444_v55 = vld [vmem:[#allocation3 + $0x2a] sm:$0xff]  ;;  %10405 = vst [vmem:[#allocation4 + $0x4c] sm:$0xf] %v17107_v57  ;;  %v17110_v35 = vpack.c.bf16 %v10228_v19, %v10228_v19  ;;  %9978 = vst [vmem:[#allocation3 + $0x4b] sm:$0xff] %v9942_v20  ;;  %v18785_v23 = vpop.eup %18784  ;;  %v10010_v27 = vld [vmem:[#allocation3 + $0x18] sm:$0xff]  ;;  %v9940_v57 = vsel %vm5158_vm11, %v9904_v46, 0.0  ;;  %18806 = vpow2.f32 %v21227_v44 }
 0x4e1   : > { %10621 = vst [vmem:[#allocation4 + $0x50] sm:$0xf] %v17143_v47  ;;  %10835 = vst [vmem:[#allocation4 + $0xc] sm:$0xf] %v17143_v47  ;;  %v17146_v10 = vpack.c.bf16 %v10444_v55, %v10444_v55  ;;  %v11089_v3 = vld [vmem:[#allocation3 + $0x24] sm:$0xff]  ;;  %v10226_v61 = vld [vmem:[#allocation3 + $0x19] sm:$0xff]  ;;  %v21253_v47 = vpop.eup %18786  ;;  %v17072_v33 = vpack.c.bf16 %v10010_v27, %v10010_v27  ;;  %13907 = vmatpush1.bf16.msra.mxu0 %v21247_v58 }
 0x4e2   : > { %v11519_v7 = vld [vmem:[#allocation3 + $0x25] sm:$0xff]  ;;  %v17251_v34 = vpack.c.bf16 %v11089_v3, %v11089_v3  ;;  %10192 = vst [vmem:[#allocation4 + $0xb4] sm:$0xf] %v17074_v38  ;;  %10408 = vst [vmem:[#allocation4 + $0xb8] sm:$0xf] %v17110_v35  ;;  %v17108_v55 = vpack.c.bf16 %v10226_v61, %v10226_v61  ;;  %v10442_v20 = vld [vmem:[#allocation3 + $0x1a] sm:$0xff]  ;;  %v21257_v61 = vpop.f32.mrf.mxu1  ;;  %13908 = vmatprep.subr.bf16.mxu0 %v22018_v6 }
 0x4e3   : > { %v11735_v56 = vld [vmem:[#allocation3 + $0x26] sm:$0xff]  ;;  %v17321_v1 = vpack.c.bf16 %v11519_v7, %v11519_v7  ;;  %10624 = vst [vmem:[#allocation4 + $0xbc] sm:$0xf] %v17146_v10  ;;  %10838 = vst [vmem:[#allocation4 + $0x78] sm:$0xf] %v17146_v10  ;;  %v18789_v7 = vpop.eup %18788  ;;  %v17144_v46 = vpack.c.bf16 %v10442_v20, %v10442_v20  ;;  %v11087_v35 = vld [vmem:[#allocation3 + $0x14] sm:$0xff] }
 0x4e4   : > { %v17357_v45 = vpack.c.bf16 %v11735_v56, %v11735_v56  ;;  %v10011_v9 = vld [vmem:[#allocation3 + $0x20] sm:$0xff]  ;;  %11058 = vst [vmem:[#allocation4 + $0x10c] sm:$0xf] %v17220_v11  ;;  %9976 = vst [vmem:[#allocation3 + $0x3b] sm:$0xff] %v9940_v57  ;;  %v17218_v56 = vpack.c.bf16 %v9940_v57, %v9940_v57  ;;  %v17249_v10 = vpack.c.bf16 %v11087_v35, %v11087_v35  ;;  %v21271_v14 = vadd.f32 1.0, %v21249_v62 }
 0x4e5   : > { %v17073_v43 = vpack.c.bf16 %v10011_v9, %v10011_v9  ;;  %v10227_v19 = vld [vmem:[#allocation3 + $0x21] sm:$0xff]  ;;  %11269 = vst [vmem:[#allocation4 + $0x5c] sm:$0xf] %v17251_v34  ;;  %11483 = vst [vmem:[#allocation4 + $0x18] sm:$0xf] %v17251_v34  ;;  %v9909_v9 = vmul.f32 %v18785_v23, %v21138_v54  ;;  %v9907_v16 = vmul.f32 %v18789_v7, %v21142_v41  ;;  %v18791_v34 = vpop.eup %18790  ;;  %v10013_v54 = vld [vmem:[#allocation3 + $0x30] sm:$0xff] }
 0x4e6   : > { %v10443_v3 = vld [vmem:[#allocation3 + $0x22] sm:$0xff]  ;;  %11699 = vst [vmem:[#allocation4 + $0x1c] sm:$0xf] %v17321_v1  ;;  %11915 = vst [vmem:[#allocation4 + $0x20] sm:$0xf] %v17357_v45  ;;  %v17109_v26 = vpack.c.bf16 %v10227_v19, %v10227_v19  ;;  %v10229_v23 = vld [vmem:[#allocation3 + $0x31] sm:$0xff]  ;;  %v17075_v19 = vpack.c.bf16 %v10013_v54, %v10013_v54 }
 0x4e7   : > { %v17145_v38 = vpack.c.bf16 %v10443_v3, %v10443_v3  ;;  %v11088_v27 = vld [vmem:[#allocation3 + $0x1c] sm:$0xff]  ;;  %10190 = vst [vmem:[#allocation4 + $0x6c] sm:$0xf] %v17072_v33  ;;  %10191 = vst [vmem:[#allocation4 + $0x90] sm:$0xf] %v17073_v43  ;;  %v10445_v1 = vld [vmem:[#allocation3 + $0x32] sm:$0xff]  ;;  %v21275_v43 = vpop.eup %18792 }
 0x4e8   : > { %v17250_v11 = vpack.c.bf16 %v11088_v27, %v11088_v27  ;;  %10406 = vst [vmem:[#allocation4 + $0x70] sm:$0xf] %v17108_v55  ;;  %11056 = vst [vmem:[#allocation4 + $0xc4] sm:$0xf] %v17218_v56  ;;  %v21263_v45 = vld [vmem:[%s21948_s3 + $0x108] sm:$0xff]   ;;  %v9945_v33 = vsel %vm5163_vm12, %v9909_v9, 0.0  ;;  %v17111_v55 = vpack.c.bf16 %v10229_v23, %v10229_v23  ;;  %v17147_v20 = vpack.c.bf16 %v10445_v1, %v10445_v1  ;;  %v18795_v62 = vpop.eup %18794 }
 0x4e9   : > { %10407 = vst [vmem:[#allocation4 + $0x94] sm:$0xf] %v17109_v26  ;;  %10622 = vst [vmem:[#allocation4 + $0x74] sm:$0xf] %v17144_v46  ;;  %v21268_v41 = vadd.f32 1.0, %v21239_v12  ;;  %v11090_v3 = vld [vmem:[#allocation3 + $0x2c] sm:$0xff]  ;;  %v17223_v12 = vpack.c.bf16 %v9945_v33, %v9945_v33  ;;  %v21287_v54 = vpop.eup %18796  ;;  %13909 = vmatpush1.bf16.msra.mxu0 %v21263_v45 }
 0x4ea   : > { %10623 = vst [vmem:[#allocation4 + $0x98] sm:$0xf] %v17145_v38  ;;  %10836 = vst [vmem:[#allocation4 + $0x30] sm:$0xf] %v17144_v46  ;;  %v11520_v56 = vld [vmem:[#allocation3 + $0x2d] sm:$0xff]  ;;  %v17252_v26 = vpack.c.bf16 %v11090_v3, %v11090_v3  ;;  %v9943_v9 = vsel %vm5161_vm13, %v9907_v16, 0.0  ;;  %13910 = vmatprep.subr.bf16.mxu0 %v22018_v6 }
 0x4eb   : > { %10837 = vst [vmem:[#allocation4 + $0x54] sm:$0xf] %v17145_v38  ;;  %11267 = vst [vmem:[#allocation4 + $0x14] sm:$0xf] %v17249_v10  ;;  %v11736_v7 = vld [vmem:[#allocation3 + $0x2e] sm:$0xff]  ;;  %v17322_v46 = vpack.c.bf16 %v11520_v56, %v11520_v56  ;;  %v21280_v10 = vpop.f32.mrf.mxu1  ;;  %v11523_v3 = vld [vmem:[#allocation3 + $0x45] sm:$0xff]  ;;  %v17221_v16 = vpack.c.bf16 %v9943_v9, %v9943_v9  ;;  %18808 = vrcp.f32 %v21268_v41 }
 0x4ec   : > { %11268 = vst [vmem:[#allocation4 + $0x38] sm:$0xf] %v17250_v11  ;;  %9981 = vst [vmem:[#allocation3 + $0x63] sm:$0xff] %v9945_v33  ;;  %v17358_v44 = vpack.c.bf16 %v11736_v7, %v11736_v7  ;;  %v10016_v38 = vld [vmem:[#allocation3 + $0x48] sm:$0xff]  ;;  %v21285_v11 = vld [vmem:[%s21948_s3 + $0x100] sm:$0xff]   ;;  %v21289_v7 = vpop.eup %18798  ;;  %18810 = vrcp.f32 %v21271_v14  ;;  %vm22060_vm6 = vcmp.eq.s32.totalorder %v20254_v8, 1 }
 0x4ed   : > { %v10232_v58 = vld [vmem:[#allocation3 + $0x49] sm:$0xff]  ;;  %10193 = vst [vmem:[#allocation4 + $0xd8] sm:$0xf] %v17075_v19  ;;  %10409 = vst [vmem:[#allocation4 + $0xdc] sm:$0xf] %v17111_v55  ;;  %v17078_v23 = vpack.c.bf16 %v10016_v38, %v10016_v38  ;;  %v17325_v19 = vpack.c.bf16 %v11523_v3, %v11523_v3  ;;  %v10014_v49 = vld [vmem:[#allocation3 + $0x38] sm:$0xff]  ;;  %v9908_v3 = vmul.f32 %v18795_v62, %v21150_v30  ;;  %13911 = vmatpush1.bf16.msra.mxu0 %v21285_v11 }
 0x4ee   : > { %v10448_v35 = vld [vmem:[#allocation3 + $0x4a] sm:$0xff]  ;;  %10625 = vst [vmem:[#allocation4 + $0xe0] sm:$0xf] %v17147_v20  ;;  %10839 = vst [vmem:[#allocation4 + $0x9c] sm:$0xf] %v17147_v20  ;;  %v17114_v1 = vpack.c.bf16 %v10232_v58, %v10232_v58  ;;  %v10015_v20 = vld [vmem:[#allocation3 + $0x40] sm:$0xff]  ;;  %v9910_v58 = vmul.f32 %v18791_v34, %v21146_v24  ;;  %13912 = vmatprep.subr.bf16.mxu0 %v22018_v6 }
 0x4ef   : > { %v17150_v57 = vpack.c.bf16 %v10448_v35, %v10448_v35  ;;  %v11093_v33 = vld [vmem:[#allocation3 + $0x44] sm:$0xff]  ;;  %11061 = vst [vmem:[#allocation4 + $0x178] sm:$0xf] %v17223_v12  ;;  %9979 = vst [vmem:[#allocation3 + $0x53] sm:$0xff] %v9943_v9  ;;  %v10230_v38 = vld [vmem:[#allocation3 + $0x39] sm:$0xff]  ;;  %v21293_v35 = vpop.eup %18800  ;;  %v17076_v12 = vpack.c.bf16 %v10014_v49, %v10014_v49  ;;  %vm22061_vm7 = vcmp.eq.s32.totalorder %v20208_v60, 1 }
 0x4f0   : > { %v11739_v56 = vld [vmem:[#allocation3 + $0x46] sm:$0xff]  ;;  %11270 = vst [vmem:[#allocation4 + $0x80] sm:$0xf] %v17252_v26  ;;  %11484 = vst [vmem:[#allocation4 + $0x3c] sm:$0xf] %v17252_v26  ;;  %v17255_v27 = vpack.c.bf16 %v11093_v33, %v11093_v33  ;;  %v17077_v26 = vpack.c.bf16 %v10015_v20, %v10015_v20  ;;  %v10446_v9 = vld [vmem:[#allocation3 + $0x3a] sm:$0xff]  ;;  %v21299_v20 = vpop.f32.mrf.mxu1 }
 0x4f1   : > { %11700 = vst [vmem:[#allocation4 + $0x40] sm:$0xf] %v17322_v46  ;;  %11916 = vst [vmem:[#allocation4 + $0x44] sm:$0xf] %v17358_v44  ;;  %v17361_v55 = vpack.c.bf16 %v11739_v56, %v11739_v56  ;;  %v10231_v46 = vld [vmem:[#allocation3 + $0x41] sm:$0xff]  ;;  %v17112_v44 = vpack.c.bf16 %v10230_v38, %v10230_v38  ;;  %v17148_v45 = vpack.c.bf16 %v10446_v9, %v10446_v9  ;;  %v11521_v49 = vld [vmem:[#allocation3 + $0x35] sm:$0xff] }
 0x4f2   : > { %10196 = vst [vmem:[#allocation4 + $0x144] sm:$0xf] %v17078_v23  ;;  %10412 = vst [vmem:[#allocation4 + $0x148] sm:$0xf] %v17114_v1  ;;  %v10447_v33 = vld [vmem:[#allocation3 + $0x42] sm:$0xff]  ;;  %v17113_v24 = vpack.c.bf16 %v10231_v46, %v10231_v46  ;;  %v11091_v23 = vld [vmem:[#allocation3 + $0x34] sm:$0xff]  ;;  %v17323_v31 = vpack.c.bf16 %v11521_v49, %v11521_v49 }
 0x4f3   : > { %10628 = vst [vmem:[#allocation4 + $0x14c] sm:$0xf] %v17150_v57  ;;  %10842 = vst [vmem:[#allocation4 + $0x108] sm:$0xf] %v17150_v57  ;;  %v17149_v34 = vpack.c.bf16 %v10447_v33, %v10447_v33  ;;  %v11092_v1 = vld [vmem:[#allocation3 + $0x3c] sm:$0xff]  ;;  %v9946_v56 = vsel %vm5164_vm14, %v9910_v58, 0.0  ;;  %v17253_v38 = vpack.c.bf16 %v11091_v23, %v11091_v23 }
 0x4f4   : > { %11059 = vst [vmem:[#allocation4 + $0x130] sm:$0xf] %v17221_v16  ;;  %11273 = vst [vmem:[#allocation4 + $0xec] sm:$0xf] %v17255_v27  ;;  %v18803_v16 = vpop.eup %18802  ;;  %v17254_v30 = vpack.c.bf16 %v11092_v1, %v11092_v1  ;;  %v11522_v62 = vld [vmem:[#allocation3 + $0x3d] sm:$0xff]  ;;  %v21325_v41 = vld [vmem:[%s21948_s3 + $0x1b8] sm:$0xff]  }
 0x4f5   : > { %11487 = vst [vmem:[#allocation4 + $0xa8] sm:$0xf] %v17255_v27  ;;  %11703 = vst [vmem:[#allocation4 + $0xac] sm:$0xf] %v17325_v19  ;;  %v11737_v50 = vld [vmem:[#allocation3 + $0x36] sm:$0xff]  ;;  %v11738_v27 = vld [vmem:[#allocation3 + $0x3e] sm:$0xff]  ;;  %v17224_v19 = vpack.c.bf16 %v9946_v56, %v9946_v56  ;;  %v17324_v58 = vpack.c.bf16 %v11522_v62, %v11522_v62  ;;  %v9911_v33 = vmul.f32 %v18803_v16, %v21158_v32  ;;  %v21320_v32 = vpop.f32.mrf.mxu1 }
 0x4f6   : > { %11919 = vst [vmem:[#allocation4 + $0xb0] sm:$0xf] %v17361_v55  ;;  %10194 = vst [vmem:[#allocation4 + $0xfc] sm:$0xf] %v17076_v12  ;;  %v21304_v55 = vld [vmem:[%s21948_s3 + $0x178] sm:$0xff]   ;;  %v17359_v46 = vpack.c.bf16 %v11737_v50, %v11737_v50  ;;  %v17360_v9 = vpack.c.bf16 %v11738_v27, %v11738_v27  ;;  %v9944_v12 = vsel %vm5162_vm15, %v9908_v3, 0.0 }
 0x4f7   : > { %10195 = vst [vmem:[#allocation4 + $0x120] sm:$0xf] %v17077_v26  ;;  %10410 = vst [vmem:[#allocation4 + $0x100] sm:$0xf] %v17112_v44  ;;  %v18320_v26 = vld [vmem:[#allocation4 + $0x48] ss:$36 sps:$4 sm:$0xff]   ;;  %v17222_v50 = vpack.c.bf16 %v9944_v12, %v9944_v12  ;;  %v9913_v44 = vmul.f32 %v21289_v7, %v21154_v25  ;;  %13913 = vmatpush2.bf16.msra.mxu0 %v21304_v55  ;;  %v21341_v55 = vpop.f32.mrf.mxu1 }
 0x4f8   : > { %9982 = vst [vmem:[#allocation3 + $0x6b] sm:$0xff] %v9946_v56  ;;  %10411 = vst [vmem:[#allocation4 + $0x124] sm:$0xf] %v17113_v24  ;;  %v18322_v4 = vld [vmem:[#allocation4 + $0x4c] ss:$36 sps:$4 sm:$0xff]   ;;  %v21318_v25 = vadd.f32 1.0, %v21287_v54  ;;  %13914 = vmatprep.subr.bf16.mxu0 %v22018_v6 }
 0x4f9   : > { %10626 = vst [vmem:[#allocation4 + $0x104] sm:$0xf] %v17148_v45  ;;  %10627 = vst [vmem:[#allocation4 + $0x128] sm:$0xf] %v17149_v34  ;;  %v10017_v11 = vld [vmem:[#allocation3 + $0x50] sm:$0xff]  ;;  %13582 = vmatprep.mubr.bf16.mxu0 %v18322_v4  ;;  %v9947_v27 = vsel %vm22059_vm5, %v9911_v33, 0.0 }
 0x4fa   : > { %10840 = vst [vmem:[#allocation4 + $0xc0] sm:$0xf] %v17148_v45  ;;  %10841 = vst [vmem:[#allocation4 + $0xe4] sm:$0xf] %v17149_v34  ;;  %v10233_v3 = vld [vmem:[#allocation3 + $0x51] sm:$0xff]  ;;  %v9810_v45 = vadd.f32 1.0, %v21275_v43  ;;  %v17079_v7 = vpack.c.bf16 %v10017_v11, %v10017_v11  ;;  %v18805_v43 = vpop.eup %18804  ;;  %13583 = vmatmul.mubr.bf16.gmra.mxu0 %v18320_v26  ;;  %v17225_v59 = vpack.c.bf16 %v9947_v27, %v9947_v27 }
 0x4fb   : > { %11271 = vst [vmem:[#allocation4 + $0xa4] sm:$0xf] %v17253_v38  ;;  %11272 = vst [vmem:[#allocation4 + $0xc8] sm:$0xf] %v17254_v30  ;;  %v10449_v24 = vld [vmem:[#allocation3 + $0x52] sm:$0xff]  ;;  %v17115_v34 = vpack.c.bf16 %v10233_v3, %v10233_v3  ;;  %v18807_v62 = vpop.eup %18806  ;;  %v9914_v40 = vmul.f32 %v18805_v43, %v21162_v52  ;;  %v21347_v26 = vld [vmem:[%s21948_s3 + $0x1b0] sm:$0xff]  }
 0x4fc   : > { %11485 = vst [vmem:[#allocation4 + $0x60] sm:$0xf] %v17253_v38  ;;  %11486 = vst [vmem:[#allocation4 + $0x84] sm:$0xf] %v17254_v30  ;;  %v17151_v23 = vpack.c.bf16 %v10449_v24, %v10449_v24  ;;  %v11094_v1 = vld [vmem:[#allocation3 + $0x4c] sm:$0xff]  ;;  %v9811_v52 = vadd.f32 1.0, %v18807_v62  ;;  %v21359_v62 = vpop.f32.mrf.mxu1 }
 0x4fd   : > { %11701 = vst [vmem:[#allocation4 + $0x64] sm:$0xf] %v17323_v31  ;;  %11062 = vst [vmem:[#allocation4 + $0x19c] sm:$0xf] %v17224_v19  ;;  %v9807_v31 = vadd.f32 1.0, %v21253_v47  ;;  %v11524_v49 = vld [vmem:[#allocation3 + $0x4d] sm:$0xff]  ;;  %v17256_v54 = vpack.c.bf16 %v11094_v1, %v11094_v1 }
 0x4fe   : > { %9980 = vst [vmem:[#allocation3 + $0x5b] sm:$0xff] %v9944_v12  ;;  %11917 = vst [vmem:[#allocation4 + $0x68] sm:$0xf] %v17359_v46  ;;  %v11740_v14 = vld [vmem:[#allocation3 + $0x4e] sm:$0xff]  ;;  %v9949_v47 = vsel %vm22058_vm4, %v9913_v44, 0.0  ;;  %v17326_v57 = vpack.c.bf16 %v11524_v49, %v11524_v49  ;;  %v9813_v19 = vadd.f32 1.0, %v21293_v35  ;;  %v21339_v35 = vadd.f32 %v21257_v61, %v20967_v48 }
 0x4ff   : > { %11918 = vst [vmem:[#allocation4 + $0x8c] sm:$0xf] %v17360_v9  ;;  %11702 = vst [vmem:[#allocation4 + $0x88] sm:$0xf] %v17324_v58  ;;  %v17362_v56 = vpack.c.bf16 %v11740_v14, %v11740_v14  ;;  %v17227_v16 = vpack.c.bf16 %v9949_v47, %v9949_v47  ;;  %v18323_v38 = vld [vmem:[#allocation4 + $0x8] ss:$36 sps:$4 sm:$0xff]   ;;  %18812 = vrcp.f32 %v9807_v31 }
 0x500   : > { %11060 = vst [vmem:[#allocation4 + $0x154] sm:$0xf] %v17222_v50  ;;  %9985 = vst [vmem:[#allocation3 + $0x83] sm:$0xff] %v9949_v47  ;;  %v18325_v30 = vld [vmem:[#allocation4 + $0xc] ss:$36 sps:$4 sm:$0xff]   ;;  %v18395_v58 = vld [vmem:[%s21948_s3 + $0x170] sm:$0xff]   ;;  %18814 = vrcp.f32 %v9810_v45 }
 0x501   : > { %10197 = vst [vmem:[#allocation4 + $0x168] sm:$0xf] %v17079_v7  ;;  %10413 = vst [vmem:[#allocation4 + $0x16c] sm:$0xf] %v17115_v34  ;;  %v10020_v46 = vld [vmem:[#allocation3 + $0x68] sm:$0xff]  ;;  %13751 = vmatprep.mubr.bf16.mxu1 %v18325_v30  ;;  %v9950_v48 = vsel %vm22060_vm6, %v9914_v40, 0.0  ;;  %18816 = vrcp.f32 %v21318_v25  ;;  %13915 = vmatpush2.bf16.msra.mxu0 %v18395_v58 }
 0x502   : > { %10629 = vst [vmem:[#allocation4 + $0x170] sm:$0xf] %v17151_v23  ;;  %10843 = vst [vmem:[#allocation4 + $0x12c] sm:$0xf] %v17151_v23  ;;  %v10236_v9 = vld [vmem:[#allocation3 + $0x69] sm:$0xff]  ;;  %v17082_v50 = vpack.c.bf16 %v10020_v46, %v10020_v46  ;;  %13752 = vmatmul.mubr.bf16.vlgmr.msra.gmra.mxu1 %v18323_v38  ;;  %v21354_v61 = vld [vmem:[%s21948_s3 + $0x168] sm:$0xff]   ;;  %v17228_v1 = vpack.c.bf16 %v9950_v48, %v9950_v48  ;;  %18818 = vrcp.f32 %v9813_v19  ;;  %13916 = vmatprep.subr.bf16.mxu0 %v22018_v6 }
 0x503   : > { %11274 = vst [vmem:[#allocation4 + $0x110] sm:$0xf] %v17256_v54  ;;  %11488 = vst [vmem:[#allocation4 + $0xcc] sm:$0xf] %v17256_v54  ;;  %v10452_v12 = vld [vmem:[#allocation3 + $0x6a] sm:$0xff]  ;;  %v17118_v44 = vpack.c.bf16 %v10236_v9, %v10236_v9  ;;  %14074 = vmatpush1.bf16.msra.mxu1 %v21325_v41  ;;  %v21365_v25 = vld [vmem:[%s21948_s3 + $0x1a8] sm:$0xff]   ;;  %18820 = vrcp.f32 %v9811_v52 }
 0x504   : > { %11704 = vst [vmem:[#allocation4 + $0xd0] sm:$0xf] %v17326_v57  ;;  %11920 = vst [vmem:[#allocation4 + $0xd4] sm:$0xf] %v17362_v56  ;;  %v17154_v33 = vpack.c.bf16 %v10452_v12, %v10452_v12  ;;  %v11097_v4 = vld [vmem:[#allocation3 + $0x64] sm:$0xff]  ;;  %14075 = vmatprep.subr.bf16.mxu1 %v22018_v6  ;;  %18822 = vpow2.f32 %v21236_v63  ;;  %v21377_v63 = vadd.f32 %v21280_v10, %v21008_v18  ;;  %vm22062_vm8 = vcmp.eq.s32.totalorder %v20338_v53, 1 }
 0x505   : > { %11065 = vst [vmem:[#allocation4 + $0x208] sm:$0xf] %v17227_v16  ;;  %9983 = vst [vmem:[#allocation3 + $0x73] sm:$0xff] %v9947_v27  ;;  %v11527_v11 = vld [vmem:[#allocation3 + $0x65] sm:$0xff]  ;;  %v17259_v24 = vpack.c.bf16 %v11097_v4, %v11097_v4  ;;  %v10018_v7 = vld [vmem:[#allocation3 + $0x58] sm:$0xff]  ;;  %13917 = vmatpush2.bf16.msra.mxu0 %v21354_v61  ;;  %vm22063_vm9 = vcmp.eq.s32.totalorder %v20278_v42, 1 }
 0x506   : > { %v11743_v3 = vld [vmem:[#allocation3 + $0x66] sm:$0xff]  ;;  %v17329_v31 = vpack.c.bf16 %v11527_v11, %v11527_v11  ;;  %v10234_v23 = vld [vmem:[#allocation3 + $0x59] sm:$0xff]  ;;  %11063 = vst [vmem:[#allocation4 + $0x1c0] sm:$0xf] %v17225_v59  ;;  %9986 = vst [vmem:[#allocation3 + $0x8b] sm:$0xff] %v9950_v48  ;;  %v17080_v8 = vpack.c.bf16 %v10018_v7, %v10018_v7  ;;  %13918 = vmatprep.subr.bf16.mxu0 %v22018_v6  ;;  %vm22064_vm10 = vcmp.eq.s32.totalorder %v20361_v22, 1 }
 0x507   : > { %v17365_v45 = vpack.c.bf16 %v11743_v3, %v11743_v3  ;;  %v10019_v34 = vld [vmem:[#allocation3 + $0x60] sm:$0xff]  ;;  %10200 = vst [vmem:[#allocation4 + $0x1d4] sm:$0xf] %v17082_v50  ;;  %10416 = vst [vmem:[#allocation4 + $0x1d8] sm:$0xf] %v17118_v44  ;;  %v17116_v47 = vpack.c.bf16 %v10234_v23, %v10234_v23  ;;  %v11095_v16 = vld [vmem:[#allocation3 + $0x54] sm:$0xff]  ;;  %14076 = vmatpush1.bf16.msra.mxu1 %v21347_v26  ;;  %v21381_v26 = vadd.f32 %v21299_v20, %v20990_v17 }
 0x508   : > { %10632 = vst [vmem:[#allocation4 + $0x1dc] sm:$0xf] %v17154_v33  ;;  %10846 = vst [vmem:[#allocation4 + $0x198] sm:$0xf] %v17154_v33  ;;  %v17081_v49 = vpack.c.bf16 %v10019_v34, %v10019_v34  ;;  %v10235_v14 = vld [vmem:[#allocation3 + $0x61] sm:$0xff]  ;;  %v11525_v30 = vld [vmem:[#allocation3 + $0x55] sm:$0xff]  ;;  %v17257_v27 = vpack.c.bf16 %v11095_v16, %v11095_v16  ;;  %14077 = vmatprep.subr.bf16.mxu1 %v22018_v6  ;;  %v21391_v17 = vadd.f32 %v21341_v55, %v20998_v13 }
 0x509   : > { %v10450_v43 = vld [vmem:[#allocation3 + $0x5a] sm:$0xff]  ;;  %v10451_v54 = vld [vmem:[#allocation3 + $0x62] sm:$0xff]  ;;  %11277 = vst [vmem:[#allocation4 + $0x17c] sm:$0xf] %v17259_v24  ;;  %11491 = vst [vmem:[#allocation4 + $0x138] sm:$0xf] %v17259_v24  ;;  %v17117_v41 = vpack.c.bf16 %v10235_v14, %v10235_v14  ;;  %v17327_v46 = vpack.c.bf16 %v11525_v30, %v11525_v30  ;;  %v21385_v24 = vadd.f32 %v21320_v32, %v21016_v21  ;;  %v21393_v21 = vpop.f32.mrf.mxu1 }
 0x50a   : > { %11707 = vst [vmem:[#allocation4 + $0x13c] sm:$0xf] %v17329_v31  ;;  %11923 = vst [vmem:[#allocation4 + $0x140] sm:$0xf] %v17365_v45  ;;  %v17152_v57 = vpack.c.bf16 %v10450_v43, %v10450_v43  ;;  %v17153_v56 = vpack.c.bf16 %v10451_v54, %v10451_v54  ;;  %v11096_v38 = vld [vmem:[#allocation3 + $0x5c] sm:$0xff]  ;;  %v18809_v31 = vpop.eup %18808  ;;  %v21446_v22 = vld [vmem:[%s21948_s3 + $0x190] sm:$0xff]  }
 0x50b   : > { %11066 = vst [vmem:[#allocation4 + $0x22c] sm:$0xf] %v17228_v1  ;;  %v17258_v40 = vpack.c.bf16 %v11096_v38, %v11096_v38  ;;  %v11526_v58 = vld [vmem:[#allocation3 + $0x5d] sm:$0xff]  ;;  %10198 = vst [vmem:[#allocation4 + $0x18c] sm:$0xf] %v17080_v8  ;;  %v18811_v20 = vpop.eup %18810  ;;  %14078 = vmatpush1.bf16.msra.mxu1 %v21365_v25  ;;  %v17570_v60 = vpop.f32.mrf.mxu1  ;;  %vm22065_vm11 = vcmp.eq.s32.totalorder %v20314_v51, 1 }
 0x50c   : > { %v11741_v9 = vld [vmem:[#allocation3 + $0x56] sm:$0xff]  ;;  %v11742_v12 = vld [vmem:[#allocation3 + $0x5e] sm:$0xff]  ;;  %10199 = vst [vmem:[#allocation4 + $0x1b0] sm:$0xf] %v17081_v49  ;;  %10414 = vst [vmem:[#allocation4 + $0x190] sm:$0xf] %v17116_v47  ;;  %v17328_v19 = vpack.c.bf16 %v11526_v58, %v11526_v58  ;;  %v9912_v47 = vmul.f32 %v18809_v31, %v21166_v37  ;;  %v9917_v16 = vmul.f32 %v18811_v20, %v21173_v2  ;;  %14079 = vmatprep.subr.bf16.mxu1 %v22018_v6  ;;  %v18813_v2 = vpop.eup %18812 }
 0x50d   : > { %v17363_v59 = vpack.c.bf16 %v11741_v9, %v11741_v9  ;;  %v17364_v50 = vpack.c.bf16 %v11742_v12, %v11742_v12  ;;  %10415 = vst [vmem:[#allocation4 + $0x1b4] sm:$0xf] %v17117_v41  ;;  %10630 = vst [vmem:[#allocation4 + $0x194] sm:$0xf] %v17152_v57  ;;  %v18326_v44 = vld [vmem:[#allocation4 + $0x90] ss:$36 sps:$4 sm:$0xff]  }
 0x50e   : > { %10631 = vst [vmem:[#allocation4 + $0x1b8] sm:$0xf] %v17153_v56  ;;  %10844 = vst [vmem:[#allocation4 + $0x150] sm:$0xf] %v17152_v57  ;;  %v18328_v33 = vld [vmem:[#allocation4 + $0x94] ss:$36 sps:$4 sm:$0xff]  }
 0x50f   : > { %10845 = vst [vmem:[#allocation4 + $0x174] sm:$0xf] %v17153_v56  ;;  %v21372_v4 = vld [vmem:[%s21948_s3 + $0x160] sm:$0xff]   ;;  %11275 = vst [vmem:[#allocation4 + $0x134] sm:$0xf] %v17257_v27  ;;  %v10021_v52 = vld [vmem:[#allocation3 + $0x70] sm:$0xff]  ;;  %13590 = vmatprep.mubr.bf16.mxu0 %v18328_v33 }
 0x510   : > { %11276 = vst [vmem:[#allocation4 + $0x158] sm:$0xf] %v17258_v40  ;;  %11489 = vst [vmem:[#allocation4 + $0xf0] sm:$0xf] %v17257_v27  ;;  %v10237_v11 = vld [vmem:[#allocation3 + $0x71] sm:$0xff]  ;;  %v17083_v45 = vpack.c.bf16 %v10021_v52, %v10021_v52  ;;  %v10024_v8 = vld [vmem:[#allocation3 + $0x88] sm:$0xff]  ;;  %13591 = vmatmul.mubr.bf16.gmra.mxu0 %v18326_v44 }
 0x511   : > { %11490 = vst [vmem:[#allocation4 + $0x114] sm:$0xf] %v17258_v40  ;;  %11705 = vst [vmem:[#allocation4 + $0xf4] sm:$0xf] %v17327_v46  ;;  %v10453_v3 = vld [vmem:[#allocation3 + $0x72] sm:$0xff]  ;;  %v17119_v7 = vpack.c.bf16 %v10237_v11, %v10237_v11  ;;  %v10240_v49 = vld [vmem:[#allocation3 + $0x89] sm:$0xff]  ;;  %v17086_v13 = vpack.c.bf16 %v10024_v8, %v10024_v8  ;;  %13919 = vmatpush2.bf16.msra.mxu0 %v21372_v4  ;;  %v21422_v11 = vadd.f32 %v21359_v62, %v21063_v29 }
 0x512   : > { %v15845_v48 = vmul.f32 -1.442695, %v21339_v35  ;;  %11706 = vst [vmem:[#allocation4 + $0x118] sm:$0xf] %v17328_v19  ;;  %11921 = vst [vmem:[#allocation4 + $0xf8] sm:$0xf] %v17363_v59  ;;  %v17155_v18 = vpack.c.bf16 %v10453_v3, %v10453_v3  ;;  %v17122_v55 = vpack.c.bf16 %v10240_v49, %v10240_v49  ;;  %v18815_v19 = vpop.eup %18814  ;;  %13920 = vmatprep.subr.bf16.mxu0 %v22018_v6 }
 0x513   : > { %11922 = vst [vmem:[#allocation4 + $0x11c] sm:$0xf] %v17364_v50  ;;  %v11098_v10 = vld [vmem:[#allocation3 + $0x6c] sm:$0xff]  ;;  %v21399_v43 = vld [vmem:[%s21948_s3 + $0x1a0] sm:$0xff]   ;;  %10201 = vst [vmem:[#allocation4 + $0x1f8] sm:$0xf] %v17083_v45  ;;  %v9915_v50 = vmul.f32 %v18813_v2, %v21178_v0  ;;  %v9918_v4 = vmul.f32 %v18815_v19, %v21189_v28  ;;  %v21431_v28 = vadd.f32 %v21393_v21, %v21046_v15  ;;  %v18817_v62 = vpop.eup %18816 }
 0x514   : > { %v11528_v34 = vld [vmem:[#allocation3 + $0x6d] sm:$0xff]  ;;  %v17260_v32 = vpack.c.bf16 %v11098_v10, %v11098_v10  ;;  %10417 = vst [vmem:[#allocation4 + $0x1fc] sm:$0xf] %v17119_v7  ;;  %10633 = vst [vmem:[#allocation4 + $0x200] sm:$0xf] %v17155_v18  ;;  %v11101_v41 = vld [vmem:[#allocation3 + $0x84] sm:$0xff]  ;;  %18824 = vpow2.f32 %v15845_v48  ;;  %v21434_v48 = vadd.f32 %v17570_v60, %v21066_v36  ;;  %14080 = vmatpush1.bf16.msra.mxu1 %v21399_v43  ;;  %v18819_v15 = vpop.eup %18818 }
 0x515   : > { %v11744_v23 = vld [vmem:[#allocation3 + $0x6e] sm:$0xff]  ;;  %v17330_v61 = vpack.c.bf16 %v11528_v34, %v11528_v34  ;;  %10847 = vst [vmem:[#allocation4 + $0x1bc] sm:$0xf] %v17155_v18  ;;  %v11531_v57 = vld [vmem:[#allocation3 + $0x85] sm:$0xff]  ;;  %v17263_v38 = vpack.c.bf16 %v11101_v41, %v11101_v41  ;;  %v9948_v40 = vsel %vm22061_vm7, %v9912_v47, 0.0  ;;  %v9953_v46 = vsel %vm22062_vm8, %v9917_v16, 0.0  ;;  %14081 = vmatprep.subr.bf16.mxu1 %v22018_v6  ;;  %v18821_v21 = vpop.eup %18820 }
 0x516   : > { %v17366_v1 = vpack.c.bf16 %v11744_v23, %v11744_v23  ;;  %v10456_v14 = vld [vmem:[#allocation3 + $0x8a] sm:$0xff]  ;;  %11278 = vst [vmem:[#allocation4 + $0x1a0] sm:$0xf] %v17260_v32  ;;  %11492 = vst [vmem:[#allocation4 + $0x15c] sm:$0xf] %v17260_v32  ;;  %v17333_v30 = vpack.c.bf16 %v11531_v57, %v11531_v57  ;;  %v17226_v25 = vpack.c.bf16 %v9948_v40, %v9948_v40  ;;  %v9951_v3 = vsel %vm22063_vm9, %v9915_v50, 0.0  ;;  %v21453_v32 = vpop.eup %18822 }
 0x517   : > { %v17158_v54 = vpack.c.bf16 %v10456_v14, %v10456_v14  ;;  %v11747_v56 = vld [vmem:[#allocation3 + $0x86] sm:$0xff]  ;;  %v18420_v37 = vld [vmem:[%s21948_s3 + $0x158] sm:$0xff]   ;;  %11708 = vst [vmem:[#allocation4 + $0x160] sm:$0xf] %v17330_v61  ;;  %v18331_v58 = vld [vmem:[#allocation4 + $0x54] ss:$36 sps:$4 sm:$0xff]   ;;  %v17231_v59 = vpack.c.bf16 %v9953_v46, %v9953_v46  ;;  %v17229_v45 = vpack.c.bf16 %v9951_v3, %v9951_v3  ;;  %v9916_v10 = vmul.f32 %v18817_v62, %v21196_v39 }
 0x518   : > { %11924 = vst [vmem:[#allocation4 + $0x164] sm:$0xf] %v17366_v1  ;;  %v17369_v27 = vpack.c.bf16 %v11747_v56, %v11747_v56  ;;  %10204 = vst [vmem:[#allocation4 + $0x264] sm:$0xf] %v17086_v13  ;;  %v15850_v9 = vmul.f32 -1.442695, %v21377_v63  ;;  %13759 = vmatprep.mubr.bf16.mxu1 %v18331_v58  ;;  %13921 = vmatpush2.bf16.msra.mxu0 %v18420_v37  ;;  %v9921_v20 = vmul.f32 %v18819_v15, %v21204_v5 }
 0x519   : > { %10420 = vst [vmem:[#allocation4 + $0x268] sm:$0xf] %v17122_v55  ;;  %10636 = vst [vmem:[#allocation4 + $0x26c] sm:$0xf] %v17158_v54  ;;  %v18329_v12 = vld [vmem:[#allocation4 + $0x50] ss:$36 sps:$4 sm:$0xff]   ;;  %13922 = vmatprep.subr.bf16.mxu0 %v22018_v6 }
 0x51a   : > { %10850 = vst [vmem:[#allocation4 + $0x228] sm:$0xf] %v17158_v54  ;;  %9984 = vst [vmem:[#allocation3 + $0x7b] sm:$0xff] %v9948_v40  ;;  %v15848_v44 = vmul.f32 -1.442695, %v21381_v26  ;;  %18826 = vpow2.f32 %v15850_v9  ;;  %13760 = vmatmul.mubr.bf16.gmra.mxu1 %v18329_v12  ;;  %v18419_v0 = vld [vmem:[%s21948_s3 + $0x198] sm:$0xff]  }
 0x51b   : > { %11281 = vst [vmem:[#allocation4 + $0x20c] sm:$0xf] %v17263_v38  ;;  %11495 = vst [vmem:[#allocation4 + $0x1c8] sm:$0xf] %v17263_v38  ;;  %v15851_v53 = vmul.f32 -1.442695, %v21385_v24  ;;  %14082 = vmatpush1.bf16.msra.mxu1 %v18419_v0 }
 0x51c   : > { %11711 = vst [vmem:[#allocation4 + $0x1cc] sm:$0xf] %v17333_v30  ;;  %11927 = vst [vmem:[#allocation4 + $0x1d0] sm:$0xf] %v17369_v27  ;;  %v18335_v33 = vld [vmem:[#allocation4 + $0xdc] ss:$36 sps:$4 sm:$0xff]   ;;  %18828 = vpow2.f32 %v15848_v44  ;;  %14083 = vmatprep.subr.bf16.mxu1 %v22018_v6 }
 0x51d   : > { %9989 = vst [vmem:[#allocation3 + $0xa3] sm:$0xff] %v9953_v46  ;;  %11064 = vst [vmem:[#allocation4 + $0x1e4] sm:$0xf] %v17226_v25  ;;  %v15849_v52 = vmul.f32 -1.442695, %v21391_v17  ;;  %13598 = vmatprep.mubr.bf16.mxu0 %v18335_v33  ;;  %v9954_v42 = vsel %vm22064_vm10, %v9918_v4, 0.0  ;;  %18830 = vpow2.f32 %v15851_v53  ;;  %v21469_v53 = vpop.f32.mrf.mxu1 }
 0x51e   : > { %11069 = vst [vmem:[#allocation4 + $0x298] sm:$0xf] %v17231_v59  ;;  %v18333_v31 = vld [vmem:[#allocation4 + $0xd8] ss:$36 sps:$4 sm:$0xff]   ;;  %9987 = vst [vmem:[#allocation3 + $0x93] sm:$0xff] %v9951_v3  ;;  %v17232_v36 = vpack.c.bf16 %v9954_v42, %v9954_v42  ;;  %v18430_v23 = vld [vmem:[%s21948_s3 + $0x150] sm:$0xff]  }
 0x51f   : > { %v18338_v29 = vld [vmem:[#allocation4 + $0x9c] ss:$36 sps:$4 sm:$0xff]   ;;  %v15854_v7 = vmul.f32 -1.442695, %v21422_v11  ;;  %v18342_v18 = vld [vmem:[#allocation4 + $0x124] ss:$36 sps:$4 sm:$0xff]   ;;  %18832 = vpow2.f32 %v15849_v52  ;;  %13599 = vmatmul.mubr.bf16.gmra.mxu0 %v18333_v31  ;;  %14084 = vmatpush1.bf16.msra.mxu1 %v21446_v22 }
 0x520   : > { %9990 = vst [vmem:[#allocation3 + $0xab] sm:$0xff] %v9954_v42  ;;  %v15852_v34 = vmul.f32 -1.442695, %v21431_v28  ;;  %13767 = vmatprep.mubr.bf16.mxu1 %v18338_v29  ;;  %11067 = vst [vmem:[#allocation4 + $0x250] sm:$0xf] %v17229_v45  ;;  %13606 = vmatprep.mubr.bf16.mxu0 %v18342_v18  ;;  %v9952_v49 = vsel %vm22065_vm11, %v9916_v10, 0.0 }
 0x521   : > { %18834 = vpow2.f32 %v15854_v7  ;;  %v18336_v39 = vld [vmem:[#allocation4 + $0x98] ss:$36 sps:$4 sm:$0xff]   ;;  %v10022_v61 = vld [vmem:[#allocation3 + $0x78] sm:$0xff]  ;;  %11070 = vst [vmem:[#allocation4 + $0x2bc] sm:$0xf] %v17232_v36  ;;  %v22066_v14 = vld [vmem:[#allocation8_spill] sm:$0xff]  ;;  %v17230_v16 = vpack.c.bf16 %v9952_v49, %v9952_v49  ;;  %13923 = vmatpush2.bf16.msra.mxu0 %v18430_v23  ;;  %14085 = vmatprep.subr.bf16.mxu1 %v22018_v6 }
 0x522   : > { %v10023_v1 = vld [vmem:[#allocation3 + $0x80] sm:$0xff]  ;;  %v9919_v47 = vmul.f32 %v18821_v21, %v22066_v14  ;;  %18836 = vpow2.f32 %v15852_v34  ;;  %v21459_v43 = vmul.f32 -1.442695, %v21434_v48  ;;  %v18345_v5 = vld [vmem:[#allocation4 + $0xe4] ss:$36 sps:$4 sm:$0xff]   ;;  %v17084_v13 = vpack.c.bf16 %v10022_v61, %v10022_v61  ;;  %9988 = vst [vmem:[#allocation3 + $0x9b] sm:$0xff] %v9952_v49  ;;  %13768 = vmatmul.mubr.bf16.gmra.mxu1 %v18336_v39  ;;  %v18825_v34 = vpop.eup %18824  ;;  %13924 = vmatprep.subr.bf16.mxu0 %v22018_v6 }
 0x523   : > { %v10238_v8 = vld [vmem:[#allocation3 + $0x79] sm:$0xff]  ;;  %v17085_v55 = vpack.c.bf16 %v10023_v1, %v10023_v1  ;;  %v10239_v54 = vld [vmem:[#allocation3 + $0x81] sm:$0xff]  ;;  %v22067_v58 = vld [vmem:[#allocation20_spill] sm:$0xff]  ;;  %11068 = vst [vmem:[#allocation4 + $0x274] sm:$0xf] %v17230_v16  ;;  %13775 = vmatprep.mubr.bf16.mxu1 %v18345_v5  ;;  %v9814_v1 = vadd.f32 1.0, %v21453_v32 }
 0x524   : > { %v17120_v41 = vpack.c.bf16 %v10238_v8, %v10238_v8  ;;  %v10454_v57 = vld [vmem:[#allocation3 + $0x7a] sm:$0xff]  ;;  %v10455_v56 = vld [vmem:[#allocation3 + $0x82] sm:$0xff]  ;;  %v17121_v51 = vpack.c.bf16 %v10239_v54, %v10239_v54  ;;  %vm22068_vm12 = vcmp.eq.s32.totalorder %v22067_v58, 1  ;;  %10202 = vst [vmem:[#allocation4 + $0x21c] sm:$0xf] %v17084_v13  ;;  %v9812_v32 = vadd.f32 1.0, %v18825_v34  ;;  %v21482_v54 = vpop.f32.mrf.mxu1 }
 0x525   : > { %v17156_v37 = vpack.c.bf16 %v10454_v57, %v10454_v57  ;;  %v17157_v38 = vpack.c.bf16 %v10455_v56, %v10455_v56  ;;  %v11099_v30 = vld [vmem:[#allocation3 + $0x74] sm:$0xff]  ;;  %v11100_v27 = vld [vmem:[#allocation3 + $0x7c] sm:$0xff]  ;;  %v9957_v2 = vsel %vm22068_vm12, %v9921_v20, 0.0  ;;  %v18340_v25 = vld [vmem:[#allocation4 + $0x120] ss:$36 sps:$4 sm:$0xff]   ;;  %18838 = vrcp.f32 %v9814_v1 }
 0x526   : > { %v11529_v40 = vld [vmem:[#allocation3 + $0x75] sm:$0xff]  ;;  %v21467_v46 = vld [vmem:[%s21948_s3 + $0x188] sm:$0xff]   ;;  %v17261_v9 = vpack.c.bf16 %v11099_v30, %v11099_v30  ;;  %v17262_v60 = vpack.c.bf16 %v11100_v27, %v11100_v27  ;;  %10203 = vst [vmem:[#allocation4 + $0x240] sm:$0xf] %v17085_v55  ;;  %10418 = vst [vmem:[#allocation4 + $0x220] sm:$0xf] %v17120_v41  ;;  %v17235_v44 = vpack.c.bf16 %v9957_v2, %v9957_v2  ;;  %18840 = vrcp.f32 %v9812_v32 }
 0x527   : > { %v11530_v12 = vld [vmem:[#allocation3 + $0x7d] sm:$0xff]  ;;  %v17331_v19 = vpack.c.bf16 %v11529_v40, %v11529_v40  ;;  %9993 = vst [vmem:[#allocation3 + $0xc3] sm:$0xff] %v9957_v2  ;;  %10419 = vst [vmem:[#allocation4 + $0x244] sm:$0xf] %v17121_v51  ;;  %v10025_v0 = vld [vmem:[#allocation3 + $0x90] sm:$0xff]  ;;  %13607 = vmatmul.mubr.bf16.gmra.mxu0 %v18340_v25  ;;  %v18827_v57 = vpop.eup %18826  ;;  %14086 = vmatpush1.bf16.msra.mxu1 %v21467_v46 }
 0x528   : > { %v11745_v59 = vld [vmem:[#allocation3 + $0x76] sm:$0xff]  ;;  %v11746_v50 = vld [vmem:[#allocation3 + $0x7e] sm:$0xff]  ;;  %v17332_v33 = vpack.c.bf16 %v11530_v12, %v11530_v12  ;;  %10634 = vst [vmem:[#allocation4 + $0x224] sm:$0xf] %v17156_v37  ;;  %10635 = vst [vmem:[#allocation4 + $0x248] sm:$0xf] %v17157_v38  ;;  %v17087_v45 = vpack.c.bf16 %v10025_v0, %v10025_v0  ;;  %14087 = vmatprep.subr.bf16.mxu1 %v22018_v6 }
 0x529   : > { %v17367_v4 = vpack.c.bf16 %v11745_v59, %v11745_v59  ;;  %v17368_v52 = vpack.c.bf16 %v11746_v50, %v11746_v50  ;;  %10848 = vst [vmem:[#allocation4 + $0x1e0] sm:$0xf] %v17156_v37  ;;  %10849 = vst [vmem:[#allocation4 + $0x204] sm:$0xf] %v17157_v38  ;;  %v10241_v3 = vld [vmem:[#allocation3 + $0x91] sm:$0xff]  ;;  %v22069_v29 = vld [vmem:[#allocation19_spill] sm:$0xff]  ;;  %v18829_v27 = vpop.eup %18828 }
 0x52a   : > { %v10457_v31 = vld [vmem:[#allocation3 + $0x92] sm:$0xff]  ;;  %vm22070_vm13 = vcmp.eq.s32.totalorder %v22069_v29, 1  ;;  %11279 = vst [vmem:[#allocation4 + $0x1c4] sm:$0xf] %v17261_v9  ;;  %11280 = vst [vmem:[#allocation4 + $0x1e8] sm:$0xf] %v17262_v60  ;;  %v17123_v42 = vpack.c.bf16 %v10241_v3, %v10241_v3  ;;  %v18831_v12 = vpop.eup %18830 }
 0x52b   : > { %v9955_v62 = vsel %vm22070_vm13, %v9919_v47, 0.0  ;;  %11493 = vst [vmem:[#allocation4 + $0x180] sm:$0xf] %v17261_v9  ;;  %11494 = vst [vmem:[#allocation4 + $0x1a4] sm:$0xf] %v17262_v60  ;;  %v17159_v7 = vpack.c.bf16 %v10457_v31, %v10457_v31  ;;  %v11102_v18 = vld [vmem:[#allocation3 + $0x8c] sm:$0xff] }
 0x52c   : > { %11709 = vst [vmem:[#allocation4 + $0x184] sm:$0xf] %v17331_v19  ;;  %v11532_v15 = vld [vmem:[#allocation3 + $0x8d] sm:$0xff]  ;;  %11073 = vst [vmem:[#allocation4 + $0x328] sm:$0xf] %v17235_v44  ;;  %v17233_v10 = vpack.c.bf16 %v9955_v62, %v9955_v62  ;;  %v17264_v22 = vpack.c.bf16 %v11102_v18, %v11102_v18  ;;  %v21479_v8 = vld [vmem:[%s21948_s3 + $0x180] sm:$0xff]  }
 0x52d   : > { %v11748_v36 = vld [vmem:[#allocation3 + $0x8e] sm:$0xff]  ;;  %9991 = vst [vmem:[#allocation3 + $0xb3] sm:$0xff] %v9955_v62  ;;  %11710 = vst [vmem:[#allocation4 + $0x1a8] sm:$0xf] %v17332_v33  ;;  %v17334_v23 = vpack.c.bf16 %v11532_v15, %v11532_v15  ;;  %v11105_v5 = vld [vmem:[#allocation3 + $0xa4] sm:$0xff]  ;;  %14088 = vmatpush1.bf16.msra.mxu1 %v21479_v8 }
 0x52e   : > { %11925 = vst [vmem:[#allocation4 + $0x188] sm:$0xf] %v17367_v4  ;;  %11926 = vst [vmem:[#allocation4 + $0x1ac] sm:$0xf] %v17368_v52  ;;  %v17370_v21 = vpack.c.bf16 %v11748_v36, %v11748_v36  ;;  %v10028_v20 = vld [vmem:[#allocation3 + $0xa8] sm:$0xff]  ;;  %v17267_v56 = vpack.c.bf16 %v11105_v5, %v11105_v5  ;;  %v10026_v37 = vld [vmem:[#allocation3 + $0x98] sm:$0xff]  ;;  %v18833_v52 = vpop.eup %18832  ;;  %14089 = vmatprep.subr.bf16.mxu1 %v22018_v6 }
 0x52f   : > { %v10244_v39 = vld [vmem:[#allocation3 + $0xa9] sm:$0xff]  ;;  %10205 = vst [vmem:[#allocation4 + $0x288] sm:$0xf] %v17087_v45  ;;  %10421 = vst [vmem:[#allocation4 + $0x28c] sm:$0xf] %v17123_v42  ;;  %v17090_v49 = vpack.c.bf16 %v10028_v20, %v10028_v20  ;;  %v10027_v38 = vld [vmem:[#allocation3 + $0xa0] sm:$0xff]  ;;  %v17088_v40 = vpack.c.bf16 %v10026_v37, %v10026_v37  ;;  %v18835_v18 = vpop.eup %18834 }
 0x530   : > { %v10460_v61 = vld [vmem:[#allocation3 + $0xaa] sm:$0xff]  ;;  %10637 = vst [vmem:[#allocation4 + $0x290] sm:$0xf] %v17159_v7  ;;  %10851 = vst [vmem:[#allocation4 + $0x24c] sm:$0xf] %v17159_v7  ;;  %v17126_v14 = vpack.c.bf16 %v10244_v39, %v10244_v39  ;;  %v10242_v30 = vld [vmem:[#allocation3 + $0x99] sm:$0xff]  ;;  %v17089_v58 = vpack.c.bf16 %v10027_v38, %v10027_v38  ;;  %v21486_v7 = vpop.f32.mrf.mxu1 }
 0x531   : > { %v17162_v47 = vpack.c.bf16 %v10460_v61, %v10460_v61  ;;  %v11535_v13 = vld [vmem:[#allocation3 + $0xa5] sm:$0xff]  ;;  %11071 = vst [vmem:[#allocation4 + $0x2e0] sm:$0xf] %v17233_v10  ;;  %11282 = vst [vmem:[#allocation4 + $0x230] sm:$0xf] %v17264_v22  ;;  %v17124_v25 = vpack.c.bf16 %v10242_v30, %v10242_v30  ;;  %v10458_v9 = vld [vmem:[#allocation3 + $0x9a] sm:$0xff] }
 0x532   : > { %v11751_v55 = vld [vmem:[#allocation3 + $0xa6] sm:$0xff]  ;;  %11496 = vst [vmem:[#allocation4 + $0x1ec] sm:$0xf] %v17264_v22  ;;  %11712 = vst [vmem:[#allocation4 + $0x1f0] sm:$0xf] %v17334_v23  ;;  %v17337_v16 = vpack.c.bf16 %v11535_v13, %v11535_v13  ;;  %v17160_v19 = vpack.c.bf16 %v10458_v9, %v10458_v9  ;;  %v11103_v50 = vld [vmem:[#allocation3 + $0x94] sm:$0xff] }
 0x533   : > { %v18343_v41 = vld [vmem:[#allocation4 + $0xe0] ss:$36 sps:$4 sm:$0xff]   ;;  %11928 = vst [vmem:[#allocation4 + $0x1f4] sm:$0xf] %v17370_v21  ;;  %v17373_v51 = vpack.c.bf16 %v11751_v55, %v11751_v55  ;;  %10208 = vst [vmem:[#allocation4 + $0x2f4] sm:$0xf] %v17090_v49  ;;  %v17265_v0 = vpack.c.bf16 %v11103_v50, %v11103_v50  ;;  %v18837_v21 = vpop.eup %18836 }
 0x534   : > { %10424 = vst [vmem:[#allocation4 + $0x2f8] sm:$0xf] %v17126_v14  ;;  %10640 = vst [vmem:[#allocation4 + $0x2fc] sm:$0xf] %v17162_v47  ;;  %v10243_v2 = vld [vmem:[#allocation3 + $0xa1] sm:$0xff]  ;;  %v11533_v33 = vld [vmem:[#allocation3 + $0x95] sm:$0xff]  ;;  %13776 = vmatmul.mubr.bf16.gmra.mxu1 %v18343_v41 }
 0x535   : > { %10854 = vst [vmem:[#allocation4 + $0x2b8] sm:$0xf] %v17162_v47  ;;  %v10459_v60 = vld [vmem:[#allocation3 + $0xa2] sm:$0xff]  ;;  %11285 = vst [vmem:[#allocation4 + $0x29c] sm:$0xf] %v17267_v56  ;;  %v17125_v46 = vpack.c.bf16 %v10243_v2, %v10243_v2  ;;  %v9817_v4 = vadd.f32 1.0, %v18827_v57  ;;  %v17335_v29 = vpack.c.bf16 %v11533_v33, %v11533_v33 }
 0x536   : > { %11499 = vst [vmem:[#allocation4 + $0x258] sm:$0xf] %v17267_v56  ;;  %11715 = vst [vmem:[#allocation4 + $0x25c] sm:$0xf] %v17337_v16  ;;  %v17161_v59 = vpack.c.bf16 %v10459_v60, %v10459_v60  ;;  %v11104_v44 = vld [vmem:[#allocation3 + $0x9c] sm:$0xff]  ;;  %v9815_v42 = vadd.f32 1.0, %v18829_v27  ;;  %v17574_v16 = vpop.f32.mrf.mxu1  ;;  %v18839_v60 = vpop.eup %18838 }
 0x537   : > { %11931 = vst [vmem:[#allocation4 + $0x260] sm:$0xf] %v17373_v51  ;;  %v17266_v3 = vpack.c.bf16 %v11104_v44, %v11104_v44  ;;  %v11534_v31 = vld [vmem:[#allocation3 + $0x9d] sm:$0xff]  ;;  %10206 = vst [vmem:[#allocation4 + $0x2ac] sm:$0xf] %v17088_v40  ;;  %v10029_v34 = vld [vmem:[#allocation3 + $0xb0] sm:$0xff]  ;;  %18842 = vrcp.f32 %v9817_v4 }
 0x538   : > { %v11749_v62 = vld [vmem:[#allocation3 + $0x96] sm:$0xff]  ;;  %v11750_v45 = vld [vmem:[#allocation3 + $0x9e] sm:$0xff]  ;;  %10207 = vst [vmem:[#allocation4 + $0x2d0] sm:$0xf] %v17089_v58  ;;  %10422 = vst [vmem:[#allocation4 + $0x2b0] sm:$0xf] %v17124_v25  ;;  %v17336_v15 = vpack.c.bf16 %v11534_v31, %v11534_v31  ;;  %v17091_v20 = vpack.c.bf16 %v10029_v34, %v10029_v34  ;;  %18844 = vrcp.f32 %v9815_v42  ;;  %v9671_v25 = vpop.f32.mrf.mxu1 }
 0x539   : > { %v17371_v36 = vpack.c.bf16 %v11749_v62, %v11749_v62  ;;  %v17372_v10 = vpack.c.bf16 %v11750_v45, %v11750_v45  ;;  %10423 = vst [vmem:[#allocation4 + $0x2d4] sm:$0xf] %v17125_v46  ;;  %10638 = vst [vmem:[#allocation4 + $0x2b4] sm:$0xf] %v17160_v19  ;;  %v10245_v22 = vld [vmem:[#allocation3 + $0xb1] sm:$0xff]  ;;  %v9818_v13 = vadd.f32 1.0, %v18831_v12  ;;  %18846 = vpow2.f32 %v21459_v43 }
 0x53a   : > { %10639 = vst [vmem:[#allocation4 + $0x2d8] sm:$0xf] %v17161_v59  ;;  %10852 = vst [vmem:[#allocation4 + $0x270] sm:$0xf] %v17160_v19  ;;  %v10461_v23 = vld [vmem:[#allocation3 + $0xb2] sm:$0xff]  ;;  %v17127_v39 = vpack.c.bf16 %v10245_v22, %v10245_v22  ;;  %v9816_v32 = vadd.f32 1.0, %v18833_v52  ;;  %v18841_v19 = vpop.eup %18840 }
 0x53b   : > { %10853 = vst [vmem:[#allocation4 + $0x294] sm:$0xf] %v17161_v59  ;;  %11283 = vst [vmem:[#allocation4 + $0x254] sm:$0xf] %v17265_v0  ;;  %v17163_v61 = vpack.c.bf16 %v10461_v23, %v10461_v23  ;;  %v11106_v1 = vld [vmem:[#allocation3 + $0xac] sm:$0xff]  ;;  %v9821_v41 = vadd.f32 1.0, %v18835_v18  ;;  %18848 = vrcp.f32 %v9818_v13  ;;  %v9920_v52 = vmul.f32 %v18841_v19, %v21339_v35 }
 0x53c   : > { %11284 = vst [vmem:[#allocation4 + $0x278] sm:$0xf] %v17266_v3  ;;  %11497 = vst [vmem:[#allocation4 + $0x210] sm:$0xf] %v17265_v0  ;;  %v11536_v49 = vld [vmem:[#allocation3 + $0xad] sm:$0xff]  ;;  %v17268_v47 = vpack.c.bf16 %v11106_v1, %v11106_v1  ;;  %18850 = vrcp.f32 %v9816_v32  ;;  %v9819_v27 = vadd.f32 1.0, %v18837_v21 }
 0x53d   : > { %11498 = vst [vmem:[#allocation4 + $0x234] sm:$0xf] %v17266_v3  ;;  %11713 = vst [vmem:[#allocation4 + $0x214] sm:$0xf] %v17335_v29  ;;  %v11752_v14 = vld [vmem:[#allocation3 + $0xae] sm:$0xff]  ;;  %v17338_v8 = vpack.c.bf16 %v11536_v49, %v11536_v49  ;;  %18852 = vrcp.f32 %v9821_v41  ;;  %v22073_v58 = vld [vmem:[#allocation33_spill] sm:$0xff] }
 0x53e   : > { %11714 = vst [vmem:[#allocation4 + $0x238] sm:$0xf] %v17336_v15  ;;  %11929 = vst [vmem:[#allocation4 + $0x218] sm:$0xf] %v17371_v36  ;;  %v17374_v5 = vpack.c.bf16 %v11752_v14, %v11752_v14  ;;  %v18349_v55 = vld [vmem:[#allocation4 + $0x16c] ss:$36 sps:$4 sm:$0xff]   ;;  %v21502_v2 = vadd.f32 %v21486_v7, %v22073_v58  ;;  %18854 = vrcp.f32 %v9819_v27 }
 0x53f   : > { %11930 = vst [vmem:[#allocation4 + $0x23c] sm:$0xf] %v17372_v10  ;;  %10209 = vst [vmem:[#allocation4 + $0x318] sm:$0xf] %v17091_v20  ;;  %v22071_v57 = vld [vmem:[#allocation32_spill] sm:$0xff]  ;;  %13614 = vmatprep.mubr.bf16.mxu0 %v18349_v55  ;;  %v22072_v43 = vld [vmem:[#allocation35_spill] sm:$0xff] }
 0x540   : > { %10425 = vst [vmem:[#allocation4 + $0x31c] sm:$0xf] %v17127_v39  ;;  %10641 = vst [vmem:[#allocation4 + $0x320] sm:$0xf] %v17163_v61  ;;  %v21493_v56 = vadd.f32 %v21469_v53, %v22071_v57  ;;  %v18347_v51 = vld [vmem:[#allocation4 + $0x168] ss:$36 sps:$4 sm:$0xff]   ;;  %v21497_v40 = vadd.f32 %v21482_v54, %v22072_v43 }
 0x541   : > { %10855 = vst [vmem:[#allocation4 + $0x2dc] sm:$0xf] %v17163_v61  ;;  %11286 = vst [vmem:[#allocation4 + $0x2c0] sm:$0xf] %v17268_v47  ;;  %v18352_v37 = vld [vmem:[#allocation4 + $0x12c] ss:$36 sps:$4 sm:$0xff]   ;;  %13615 = vmatmul.mubr.bf16.gmra.mxu0 %v18347_v51 }
 0x542   : > { %11500 = vst [vmem:[#allocation4 + $0x27c] sm:$0xf] %v17268_v47  ;;  %11716 = vst [vmem:[#allocation4 + $0x280] sm:$0xf] %v17338_v8  ;;  %v18350_v38 = vld [vmem:[#allocation4 + $0x128] ss:$36 sps:$4 sm:$0xff]   ;;  %13783 = vmatprep.mubr.bf16.mxu1 %v18352_v37 }
 0x543   : > { %11932 = vst [vmem:[#allocation4 + $0x284] sm:$0xf] %v17374_v5  ;;  %v18356_v30 = vld [vmem:[#allocation4 + $0x1b4] ss:$36 sps:$4 sm:$0xff]   ;;  %v15853_v53 = vmul.f32 -1.442695, %v21493_v56  ;;  %13784 = vmatmul.mubr.bf16.gmra.mxu1 %v18350_v38 }
 0x544   : > { %13622 = vmatprep.mubr.bf16.mxu0 %v18356_v30  ;;  %v18359_v9 = vld [vmem:[#allocation4 + $0x174] ss:$36 sps:$4 sm:$0xff]   ;;  %v22074_v12 = vld [vmem:[#allocation36_spill] sm:$0xff]  ;;  %v22075_v59 = vld [vmem:[#allocation7_spill] sm:$0xff]  ;;  %v15858_v50 = vmul.f32 -1.442695, %v21497_v40  ;;  %v18843_v45 = vpop.eup %18842 }
 0x545   : > { %v21505_v46 = vadd.f32 %v17574_v16, %v22074_v12  ;;  %13791 = vmatprep.mubr.bf16.mxu1 %v18359_v9  ;;  %v9922_v54 = vmul.f32 %v18839_v60, %v22075_v59  ;;  %v22076_v44 = vld [vmem:[#allocation34_spill] sm:$0xff]  ;;  %v18354_v4 = vld [vmem:[#allocation4 + $0x1b0] ss:$36 sps:$4 sm:$0xff]   ;;  %18856 = vpow2.f32 %v15853_v53  ;;  %v15856_v0 = vmul.f32 -1.442695, %v21502_v2  ;;  %v22077_v31 = vld [vmem:[#allocation23_spill] sm:$0xff]  ;;  %v18845_v36 = vpop.eup %18844 }
 0x546   : > { %v21510_v33 = vadd.f32 %v9671_v25, %v22076_v44  ;;  %v18357_v3 = vld [vmem:[#allocation4 + $0x170] ss:$36 sps:$4 sm:$0xff]   ;;  %vm22078_vm14 = vcmp.eq.s32.totalorder %v22077_v31, 1  ;;  %v18363_v62 = vld [vmem:[#allocation4 + $0x1fc] ss:$36 sps:$4 sm:$0xff]   ;;  %v9925_v10 = vmul.f32 %v18843_v45, %v21377_v63  ;;  %v9923_v23 = vmul.f32 %v18845_v36, %v21381_v26  ;;  %v18847_v21 = vpop.eup %18846  ;;  %v22081_v20 = vld [vmem:[#allocation24_spill] sm:$0xff] }
 0x547   : > { %v9958_v29 = vsel %vm22078_vm14, %v9922_v54, 0.0  ;;  %v22079_v7 = vld [vmem:[#allocation21_spill] sm:$0xff]  ;;  %v15859_v15 = vmul.f32 -1.442695, %v21505_v46  ;;  %v18366_v22 = vld [vmem:[#allocation4 + $0x1bc] ss:$36 sps:$4 sm:$0xff]   ;;  %18858 = vpow2.f32 %v15858_v50 }
 0x548   : > { %9994 = vst [vmem:[#allocation3 + $0xcb] sm:$0xff] %v9958_v29  ;;  %v17236_v42 = vpack.c.bf16 %v9958_v29, %v9958_v29  ;;  %vm22080_vm15 = vcmp.eq.s32.totalorder %v22079_v7, 1  ;;  %v15857_v34 = vmul.f32 -1.442695, %v21510_v33  ;;  %vm22082_vm4 = vcmp.eq.s32.totalorder %v22081_v20, 1  ;;  %v18849_v61 = vpop.eup %18848  ;;  %v22083_v63 = vld [vmem:[#allocation22_spill] sm:$0xff] }
 0x549   : > { %v9956_v18 = vsel %vm22080_vm15, %v9920_v52, 0.0  ;;  %13623 = vmatmul.mubr.bf16.gmra.mxu0 %v18354_v4  ;;  %v9961_v39 = vsel %vm22082_vm4, %v9925_v10, 0.0  ;;  %18860 = vpow2.f32 %v15856_v0  ;;  %vm22084_vm5 = vcmp.eq.s32.totalorder %v22083_v63, 1  ;;  %v18851_v47 = vpop.eup %18850  ;;  %v18361_v5 = vld [vmem:[#allocation4 + $0x1f8] ss:$36 sps:$4 sm:$0xff]   ;;  %v18437_v57 = vld [vmem:[%s21948_s3 + $0x1f8] sm:$0xff]  }
 0x54a   : > { %9992 = vst [vmem:[#allocation3 + $0xbb] sm:$0xff] %v9956_v18  ;;  %v17234_v35 = vpack.c.bf16 %v9956_v18, %v9956_v18  ;;  %13630 = vmatprep.mubr.bf16.mxu0 %v18363_v62  ;;  %11074 = vst [vmem:[#allocation4 + $0x34c] sm:$0xf] %v17236_v42  ;;  %v17239_v1 = vpack.c.bf16 %v9961_v39, %v9961_v39  ;;  %v9959_v49 = vsel %vm22084_vm5, %v9923_v23, 0.0  ;;  %v9822_v14 = vadd.f32 1.0, %v18847_v21  ;;  %v18853_v13 = vpop.eup %18852  ;;  %v22087_v23 = vld [vmem:[#allocation5_spill] sm:$0xff] }
 0x54b   : > { %13792 = vmatmul.mubr.bf16.gmra.mxu1 %v18357_v3  ;;  %9997 = vst [vmem:[#allocation3 + $0xe3] sm:$0xff] %v9961_v39  ;;  %18862 = vpow2.f32 %v15859_v15  ;;  %9995 = vst [vmem:[#allocation3 + $0xd3] sm:$0xff] %v9959_v49  ;;  %v17237_v26 = vpack.c.bf16 %v9959_v49, %v9959_v49  ;;  %v9926_v8 = vmul.f32 %v18849_v61, %v21385_v24  ;;  %v18364_v32 = vld [vmem:[#allocation4 + $0x1b8] ss:$36 sps:$4 sm:$0xff]   ;;  %v18370_v41 = vld [vmem:[#allocation4 + $0x244] ss:$36 sps:$4 sm:$0xff]   ;;  %v18855_v0 = vpop.eup %18854 }
 0x54c   : > { %11072 = vst [vmem:[#allocation4 + $0x304] sm:$0xf] %v17234_v35  ;;  %13799 = vmatprep.mubr.bf16.mxu1 %v18366_v22  ;;  %18864 = vpow2.f32 %v15857_v34  ;;  %11077 = vst [vmem:[#allocation4 + $0x3b8] sm:$0xf] %v17239_v1  ;;  %v9924_v55 = vmul.f32 %v18851_v47, %v21391_v17  ;;  %v9929_v30 = vmul.f32 %v18853_v13, %v21422_v11  ;;  %v18373_v27 = vld [vmem:[#allocation4 + $0x204] ss:$36 sps:$4 sm:$0xff]   ;;  %14090 = vmatpush2.bf16.msra.mxu1 %v18437_v57 }
 0x54d   : > { %18866 = vrcp.f32 %v9822_v14  ;;  %11075 = vst [vmem:[#allocation4 + $0x370] sm:$0xf] %v17237_v26  ;;  %v9962_v24 = vsel %vm5180_vm0, %v9926_v8, 0.0  ;;  %v21537_v17 = vld [vmem:[%s21948_s3 + $0x1f0] sm:$0xff]   ;;  %vm22088_vm0 = vcmp.eq.s32.totalorder %v22087_v23, 1  ;;  %14091 = vmatprep.subr.bf16.mxu1 %v22018_v6 }
 0x54e   : > { %9998 = vst [vmem:[#allocation3 + $0xeb] sm:$0xff] %v9962_v24  ;;  %v17240_v12 = vpack.c.bf16 %v9962_v24, %v9962_v24  ;;  %v9960_v52 = vsel %vm5178_vm2, %v9924_v55, 0.0  ;;  %v9965_v21 = vsel %vm22088_vm0, %v9929_v30, 0.0  ;;  %v18368_v47 = vld [vmem:[#allocation4 + $0x240] ss:$36 sps:$4 sm:$0xff]  }
 0x54f   : > { %v10032_v16 = vld [vmem:[#allocation3 + $0xc8] sm:$0xff]  ;;  %9996 = vst [vmem:[#allocation3 + $0xdb] sm:$0xff] %v9960_v52  ;;  %v17238_v7 = vpack.c.bf16 %v9960_v52, %v9960_v52  ;;  %10001 = vst [vmem:[#allocation3 + $0x103] sm:$0xff] %v9965_v21  ;;  %v17243_v14 = vpack.c.bf16 %v9965_v21, %v9965_v21  ;;  %v18377_v57 = vld [vmem:[#allocation4 + $0x28c] ss:$36 sps:$4 sm:$0xff]  }
 0x550   : > { %v10248_v51 = vld [vmem:[#allocation3 + $0xc9] sm:$0xff]  ;;  %v17094_v43 = vpack.c.bf16 %v10032_v16, %v10032_v16  ;;  %11078 = vst [vmem:[#allocation4 + $0x3dc] sm:$0xf] %v17240_v12  ;;  %14092 = vmatpush2.bf16.msra.mxu1 %v21537_v17  ;;  %v22089_v12 = vld [vmem:[#allocation6_spill] sm:$0xff] }
 0x551   : > { %v10464_v37 = vld [vmem:[#allocation3 + $0xca] sm:$0xff]  ;;  %v17130_v53 = vpack.c.bf16 %v10248_v51, %v10248_v51  ;;  %13631 = vmatmul.mubr.bf16.gmra.mxu0 %v18361_v5  ;;  %v10030_v50 = vld [vmem:[#allocation3 + $0xb8] sm:$0xff]  ;;  %v10031_v11 = vld [vmem:[#allocation3 + $0xc0] sm:$0xff]  ;;  %11076 = vst [vmem:[#allocation4 + $0x394] sm:$0xf] %v17238_v7  ;;  %14093 = vmatprep.subr.bf16.mxu1 %v22018_v6  ;;  %vm22090_vm2 = vcmp.eq.s32.totalorder %v22089_v12, 1 }
 0x552   : > { %v17166_v58 = vpack.c.bf16 %v10464_v37, %v10464_v37  ;;  %v11109_v25 = vld [vmem:[#allocation3 + $0xc4] sm:$0xff]  ;;  %v10246_v44 = vld [vmem:[#allocation3 + $0xb9] sm:$0xff]  ;;  %13638 = vmatprep.mubr.bf16.mxu0 %v18370_v41  ;;  %10212 = vst [vmem:[#allocation4 + $0x384] sm:$0xf] %v17094_v43  ;;  %v17092_v3 = vpack.c.bf16 %v10030_v50, %v10030_v50  ;;  %v17093_v31 = vpack.c.bf16 %v10031_v11, %v10031_v11  ;;  %v18857_v18 = vpop.eup %18856  ;;  %v10033_v13 = vld [vmem:[#allocation3 + $0xd0] sm:$0xff] }
 0x553   : > { %v11539_v9 = vld [vmem:[#allocation3 + $0xc5] sm:$0xff]  ;;  %v17271_v19 = vpack.c.bf16 %v11109_v25, %v11109_v25  ;;  %10428 = vst [vmem:[#allocation4 + $0x388] sm:$0xf] %v17130_v53  ;;  %v17128_v62 = vpack.c.bf16 %v10246_v44, %v10246_v44  ;;  %v10462_v45 = vld [vmem:[#allocation3 + $0xba] sm:$0xff]  ;;  %13800 = vmatmul.mubr.bf16.gmra.mxu1 %v18364_v32  ;;  %v10249_v55 = vld [vmem:[#allocation3 + $0xd1] sm:$0xff]  ;;  %v9927_v41 = vmul.f32 %v18855_v0, %v21431_v28 }
 0x554   : > { %v11755_v60 = vld [vmem:[#allocation3 + $0xc6] sm:$0xff]  ;;  %v17341_v59 = vpack.c.bf16 %v11539_v9, %v11539_v9  ;;  %10644 = vst [vmem:[#allocation4 + $0x38c] sm:$0xf] %v17166_v58  ;;  %10858 = vst [vmem:[#allocation4 + $0x348] sm:$0xf] %v17166_v58  ;;  %v17164_v36 = vpack.c.bf16 %v10462_v45, %v10462_v45  ;;  %v11107_v10 = vld [vmem:[#allocation3 + $0xb4] sm:$0xff]  ;;  %13807 = vmatprep.mubr.bf16.mxu1 %v18373_v27  ;;  %v17095_v16 = vpack.c.bf16 %v10033_v13, %v10033_v13  ;;  %v18859_v28 = vpop.eup %18858 }
 0x555   : > { %v17377_v54 = vpack.c.bf16 %v11755_v60, %v11755_v60  ;;  %v10247_v29 = vld [vmem:[#allocation3 + $0xc1] sm:$0xff]  ;;  %11289 = vst [vmem:[#allocation4 + $0x32c] sm:$0xf] %v17271_v19  ;;  %11503 = vst [vmem:[#allocation4 + $0x2e8] sm:$0xf] %v17271_v19  ;;  %v11537_v22 = vld [vmem:[#allocation3 + $0xb5] sm:$0xff]  ;;  %v17269_v20 = vpack.c.bf16 %v11107_v10, %v11107_v10  ;;  %v17131_v51 = vpack.c.bf16 %v10249_v55, %v10249_v55 }
 0x556   : > { %v10463_v42 = vld [vmem:[#allocation3 + $0xc2] sm:$0xff]  ;;  %11719 = vst [vmem:[#allocation4 + $0x2ec] sm:$0xf] %v17341_v59  ;;  %v17129_v15 = vpack.c.bf16 %v10247_v29, %v10247_v29  ;;  %v17339_v1 = vpack.c.bf16 %v11537_v22, %v11537_v22  ;;  %v11753_v63 = vld [vmem:[#allocation3 + $0xb6] sm:$0xff]  ;;  %10210 = vst [vmem:[#allocation4 + $0x33c] sm:$0xf] %v17092_v3 }
 0x557   : > { %11935 = vst [vmem:[#allocation4 + $0x2f0] sm:$0xf] %v17377_v54  ;;  %v17165_v35 = vpack.c.bf16 %v10463_v42, %v10463_v42  ;;  %v11108_v34 = vld [vmem:[#allocation3 + $0xbc] sm:$0xff]  ;;  %10211 = vst [vmem:[#allocation4 + $0x360] sm:$0xf] %v17093_v31  ;;  %v17375_v8 = vpack.c.bf16 %v11753_v63, %v11753_v63  ;;  %v10465_v32 = vld [vmem:[#allocation3 + $0xd2] sm:$0xff]  ;;  %v18861_v54 = vpop.eup %18860 }
 0x558   : > { %v17270_v39 = vpack.c.bf16 %v11108_v34, %v11108_v34  ;;  %v11538_v61 = vld [vmem:[#allocation3 + $0xbd] sm:$0xff]  ;;  %10426 = vst [vmem:[#allocation4 + $0x340] sm:$0xf] %v17128_v62  ;;  %10427 = vst [vmem:[#allocation4 + $0x364] sm:$0xf] %v17129_v15  ;;  %v17167_v37 = vpack.c.bf16 %v10465_v32, %v10465_v32  ;;  %v11110_v38 = vld [vmem:[#allocation3 + $0xcc] sm:$0xff]  ;;  %v21549_v31 = vpop.eup %18862 }
 0x559   : > { %v11754_v49 = vld [vmem:[#allocation3 + $0xbe] sm:$0xff]  ;;  %v17340_v26 = vpack.c.bf16 %v11538_v61, %v11538_v61  ;;  %10642 = vst [vmem:[#allocation4 + $0x344] sm:$0xf] %v17164_v36  ;;  %10643 = vst [vmem:[#allocation4 + $0x368] sm:$0xf] %v17165_v35  ;;  %v11540_v24 = vld [vmem:[#allocation3 + $0xcd] sm:$0xff]  ;;  %v17272_v17 = vpack.c.bf16 %v11110_v38, %v11110_v38  ;;  %13639 = vmatmul.mubr.bf16.gmra.mxu0 %v18368_v47  ;;  %v18865_v15 = vpop.eup %18864 }
 0x55a   : > { %v17376_v5 = vpack.c.bf16 %v11754_v49, %v11754_v49  ;;  %10856 = vst [vmem:[#allocation4 + $0x300] sm:$0xf] %v17164_v36  ;;  %10857 = vst [vmem:[#allocation4 + $0x324] sm:$0xf] %v17165_v35  ;;  %v11756_v30 = vld [vmem:[#allocation3 + $0xce] sm:$0xff]  ;;  %v9820_v27 = vadd.f32 1.0, %v18857_v18  ;;  %v17342_v53 = vpack.c.bf16 %v11540_v24, %v11540_v24  ;;  %13646 = vmatprep.mubr.bf16.mxu0 %v18377_v57 }
 0x55b   : > { %11287 = vst [vmem:[#allocation4 + $0x2e4] sm:$0xf] %v17269_v20  ;;  %11288 = vst [vmem:[#allocation4 + $0x308] sm:$0xf] %v17270_v39  ;;  %v18371_v43 = vld [vmem:[#allocation4 + $0x200] ss:$36 sps:$4 sm:$0xff]   ;;  %v17378_v58 = vpack.c.bf16 %v11756_v30, %v11756_v30 }
 0x55c   : > { %11501 = vst [vmem:[#allocation4 + $0x2a0] sm:$0xf] %v17269_v20  ;;  %11502 = vst [vmem:[#allocation4 + $0x2c4] sm:$0xf] %v17270_v39  ;;  %v10036_v25 = vld [vmem:[#allocation3 + $0xe8] sm:$0xff]  ;;  %v9963_v19 = vsel %vm22090_vm2, %v9927_v41, 0.0  ;;  %18868 = vrcp.f32 %v9820_v27  ;;  %13808 = vmatmul.mubr.bf16.gmra.mxu1 %v18371_v43  ;;  %v18867_v20 = vpop.eup %18866 }
 0x55d   : > { %11717 = vst [vmem:[#allocation4 + $0x2a4] sm:$0xf] %v17339_v1  ;;  %11081 = vst [vmem:[#allocation4 + $0x448] sm:$0xf] %v17243_v14  ;;  %v10252_v9 = vld [vmem:[#allocation3 + $0xe9] sm:$0xff]  ;;  %v17098_v50 = vpack.c.bf16 %v10036_v25, %v10036_v25  ;;  %v17241_v3 = vpack.c.bf16 %v9963_v19, %v9963_v19  ;;  %v10034_v42 = vld [vmem:[#allocation3 + $0xd8] sm:$0xff]  ;;  %v9930_v41 = vmul.f32 %v18867_v20, %v21434_v48 }
 0x55e   : > { %11718 = vst [vmem:[#allocation4 + $0x2c8] sm:$0xf] %v17340_v26  ;;  %11933 = vst [vmem:[#allocation4 + $0x2a8] sm:$0xf] %v17375_v8  ;;  %v10468_v60 = vld [vmem:[#allocation3 + $0xea] sm:$0xff]  ;;  %v17134_v11 = vpack.c.bf16 %v10252_v9, %v10252_v9  ;;  %v10035_v7 = vld [vmem:[#allocation3 + $0xe0] sm:$0xff]  ;;  %v17096_v36 = vpack.c.bf16 %v10034_v42, %v10034_v42 }
 0x55f   : > { %11934 = vst [vmem:[#allocation4 + $0x2cc] sm:$0xf] %v17376_v5  ;;  %v18380_v59 = vld [vmem:[#allocation4 + $0x24c] ss:$36 sps:$4 sm:$0xff]   ;;  %10213 = vst [vmem:[#allocation4 + $0x3a8] sm:$0xf] %v17095_v16  ;;  %v17170_v44 = vpack.c.bf16 %v10468_v60, %v10468_v60  ;;  %v17097_v35 = vpack.c.bf16 %v10035_v7, %v10035_v7 }
 0x560   : > { %10429 = vst [vmem:[#allocation4 + $0x3ac] sm:$0xf] %v17131_v51  ;;  %10645 = vst [vmem:[#allocation4 + $0x3b0] sm:$0xf] %v17167_v37  ;;  %v11113_v4 = vld [vmem:[#allocation3 + $0xe4] sm:$0xff]  ;;  %v10250_v18 = vld [vmem:[#allocation3 + $0xd9] sm:$0xff]  ;;  %13815 = vmatprep.mubr.bf16.mxu1 %v18380_v59 }
 0x561   : > { %10859 = vst [vmem:[#allocation4 + $0x36c] sm:$0xf] %v17167_v37  ;;  %v11543_v52 = vld [vmem:[#allocation3 + $0xe5] sm:$0xff]  ;;  %9999 = vst [vmem:[#allocation3 + $0xf3] sm:$0xff] %v9963_v19  ;;  %v17275_v29 = vpack.c.bf16 %v11113_v4, %v11113_v4  ;;  %v17132_v34 = vpack.c.bf16 %v10250_v18, %v10250_v18  ;;  %v10466_v22 = vld [vmem:[#allocation3 + $0xda] sm:$0xff]  ;;  %v9825_v21 = vadd.f32 1.0, %v18859_v28 }
 0x562   : > { %v11759_v0 = vld [vmem:[#allocation3 + $0xe6] sm:$0xff]  ;;  %11290 = vst [vmem:[#allocation4 + $0x350] sm:$0xf] %v17272_v17  ;;  %11504 = vst [vmem:[#allocation4 + $0x30c] sm:$0xf] %v17272_v17  ;;  %v17345_v62 = vpack.c.bf16 %v11543_v52, %v11543_v52  ;;  %v17168_v61 = vpack.c.bf16 %v10466_v22, %v10466_v22  ;;  %v11111_v63 = vld [vmem:[#allocation3 + $0xd4] sm:$0xff] }
 0x563   : > { %11720 = vst [vmem:[#allocation4 + $0x310] sm:$0xf] %v17342_v53  ;;  %11936 = vst [vmem:[#allocation4 + $0x314] sm:$0xf] %v17378_v58  ;;  %v17381_v45 = vpack.c.bf16 %v11759_v0, %v11759_v0  ;;  %v10251_v10 = vld [vmem:[#allocation3 + $0xe1] sm:$0xff]  ;;  %v11541_v14 = vld [vmem:[#allocation3 + $0xd5] sm:$0xff]  ;;  %v17273_v26 = vpack.c.bf16 %v11111_v63, %v11111_v63  ;;  %18870 = vrcp.f32 %v9825_v21 }
 0x564   : > { %10216 = vst [vmem:[#allocation4 + $0x414] sm:$0xf] %v17098_v50  ;;  %10432 = vst [vmem:[#allocation4 + $0x418] sm:$0xf] %v17134_v11  ;;  %v10467_v23 = vld [vmem:[#allocation3 + $0xe2] sm:$0xff]  ;;  %v17133_v39 = vpack.c.bf16 %v10251_v10, %v10251_v10  ;;  %v9823_v47 = vadd.f32 1.0, %v18861_v54  ;;  %v17343_v13 = vpack.c.bf16 %v11541_v14, %v11541_v14 }
 0x565   : > { %10648 = vst [vmem:[#allocation4 + $0x41c] sm:$0xf] %v17170_v44  ;;  %10862 = vst [vmem:[#allocation4 + $0x3d8] sm:$0xf] %v17170_v44  ;;  %v17169_v1 = vpack.c.bf16 %v10467_v23, %v10467_v23  ;;  %v11112_v49 = vld [vmem:[#allocation3 + $0xdc] sm:$0xff]  ;;  %v22091_v38 = vld [vmem:[#allocation27_spill] sm:$0xff] }
 0x566   : > { %11079 = vst [vmem:[#allocation4 + $0x400] sm:$0xf] %v17241_v3  ;;  %11293 = vst [vmem:[#allocation4 + $0x3bc] sm:$0xf] %v17275_v29  ;;  %v17274_v8 = vpack.c.bf16 %v11112_v49, %v11112_v49  ;;  %v11542_v5 = vld [vmem:[#allocation3 + $0xdd] sm:$0xff]  ;;  %vm22092_vm6 = vcmp.eq.s32.totalorder %v22091_v38, 1  ;;  %18872 = vrcp.f32 %v9823_v47 }
 0x567   : > { %11507 = vst [vmem:[#allocation4 + $0x378] sm:$0xf] %v17275_v29  ;;  %11723 = vst [vmem:[#allocation4 + $0x37c] sm:$0xf] %v17345_v62  ;;  %v11757_v55 = vld [vmem:[#allocation3 + $0xd6] sm:$0xff]  ;;  %v11758_v32 = vld [vmem:[#allocation3 + $0xde] sm:$0xff]  ;;  %v17344_v57 = vpack.c.bf16 %v11542_v5, %v11542_v5 }
 0x568   : > { %11939 = vst [vmem:[#allocation4 + $0x380] sm:$0xf] %v17381_v45  ;;  %10214 = vst [vmem:[#allocation4 + $0x3cc] sm:$0xf] %v17096_v36  ;;  %v17379_v16 = vpack.c.bf16 %v11757_v55, %v11757_v55  ;;  %v17380_v51 = vpack.c.bf16 %v11758_v32, %v11758_v32  ;;  %v18375_v37 = vld [vmem:[#allocation4 + $0x288] ss:$36 sps:$4 sm:$0xff]  }
 0x569   : > { %10215 = vst [vmem:[#allocation4 + $0x3f0] sm:$0xf] %v17097_v35  ;;  %10430 = vst [vmem:[#allocation4 + $0x3d0] sm:$0xf] %v17132_v34  ;;  %v9966_v24 = vsel %vm22092_vm6, %v9930_v41, 0.0  ;;  %v9826_v48 = vadd.f32 1.0, %v21549_v31  ;;  %13647 = vmatmul.mubr.bf16.gmra.mxu0 %v18375_v37  ;;  %v18869_v0 = vpop.eup %18868 }
 0x56a   : > { %10431 = vst [vmem:[#allocation4 + $0x3f4] sm:$0xf] %v17133_v39  ;;  %10646 = vst [vmem:[#allocation4 + $0x3d4] sm:$0xf] %v17168_v61  ;;  %v9824_v30 = vadd.f32 1.0, %v18865_v15  ;;  %v10037_v28 = vld [vmem:[#allocation3 + $0xf0] sm:$0xff]  ;;  %v17244_v58 = vpack.c.bf16 %v9966_v24, %v9966_v24  ;;  %v9928_v36 = vmul.f32 %v18869_v0, %v21493_v56 }
 0x56b   : > { %10647 = vst [vmem:[#allocation4 + $0x3f8] sm:$0xf] %v17169_v1  ;;  %10860 = vst [vmem:[#allocation4 + $0x390] sm:$0xf] %v17168_v61  ;;  %v18378_v27 = vld [vmem:[#allocation4 + $0x248] ss:$36 sps:$4 sm:$0xff]   ;;  %v17099_v25 = vpack.c.bf16 %v10037_v28, %v10037_v28  ;;  %18874 = vrcp.f32 %v9826_v48 }
 0x56c   : > { %10861 = vst [vmem:[#allocation4 + $0x3b4] sm:$0xf] %v17169_v1  ;;  %11291 = vst [vmem:[#allocation4 + $0x374] sm:$0xf] %v17273_v26  ;;  %v18383_v43 = vld [vmem:[#allocation4 + $0x2d4] ss:$36 sps:$4 sm:$0xff]   ;;  %18876 = vrcp.f32 %v9824_v30  ;;  %13816 = vmatmul.mubr.bf16.gmra.mxu1 %v18378_v27 }
 0x56d   : > { %11292 = vst [vmem:[#allocation4 + $0x398] sm:$0xf] %v17274_v8  ;;  %11505 = vst [vmem:[#allocation4 + $0x330] sm:$0xf] %v17273_v26  ;;  %v10253_v17 = vld [vmem:[#allocation3 + $0xf1] sm:$0xff]  ;;  %13654 = vmatprep.mubr.bf16.mxu0 %v18383_v43  ;;  %v22093_v23 = vld [vmem:[#allocation26_spill] sm:$0xff] }
 0x56e   : > { %11506 = vst [vmem:[#allocation4 + $0x354] sm:$0xf] %v17274_v8  ;;  %11721 = vst [vmem:[#allocation4 + $0x334] sm:$0xf] %v17343_v13  ;;  %v10469_v53 = vld [vmem:[#allocation3 + $0xf2] sm:$0xff]  ;;  %v17135_v9 = vpack.c.bf16 %v10253_v17, %v10253_v17  ;;  %vm22094_vm7 = vcmp.eq.s32.totalorder %v22093_v23, 1 }
 0x56f   : > { %11722 = vst [vmem:[#allocation4 + $0x358] sm:$0xf] %v17344_v57  ;;  %11937 = vst [vmem:[#allocation4 + $0x338] sm:$0xf] %v17379_v16  ;;  %v17171_v60 = vpack.c.bf16 %v10469_v53, %v10469_v53  ;;  %v11114_v12 = vld [vmem:[#allocation3 + $0xec] sm:$0xff]  ;;  %v9964_v21 = vsel %vm22094_vm7, %v9928_v36, 0.0 }
 0x570   : > { %11938 = vst [vmem:[#allocation4 + $0x35c] sm:$0xf] %v17380_v51  ;;  %10002 = vst [vmem:[#allocation3 + $0x10b] sm:$0xff] %v9966_v24  ;;  %v11544_v19 = vld [vmem:[#allocation3 + $0xed] sm:$0xff]  ;;  %v17276_v54 = vpack.c.bf16 %v11114_v12, %v11114_v12  ;;  %v18386_v44 = vld [vmem:[#allocation4 + $0x294] ss:$36 sps:$4 sm:$0xff]   ;;  %v18871_v39 = vpop.eup %18870  ;;  %v17242_v56 = vpack.c.bf16 %v9964_v21, %v9964_v21 }
 0x571   : > { %v11760_v59 = vld [vmem:[#allocation3 + $0xee] sm:$0xff]  ;;  %v17346_v50 = vpack.c.bf16 %v11544_v19, %v11544_v19  ;;  %11082 = vst [vmem:[#allocation4 + $0x46c] sm:$0xf] %v17244_v58  ;;  %10217 = vst [vmem:[#allocation4 + $0x438] sm:$0xf] %v17099_v25  ;;  %13823 = vmatprep.mubr.bf16.mxu1 %v18386_v44  ;;  %v9933_v1 = vmul.f32 %v18871_v39, %v21497_v40  ;;  %v18439_v49 = vld [vmem:[%s21948_s3 + $0x148] sm:$0xff]  }
 0x572   : > { %v17382_v11 = vpack.c.bf16 %v11760_v59, %v11760_v59  ;;  %10433 = vst [vmem:[#allocation4 + $0x43c] sm:$0xf] %v17135_v9  ;;  %10649 = vst [vmem:[#allocation4 + $0x440] sm:$0xf] %v17171_v60  ;;  %v18381_v4 = vld [vmem:[#allocation4 + $0x2d0] ss:$36 sps:$4 sm:$0xff]   ;;  %13925 = vmatpush2.bf16.msra.mxu0 %v18439_v49 }
 0x573   : > { %10863 = vst [vmem:[#allocation4 + $0x3fc] sm:$0xf] %v17171_v60  ;;  %11294 = vst [vmem:[#allocation4 + $0x3e0] sm:$0xf] %v17276_v54  ;;  %v18391_v52 = vld [vmem:[#allocation4 + $0x31c] ss:$36 sps:$4 sm:$0xff]   ;;  %13655 = vmatmul.mubr.bf16.gmra.mxu0 %v18381_v4  ;;  %v18873_v61 = vpop.eup %18872  ;;  %13926 = vmatprep.subr.bf16.mxu0 %v22018_v6 }
 0x574   : > { %11508 = vst [vmem:[#allocation4 + $0x39c] sm:$0xf] %v17276_v54  ;;  %11724 = vst [vmem:[#allocation4 + $0x3a0] sm:$0xf] %v17346_v50  ;;  %v18384_v22 = vld [vmem:[#allocation4 + $0x290] ss:$36 sps:$4 sm:$0xff]   ;;  %13662 = vmatprep.mubr.bf16.mxu0 %v18391_v52  ;;  %v9931_v63 = vmul.f32 %v18873_v61, %v21502_v2 }
 0x575   : > { %11940 = vst [vmem:[#allocation4 + $0x3a4] sm:$0xf] %v17382_v11  ;;  %v18394_v20 = vld [vmem:[#allocation4 + $0x2dc] ss:$36 sps:$4 sm:$0xff]   ;;  %10000 = vst [vmem:[#allocation3 + $0xfb] sm:$0xff] %v9964_v21  ;;  %13824 = vmatmul.mubr.bf16.gmra.mxu1 %v18384_v22  ;;  %v22097_v55 = vld [vmem:[#allocation28_spill] sm:$0xff] }
 0x576   : > { %13831 = vmatprep.mubr.bf16.mxu1 %v18394_v20  ;;  %11080 = vst [vmem:[#allocation4 + $0x424] sm:$0xf] %v17242_v56  ;;  %v18446_v14 = vld [vmem:[%s21948_s3 + $0x1e8] sm:$0xff]   ;;  %vm22098_vm9 = vcmp.eq.s32.totalorder %v22097_v55, 1  ;;  %v18399_v57 = vld [vmem:[#allocation4 + $0x364] ss:$36 sps:$4 sm:$0xff]  }
 0x577   : > { %v10040_v3 = vld [vmem:[#allocation3 + $0x108] sm:$0xff]  ;;  %v22095_v26 = vld [vmem:[#allocation30_spill] sm:$0xff]  ;;  %v9967_v32 = vsel %vm22098_vm9, %v9931_v63, 0.0  ;;  %14094 = vmatpush2.bf16.msra.mxu1 %v18446_v14  ;;  %v18447_v38 = vld [vmem:[%s21948_s3 + $0x1e0] sm:$0xff]  }
 0x578   : > { %v10256_v31 = vld [vmem:[#allocation3 + $0x109] sm:$0xff]  ;;  %v17102_v62 = vpack.c.bf16 %v10040_v3, %v10040_v3  ;;  %v18875_v47 = vpop.eup %18874  ;;  %vm22096_vm8 = vcmp.eq.s32.totalorder %v22095_v26, 1  ;;  %v18389_v5 = vld [vmem:[#allocation4 + $0x318] ss:$36 sps:$4 sm:$0xff]   ;;  %10003 = vst [vmem:[#allocation3 + $0x113] sm:$0xff] %v9967_v32  ;;  %v17245_v16 = vpack.c.bf16 %v9967_v32, %v9967_v32  ;;  %14095 = vmatprep.subr.bf16.mxu1 %v22018_v6 }
 0x579   : > { %v10472_v29 = vld [vmem:[#allocation3 + $0x10a] sm:$0xff]  ;;  %v17138_v45 = vpack.c.bf16 %v10256_v31, %v10256_v31  ;;  %v9969_v8 = vsel %vm22096_vm8, %v9933_v1, 0.0  ;;  %v18877_v13 = vpop.eup %18876  ;;  %v9934_v2 = vmul.f32 %v18875_v47, %v21505_v46  ;;  %v18392_v41 = vld [vmem:[#allocation4 + $0x2d8] ss:$36 sps:$4 sm:$0xff]   ;;  %v18448_v46 = vld [vmem:[%s21948_s3 + $0x140] sm:$0xff]  }
 0x57a   : > { %v17174_v42 = vpack.c.bf16 %v10472_v29, %v10472_v29  ;;  %v11117_v7 = vld [vmem:[#allocation3 + $0x104] sm:$0xff]  ;;  %10220 = vst [vmem:[#allocation4 + $0x4a4] sm:$0xf] %v17102_v62  ;;  %10005 = vst [vmem:[#allocation3 + $0x123] sm:$0xff] %v9969_v8  ;;  %v17247_v40 = vpack.c.bf16 %v9969_v8, %v9969_v8  ;;  %v9932_v51 = vmul.f32 %v18877_v13, %v21510_v33  ;;  %v18402_v37 = vld [vmem:[#allocation4 + $0x324] ss:$36 sps:$4 sm:$0xff]   ;;  %13927 = vmatpush2.bf16.msra.mxu0 %v18448_v46 }
 0x57b   : > { %v11547_v18 = vld [vmem:[#allocation3 + $0x105] sm:$0xff]  ;;  %v17279_v35 = vpack.c.bf16 %v11117_v7, %v11117_v7  ;;  %10436 = vst [vmem:[#allocation4 + $0x4a8] sm:$0xf] %v17138_v45  ;;  %v9970_v48 = vsel %vm5188_vm1, %v9934_v2, 0.0  ;;  %13663 = vmatmul.mubr.bf16.gmra.mxu0 %v18389_v5  ;;  %v21585_v33 = vld [vmem:[%s21948_s3 + $0x238] sm:$0xff]   ;;  %14096 = vmatpush2.bf16.msra.mxu1 %v18447_v38 }
 0x57c   : > { %v11763_v15 = vld [vmem:[#allocation3 + $0x106] sm:$0xff]  ;;  %v17349_v10 = vpack.c.bf16 %v11547_v18, %v11547_v18  ;;  %10652 = vst [vmem:[#allocation4 + $0x4ac] sm:$0xf] %v17174_v42  ;;  %10866 = vst [vmem:[#allocation4 + $0x468] sm:$0xf] %v17174_v42  ;;  %v10038_v30 = vld [vmem:[#allocation3 + $0xf8] sm:$0xff]  ;;  %v17248_v28 = vpack.c.bf16 %v9970_v48, %v9970_v48  ;;  %13670 = vmatprep.mubr.bf16.mxu0 %v18399_v57  ;;  %14097 = vmatprep.subr.bf16.mxu1 %v22018_v6 }
 0x57d   : > { %v17385_v34 = vpack.c.bf16 %v11763_v15, %v11763_v15  ;;  %11297 = vst [vmem:[#allocation4 + $0x44c] sm:$0xf] %v17279_v35  ;;  %11511 = vst [vmem:[#allocation4 + $0x408] sm:$0xf] %v17279_v35  ;;  %v10039_v27 = vld [vmem:[#allocation3 + $0x100] sm:$0xff]  ;;  %v9968_v53 = vsel %vm5186_vm3, %v9932_v51, 0.0  ;;  %v17100_v25 = vpack.c.bf16 %v10038_v30, %v10038_v30  ;;  %13832 = vmatmul.mubr.bf16.gmra.mxu1 %v18392_v41  ;;  %17575 = vmatprep.subr.bf16.mxu0 %v21585_v33 }
 0x57e   : > { %11727 = vst [vmem:[#allocation4 + $0x40c] sm:$0xf] %v17349_v10  ;;  %11085 = vst [vmem:[#allocation4 + $0x4d8] sm:$0xf] %v17247_v40  ;;  %v10254_v43 = vld [vmem:[#allocation3 + $0xf9] sm:$0xff]  ;;  %v18455_v58 = vld [vmem:[%s21948_s3 + $0x1d8] sm:$0xff]   ;;  %v17101_v9 = vpack.c.bf16 %v10039_v27, %v10039_v27  ;;  %v17246_v54 = vpack.c.bf16 %v9968_v53, %v9968_v53  ;;  %13839 = vmatprep.mubr.bf16.mxu1 %v18402_v37 }
 0x57f   : > { %11943 = vst [vmem:[#allocation4 + $0x410] sm:$0xf] %v17385_v34  ;;  %11083 = vst [vmem:[#allocation4 + $0x490] sm:$0xf] %v17245_v16  ;;  %v10255_v60 = vld [vmem:[#allocation3 + $0x101] sm:$0xff]  ;;  %v17136_v12 = vpack.c.bf16 %v10254_v43, %v10254_v43  ;;  %v11115_v4 = vld [vmem:[#allocation3 + $0xf4] sm:$0xff]  ;;  %14098 = vmatpush2.bf16.msra.mxu1 %v18455_v58 }
 0x580   : > { %10006 = vst [vmem:[#allocation3 + $0x12b] sm:$0xff] %v9970_v48  ;;  %v10470_v19 = vld [vmem:[#allocation3 + $0xfa] sm:$0xff]  ;;  %v10471_v59 = vld [vmem:[#allocation3 + $0x102] sm:$0xff]  ;;  %10004 = vst [vmem:[#allocation3 + $0x11b] sm:$0xff] %v9968_v53  ;;  %v17137_v50 = vpack.c.bf16 %v10255_v60, %v10255_v60  ;;  %v17277_v3 = vpack.c.bf16 %v11115_v4, %v11115_v4  ;;  %14099 = vmatprep.subr.bf16.mxu1 %v22018_v6 }
 0x581   : > { %v17172_v11 = vpack.c.bf16 %v10470_v19, %v10470_v19  ;;  %v17173_v44 = vpack.c.bf16 %v10471_v59, %v10471_v59  ;;  %v11116_v52 = vld [vmem:[#allocation3 + $0xfc] sm:$0xff]  ;;  %11086 = vst [vmem:[#allocation4 + $0x4fc] sm:$0xf] %v17248_v28  ;;  %10218 = vst [vmem:[#allocation4 + $0x45c] sm:$0xf] %v17100_v25  ;;  %v21596_v10 = vld [vmem:[%s21948_s3 + $0x1d0] sm:$0xff]  }
 0x582   : > { %v11545_v0 = vld [vmem:[#allocation3 + $0xf5] sm:$0xff]  ;;  %v17278_v31 = vpack.c.bf16 %v11116_v52, %v11116_v52  ;;  %v11546_v29 = vld [vmem:[#allocation3 + $0xfd] sm:$0xff]  ;;  %10219 = vst [vmem:[#allocation4 + $0x480] sm:$0xf] %v17101_v9  ;;  %10434 = vst [vmem:[#allocation4 + $0x460] sm:$0xf] %v17136_v12 }
 0x583   : > { %v17347_v62 = vpack.c.bf16 %v11545_v0, %v11545_v0  ;;  %v11761_v45 = vld [vmem:[#allocation3 + $0xf6] sm:$0xff]  ;;  %v11762_v42 = vld [vmem:[#allocation3 + $0xfe] sm:$0xff]  ;;  %11084 = vst [vmem:[#allocation4 + $0x4b4] sm:$0xf] %v17246_v54  ;;  %v18397_v7 = vld [vmem:[#allocation4 + $0x360] ss:$36 sps:$4 sm:$0xff]   ;;  %v17348_v18 = vpack.c.bf16 %v11546_v29, %v11546_v29  ;;  %14100 = vmatpush2.bf16.msra.mxu1 %v21596_v10 }
 0x584   : > { %v17383_v15 = vpack.c.bf16 %v11761_v45, %v11761_v45  ;;  %v17384_v36 = vpack.c.bf16 %v11762_v42, %v11762_v42  ;;  %10435 = vst [vmem:[#allocation4 + $0x484] sm:$0xf] %v17137_v50  ;;  %10650 = vst [vmem:[#allocation4 + $0x464] sm:$0xf] %v17172_v11  ;;  %v18407_v35 = vld [vmem:[#allocation4 + $0x3ac] ss:$36 sps:$4 sm:$0xff]   ;;  %13671 = vmatmul.mubr.bf16.gmra.mxu0 %v18397_v7  ;;  %14101 = vmatprep.subr.bf16.mxu1 %v22018_v6 }
 0x585   : > { %10651 = vst [vmem:[#allocation4 + $0x488] sm:$0xf] %v17173_v44  ;;  %10864 = vst [vmem:[#allocation4 + $0x420] sm:$0xf] %v17172_v11  ;;  %v10041_v34 = vld [vmem:[#allocation3 + $0x110] sm:$0xff]  ;;  %13678 = vmatprep.mubr.bf16.mxu0 %v18407_v35  ;;  %v18461_v16 = vld [vmem:[%s21948_s3 + $0x1c8] sm:$0xff]  }
 0x586   : > { %10865 = vst [vmem:[#allocation4 + $0x444] sm:$0xf] %v17173_v44  ;;  %11295 = vst [vmem:[#allocation4 + $0x404] sm:$0xf] %v17277_v3  ;;  %v10257_v22 = vld [vmem:[#allocation3 + $0x111] sm:$0xff]  ;;  %v17103_v20 = vpack.c.bf16 %v10041_v34, %v10041_v34 }
 0x587   : > { %11296 = vst [vmem:[#allocation4 + $0x428] sm:$0xf] %v17278_v31  ;;  %11509 = vst [vmem:[#allocation4 + $0x3c0] sm:$0xf] %v17277_v3  ;;  %v10473_v23 = vld [vmem:[#allocation3 + $0x112] sm:$0xff]  ;;  %v17139_v39 = vpack.c.bf16 %v10257_v22, %v10257_v22  ;;  %v10690_v8 = vld [vmem:[#allocation3 + $0x12a] sm:$0xff]  ;;  %14102 = vmatpush2.bf16.msra.mxu1 %v18461_v16 }
 0x588   : > { %11510 = vst [vmem:[#allocation4 + $0x3e4] sm:$0xf] %v17278_v31  ;;  %11725 = vst [vmem:[#allocation4 + $0x3c4] sm:$0xf] %v17347_v62  ;;  %v18400_v21 = vld [vmem:[#allocation4 + $0x320] ss:$36 sps:$4 sm:$0xff]   ;;  %v17175_v56 = vpack.c.bf16 %v10473_v23, %v10473_v23  ;;  %v17212_v40 = vpack.c.bf16 %v10690_v8, %v10690_v8  ;;  %14103 = vmatprep.subr.bf16.mxu1 %v22018_v6 }
 0x589   : > { %11726 = vst [vmem:[#allocation4 + $0x3e8] sm:$0xf] %v17348_v18  ;;  %11941 = vst [vmem:[#allocation4 + $0x3c8] sm:$0xf] %v17383_v15  ;;  %v11118_v61 = vld [vmem:[#allocation3 + $0x10c] sm:$0xff]  ;;  %v11121_v5 = vld [vmem:[#allocation3 + $0x124] sm:$0xff]  ;;  %13840 = vmatmul.mubr.bf16.gmra.mxu1 %v18400_v21  ;;  %v21609_v21 = vpop.f32.mrf.mxu0 }
 0x58a   : > { %11942 = vst [vmem:[#allocation4 + $0x3ec] sm:$0xf] %v17384_v36  ;;  %v11548_v1 = vld [vmem:[#allocation3 + $0x10d] sm:$0xff]  ;;  %v17280_v14 = vpack.c.bf16 %v11118_v61, %v11118_v61  ;;  %10221 = vst [vmem:[#allocation4 + $0x4c8] sm:$0xf] %v17103_v20  ;;  %v17283_v55 = vpack.c.bf16 %v11121_v5, %v11121_v5  ;;  %v11551_v2 = vld [vmem:[#allocation3 + $0x125] sm:$0xff] }
 0x58b   : > { %v11764_v63 = vld [vmem:[#allocation3 + $0x10e] sm:$0xff]  ;;  %v17350_v47 = vpack.c.bf16 %v11548_v1, %v11548_v1  ;;  %10437 = vst [vmem:[#allocation4 + $0x4cc] sm:$0xf] %v17139_v39  ;;  %10653 = vst [vmem:[#allocation4 + $0x4d0] sm:$0xf] %v17175_v56  ;;  %v11767_v57 = vld [vmem:[#allocation3 + $0x126] sm:$0xff]  ;;  %v17353_v51 = vpack.c.bf16 %v11551_v2, %v11551_v2  ;;  %v13578_v39 = vpop.f32.mrf.mxu0 }
 0x58c   : > { %v18410_v49 = vld [vmem:[#allocation4 + $0x36c] ss:$36 sps:$4 sm:$0xff]   ;;  %v17386_v26 = vpack.c.bf16 %v11764_v63, %v11764_v63  ;;  %v11122_v13 = vld [vmem:[#allocation3 + $0x12c] sm:$0xff]  ;;  %10867 = vst [vmem:[#allocation4 + $0x48c] sm:$0xf] %v17175_v56  ;;  %v17389_v46 = vpack.c.bf16 %v11767_v57, %v11767_v57  ;;  %v10689_v17 = vld [vmem:[#allocation3 + $0x122] sm:$0xff] }
 0x58d   : > { %v17284_v32 = vpack.c.bf16 %v11122_v13, %v11122_v13  ;;  %v11552_v41 = vld [vmem:[#allocation3 + $0x12d] sm:$0xff]  ;;  %11298 = vst [vmem:[#allocation4 + $0x470] sm:$0xf] %v17280_v14  ;;  %11512 = vst [vmem:[#allocation4 + $0x42c] sm:$0xf] %v17280_v14  ;;  %v10042_v24 = vld [vmem:[#allocation3 + $0x118] sm:$0xff]  ;;  %13847 = vmatprep.mubr.bf16.mxu1 %v18410_v49  ;;  %v17211_v25 = vpack.c.bf16 %v10689_v17, %v10689_v17  ;;  %v21611_v1 = vpop.f32.mrf.mxu0 }
 0x58e   : > { %11728 = vst [vmem:[#allocation4 + $0x430] sm:$0xf] %v17350_v47  ;;  %11944 = vst [vmem:[#allocation4 + $0x434] sm:$0xf] %v17386_v26  ;;  %v17354_v37 = vpack.c.bf16 %v11552_v41, %v11552_v41  ;;  %v11768_v38 = vld [vmem:[#allocation3 + $0x12e] sm:$0xff]  ;;  %v10258_v48 = vld [vmem:[#allocation3 + $0x119] sm:$0xff]  ;;  %v17104_v27 = vpack.c.bf16 %v10042_v24, %v10042_v24 }
 0x58f   : > { %v17390_v30 = vpack.c.bf16 %v11768_v38, %v11768_v38  ;;  %10870 = vst [vmem:[#allocation4 + $0x4f8] sm:$0xf] %v17212_v40  ;;  %11301 = vst [vmem:[#allocation4 + $0x4dc] sm:$0xf] %v17283_v55  ;;  %v17140_v43 = vpack.c.bf16 %v10258_v48, %v10258_v48  ;;  %v10474_v28 = vld [vmem:[#allocation3 + $0x11a] sm:$0xff]  ;;  %v13581_v49 = vpop.f32.mrf.mxu0  ;;  %v18478_v47 = vld [vmem:[%s21948_s3 + $0x230] sm:$0xff]  }
 0x590   : > { %11302 = vst [vmem:[#allocation4 + $0x500] sm:$0xf] %v17284_v32  ;;  %11515 = vst [vmem:[#allocation4 + $0x498] sm:$0xf] %v17283_v55  ;;  %v11119_v53 = vld [vmem:[#allocation3 + $0x114] sm:$0xff]  ;;  %v17176_v58 = vpack.c.bf16 %v10474_v28, %v10474_v28  ;;  %v11120_v9 = vld [vmem:[#allocation3 + $0x11c] sm:$0xff] }
 0x591   : > { %11516 = vst [vmem:[#allocation4 + $0x4bc] sm:$0xf] %v17284_v32  ;;  %11731 = vst [vmem:[#allocation4 + $0x49c] sm:$0xf] %v17353_v51  ;;  %v17281_v60 = vpack.c.bf16 %v11119_v53, %v11119_v53  ;;  %v11549_v12 = vld [vmem:[#allocation3 + $0x115] sm:$0xff]  ;;  %v11550_v19 = vld [vmem:[#allocation3 + $0x11d] sm:$0xff]  ;;  %v17282_v59 = vpack.c.bf16 %v11120_v9, %v11120_v9 }
 0x592   : > { %11732 = vst [vmem:[#allocation4 + $0x4c0] sm:$0xf] %v17354_v37  ;;  %11947 = vst [vmem:[#allocation4 + $0x4a0] sm:$0xf] %v17389_v46  ;;  %v17351_v54 = vpack.c.bf16 %v11549_v12, %v11549_v12  ;;  %v17352_v50 = vpack.c.bf16 %v11550_v19, %v11550_v19  ;;  %v11765_v11 = vld [vmem:[#allocation3 + $0x116] sm:$0xff]  ;;  %v11766_v44 = vld [vmem:[#allocation3 + $0x11e] sm:$0xff] }
 0x593   : > { %11948 = vst [vmem:[#allocation4 + $0x4c4] sm:$0xf] %v17390_v30  ;;  %10222 = vst [vmem:[#allocation4 + $0x4ec] sm:$0xf] %v17104_v27  ;;  %v17387_v4 = vpack.c.bf16 %v11765_v11, %v11765_v11  ;;  %v17388_v52 = vpack.c.bf16 %v11766_v44, %v11766_v44  ;;  %v18405_v0 = vld [vmem:[#allocation4 + $0x3a8] ss:$36 sps:$4 sm:$0xff]  }
 0x594   : > { %10438 = vst [vmem:[#allocation4 + $0x4f0] sm:$0xf] %v17140_v43  ;;  %10654 = vst [vmem:[#allocation4 + $0x4f4] sm:$0xf] %v17176_v58  ;;  %v18415_v3 = vld [vmem:[#allocation4 + $0x3f4] ss:$36 sps:$4 sm:$0xff]   ;;  %13679 = vmatmul.mubr.bf16.gmra.mxu0 %v18405_v0 }
 0x595   : > { %10868 = vst [vmem:[#allocation4 + $0x4b0] sm:$0xf] %v17176_v58  ;;  %10869 = vst [vmem:[#allocation4 + $0x4d4] sm:$0xf] %v17211_v25  ;;  %v18408_v31 = vld [vmem:[#allocation4 + $0x368] ss:$36 sps:$4 sm:$0xff]   ;;  %13686 = vmatprep.mubr.bf16.mxu0 %v18415_v3 }
 0x596   : > { %11299 = vst [vmem:[#allocation4 + $0x494] sm:$0xf] %v17281_v60  ;;  %11513 = vst [vmem:[#allocation4 + $0x450] sm:$0xf] %v17281_v60  ;;  %v18418_v29 = vld [vmem:[#allocation4 + $0x3b4] ss:$36 sps:$4 sm:$0xff]   ;;  %13848 = vmatmul.mubr.bf16.gmra.mxu1 %v18408_v31 }
 0x597   : > { %11300 = vst [vmem:[#allocation4 + $0x4b8] sm:$0xf] %v17282_v59  ;;  %11514 = vst [vmem:[#allocation4 + $0x474] sm:$0xf] %v17282_v59  ;;  %13855 = vmatprep.mubr.bf16.mxu1 %v18418_v29  ;;  %v18465_v62 = vld [vmem:[%s21948_s3 + $0x1c0] sm:$0xff]   ;;  %v18491_v13 = vld [vmem:[%s21948_s3 + $0x228] sm:$0xff]  }
 0x598   : > { %11729 = vst [vmem:[#allocation4 + $0x454] sm:$0xf] %v17351_v54  ;;  %11730 = vst [vmem:[#allocation4 + $0x478] sm:$0xf] %v17352_v50  ;;  %14104 = vmatpush2.bf16.msra.mxu1 %v18465_v62  ;;  %v18413_v45 = vld [vmem:[#allocation4 + $0x3f0] ss:$36 sps:$4 sm:$0xff]  }
 0x599   : > { %11945 = vst [vmem:[#allocation4 + $0x458] sm:$0xf] %v17387_v4  ;;  %11946 = vst [vmem:[#allocation4 + $0x47c] sm:$0xf] %v17388_v52  ;;  %v18424_v42 = vld [vmem:[#allocation4 + $0x43c] ss:$36 sps:$4 sm:$0xff]  }
 0x59a   : > { %v18416_v7 = vld [vmem:[#allocation4 + $0x3b0] ss:$36 sps:$4 sm:$0xff]   ;;  %v18427_v18 = vld [vmem:[#allocation4 + $0x3fc] ss:$36 sps:$4 sm:$0xff]   ;;  %v18433_v36 = vld [vmem:[#allocation4 + $0x484] ss:$36 sps:$4 sm:$0xff]  }
 0x59b   : > { %v18422_v15 = vld [vmem:[#allocation4 + $0x438] ss:$36 sps:$4 sm:$0xff]   ;;  %v18436_v35 = vld [vmem:[#allocation4 + $0x444] ss:$36 sps:$4 sm:$0xff]   ;;  %v18442_v34 = vld [vmem:[#allocation4 + $0x4cc] ss:$36 sps:$4 sm:$0xff]  }
 0x59c   : > { %13687 = vmatmul.mubr.bf16.gmra.mxu0 %v18413_v45  ;;  %v18425_v6 = vld [vmem:[#allocation4 + $0x3f8] ss:$36 sps:$4 sm:$0xff]   ;;  %v18431_v10 = vld [vmem:[#allocation4 + $0x480] ss:$36 sps:$4 sm:$0xff]   ;;  %v18445_v23 = vld [vmem:[#allocation4 + $0x48c] ss:$36 sps:$4 sm:$0xff]  }
 0x59d   : > { %13694 = vmatprep.mubr.bf16.mxu0 %v18424_v42  ;;  %v18434_v22 = vld [vmem:[#allocation4 + $0x440] ss:$36 sps:$4 sm:$0xff]   ;;  %v18440_v20 = vld [vmem:[#allocation4 + $0x4c8] ss:$36 sps:$4 sm:$0xff]   ;;  %v18454_v56 = vld [vmem:[#allocation4 + $0x14] ss:$36 sps:$4 sm:$0xff]  }
 0x59e   : > { %13856 = vmatmul.mubr.bf16.gmra.mxu1 %v18416_v7  ;;  %v18443_v61 = vld [vmem:[#allocation4 + $0x488] ss:$36 sps:$4 sm:$0xff]   ;;  %v18451_v63 = vld [vmem:[#allocation4 + $0x4d4] ss:$36 sps:$4 sm:$0xff]   ;;  %v18460_v26 = vld [vmem:[#allocation4 + $0x5c] ss:$36 sps:$4 sm:$0xff]  }
 0x59f   : > { %13863 = vmatprep.mubr.bf16.mxu1 %v18427_v18  ;;  %v18452_v14 = vld [vmem:[#allocation4 + $0x10] ss:$36 sps:$4 sm:$0xff]   ;;  %v18464_v5 = vld [vmem:[#allocation4 + $0x1c] ss:$36 sps:$4 sm:$0xff]   ;;  %v18468_v32 = vld [vmem:[#allocation4 + $0xa4] ss:$36 sps:$4 sm:$0xff]  }
 0x5a0   : > { %v18449_v8 = vld [vmem:[#allocation4 + $0x4d0] ss:$36 sps:$4 sm:$0xff]   ;;  %v18458_v40 = vld [vmem:[#allocation4 + $0x58] ss:$36 sps:$4 sm:$0xff]   ;;  %v18471_v41 = vld [vmem:[#allocation4 + $0x64] ss:$36 sps:$4 sm:$0xff]  }
 0x5a1   : > { %v18504_v55 = vld [vmem:[%s21948_s3 + $0x220] sm:$0xff]   ;;  %v18462_v2 = vld [vmem:[#allocation4 + $0x18] ss:$36 sps:$4 sm:$0xff]   ;;  %v18466_v57 = vld [vmem:[#allocation4 + $0xa0] ss:$36 sps:$4 sm:$0xff]  }
 0x5a2   : > { %v18536_v16 = vld [vmem:[%s21948_s3 + $0x210] sm:$0xff]   ;;  %v18474_v51 = vld [vmem:[#allocation4 + $0xec] ss:$36 sps:$4 sm:$0xff]   ;;  %v18549_v46 = vld [vmem:[%s21948_s3 + $0x208] sm:$0xff]  }
 0x5a3   : > { %v18469_v37 = vld [vmem:[#allocation4 + $0x60] ss:$36 sps:$4 sm:$0xff]   ;;  %v18477_v38 = vld [vmem:[#allocation4 + $0xac] ss:$36 sps:$4 sm:$0xff]   ;;  %v18481_v30 = vld [vmem:[#allocation4 + $0x134] ss:$36 sps:$4 sm:$0xff]  }
 0x5a4   : > { %13695 = vmatmul.mubr.bf16.gmra.mxu0 %v18422_v15  ;;  %v18472_v24 = vld [vmem:[#allocation4 + $0xe8] ss:$36 sps:$4 sm:$0xff]   ;;  %v18562_v48 = vld [vmem:[%s21948_s3 + $0x200] sm:$0xff]   ;;  %v18487_v17 = vld [vmem:[#allocation4 + $0x17c] ss:$36 sps:$4 sm:$0xff]  }
 0x5a5   : > { %13702 = vmatprep.mubr.bf16.mxu0 %v18433_v36  ;;  %v18475_v27 = vld [vmem:[#allocation4 + $0xa8] ss:$36 sps:$4 sm:$0xff]   ;;  %v18484_v43 = vld [vmem:[#allocation4 + $0xf4] ss:$36 sps:$4 sm:$0xff]   ;;  %v18490_v58 = vld [vmem:[#allocation4 + $0x13c] ss:$36 sps:$4 sm:$0xff]  }
 0x5a6   : > { %13864 = vmatmul.mubr.bf16.gmra.mxu1 %v18425_v6  ;;  %v18479_v28 = vld [vmem:[#allocation4 + $0x130] ss:$36 sps:$4 sm:$0xff]   ;;  %v18485_v25 = vld [vmem:[#allocation4 + $0x178] ss:$36 sps:$4 sm:$0xff]   ;;  %v18494_v9 = vld [vmem:[#allocation4 + $0x1c4] ss:$36 sps:$4 sm:$0xff]  }
 0x5a7   : > { %13871 = vmatprep.mubr.bf16.mxu1 %v18436_v35  ;;  %v18482_v53 = vld [vmem:[#allocation4 + $0xf0] ss:$36 sps:$4 sm:$0xff]   ;;  %v18488_v60 = vld [vmem:[#allocation4 + $0x138] ss:$36 sps:$4 sm:$0xff]   ;;  %v18497_v12 = vld [vmem:[#allocation4 + $0x184] ss:$36 sps:$4 sm:$0xff]  }
 0x5a8   : > { %v18492_v19 = vld [vmem:[#allocation4 + $0x1c0] ss:$36 sps:$4 sm:$0xff]   ;;  %v18500_v59 = vld [vmem:[#allocation4 + $0x20c] ss:$36 sps:$4 sm:$0xff]   ;;  %v18507_v62 = vld [vmem:[#allocation4 + $0x254] ss:$36 sps:$4 sm:$0xff]  }
 0x5a9   : > { %v18495_v54 = vld [vmem:[#allocation4 + $0x180] ss:$36 sps:$4 sm:$0xff]   ;;  %v21638_v50 = vld [vmem:[%s21949_s4] ss:$0 sm:$0xff]  ;;  %v18498_v3 = vld [vmem:[#allocation4 + $0x208] ss:$36 sps:$4 sm:$0xff]  }
 0x5aa   : > { %v18503_v11 = vld [vmem:[#allocation4 + $0x1cc] ss:$36 sps:$4 sm:$0xff]   ;;  %v13577_v4 = vadd.f32 %v21638_v50, %v21609_v21  ;;  %v13580_v42 = vadd.f32 %v21638_v50, %v21611_v1  ;;  %v18510_v15 = vld [vmem:[#allocation4 + $0x214] ss:$36 sps:$4 sm:$0xff]   ;;  %v18516_v39 = vld [vmem:[#allocation4 + $0x25c] ss:$36 sps:$4 sm:$0xff]  }
 0x5ab   : > { %v18501_v7 = vld [vmem:[#allocation4 + $0x1c8] ss:$36 sps:$4 sm:$0xff]   ;;  %v18508_v21 = vld [vmem:[#allocation4 + $0x210] ss:$36 sps:$4 sm:$0xff]  }
 0x5ac   : > { %13703 = vmatmul.mubr.bf16.gmra.mxu0 %v18431_v10 }
 0x5ad   : > { %13710 = vmatprep.mubr.bf16.mxu0 %v18442_v34  ;;  %v18505_v34 = vld [vmem:[#allocation4 + $0x250] ss:$36 sps:$4 sm:$0xff]  }
 0x5ae   : > { %13872 = vmatmul.mubr.bf16.gmra.mxu1 %v18434_v22  ;;  %v18513_v22 = vld [vmem:[#allocation4 + $0x29c] ss:$36 sps:$4 sm:$0xff]  }
 0x5af   : > { %13879 = vmatprep.mubr.bf16.mxu1 %v18445_v23 }
 0x5b4   : > { %13711 = vmatmul.mubr.bf16.gmra.mxu0 %v18440_v20 }
 0x5b5   : > { %13928 = vmatprep.mubr.bf16.mxu0 %v18454_v56 }
 0x5b6   : > { %13880 = vmatmul.mubr.bf16.gmra.mxu1 %v18443_v61 }
 0x5b7   : > { %13887 = vmatprep.mubr.bf16.mxu1 %v18451_v63 }
 0x5ba   : > { %v13584_v44 = vpop.f32.mrf.mxu0 }
 0x5bb   : > { %v13585_v20 = vadd.f32 %v21638_v50, %v13584_v44 }
 0x5bc   : > { %13929 = vmatmul.mubr.bf16.vlgmr.msra.gmra.mxu0 %v18452_v14  ;;  %v13586_v52 = vpop.f32.mrf.mxu0 }
 0x5bd   : > { %13936 = vmatprep.mubr.bf16.mxu0 %v18460_v26  ;;  %17576 = vmatpush3.bf16.msra.mxu0 %v21585_v33  ;;  %v18517_v33 = vld [vmem:[%s21948_s3 + $0x218] sm:$0xff]   ;;  %v18511_v26 = vld [vmem:[#allocation4 + $0x298] ss:$36 sps:$4 sm:$0xff]  }
 0x5be   : > { %13888 = vmatmul.mubr.bf16.gmra.mxu1 %v18449_v8  ;;  %17577 = vmatprep.subr.bf16.mxu0 %v18478_v47  ;;  %v13587_v29 = vpop.f32.mrf.mxu0  ;;  %v18527_v52 = vld [vmem:[#allocation4 + $0x2e8] ss:$36 sps:$4 sm:$0xff]  }
 0x5bf   : > { %14105 = vmatprep.mubr.bf16.mxu1 %v18464_v5  ;;  %v13588_v14 = vadd.f32 %v21638_v50, %v13587_v29 }
 0x5c0   : > { %v13589_v18 = vpop.f32.mrf.mxu0 }
 0x5c1   : > { %17578 = vmatpush3.bf16.msra.mxu0 %v18478_v47 }
 0x5c2   : > { %17579 = vmatprep.subr.bf16.mxu0 %v18491_v13  ;;  %v13753_v0 = vpop.f32.mrf.mxu1 }
 0x5c3   : > { %v21642_v31 = vadd.f32 %v13753_v0, %v13577_v4  ;;  %v18532_v4 = vld [vmem:[#allocation4 + $0x374] ss:$36 sps:$4 sm:$0xff]  }
 0x5c4   : > { %13937 = vmatmul.mubr.bf16.gmra.mxu0 %v18458_v40  ;;  %v13755_v45 = vpop.f32.mrf.mxu1 }
 0x5c5   : > { %13944 = vmatprep.mubr.bf16.mxu0 %v18468_v32  ;;  %17580 = vmatpush3.bf16.msra.mxu0 %v18491_v13  ;;  %v18520_v13 = vld [vmem:[#allocation4 + $0x2e4] ss:$36 sps:$4 sm:$0xff]  }
 0x5c6   : > { %14106 = vmatmul.mubr.bf16.vlgmr.msra.gmra.mxu1 %v18462_v2  ;;  %17581 = vmatprep.subr.bf16.mxu0 %v18504_v55  ;;  %v13756_v36 = vpop.f32.mrf.mxu1 }
 0x5c7   : > { %14113 = vmatprep.mubr.bf16.mxu1 %v18471_v41  ;;  %v21646_v6 = vadd.f32 %v13756_v36, %v13580_v42  ;;  %v18523_v41 = vld [vmem:[#allocation4 + $0x2a4] ss:$36 sps:$4 sm:$0xff]  }
 0x5c8   : > { %v13758_v35 = vpop.f32.mrf.mxu1 }
 0x5c9   : > { %17582 = vmatpush3.bf16.msra.mxu0 %v18504_v55  ;;  %v18514_v55 = vld [vmem:[#allocation4 + $0x258] ss:$36 sps:$4 sm:$0xff]   ;;  %v18530_v35 = vld [vmem:[#allocation4 + $0x370] ss:$36 sps:$4 sm:$0xff]  }
 0x5ca   : > { %17583 = vmatprep.subr.bf16.mxu0 %v18517_v33 }
 0x5cc   : > { %13945 = vmatmul.mubr.bf16.gmra.mxu0 %v18466_v57 }
 0x5cd   : > { %13952 = vmatprep.mubr.bf16.mxu0 %v18474_v51  ;;  %17584 = vmatpush3.bf16.msra.mxu0 %v18517_v33 }
 0x5ce   : > { %14114 = vmatmul.mubr.bf16.gmra.mxu1 %v18469_v37  ;;  %17585 = vmatprep.subr.bf16.mxu0 %v18536_v16 }
 0x5cf   : > { %14121 = vmatprep.mubr.bf16.mxu1 %v18477_v38 }
 0x5d0   : > { %v13592_v10 = vpop.f32.mrf.mxu0 }
 0x5d1   : > { %17586 = vmatpush3.bf16.msra.mxu0 %v18536_v16  ;;  %v13593_v2 = vadd.f32 %v21638_v50, %v13592_v10 }
 0x5d2   : > { %17587 = vmatprep.subr.bf16.mxu0 %v18549_v46  ;;  %v13594_v23 = vpop.f32.mrf.mxu0 }
 0x5d3   : > { %v18539_v23 = vld [vmem:[#allocation4 + $0x3bc] ss:$36 sps:$4 sm:$0xff]  }
 0x5d4   : > { %13953 = vmatmul.mubr.bf16.gmra.mxu0 %v18472_v24  ;;  %v13595_v56 = vpop.f32.mrf.mxu0  ;;  %v18518_v24 = vld [vmem:[#allocation4 + $0x2e0] ss:$36 sps:$4 sm:$0xff]  }
 0x5d5   : > { %13960 = vmatprep.mubr.bf16.mxu0 %v18481_v30  ;;  %17588 = vmatpush3.bf16.msra.mxu0 %v18549_v46  ;;  %v13596_v38 = vadd.f32 %v21638_v50, %v13595_v56 }
 0x5d6   : > { %14122 = vmatmul.mubr.bf16.gmra.mxu1 %v18475_v27  ;;  %17589 = vmatprep.subr.bf16.mxu0 %v18562_v48  ;;  %v13597_v63 = vpop.f32.mrf.mxu0  ;;  %v18526_v27 = vld [vmem:[#allocation4 + $0x32c] ss:$36 sps:$4 sm:$0xff]  }
 0x5d7   : > { %14129 = vmatprep.mubr.bf16.mxu1 %v18484_v43 }
 0x5d9   : > { %17590 = vmatpush3.bf16.msra.mxu0 %v18562_v48 }
 0x5da   : > { %v13761_v61 = vpop.f32.mrf.mxu1 }
 0x5db   : > { %v21649_v1 = vadd.f32 %v13761_v61, %v13585_v20  ;;  %v18542_v61 = vld [vmem:[#allocation4 + $0x37c] ss:$36 sps:$4 sm:$0xff]  }
 0x5dc   : > { %13961 = vmatmul.mubr.bf16.gmra.mxu0 %v18479_v28  ;;  %v13763_v49 = vpop.f32.mrf.mxu1  ;;  %v18521_v28 = vld [vmem:[#allocation4 + $0x2a0] ss:$36 sps:$4 sm:$0xff]  }
 0x5dd   : > { %13968 = vmatprep.mubr.bf16.mxu0 %v18487_v17 }
 0x5de   : > { %14130 = vmatmul.mubr.bf16.gmra.mxu1 %v18482_v53  ;;  %v13764_v8 = vpop.f32.mrf.mxu1 }
 0x5df   : > { %14137 = vmatprep.mubr.bf16.mxu1 %v18490_v58  ;;  %v13600_v47 = vpop.f32.mrf.mxu0  ;;  %v21652_v5 = vadd.f32 %v13764_v8, %v13588_v14  ;;  %v18529_v58 = vld [vmem:[#allocation4 + $0x2ec] ss:$36 sps:$4 sm:$0xff]  }
 0x5e0   : > { %v13766_v32 = vpop.f32.mrf.mxu1  ;;  %v13601_v53 = vadd.f32 %v21638_v50, %v13600_v47 }
 0x5e1   : > { %v13602_v40 = vpop.f32.mrf.mxu0 }
 0x5e2   : > { %v13769_v57 = vpop.f32.mrf.mxu1 }
 0x5e3   : > { %v13603_v33 = vpop.f32.mrf.mxu0  ;;  %v21655_v16 = vadd.f32 %v13769_v57, %v13593_v2  ;;  %v18545_v2 = vld [vmem:[#allocation4 + $0x404] ss:$36 sps:$4 sm:$0xff]  }
 0x5e4   : > { %13969 = vmatmul.mubr.bf16.gmra.mxu0 %v18485_v25  ;;  %v13771_v37 = vpop.f32.mrf.mxu1 }
 0x5e5   : > { %13976 = vmatprep.mubr.bf16.mxu0 %v18494_v9  ;;  %v13605_v51 = vpop.f32.mrf.mxu0  ;;  %v18548_v37 = vld [vmem:[#allocation4 + $0x3c4] ss:$36 sps:$4 sm:$0xff]  }
 0x5e6   : > { %14138 = vmatmul.mubr.bf16.gmra.mxu1 %v18488_v60  ;;  %v13772_v48 = vpop.f32.mrf.mxu1 }
 0x5e7   : > { %14145 = vmatprep.mubr.bf16.mxu1 %v18497_v12  ;;  %v13608_v46 = vpop.f32.mrf.mxu0  ;;  %v21658_v30 = vadd.f32 %v13772_v48, %v13596_v38 }
 0x5e8   : > { %v13774_v17 = vpop.f32.mrf.mxu1  ;;  %v13609_v29 = vadd.f32 %v21638_v50, %v13608_v46 }
 0x5e9   : > { %v13610_v43 = vpop.f32.mrf.mxu0 }
 0x5eb   : > { %v13611_v25 = vpop.f32.mrf.mxu0 }
 0x5ec   : > { %13977 = vmatmul.mubr.bf16.gmra.mxu0 %v18492_v19  ;;  %v13612_v36 = vadd.f32 %v21638_v50, %v13611_v25  ;;  %v18552_v25 = vld [vmem:[#allocation4 + $0x44c] ss:$36 sps:$4 sm:$0xff]  }
 0x5ed   : > { %13984 = vmatprep.mubr.bf16.mxu0 %v18500_v59  ;;  %v13613_v12 = vpop.f32.mrf.mxu0  ;;  %v13604_v59 = vadd.f32 %v21638_v50, %v13603_v33 }
 0x5ee   : > { %14146 = vmatmul.mubr.bf16.gmra.mxu1 %v18495_v54  ;;  %v18524_v54 = vld [vmem:[#allocation4 + $0x328] ss:$36 sps:$4 sm:$0xff]  }
 0x5ef   : > { %14153 = vmatprep.mubr.bf16.mxu1 %v18503_v11 }
 0x5f4   : > { %13985 = vmatmul.mubr.bf16.gmra.mxu0 %v18498_v3  ;;  %v13777_v9 = vpop.f32.mrf.mxu1 }
 0x5f5   : > { %13992 = vmatprep.mubr.bf16.mxu0 %v18507_v62  ;;  %v21661_v60 = vadd.f32 %v13777_v9, %v13601_v53  ;;  %v18535_v62 = vld [vmem:[#allocation4 + $0x334] ss:$36 sps:$4 sm:$0xff]   ;;  %v18546_v9 = vld [vmem:[#allocation4 + $0x3c0] ss:$36 sps:$4 sm:$0xff]  }
 0x5f6   : > { %14154 = vmatmul.mubr.bf16.gmra.mxu1 %v18501_v7  ;;  %v13779_v19 = vpop.f32.mrf.mxu1 }
 0x5f7   : > { %14161 = vmatprep.mubr.bf16.mxu1 %v18510_v15 }
 0x5f8   : > { %v13780_v11 = vpop.f32.mrf.mxu1 }
 0x5f9   : > { %v21664_v44 = vadd.f32 %v13780_v11, %v13604_v59 }
 0x5fa   : > { %v13782_v0 = vpop.f32.mrf.mxu1 }
 0x5fc   : > { %13993 = vmatmul.mubr.bf16.gmra.mxu0 %v18505_v34 }
 0x5fd   : > { %14000 = vmatprep.mubr.bf16.mxu0 %v18513_v22 }
 0x5fe   : > { %14162 = vmatmul.mubr.bf16.gmra.mxu1 %v18508_v21  ;;  %v18533_v21 = vld [vmem:[#allocation4 + $0x330] ss:$36 sps:$4 sm:$0xff]  }
 0x5ff   : > { %14169 = vmatprep.mubr.bf16.mxu1 %v18516_v39 }
 0x601   : > { %v13616_v3 = vpop.f32.mrf.mxu0 }
 0x602   : > { %v13617_v56 = vadd.f32 %v21638_v50, %v13616_v3 }
 0x603   : > { %v13785_v45 = vpop.f32.mrf.mxu1  ;;  %v13618_v42 = vpop.f32.mrf.mxu0 }
 0x604   : > { %14001 = vmatmul.mubr.bf16.gmra.mxu0 %v18511_v26  ;;  %v21667_v7 = vadd.f32 %v13785_v45, %v13609_v29 }
 0x605   : > { %14008 = vmatprep.mubr.bf16.mxu0 %v18520_v13  ;;  %v13787_v18 = vpop.f32.mrf.mxu1  ;;  %v13619_v15 = vpop.f32.mrf.mxu0  ;;  %v18537_v13 = vld [vmem:[#allocation4 + $0x3b8] ss:$36 sps:$4 sm:$0xff]  }
 0x606   : > { %14170 = vmatmul.mubr.bf16.gmra.mxu1 %v18514_v55  ;;  %v13620_v8 = vadd.f32 %v21638_v50, %v13619_v15  ;;  %v18558_v15 = vld [vmem:[#allocation4 + $0x494] ss:$36 sps:$4 sm:$0xff]  }
 0x607   : > { %14177 = vmatprep.mubr.bf16.mxu1 %v18523_v41  ;;  %v13788_v10 = vpop.f32.mrf.mxu1  ;;  %v13621_v34 = vpop.f32.mrf.mxu0  ;;  %v18540_v41 = vld [vmem:[#allocation4 + $0x378] ss:$36 sps:$4 sm:$0xff]  }
 0x608   : > { %v21670_v22 = vadd.f32 %v13788_v10, %v13612_v36  ;;  %v18553_v36 = vld [vmem:[#allocation4 + $0x408] ss:$36 sps:$4 sm:$0xff]  }
 0x609   : > { %v13790_v20 = vpop.f32.mrf.mxu1  ;;  %v13624_v39 = vpop.f32.mrf.mxu0 }
 0x60a   : > { %v13625_v51 = vadd.f32 %v21638_v50, %v13624_v39 }
 0x60b   : > { %v13793_v63 = vpop.f32.mrf.mxu1  ;;  %v13626_v49 = vpop.f32.mrf.mxu0 }
 0x60c   : > { %14009 = vmatmul.mubr.bf16.gmra.mxu0 %v18518_v24  ;;  %v21673_v14 = vadd.f32 %v13793_v63, %v13617_v56  ;;  %v18556_v49 = vld [vmem:[#allocation4 + $0x490] ss:$36 sps:$4 sm:$0xff]  }
 0x60d   : > { %14016 = vmatprep.mubr.bf16.mxu0 %v18526_v27  ;;  %v13795_v47 = vpop.f32.mrf.mxu1  ;;  %v13627_v26 = vpop.f32.mrf.mxu0 }
 0x60e   : > { %14178 = vmatmul.mubr.bf16.gmra.mxu1 %v18521_v28  ;;  %v13628_v43 = vadd.f32 %v21638_v50, %v13627_v26  ;;  %v18543_v28 = vld [vmem:[#allocation4 + $0x400] ss:$36 sps:$4 sm:$0xff]  }
 0x60f   : > { %14185 = vmatprep.mubr.bf16.mxu1 %v18529_v58  ;;  %v13796_v40 = vpop.f32.mrf.mxu1  ;;  %v13629_v55 = vpop.f32.mrf.mxu0 }
 0x610   : > { %v21676_v32 = vadd.f32 %v13796_v40, %v13620_v8  ;;  %v18559_v40 = vld [vmem:[#allocation4 + $0x450] ss:$36 sps:$4 sm:$0xff]  }
 0x611   : > { %v13798_v33 = vpop.f32.mrf.mxu1  ;;  %v13632_v57 = vpop.f32.mrf.mxu0 }
 0x612   : > { %v13633_v59 = vadd.f32 %v21638_v50, %v13632_v57  ;;  %v18568_v33 = vld [vmem:[#allocation4 + $0x49c] ss:$36 sps:$4 sm:$0xff]  }
 0x613   : > { %v13801_v38 = vpop.f32.mrf.mxu1  ;;  %v13634_v46 = vpop.f32.mrf.mxu0 }
 0x614   : > { %14017 = vmatmul.mubr.bf16.gmra.mxu0 %v18524_v54  ;;  %v21679_v24 = vadd.f32 %v13801_v38, %v13625_v51  ;;  %v18555_v54 = vld [vmem:[#allocation4 + $0x40c] ss:$36 sps:$4 sm:$0xff]  }
 0x615   : > { %14024 = vmatprep.mubr.bf16.mxu0 %v18532_v4  ;;  %v13803_v48 = vpop.f32.mrf.mxu1  ;;  %v13635_v27 = vpop.f32.mrf.mxu0 }
 0x616   : > { %14186 = vmatmul.mubr.bf16.gmra.mxu1 %v18527_v52  ;;  %v13636_v29 = vadd.f32 %v21638_v50, %v13635_v27  ;;  %v18563_v27 = vld [vmem:[#allocation4 + $0x4d8] ss:$36 sps:$4 sm:$0xff]  }
 0x617   : > { %14193 = vmatprep.mubr.bf16.mxu1 %v18535_v62  ;;  %v13804_v17 = vpop.f32.mrf.mxu1  ;;  %v13637_v53 = vpop.f32.mrf.mxu0  ;;  %v18550_v62 = vld [vmem:[#allocation4 + $0x448] ss:$36 sps:$4 sm:$0xff]  }
 0x618   : > { %v21682_v58 = vadd.f32 %v13804_v17, %v13628_v43  ;;  %v18569_v53 = vld [vmem:[#allocation4 + $0x20] ss:$36 sps:$4 sm:$0xff]  }
 0x619   : > { %v13806_v12 = vpop.f32.mrf.mxu1  ;;  %v13640_v19 = vpop.f32.mrf.mxu0 }
 0x61a   : > { %v13641_v34 = vadd.f32 %v21638_v50, %v13640_v19 }
 0x61b   : > { %v13642_v4 = vpop.f32.mrf.mxu0 }
 0x61c   : > { %14025 = vmatmul.mubr.bf16.gmra.mxu0 %v18530_v35  ;;  %v13809_v11 = vpop.f32.mrf.mxu1 }
 0x61d   : > { %14032 = vmatprep.mubr.bf16.mxu0 %v18539_v23  ;;  %v21685_v52 = vadd.f32 %v13809_v11, %v13633_v59  ;;  %v13643_v3 = vpop.f32.mrf.mxu0  ;;  %v18561_v23 = vld [vmem:[#allocation4 + $0x454] ss:$36 sps:$4 sm:$0xff]  }
 0x61e   : > { %14194 = vmatmul.mubr.bf16.gmra.mxu1 %v18533_v21  ;;  %v13811_v0 = vpop.f32.mrf.mxu1  ;;  %v13644_v63 = vadd.f32 %v21638_v50, %v13643_v3 }
 0x61f   : > { %14201 = vmatprep.mubr.bf16.mxu1 %v18542_v61  ;;  %v13645_v42 = vpop.f32.mrf.mxu0 }
 0x620   : > { %v13812_v45 = vpop.f32.mrf.mxu1  ;;  %v18570_v42 = vld [vmem:[#allocation4 + $0x4e0] ss:$36 sps:$4 sm:$0xff]  }
 0x621   : > { %v21688_v18 = vadd.f32 %v13812_v45, %v13636_v29 }
 0x622   : > { %v13814_v35 = vpop.f32.mrf.mxu1 }
 0x623   : > { %v18574_v35 = vld [vmem:[#allocation4 + $0xb0] ss:$36 sps:$4 sm:$0xff]  }
 0x624   : > { %14033 = vmatmul.mubr.bf16.gmra.mxu0 %v18537_v13  ;;  %v18565_v13 = vld [vmem:[#allocation4 + $0x4dc] ss:$36 sps:$4 sm:$0xff]  }
 0x625   : > { %14040 = vmatprep.mubr.bf16.mxu0 %v18545_v2 }
 0x626   : > { %14202 = vmatmul.mubr.bf16.gmra.mxu1 %v18540_v41 }
 0x627   : > { %14209 = vmatprep.mubr.bf16.mxu1 %v18548_v37 }
 0x629   : > { %v13648_v10 = vpop.f32.mrf.mxu0 }
 0x62a   : > { %v13649_v41 = vadd.f32 %v21638_v50, %v13648_v10 }
 0x62b   : > { %v13650_v20 = vpop.f32.mrf.mxu0 }
 0x62c   : > { %14041 = vmatmul.mubr.bf16.gmra.mxu0 %v18543_v28  ;;  %v13817_v21 = vpop.f32.mrf.mxu1 }
 0x62d   : > { %14048 = vmatprep.mubr.bf16.mxu0 %v18552_v25  ;;  %v21691_v39 = vadd.f32 %v13817_v21, %v13641_v34  ;;  %v13651_v61 = vpop.f32.mrf.mxu0  ;;  %v18572_v25 = vld [vmem:[#allocation4 + $0x4e4] ss:$36 sps:$4 sm:$0xff]  }
 0x62e   : > { %14210 = vmatmul.mubr.bf16.gmra.mxu1 %v18546_v9  ;;  %v13819_v56 = vpop.f32.mrf.mxu1  ;;  %v13652_v48 = vadd.f32 %v21638_v50, %v13651_v61  ;;  %v18566_v9 = vld [vmem:[#allocation4 + $0x498] ss:$36 sps:$4 sm:$0xff]  }
 0x62f   : > { %14217 = vmatprep.mubr.bf16.mxu1 %v18555_v54  ;;  %v13653_v26 = vpop.f32.mrf.mxu0 }
 0x630   : > { %v13820_v47 = vpop.f32.mrf.mxu1 }
 0x631   : > { %v21694_v8 = vadd.f32 %v13820_v47, %v13644_v63 }
 0x632   : > { %v13822_v55 = vpop.f32.mrf.mxu1 }
 0x633   : > { %v13656_v2 = vpop.f32.mrf.mxu0  ;;  %v18576_v55 = vld [vmem:[#allocation4 + $0x140] ss:$36 sps:$4 sm:$0xff]  }
 0x634   : > { %14049 = vmatmul.mubr.bf16.gmra.mxu0 %v18550_v62  ;;  %v13657_v59 = vadd.f32 %v21638_v50, %v13656_v2 }
 0x635   : > { %14056 = vmatprep.mubr.bf16.mxu0 %v18558_v15  ;;  %v13825_v57 = vpop.f32.mrf.mxu1  ;;  %v13658_v51 = vpop.f32.mrf.mxu0  ;;  %v18573_v15 = vld [vmem:[#allocation4 + $0x68] ss:$36 sps:$4 sm:$0xff]  }
 0x636   : > { %14218 = vmatmul.mubr.bf16.gmra.mxu1 %v18553_v36  ;;  %v21697_v37 = vadd.f32 %v13825_v57, %v13649_v41 }
 0x637   : > { %14225 = vmatprep.mubr.bf16.mxu1 %v18561_v23  ;;  %v13827_v38 = vpop.f32.mrf.mxu1  ;;  %v13659_v46 = vpop.f32.mrf.mxu0 }
 0x638   : > { %v13660_v29 = vadd.f32 %v21638_v50, %v13659_v46 }
 0x639   : > { %v13828_v43 = vpop.f32.mrf.mxu1  ;;  %v13661_v28 = vpop.f32.mrf.mxu0 }
 0x63a   : > { %v21700_v17 = vadd.f32 %v13828_v43, %v13652_v48 }
 0x63b   : > { %v13830_v12 = vpop.f32.mrf.mxu1  ;;  %v13664_v19 = vpop.f32.mrf.mxu0 }
 0x63c   : > { %14057 = vmatmul.mubr.bf16.gmra.mxu0 %v18556_v49  ;;  %v13665_v23 = vadd.f32 %v21638_v50, %v13664_v19 }
 0x63d   : > { %14064 = vmatprep.mubr.bf16.mxu0 %v18565_v13  ;;  %v13833_v54 = vpop.f32.mrf.mxu1  ;;  %v13666_v11 = vpop.f32.mrf.mxu0  ;;  %v18575_v13 = vld [vmem:[#allocation4 + $0xf8] ss:$36 sps:$4 sm:$0xff]  }
 0x63e   : > { %14226 = vmatmul.mubr.bf16.gmra.mxu1 %v18559_v40  ;;  %v21703_v4 = vadd.f32 %v13833_v54, %v13657_v59 }
 0x63f   : > { %14233 = vmatprep.mubr.bf16.mxu1 %v18568_v33  ;;  %v13835_v0 = vpop.f32.mrf.mxu1  ;;  %v13667_v3 = vpop.f32.mrf.mxu0 }
 0x640   : > { %v13668_v49 = vadd.f32 %v21638_v50, %v13667_v3 }
 0x641   : > { %v13836_v62 = vpop.f32.mrf.mxu1  ;;  %v13669_v45 = vpop.f32.mrf.mxu0 }
 0x642   : > { %v21706_v36 = vadd.f32 %v13836_v62, %v13660_v29 }
 0x643   : > { %v13838_v10 = vpop.f32.mrf.mxu1 }
 0x644   : > { %14065 = vmatmul.mubr.bf16.gmra.mxu0 %v18563_v27  ;;  %v13672_v34 = vpop.f32.mrf.mxu0  ;;  %v18580_v10 = vld [vmem:[#allocation4 + $0x260] ss:$36 sps:$4 sm:$0xff]  }
 0x645   : > { %17591 = vmatprep.mubr.bf16.mxu0 %v18569_v53  ;;  %v13673_v33 = vadd.f32 %v21638_v50, %v13672_v34  ;;  %v18577_v53 = vld [vmem:[#allocation4 + $0x188] ss:$36 sps:$4 sm:$0xff]  }
 0x646   : > { %14234 = vmatmul.mubr.bf16.gmra.mxu1 %v18566_v9  ;;  %v13674_v20 = vpop.f32.mrf.mxu0  ;;  %v18578_v9 = vld [vmem:[#allocation4 + $0x1d0] ss:$36 sps:$4 sm:$0xff]  }
 0x647   : > { %14241 = vmatprep.mubr.bf16.mxu1 %v18572_v25 }
 0x648   : > { %v13675_v63 = vpop.f32.mrf.mxu0 }
 0x649   : > { %v13841_v21 = vpop.f32.mrf.mxu1  ;;  %v13676_v27 = vadd.f32 %v21638_v50, %v13675_v63 }
 0x64a   : > { %v21709_v56 = vadd.f32 %v13841_v21, %v13665_v23  ;;  %v13677_v26 = vpop.f32.mrf.mxu0 }
 0x64b   : > { %v13843_v61 = vpop.f32.mrf.mxu1 }
 0x64c   : > { %17592 = vmatmul.mubr.bf16.vlgmr.msra.gmra.mxu0 %v18573_v15  ;;  %v18579_v15 = vld [vmem:[#allocation4 + $0x218] ss:$36 sps:$4 sm:$0xff]  }
 0x64d   : > { %17595 = vmatprep.mubr.bf16.mxu0 %v18574_v35  ;;  %v13844_v47 = vpop.f32.mrf.mxu1 }
 0x64e   : > { %14242 = vmatmul.mubr.bf16.gmra.mxu1 %v18570_v42  ;;  %v21712_v40 = vadd.f32 %v13844_v47, %v13668_v49 }
 0x64f   : > { %v13846_v2 = vpop.f32.mrf.mxu1 }
 0x650   : > { %v18581_v2 = vld [vmem:[#allocation4 + $0x2a8] ss:$36 sps:$4 sm:$0xff]  }
 0x654   : > { %v13680_v41 = vpop.f32.mrf.mxu0  ;;  %17596 = vmatmul.mubr.bf16.gmra.mxu0 %v18575_v13 }
 0x655   : > { %17599 = vmatprep.mubr.bf16.mxu0 %v18576_v55  ;;  %v13681_v59 = vadd.f32 %v21638_v50, %v13680_v41 }
 0x656   : > { %v13849_v57 = vpop.f32.mrf.mxu1  ;;  %v13682_v51 = vpop.f32.mrf.mxu0 }
 0x657   : > { %v21715_v38 = vadd.f32 %v13849_v57, %v13673_v33  ;;  %v18582_v33 = vld [vmem:[#allocation4 + $0x2f0] ss:$36 sps:$4 sm:$0xff]  }
 0x658   : > { %v13851_v46 = vpop.f32.mrf.mxu1  ;;  %v13683_v48 = vpop.f32.mrf.mxu0 }
 0x659   : > { %v13684_v62 = vadd.f32 %v21638_v50, %v13683_v48 }
 0x65a   : > { %v13852_v43 = vpop.f32.mrf.mxu1  ;;  %v13685_v28 = vpop.f32.mrf.mxu0 }
 0x65b   : > { %v21718_v25 = vadd.f32 %v13852_v43, %v13676_v27 }
 0x65c   : > { %v13854_v12 = vpop.f32.mrf.mxu1  ;;  %v13688_v19 = vpop.f32.mrf.mxu0  ;;  %17600 = vmatmul.mubr.bf16.gmra.mxu0 %v18577_v53 }
 0x65d   : > { %17603 = vmatprep.mubr.bf16.mxu0 %v18578_v9  ;;  %v13689_v21 = vadd.f32 %v21638_v50, %v13688_v19 }
 0x65e   : > { %v13857_v54 = vpop.f32.mrf.mxu1  ;;  %v13690_v11 = vpop.f32.mrf.mxu0 }
 0x65f   : > { %v21721_v0 = vadd.f32 %v13857_v54, %v13681_v59  ;;  %v18583_v59 = vld [vmem:[#allocation4 + $0x338] ss:$36 sps:$4 sm:$0xff]   ;;  %v18584_v11 = vld [vmem:[#allocation4 + $0x380] ss:$36 sps:$4 sm:$0xff]  }
 0x660   : > { %v13859_v3 = vpop.f32.mrf.mxu1  ;;  %v13691_v29 = vpop.f32.mrf.mxu0 }
 0x661   : > { %v13692_v26 = vadd.f32 %v21638_v50, %v13691_v29 }
 0x662   : > { %v13860_v45 = vpop.f32.mrf.mxu1  ;;  %v13693_v42 = vpop.f32.mrf.mxu0 }
 0x663   : > { %v21724_v35 = vadd.f32 %v13860_v45, %v13684_v62 }
 0x664   : > { %v13862_v34 = vpop.f32.mrf.mxu1  ;;  %v13696_v23 = vpop.f32.mrf.mxu0  ;;  %17604 = vmatmul.mubr.bf16.gmra.mxu0 %v18579_v15 }
 0x665   : > { %17607 = vmatprep.mubr.bf16.mxu0 %v18580_v10  ;;  %v13697_v46 = vadd.f32 %v21638_v50, %v13696_v23 }
 0x666   : > { %v13865_v20 = vpop.f32.mrf.mxu1  ;;  %v13698_v61 = vpop.f32.mrf.mxu0 }
 0x667   : > { %v21727_v63 = vadd.f32 %v13865_v20, %v13689_v21  ;;  %v18585_v61 = vld [vmem:[#allocation4 + $0x3c8] ss:$36 sps:$4 sm:$0xff]  }
 0x668   : > { %v13867_v49 = vpop.f32.mrf.mxu1  ;;  %v13699_v47 = vpop.f32.mrf.mxu0 }
 0x669   : > { %v13700_v9 = vadd.f32 %v21638_v50, %v13699_v47  ;;  %v18586_v47 = vld [vmem:[#allocation4 + $0x410] ss:$36 sps:$4 sm:$0xff]  }
 0x66a   : > { %v13868_v13 = vpop.f32.mrf.mxu1  ;;  %v13701_v55 = vpop.f32.mrf.mxu0 }
 0x66b   : > { %v21730_v41 = vadd.f32 %v13868_v13, %v13692_v26 }
 0x66c   : > { %v13870_v57 = vpop.f32.mrf.mxu1  ;;  %v13704_v51 = vpop.f32.mrf.mxu0  ;;  %17608 = vmatmul.mubr.bf16.gmra.mxu0 %v18581_v2 }
 0x66d   : > { %17611 = vmatprep.mubr.bf16.mxu0 %v18582_v33  ;;  %v13705_v62 = vadd.f32 %v21638_v50, %v13704_v51 }
 0x66e   : > { %v13873_v48 = vpop.f32.mrf.mxu1  ;;  %v13706_v27 = vpop.f32.mrf.mxu0 }
 0x66f   : > { %v21733_v43 = vadd.f32 %v13873_v48, %v13697_v46 }
 0x670   : > { %v13875_v28 = vpop.f32.mrf.mxu1  ;;  %v13707_v53 = vpop.f32.mrf.mxu0 }
 0x671   : > { %v13708_v23 = vadd.f32 %v21638_v50, %v13707_v53 }
 0x672   : > { %v13876_v12 = vpop.f32.mrf.mxu1  ;;  %v13709_v19 = vpop.f32.mrf.mxu0 }
 0x673   : > { %v21736_v54 = vadd.f32 %v13876_v12, %v13700_v9  ;;  %v18587_v12 = vld [vmem:[#allocation4 + $0x458] ss:$36 sps:$4 sm:$0xff]  }
 0x674   : > { %v13878_v3 = vpop.f32.mrf.mxu1  ;;  %v13712_v29 = vpop.f32.mrf.mxu0  ;;  %17612 = vmatmul.mubr.bf16.gmra.mxu0 %v18583_v59  ;;  %v18588_v59 = vld [vmem:[#allocation4 + $0x4a0] ss:$36 sps:$4 sm:$0xff]  }
 0x675   : > { %17615 = vmatprep.mubr.bf16.mxu0 %v18584_v11  ;;  %v13713_v55 = vadd.f32 %v21638_v50, %v13712_v29 }
 0x676   : > { %v13881_v45 = vpop.f32.mrf.mxu1  ;;  %v13714_v42 = vpop.f32.mrf.mxu0 }
 0x677   : > { %v21739_v15 = vadd.f32 %v13881_v45, %v13705_v62 }
 0x678   : > { %v13883_v10 = vpop.f32.mrf.mxu1  ;;  %v13715_v34 = vpop.f32.mrf.mxu0 }
 0x679   : > { %v13716_v27 = vadd.f32 %v21638_v50, %v13715_v34  ;;  %v18589_v10 = vld [vmem:[#allocation4 + $0x4e8] ss:$36 sps:$4 sm:$0xff]  }
 0x67a   : > { %v13884_v21 = vpop.f32.mrf.mxu1  ;;  %v13717_v20 = vpop.f32.mrf.mxu0 }
 0x67b   : > { %v21742_v49 = vadd.f32 %v13884_v21, %v13708_v23 }
 0x67c   : > { %v13886_v26 = vpop.f32.mrf.mxu1  ;;  %v13930_v13 = vpop.f32.mrf.mxu0  ;;  %17616 = vmatmul.mubr.bf16.gmra.mxu0 %v18585_v61 }
 0x67d   : > { %v13931_v2 = vadd.f32 %v13930_v13, %v21642_v31  ;;  %17619 = vmatprep.mubr.bf16.mxu0 %v18586_v47 }
 0x67e   : > { %v13889_v33 = vpop.f32.mrf.mxu1  ;;  %v13932_v57 = vpop.f32.mrf.mxu0 }
 0x67f   : > { %v21746_v51 = vadd.f32 %v13889_v33, %v13713_v55 }
 0x680   : > { %v13891_v46 = vpop.f32.mrf.mxu1  ;;  %v13933_v48 = vpop.f32.mrf.mxu0 }
 0x681   : > { %v13934_v28 = vadd.f32 %v13933_v48, %v21646_v6 }
 0x682   : > { %v13892_v53 = vpop.f32.mrf.mxu1  ;;  %v13935_v9 = vpop.f32.mrf.mxu0 }
 0x683   : > { %v21750_v19 = vadd.f32 %v13892_v53, %v13716_v27 }
 0x684   : > { %v13894_v11 = vpop.f32.mrf.mxu1  ;;  %v13938_v3 = vpop.f32.mrf.mxu0  ;;  %17620 = vmatmul.mubr.bf16.gmra.mxu0 %v18587_v12 }
 0x685   : > { %v13939_v31 = vadd.f32 %v13938_v3, %v21649_v1  ;;  %17623 = vmatprep.mubr.bf16.mxu0 %v18588_v59 }
 0x686   : > { %v14107_v29 = vpop.f32.mrf.mxu1  ;;  %v13940_v62 = vpop.f32.mrf.mxu0 }
 0x687   : > { %v21753_v45 = vadd.f32 %v14107_v29, %v13931_v2 }
 0x688   : > { %v14109_v42 = vpop.f32.mrf.mxu1  ;;  %v13941_v50 = vpop.f32.mrf.mxu0 }
 0x689   : > { %v13942_v6 = vadd.f32 %v13941_v50, %v21652_v5 }
 0x68a   : > { %v14110_v34 = vpop.f32.mrf.mxu1  ;;  %v13943_v23 = vpop.f32.mrf.mxu0 }
 0x68b   : > { %v21756_v21 = vadd.f32 %v14110_v34, %v13934_v28 }
 0x68c   : > { %v14112_v20 = vpop.f32.mrf.mxu1  ;;  %v13946_v61 = vpop.f32.mrf.mxu0  ;;  %17624 = vmatmul.mubr.bf16.gmra.mxu0 %v18589_v10 }
 0x68d   : > { %v13947_v47 = vadd.f32 %v13946_v61, %v21655_v16 }
 0x68e   : > { %v14115_v1 = vpop.f32.mrf.mxu1  ;;  %v13948_v26 = vpop.f32.mrf.mxu0 }
 0x68f   : > { %v21759_v13 = vadd.f32 %v14115_v1, %v13939_v31 }
 0x690   : > { %v14117_v55 = vpop.f32.mrf.mxu1  ;;  %v13949_v2 = vpop.f32.mrf.mxu0 }
 0x691   : > { %v13950_v33 = vadd.f32 %v13949_v2, %v21658_v30 }
 0x692   : > { %v14118_v57 = vpop.f32.mrf.mxu1  ;;  %v13951_v46 = vpop.f32.mrf.mxu0 }
 0x693   : > { %v21762_v5 = vadd.f32 %v14118_v57, %v13942_v6 }
 0x694   : > { %v14120_v48 = vpop.f32.mrf.mxu1  ;;  %v13954_v27 = vpop.f32.mrf.mxu0 }
 0x695   : > { %v13955_v28 = vadd.f32 %v13954_v27, %v21661_v60 }
 0x696   : > { %v14123_v53 = vpop.f32.mrf.mxu1  ;;  %v13956_v9 = vpop.f32.mrf.mxu0 }
 0x697   : > { %v21765_v12 = vadd.f32 %v14123_v53, %v13947_v47 }
 0x698   : > { %v14125_v16 = vpop.f32.mrf.mxu1  ;;  %v13957_v59 = vpop.f32.mrf.mxu0 }
 0x699   : > { %v13958_v11 = vadd.f32 %v13957_v59, %v21664_v44 }
 0x69a   : > { %v14126_v3 = vpop.f32.mrf.mxu1  ;;  %v13959_v31 = vpop.f32.mrf.mxu0 }
 0x69b   : > { %v21768_v29 = vadd.f32 %v14126_v3, %v13950_v33 }
 0x69c   : > { %v14128_v30 = vpop.f32.mrf.mxu1  ;;  %v13962_v62 = vpop.f32.mrf.mxu0 }
 0x69d   : > { %v13963_v42 = vadd.f32 %v13962_v62, %v21667_v7 }
 0x69e   : > { %v14131_v50 = vpop.f32.mrf.mxu1  ;;  %v13964_v10 = vpop.f32.mrf.mxu0 }
 0x69f   : > { %v21771_v6 = vadd.f32 %v14131_v50, %v13955_v28 }
 0x6a0   : > { %v14133_v60 = vpop.f32.mrf.mxu1  ;;  %v13965_v34 = vpop.f32.mrf.mxu0 }
 0x6a1   : > { %v13966_v23 = vadd.f32 %v13965_v34, %v21670_v22 }
 0x6a2   : > { %v14134_v20 = vpop.f32.mrf.mxu1  ;;  %v13967_v61 = vpop.f32.mrf.mxu0 }
 0x6a3   : > { %v21774_v47 = vadd.f32 %v14134_v20, %v13958_v11 }
 0x6a4   : > { %v14136_v44 = vpop.f32.mrf.mxu1  ;;  %v13970_v1 = vpop.f32.mrf.mxu0 }
 0x6a5   : > { %v13971_v26 = vadd.f32 %v13970_v1, %v21673_v14 }
 0x6a6   : > { %v14139_v55 = vpop.f32.mrf.mxu1  ;;  %v13972_v2 = vpop.f32.mrf.mxu0 }
 0x6a7   : > { %v21777_v33 = vadd.f32 %v14139_v55, %v13963_v42 }
 0x6a8   : > { %v14141_v7 = vpop.f32.mrf.mxu1  ;;  %v13973_v57 = vpop.f32.mrf.mxu0 }
 0x6a9   : > { %v13974_v46 = vadd.f32 %v13973_v57, %v21676_v32 }
 0x6aa   : > { %v14142_v48 = vpop.f32.mrf.mxu1  ;;  %v13975_v27 = vpop.f32.mrf.mxu0 }
 0x6ab   : > { %v21780_v28 = vadd.f32 %v14142_v48, %v13966_v23 }
 0x6ac   : > { %v14144_v22 = vpop.f32.mrf.mxu1  ;;  %v13978_v53 = vpop.f32.mrf.mxu0 }
 0x6ad   : > { %v13979_v9 = vadd.f32 %v13978_v53, %v21679_v24 }
 0x6ae   : > { %v14147_v16 = vpop.f32.mrf.mxu1  ;;  %v13980_v59 = vpop.f32.mrf.mxu0 }
 0x6af   : > { %v21783_v11 = vadd.f32 %v14147_v16, %v13971_v26 }
 0x6b0   : > { %v14149_v14 = vpop.f32.mrf.mxu1  ;;  %v13981_v3 = vpop.f32.mrf.mxu0 }
 0x6b1   : > { %v13982_v31 = vadd.f32 %v13981_v3, %v21682_v58 }
 0x6b2   : > { %v14150_v30 = vpop.f32.mrf.mxu1  ;;  %v13983_v62 = vpop.f32.mrf.mxu0 }
 0x6b3   : > { %v21786_v42 = vadd.f32 %v14150_v30, %v13974_v46 }
 0x6b4   : > { %v14152_v32 = vpop.f32.mrf.mxu1  ;;  %v13986_v50 = vpop.f32.mrf.mxu0 }
 0x6b5   : > { %v13987_v10 = vadd.f32 %v13986_v50, %v21685_v52 }
 0x6b6   : > { %v14155_v60 = vpop.f32.mrf.mxu1  ;;  %v13988_v34 = vpop.f32.mrf.mxu0 }
 0x6b7   : > { %v21789_v23 = vadd.f32 %v14155_v60, %v13979_v9 }
 0x6b8   : > { %v14157_v24 = vpop.f32.mrf.mxu1  ;;  %v13989_v20 = vpop.f32.mrf.mxu0 }
 0x6b9   : > { %v13990_v61 = vadd.f32 %v13989_v20, %v21688_v18 }
 0x6ba   : > { %v14158_v44 = vpop.f32.mrf.mxu1  ;;  %v13991_v1 = vpop.f32.mrf.mxu0 }
 0x6bb   : > { %v21792_v26 = vadd.f32 %v14158_v44, %v13982_v31 }
 0x6bc   : > { %v14160_v58 = vpop.f32.mrf.mxu1  ;;  %v13994_v55 = vpop.f32.mrf.mxu0 }
 0x6bd   : > { %v13995_v2 = vadd.f32 %v13994_v55, %v21691_v39 }
 0x6be   : > { %v14163_v7 = vpop.f32.mrf.mxu1  ;;  %v13996_v57 = vpop.f32.mrf.mxu0 }
 0x6bf   : > { %v21795_v46 = vadd.f32 %v14163_v7, %v13987_v10 }
 0x6c0   : > { %v14165_v52 = vpop.f32.mrf.mxu1  ;;  %v13997_v48 = vpop.f32.mrf.mxu0 }
 0x6c1   : > { %v13998_v27 = vadd.f32 %v13997_v48, %v21694_v8 }
 0x6c2   : > { %v14166_v22 = vpop.f32.mrf.mxu1  ;;  %v13999_v53 = vpop.f32.mrf.mxu0 }
 0x6c3   : > { %v21798_v9 = vadd.f32 %v14166_v22, %v13990_v61 }
 0x6c4   : > { %v14168_v18 = vpop.f32.mrf.mxu1  ;;  %v14002_v16 = vpop.f32.mrf.mxu0 }
 0x6c5   : > { %v14003_v59 = vadd.f32 %v14002_v16, %v21697_v37 }
 0x6c6   : > { %v14171_v14 = vpop.f32.mrf.mxu1  ;;  %v14004_v3 = vpop.f32.mrf.mxu0 }
 0x6c7   : > { %v21801_v31 = vadd.f32 %v14171_v14, %v13995_v2 }
 0x6c8   : > { %v14173_v39 = vpop.f32.mrf.mxu1  ;;  %v14005_v30 = vpop.f32.mrf.mxu0 }
 0x6c9   : > { %v14006_v62 = vadd.f32 %v14005_v30, %v21700_v17 }
 0x6ca   : > { %v14174_v32 = vpop.f32.mrf.mxu1  ;;  %v14007_v50 = vpop.f32.mrf.mxu0 }
 0x6cb   : > { %v21804_v10 = vadd.f32 %v14174_v32, %v13998_v27 }
 0x6cc   : > { %v14176_v8 = vpop.f32.mrf.mxu1  ;;  %v14010_v60 = vpop.f32.mrf.mxu0 }
 0x6cd   : > { %v14011_v34 = vadd.f32 %v14010_v60, %v21703_v4 }
 0x6ce   : > { %v14179_v24 = vpop.f32.mrf.mxu1  ;;  %v14012_v20 = vpop.f32.mrf.mxu0 }
 0x6cf   : > { %v21807_v61 = vadd.f32 %v14179_v24, %v14003_v59 }
 0x6d0   : > { %v14181_v37 = vpop.f32.mrf.mxu1  ;;  %v14013_v44 = vpop.f32.mrf.mxu0 }
 0x6d1   : > { %v14014_v1 = vadd.f32 %v14013_v44, %v21706_v36 }
 0x6d2   : > { %v14182_v58 = vpop.f32.mrf.mxu1  ;;  %v14015_v55 = vpop.f32.mrf.mxu0 }
 0x6d3   : > { %v21810_v2 = vadd.f32 %v14182_v58, %v14006_v62 }
 0x6d4   : > { %v14184_v17 = vpop.f32.mrf.mxu1  ;;  %v14018_v7 = vpop.f32.mrf.mxu0 }
 0x6d5   : > { %v14019_v57 = vadd.f32 %v14018_v7, %v21709_v56 }
 0x6d6   : > { %v14187_v52 = vpop.f32.mrf.mxu1  ;;  %v14020_v48 = vpop.f32.mrf.mxu0 }
 0x6d7   : > { %v21813_v27 = vadd.f32 %v14187_v52, %v14011_v34 }
 0x6d8   : > { %v14189_v4 = vpop.f32.mrf.mxu1  ;;  %v14021_v22 = vpop.f32.mrf.mxu0 }
 0x6d9   : > { %v14022_v53 = vadd.f32 %v14021_v22, %v21712_v40 }
 0x6da   : > { %v14190_v18 = vpop.f32.mrf.mxu1  ;;  %v14023_v16 = vpop.f32.mrf.mxu0 }
 0x6db   : > { %v21816_v59 = vadd.f32 %v14190_v18, %v14014_v1 }
 0x6dc   : > { %v14192_v36 = vpop.f32.mrf.mxu1  ;;  %v14026_v14 = vpop.f32.mrf.mxu0 }
 0x6dd   : > { %v14027_v3 = vadd.f32 %v14026_v14, %v21715_v38 }
 0x6de   : > { %v14195_v39 = vpop.f32.mrf.mxu1  ;;  %v14028_v30 = vpop.f32.mrf.mxu0 }
 0x6df   : > { %v21819_v62 = vadd.f32 %v14195_v39, %v14019_v57 }
 0x6e0   : > { %v14197_v56 = vpop.f32.mrf.mxu1  ;;  %v14029_v32 = vpop.f32.mrf.mxu0 }
 0x6e1   : > { %v14030_v50 = vadd.f32 %v14029_v32, %v21718_v25 }
 0x6e2   : > { %v14198_v8 = vpop.f32.mrf.mxu1  ;;  %v14031_v60 = vpop.f32.mrf.mxu0 }
 0x6e3   : > { %v21822_v34 = vadd.f32 %v14198_v8, %v14022_v53 }
 0x6e4   : > { %v14200_v40 = vpop.f32.mrf.mxu1  ;;  %v14034_v24 = vpop.f32.mrf.mxu0 }
 0x6e5   : > { %v14035_v20 = vadd.f32 %v14034_v24, %v21721_v0 }
 0x6e6   : > { %v14203_v37 = vpop.f32.mrf.mxu1  ;;  %v14036_v44 = vpop.f32.mrf.mxu0 }
 0x6e7   : > { %v21825_v1 = vadd.f32 %v14203_v37, %v14027_v3 }
 0x6e8   : > { %v14205_v38 = vpop.f32.mrf.mxu1  ;;  %v14037_v58 = vpop.f32.mrf.mxu0 }
 0x6e9   : > { %v14038_v55 = vadd.f32 %v14037_v58, %v21724_v35 }
 0x6ea   : > { %v14206_v17 = vpop.f32.mrf.mxu1  ;;  %v14039_v7 = vpop.f32.mrf.mxu0 }
 0x6eb   : > { %v21828_v57 = vadd.f32 %v14206_v17, %v14030_v50 }
 0x6ec   : > { %v14208_v25 = vpop.f32.mrf.mxu1  ;;  %v14042_v52 = vpop.f32.mrf.mxu0 }
 0x6ed   : > { %v14043_v48 = vadd.f32 %v14042_v52, %v21727_v63 }
 0x6ee   : > { %v14211_v4 = vpop.f32.mrf.mxu1  ;;  %v14044_v22 = vpop.f32.mrf.mxu0 }
 0x6ef   : > { %v21831_v53 = vadd.f32 %v14211_v4, %v14035_v20 }
 0x6f0   : > { %v14213_v0 = vpop.f32.mrf.mxu1  ;;  %v14045_v18 = vpop.f32.mrf.mxu0 }
 0x6f1   : > { %v14046_v16 = vadd.f32 %v14045_v18, %v21730_v41 }
 0x6f2   : > { %v14214_v36 = vpop.f32.mrf.mxu1  ;;  %v14047_v14 = vpop.f32.mrf.mxu0 }
 0x6f3   : > { %v21834_v3 = vadd.f32 %v14214_v36, %v14038_v55 }
 0x6f4   : > { %v14216_v35 = vpop.f32.mrf.mxu1  ;;  %v14050_v39 = vpop.f32.mrf.mxu0 }
 0x6f5   : > { %v14051_v30 = vadd.f32 %v14050_v39, %v21733_v43 }
 0x6f6   : > { %v14219_v56 = vpop.f32.mrf.mxu1  ;;  %v14052_v32 = vpop.f32.mrf.mxu0 }
 0x6f7   : > { %v21837_v50 = vadd.f32 %v14219_v56, %v14043_v48 }
 0x6f8   : > { %v14221_v63 = vpop.f32.mrf.mxu1  ;;  %v14053_v8 = vpop.f32.mrf.mxu0 }
 0x6f9   : > { %v14054_v60 = vadd.f32 %v14053_v8, %v21736_v54 }
 0x6fa   : > { %v14222_v40 = vpop.f32.mrf.mxu1  ;;  %v14055_v24 = vpop.f32.mrf.mxu0 }
 0x6fb   : > { %v21840_v20 = vadd.f32 %v14222_v40, %v14046_v16 }
 0x6fc   : > { %v14224_v41 = vpop.f32.mrf.mxu1  ;;  %v14058_v37 = vpop.f32.mrf.mxu0 }
 0x6fd   : > { %v14059_v44 = vadd.f32 %v14058_v37, %v21739_v15 }
 0x6fe   : > { %v14227_v38 = vpop.f32.mrf.mxu1  ;;  %v14060_v58 = vpop.f32.mrf.mxu0 }
 0x6ff   : > { %v21843_v43 = vadd.f32 %v14227_v38, %v14051_v30 }
 0x700   : > { %v14229_v55 = vpop.f32.mrf.mxu1  ;;  %v14061_v17 = vpop.f32.mrf.mxu0 }
 0x701   : > { %v14062_v7 = vadd.f32 %v14061_v17, %v21742_v49 }
 0x702   : > { %v14230_v25 = vpop.f32.mrf.mxu1  ;;  %v14063_v52 = vpop.f32.mrf.mxu0 }
 0x703   : > { %v21846_v54 = vadd.f32 %v14230_v25, %v14054_v60 }
 0x704   : > { %v14232_v48 = vpop.f32.mrf.mxu1  ;;  %v14066_v4 = vpop.f32.mrf.mxu0 }
 0x705   : > { %v21849_v22 = vadd.f32 %v14066_v4, %v21746_v51 }
 0x706   : > { %v14235_v0 = vpop.f32.mrf.mxu1  ;;  %v14068_v15 = vpop.f32.mrf.mxu0 }
 0x707   : > { %v21851_v18 = vadd.f32 %v14235_v0, %v14059_v44 }
 0x708   : > { %v14237_v16 = vpop.f32.mrf.mxu1  ;;  %v14069_v36 = vpop.f32.mrf.mxu0 }
 0x709   : > { %v21855_v14 = vadd.f32 %v14069_v36, %v21750_v19 }
 0x70a   : > { %v14238_v49 = vpop.f32.mrf.mxu1  ;;  %v14071_v35 = vpop.f32.mrf.mxu0 }
 0x70b   : > { %v21857_v39 = vadd.f32 %v14238_v49, %v14062_v7 }
 0x70c   : > { %v14240_v30 = vpop.f32.mrf.mxu1  ;;  %v17593_v51 = vpop.f32.mrf.mxu0 }
 0x70d   : > { %v14293_v56 = vadd.f32 %v17593_v51, %v21759_v13 }
 0x70e   : > { %v21865_v32 = vpop.f32.mrf.mxu1  ;;  %v14284_v19 = vpop.f32.mrf.mxu0 }
 0x70f   : > { %14429 = vst [vmem:[%s21862_s16 + $0x10] sm:$0xff] %v14293_v56  ;;  %v14285_v63 = vadd.f32 %v14284_v19, %v21753_v45 }
 0x710   : > { %v14245_v8 = vpop.f32.mrf.mxu1  ;;  %v17594_v60 = vpop.f32.mrf.mxu0 }
 0x711   : > { %14427 = vst [vmem:[%s21862_s16] sm:$0xff] %v14285_v63  ;;  %v14296_v40 = vadd.f32 %v17594_v60, %v21762_v5 }
 0x712   : > { %v21871_v24 = vpop.f32.mrf.mxu1  ;;  %v14287_v41 = vpop.f32.mrf.mxu0 }
 0x713   : > { %14430 = vst [vmem:[%s21862_s16 + $0x18] sm:$0xff] %v14296_v40  ;;  %v14288_v13 = vadd.f32 %v14287_v41, %v21756_v21 }
 0x714   : > { %v17597_v37 = vpop.f32.mrf.mxu0  ;;  %v14248_v44 = vpop.f32.mrf.mxu1 }
 0x715   : > { %14428 = vst [vmem:[%s21862_s16 + $0x8] sm:$0xff] %v14288_v13  ;;  %v14309_v45 = vadd.f32 %v17597_v37, %v21771_v6 }
 0x716   : > { %v14300_v38 = vpop.f32.mrf.mxu0 }
 0x717   : > { %14433 = vst [vmem:[%s21862_s16 + $0x30] sm:$0xff] %v14309_v45  ;;  %v14301_v58 = vadd.f32 %v14300_v38, %v21765_v12  ;;  %v14244_v38 = vadd.f32 %v21865_v32, %v21849_v22 }
 0x718   : > { %v17598_v5 = vpop.f32.mrf.mxu0 }
 0x719   : > { %14431 = vst [vmem:[%s21862_s16 + $0x20] sm:$0xff] %v14301_v58  ;;  %v14312_v55 = vadd.f32 %v17598_v5, %v21774_v47 }
 0x71a   : > { %v14303_v17 = vpop.f32.mrf.mxu0 }
 0x71b   : > { %14434 = vst [vmem:[%s21862_s16 + $0x38] sm:$0xff] %v14312_v55  ;;  %v14304_v21 = vadd.f32 %v14303_v17, %v21768_v29 }
 0x71c   : > { %v17601_v7 = vpop.f32.mrf.mxu0 }
 0x71d   : > { %14432 = vst [vmem:[%s21862_s16 + $0x28] sm:$0xff] %v14304_v21  ;;  %v14325_v6 = vadd.f32 %v17601_v7, %v21783_v11 }
 0x71e   : > { %v14316_v25 = vpop.f32.mrf.mxu0 }
 0x71f   : > { %14437 = vst [vmem:[%s21862_s16 + $0x50] sm:$0xff] %v14325_v6  ;;  %v14317_v12 = vadd.f32 %v14316_v25, %v21777_v33 }
 0x720   : > { %v17602_v52 = vpop.f32.mrf.mxu0 }
 0x721   : > { %14435 = vst [vmem:[%s21862_s16 + $0x40] sm:$0xff] %v14317_v12  ;;  %v14328_v47 = vadd.f32 %v17602_v52, %v21786_v42 }
 0x722   : > { %v14319_v48 = vpop.f32.mrf.mxu0 }
 0x723   : > { %14438 = vst [vmem:[%s21862_s16 + $0x58] sm:$0xff] %v14328_v47  ;;  %v14320_v29 = vadd.f32 %v14319_v48, %v21780_v28 }
 0x724   : > { %v17605_v4 = vpop.f32.mrf.mxu0 }
 0x725   : > { %14436 = vst [vmem:[%s21862_s16 + $0x48] sm:$0xff] %v14320_v29  ;;  %v14341_v11 = vadd.f32 %v17605_v4, %v21795_v46 }
 0x726   : > { %v14332_v0 = vpop.f32.mrf.mxu0 }
 0x727   : > { %14441 = vst [vmem:[%s21862_s16 + $0x70] sm:$0xff] %v14341_v11  ;;  %v14333_v33 = vadd.f32 %v14332_v0, %v21789_v23 }
 0x728   : > { %v17606_v15 = vpop.f32.mrf.mxu0 }
 0x729   : > { %14439 = vst [vmem:[%s21862_s16 + $0x60] sm:$0xff] %v14333_v33  ;;  %v14344_v42 = vadd.f32 %v17606_v15, %v21798_v9 }
 0x72a   : > { %v14335_v16 = vpop.f32.mrf.mxu0 }
 0x72b   : > { %14442 = vst [vmem:[%s21862_s16 + $0x78] sm:$0xff] %v14344_v42  ;;  %v14336_v28 = vadd.f32 %v14335_v16, %v21792_v26 }
 0x72c   : > { %v17609_v36 = vpop.f32.mrf.mxu0 }
 0x72d   : > { %14440 = vst [vmem:[%s21862_s16 + $0x68] sm:$0xff] %v14336_v28  ;;  %v14357_v46 = vadd.f32 %v17609_v36, %v21807_v61 }
 0x72e   : > { %v14348_v49 = vpop.f32.mrf.mxu0 }
 0x72f   : > { %14445 = vst [vmem:[%s21862_s16 + $0x90] sm:$0xff] %v14357_v46  ;;  %v14349_v23 = vadd.f32 %v14348_v49, %v21801_v31 }
 0x730   : > { %v17610_v35 = vpop.f32.mrf.mxu0 }
 0x731   : > { %14443 = vst [vmem:[%s21862_s16 + $0x80] sm:$0xff] %v14349_v23  ;;  %v14360_v9 = vadd.f32 %v17610_v35, %v21810_v2 }
 0x732   : > { %v14351_v30 = vpop.f32.mrf.mxu0 }
 0x733   : > { %14446 = vst [vmem:[%s21862_s16 + $0x98] sm:$0xff] %v14360_v9  ;;  %v14352_v26 = vadd.f32 %v14351_v30, %v21804_v10 }
 0x734   : > { %v17613_v51 = vpop.f32.mrf.mxu0 }
 0x735   : > { %14444 = vst [vmem:[%s21862_s16 + $0x88] sm:$0xff] %v14352_v26  ;;  %v14373_v61 = vadd.f32 %v17613_v51, %v21819_v62 }
 0x736   : > { %v14364_v56 = vpop.f32.mrf.mxu0 }
 0x737   : > { %14449 = vst [vmem:[%s21862_s16 + $0xb0] sm:$0xff] %v14373_v61  ;;  %v14365_v31 = vadd.f32 %v14364_v56, %v21813_v27 }
 0x738   : > { %v17614_v19 = vpop.f32.mrf.mxu0 }
 0x739   : > { %14447 = vst [vmem:[%s21862_s16 + $0xa0] sm:$0xff] %v14365_v31  ;;  %v14376_v2 = vadd.f32 %v17614_v19, %v21822_v34 }
 0x73a   : > { %v14367_v63 = vpop.f32.mrf.mxu0 }
 0x73b   : > { %14450 = vst [vmem:[%s21862_s16 + $0xb8] sm:$0xff] %v14376_v2  ;;  %v14368_v10 = vadd.f32 %v14367_v63, %v21816_v59 }
 0x73c   : > { %v17617_v8 = vpop.f32.mrf.mxu0 }
 0x73d   : > { %14448 = vst [vmem:[%s21862_s16 + $0xa8] sm:$0xff] %v14368_v10  ;;  %v14389_v62 = vadd.f32 %v17617_v8, %v21831_v53 }
 0x73e   : > { %v14380_v60 = vpop.f32.mrf.mxu0 }
 0x73f   : > { %14453 = vst [vmem:[%s21862_s16 + $0xd0] sm:$0xff] %v14389_v62  ;;  %v14381_v27 = vadd.f32 %v14380_v60, %v21825_v1 }
 0x740   : > { %v17618_v40 = vpop.f32.mrf.mxu0 }
 0x741   : > { %14451 = vst [vmem:[%s21862_s16 + $0xc0] sm:$0xff] %v14381_v27  ;;  %v14392_v34 = vadd.f32 %v17618_v40, %v21834_v3 }
 0x742   : > { %v14383_v41 = vpop.f32.mrf.mxu0 }
 0x743   : > { %14454 = vst [vmem:[%s21862_s16 + $0xd8] sm:$0xff] %v14392_v34  ;;  %v14384_v59 = vadd.f32 %v14383_v41, %v21828_v57 }
 0x744   : > { %v17621_v13 = vpop.f32.mrf.mxu0 }
 0x745   : > { %14452 = vst [vmem:[%s21862_s16 + $0xc8] sm:$0xff] %v14384_v59  ;;  %v14405_v37 = vadd.f32 %v17621_v13, %v21843_v43 }
 0x746   : > { %v14396_v53 = vpop.f32.mrf.mxu0 }
 0x747   : > { %14457 = vst [vmem:[%s21862_s16 + $0xf0] sm:$0xff] %v14405_v37  ;;  %v14397_v44 = vadd.f32 %v14396_v53, %v21837_v50  ;;  %v14247_v50 = vadd.f32 %v21871_v24, %v21855_v14 }
 0x748   : > { %v17622_v1 = vpop.f32.mrf.mxu0 }
 0x749   : > { %14455 = vst [vmem:[%s21862_s16 + $0xe0] sm:$0xff] %v14397_v44  ;;  %v14408_v45 = vadd.f32 %v17622_v1, %v21846_v54 }
 0x74a   : > { %v14399_v3 = vpop.f32.mrf.mxu0 }
 0x74b   : > { %14458 = vst [vmem:[%s21862_s16 + $0xf8] sm:$0xff] %v14408_v45  ;;  %v14400_v57 = vadd.f32 %v14399_v3, %v21840_v20 }
 0x74c   : > { %v17625_v43 = vpop.f32.mrf.mxu0 }
 0x74d   : > { %14456 = vst [vmem:[%s21862_s16 + $0xe8] sm:$0xff] %v14400_v57  ;;  %v14421_v58 = vadd.f32 %v17625_v43, %v14244_v38 }
 0x74e   : > { %v14412_v5 = vpop.f32.mrf.mxu0 }
 0x74f   : > { %14461 = vst [vmem:[%s21862_s16 + $0x110] sm:$0xff] %v14421_v58  ;;  %v14413_v55 = vadd.f32 %v14412_v5, %v21851_v18 }
 0x750   : > { %v17626_v54 = vpop.f32.mrf.mxu0 }
 0x751   : > { %14459 = vst [vmem:[%s21862_s16 + $0x100] sm:$0xff] %v14413_v55  ;;  %v14424_v17 = vadd.f32 %v17626_v54, %v14247_v50 }
 0x752   : > { %v14415_v21 = vpop.f32.mrf.mxu0 }
 0x753   : > { %14462 = vst [vmem:[%s21862_s16 + $0x118] sm:$0xff] %v14424_v17  ;;  %v14416_v22 = vadd.f32 %v14415_v21, %v21857_v39 }
 0x755   : > { %14460 = vst [vmem:[%s21862_s16 + $0x108] sm:$0xff] %v14416_v22 }
 0x756 PF: > { %s16_s21 = sadd.s32 1, %s18896_s21  }
 0x757   : > { %p13_p4 = scmp.ge.s32.totalorder %s16_s21, 4  }
 0x759   :  { %15 = sbr.rel (!%p13_p4) target bundleno = 1 (0x1), region = 76 }

</bundles_post_ra>
